<compile_context>
chip_gen: v7x
topology: tpu7x:2x2x1
jax: 0.10.0
libtpu: 0.0.40
codegen_flags: <defaults>
</compile_context>

<pallas_src>
import functools

import jax
import jax.numpy as jnp
from jax.experimental import pallas as pl
from jax.experimental.pallas import tpu as pltpu


NUM_SQRT_ITER = 5     # Sqrtm_autograd(num_iter=5), norm_type='AT'
MXU_WIDTH = 256       # block-diagonal NS group width (v6e/v7x MXU).
                      # TODO(synk): use 128 on v5e (128x128 MXUs).
TILE_N_MAX = 512      # in-kernel N tile for the covariance accumulation


def _soencoding_kernel(x_ref, c_ref, ct_ref, s_ref, sel_ref, emat_ref,
                       tmat_ref, mask_ref, eye_ref, o_ref, *,
                       K, G, D, N, tile_n, num_tiles, num_groups):
    """One (batch element, codeword group) step.

    x_ref:    (1, D, Np)   features, N on lanes
    c_ref:    (K, D)       codewords                (resident)
    ct_ref:   (D, K)       codewords transposed     (resident, used iff K==1)
    s_ref:    (K, 1)       scale factors            (resident)
    sel_ref:  (1, G, K)    this group's 0/1 codeword selector
    emat_ref: (GD, G)      row expansion  e_mat[g*D+d, g] = 1       (resident)
    tmat_ref: (GD, D)      feature tiling t_mat[g*D+d, d] = 1       (resident)
    mask_ref: (GD, GD)     block-diagonal mask                      (resident)
    eye_ref:  (GD, GD)     identity                                 (resident)
    o_ref:    (1, D, GD)   lane-dense output; o[d, g*D+e] = sA_g[d, e]
    """
    f32 = jnp.float32
    GD = G * D

    c = c_ref[...]                                    # (K, D)
    scale = s_ref[...]                                # (K, 1)
    c2 = jnp.sum(c * c, axis=1, keepdims=True)        # (K, 1)
    sel = sel_ref[0]                                  # (G, K)
    e_mat = emat_ref[...]                             # (GD, G)
    t_mat = tmat_ref[...]                             # (GD, D)
    mask_bd = mask_ref[...]                           # (GD, GD)
    eye_gd = eye_ref[...]                             # (GD, GD)

    def tile_contrib(x_t):
        # x_t: (D, tn); everything below keeps n on the lane axis.
        x2 = jnp.sum(x_t * x_t, axis=0, keepdims=True)                  # (1, tn)
        cx = jnp.dot(c, x_t, preferred_element_type=f32)                # (K, tn)
        sl2 = scale * (x2 - 2.0 * cx + c2)                              # (K, tn)
        # softmax over the K codewords: sublane-axis reduce, exact divide.
        m = jnp.max(sl2, axis=0, keepdims=True)                         # (1, tn)
        e = jnp.exp(sl2 - m)                                            # (K, tn)
        denom = jnp.sum(e, axis=0, keepdims=True)                       # (1, tn)
        if num_groups == 1:
            a_g = e / denom                                             # (G, tn)
        else:
            a_g = jnp.dot(sel, e, preferred_element_type=f32) / denom   # (G, tn)

        if K == 1:   # K==1 branch of the reference subtracts the codeword
            xr = x_t - ct_ref[...]                                      # (D, tn)
            xr2 = jnp.sum(xr * xr, axis=0, keepdims=True)               # (1, tn)
        else:
            xr = x_t
            xr2 = x2

        # W[g*D+d, n] = A_g[g, n] * xr[d, n]  (all G codewords of the group)
        a_rep = jnp.dot(e_mat, a_g, preferred_element_type=f32)         # (GD, tn)
        x_rep = jnp.dot(t_mat, xr, preferred_element_type=f32)          # (GD, tn)
        w = a_rep * x_rep                                               # (GD, tn)
        # fused (un-normalized) covariances: diagonal DxD blocks of W W^T
        cov_c = jax.lax.dot_general(w, w, (((1,), (1,)), ((), ())),
                                    preferred_element_type=f32)         # (GD, GD)
        # un-normalized traces: sum_n A_g^2 * ||xr_n||^2
        trx_c = jnp.sum(a_g * a_g * xr2, axis=1, keepdims=True)         # (G, 1)
        return cov_c, trx_c

    if num_tiles == 1:
        cov, trx = tile_contrib(x_ref[0])
    else:
        def body(t, carry):
            cov_acc, trx_acc = carry
            n0 = pl.multiple_of(t * tile_n, tile_n)
            cov_c, trx_c = tile_contrib(x_ref[0, :, pl.ds(n0, tile_n)])
            return cov_acc + cov_c, trx_acc + trx_c
        cov, trx = jax.lax.fori_loop(
            0, num_tiles, body,
            (jnp.zeros((GD, GD), f32), jnp.zeros((G, 1), f32)))

    # Y0 = blockdiag_g( cov_g / (N * tr_g) ): exact normalization applied
    # after the matmul, fused with the block-diagonal mask.
    tr = trx * (1.0 / N) + 1e-12                                        # (G, 1)
    inv_ntr = 1.0 / (tr * float(N))                                     # (G, 1)
    row_scale = jnp.dot(e_mat, inv_ntr, preferred_element_type=f32)     # (GD, 1)
    y = cov * (mask_bd * row_scale)                                     # (GD, GD)

    # Newton-Schulz sqrtm batched across the group's G codewords as one
    # block-diagonal (GD, GD) iterate; off-diagonal blocks stay exactly 0.
    z = eye_gd
    for _ in range(NUM_SQRT_ITER):
        t = 0.5 * (3.0 * eye_gd - jnp.dot(z, y, preferred_element_type=f32))
        y = jnp.dot(y, t, preferred_element_type=f32)
        z = jnp.dot(t, z, preferred_element_type=f32)

    # sA_g = Y_g * sqrt(tr_g); extract the diagonal blocks lane-dense:
    # (t_mat^T @ y)[d, g*D + e] = y[g*D + d, g*D + e]  (off-diag blocks == 0)
    row_sqrt = jnp.dot(e_mat, jnp.sqrt(tr), preferred_element_type=f32)  # (GD, 1)
    out = jax.lax.dot_general(t_mat, y * row_sqrt,
                              (((0,), (0,)), ((), ())),
                              preferred_element_type=f32)               # (D, GD)
    o_ref[0] = out.astype(o_ref.dtype)


def soencoding_forward(x_nchw, codewords, scale):
    """x_nchw: (B, D, H, W) float32 -> (B, K, D, D) float32."""
    B, D, H, W = x_nchw.shape
    K = codewords.shape[0]
    N = H * W
    f32 = jnp.float32

    # ---- codeword grouping: cap the block-diagonal NS iterate at MXU width ----
    if K * D <= MXU_WIDTH:
        G = K
    else:
        G = max(1, MXU_WIDTH // D)
        if (G * D) % 128 != 0:
            # keep the per-group output slab lane-aligned
            # TODO(synk): smarter grouping when D does not divide the MXU width.
            G = K
    NG = -(-K // G)
    GD = G * D
    K_pad = NG * G

    # ---- N tiling (covariance accumulated over tiles inside the kernel) ----
    if N <= TILE_N_MAX:
        tile_n, num_tiles, Np = N, 1, N
    else:
        tile_n = TILE_N_MAX
        num_tiles = -(-N // tile_n)
        Np = num_tiles * tile_n

    # glue: NCHW -> (B, D, N) is a free reshape (no transpose); N stays on lanes.
    x_bdn = x_nchw.reshape(B, D, N).astype(f32)
    if Np != N:
        # zero-padded columns contribute exactly 0 to covariance and trace
        x_bdn = jnp.pad(x_bdn, ((0, 0), (0, 0), (0, Np - N)))

    cw = codewords.astype(f32)                         # (K, D)
    cw_t = jnp.transpose(cw)                           # (D, K) for the K==1 residual
    scale_col = scale.reshape(K, 1).astype(f32)        # (K, 1)

    # ---- constant selection / mask matrices (built once, resident in VMEM) ----
    sel = jnp.pad(jnp.eye(K, dtype=f32),
                  ((0, K_pad - K), (0, 0))).reshape(NG, G, K)            # (NG,G,K)
    r = jnp.arange(GD, dtype=jnp.int32)[:, None]
    e_mat = (r // D == jnp.arange(G, dtype=jnp.int32)[None, :]).astype(f32)   # (GD,G)
    t_mat = (r % D == jnp.arange(D, dtype=jnp.int32)[None, :]).astype(f32)    # (GD,D)
    c_idx = jnp.arange(GD, dtype=jnp.int32)[None, :]
    mask_bd = (r // D == c_idx // D).astype(f32)                              # (GD,GD)
    eye_gd = jnp.eye(GD, dtype=f32)                                           # (GD,GD)

    kernel = functools.partial(_soencoding_kernel, K=K, G=G, D=D, N=N,
                               tile_n=tile_n, num_tiles=num_tiles,
                               num_groups=NG)

    out_lane = pl.pallas_call(
        kernel,
        out_shape=jax.ShapeDtypeStruct((B, D, K_pad * D), jnp.float32),
        grid_spec=pltpu.PrefetchScalarGridSpec(
            num_scalar_prefetch=0,
            grid=(B, NG),                                      # group axis innermost
            in_specs=[
                pl.BlockSpec((1, D, Np), lambda b, g: (b, 0, 0)),   # x (per batch)
                pl.BlockSpec((K, D), lambda b, g: (0, 0)),          # codewords
                pl.BlockSpec((D, K), lambda b, g: (0, 0)),          # codewords^T
                pl.BlockSpec((K, 1), lambda b, g: (0, 0)),          # scale
                pl.BlockSpec((1, G, K), lambda b, g: (g, 0, 0)),    # group selector
                pl.BlockSpec((GD, G), lambda b, g: (0, 0)),         # e_mat
                pl.BlockSpec((GD, D), lambda b, g: (0, 0)),         # t_mat
                pl.BlockSpec((GD, GD), lambda b, g: (0, 0)),        # mask_bd
                pl.BlockSpec((GD, GD), lambda b, g: (0, 0)),        # eye
            ],
            out_specs=pl.BlockSpec((1, D, GD), lambda b, g: (b, 0, g)),
        ),
        compiler_params=pltpu.CompilerParams(
            dimension_semantics=("parallel", "parallel"),
            vmem_limit_bytes=48 * 1024 * 1024,
        ),
    )(x_bdn, cw, cw_t, scale_col, sel, e_mat, t_mat, mask_bd, eye_gd)

    out_lane = out_lane[:, :, :K * D]   # drop zero-padded codeword groups (no-op here)
    # (B, D, K*D) -> (B, K, D, D):  out_lane[b, d, k*D + e] == sA[b, k, d, e]
    return jnp.transpose(out_lane.reshape(B, D, K, D), (0, 2, 1, 3))


def soencoding_reference(x_nchw, codewords, scale):
    """Pure-JAX reference reproducing the PyTorch forward semantics."""
    B, D, H, W = x_nchw.shape
    K = codewords.shape[0]
    N = H * W
    X = jnp.transpose(x_nchw.reshape(B, D, N), (0, 2, 1))             # (B, N, D)

    diff = X[:, :, None, :] - codewords[None, None, :, :]             # (B, N, K, D)
    sl2 = scale[None, None, :] * jnp.sum(diff * diff, axis=-1)        # (B, N, K)
    A = jax.nn.softmax(sl2, axis=2)

    if K == 1:
        residual = X[:, :, None, :] - codewords[None, None, :, :]
    else:
        residual = jnp.broadcast_to(X[:, :, None, :], (B, N, K, D))
    residual = residual * A[..., None]

    outs = []
    eye = jnp.eye(D, dtype=jnp.float32)
    for k in range(K):
        f = residual[:, :, k, :]                                      # (B, N, D)
        cov = jnp.einsum("bnd,bne->bde", f, f) / N                    # (B, D, D)
        tr = jnp.trace(cov, axis1=1, axis2=2)[:, None, None] + 1e-12
        Y = cov / tr
        Z = jnp.broadcast_to(eye, (B, D, D))
        I = Z
        for _ in range(NUM_SQRT_ITER):
            T = 0.5 * (3.0 * I - jnp.einsum("bij,bjk->bik", Z, Y))
            Y = jnp.einsum("bij,bjk->bik", Y, T)
            Z = jnp.einsum("bij,bjk->bik", T, Z)
        outs.append(Y * jnp.sqrt(tr))
    return jnp.stack(outs, axis=1)                                    # (B, K, D, D)


if __name__ == "__main__":
    B, D, H, W, K = 2, 32, 8, 8, 8

    key = jax.random.PRNGKey(0)
    kx, kc, ks = jax.random.split(key, 3)

    x = jax.random.uniform(kx, (B, D, H, W), jnp.float32, minval=-0.5, maxval=0.5)

    # deterministic parameter init matching reset_params():
    std1 = 1.0 / (K * D) ** 0.5
    codewords = jax.random.uniform(kc, (K, D), jnp.float32, minval=-std1, maxval=std1)
    scale = jax.random.uniform(ks, (K,), jnp.float32, minval=-1.0, maxval=0.0)

    out = soencoding_forward(x, codewords, scale)
    out = jax.block_until_ready(out)

    ref = soencoding_reference(x, codewords, scale)
    assert out.shape == (B, K, D, D)
    # tolerance covers TPU MXU default-precision f32 matmul accumulation-order
    # differences between the Pallas kernel and the XLA einsum reference
    # (all reciprocals / normalizations in the kernel are exact).
    assert jnp.allclose(out, ref, atol=1e-3, rtol=1e-3), (
        float(jnp.max(jnp.abs(out - ref)))
    )

    print("KERNEL_OK")
</pallas_src>

<mosaic_0001>
module attributes {stable_mosaic.version = 11 : i64} {
  func.func @_soencoding_kernel(%arg0: i32, %arg1: i32, %arg2: memref<1x32x64xf32, #tpu.memory_space<vmem>>, %arg3: memref<8x32xf32, #tpu.memory_space<vmem>>, %arg4: memref<32x8xf32, #tpu.memory_space<vmem>>, %arg5: memref<8x1xf32, #tpu.memory_space<vmem>>, %arg6: memref<1x8x8xf32, #tpu.memory_space<vmem>>, %arg7: memref<256x8xf32, #tpu.memory_space<vmem>>, %arg8: memref<256x32xf32, #tpu.memory_space<vmem>>, %arg9: memref<256x256xf32, #tpu.memory_space<vmem>>, %arg10: memref<256x256xf32, #tpu.memory_space<vmem>>, %arg11: memref<1x32x256xf32, #tpu.memory_space<vmem>>) attributes {dimension_semantics = [#tpu.dimension_semantics<parallel>, #tpu.dimension_semantics<parallel>], iteration_bounds = array<i64: 2, 1>, scalar_prefetch = 0 : i64, scratch_operands = 0 : i64, tpu.core_type = #tpu.core_type<tc>, window_params = [{transform_indices = @transform_0, window_bounds = array<i64: 1, 32, 64>}, {pipeline_mode = #tpu.pipeline_mode<synchronous>, transform_indices = @transform_1, window_bounds = array<i64: 8, 32>}, {pipeline_mode = #tpu.pipeline_mode<synchronous>, transform_indices = @transform_2, window_bounds = array<i64: 32, 8>}, {pipeline_mode = #tpu.pipeline_mode<synchronous>, transform_indices = @transform_3, window_bounds = array<i64: 8, 1>}, {transform_indices = @transform_4, window_bounds = array<i64: 1, 8, 8>}, {pipeline_mode = #tpu.pipeline_mode<synchronous>, transform_indices = @transform_5, window_bounds = array<i64: 256, 8>}, {pipeline_mode = #tpu.pipeline_mode<synchronous>, transform_indices = @transform_6, window_bounds = array<i64: 256, 32>}, {pipeline_mode = #tpu.pipeline_mode<synchronous>, transform_indices = @transform_7, window_bounds = array<i64: 256, 256>}, {pipeline_mode = #tpu.pipeline_mode<synchronous>, transform_indices = @transform_8, window_bounds = array<i64: 256, 256>}, {transform_indices = @transform_9, window_bounds = array<i64: 1, 32, 256>}]} {
    %c0 = arith.constant 0 : index
    %c0_0 = arith.constant 0 : index
    %0 = vector.load %arg3[%c0, %c0_0] : memref<8x32xf32, #tpu.memory_space<vmem>>, vector<8x32xf32>
    %c0_1 = arith.constant 0 : index
    %c0_2 = arith.constant 0 : index
    %1 = vector.load %arg5[%c0_1, %c0_2] : memref<8x1xf32, #tpu.memory_space<vmem>>, vector<8x1xf32>
    %2 = arith.mulf %0, %0 : vector<8x32xf32>
    %cst = arith.constant dense<0.000000e+00> : vector<8xf32>
    %3 = vector.multi_reduction <add>, %2, %cst [1] : vector<8x32xf32> to vector<8xf32>
    %4 = vector.shape_cast %3 : vector<8xf32> to vector<8x1xf32>
    %c0_3 = arith.constant 0 : index
    %c0_4 = arith.constant 0 : index
    %5 = vector.load %arg7[%c0_3, %c0_4] : memref<256x8xf32, #tpu.memory_space<vmem>>, vector<256x8xf32>
    %c0_5 = arith.constant 0 : index
    %c0_6 = arith.constant 0 : index
    %6 = vector.load %arg8[%c0_5, %c0_6] : memref<256x32xf32, #tpu.memory_space<vmem>>, vector<256x32xf32>
    %c0_7 = arith.constant 0 : index
    %c0_8 = arith.constant 0 : index
    %7 = vector.load %arg9[%c0_7, %c0_8] : memref<256x256xf32, #tpu.memory_space<vmem>>, vector<256x256xf32>
    %c0_9 = arith.constant 0 : index
    %c0_10 = arith.constant 0 : index
    %8 = vector.load %arg10[%c0_9, %c0_10] : memref<256x256xf32, #tpu.memory_space<vmem>>, vector<256x256xf32>
    %c0_11 = arith.constant 0 : index
    %c0_12 = arith.constant 0 : index
    %c0_13 = arith.constant 0 : index
    %9 = vector.load %arg2[%c0_11, %c0_12, %c0_13] : memref<1x32x64xf32, #tpu.memory_space<vmem>>, vector<1x32x64xf32>
    %10 = vector.shape_cast %9 : vector<1x32x64xf32> to vector<32x64xf32>
    %11 = arith.mulf %10, %10 : vector<32x64xf32>
    %cst_14 = arith.constant dense<0.000000e+00> : vector<64xf32>
    %12 = vector.multi_reduction <add>, %11, %cst_14 [0] : vector<32x64xf32> to vector<64xf32>
    %13 = vector.shape_cast %12 : vector<64xf32> to vector<1x64xf32>
    %cst_15 = arith.constant dense<0.000000e+00> : vector<8x64xf32>
    %14 = tpu.matmul %0, %10, %cst_15 {dimension_numbers = #tpu.dot_dimension_numbers<[1], [0], [0], [1], [0, 0, 1, 1], [], []>} : vector<8x32xf32>, vector<32x64xf32>, vector<8x64xf32> -> vector<8x64xf32>
    %cst_16 = arith.constant 2.000000e+00 : f32
    %15 = vector.broadcast %cst_16 : f32 to vector<8x64xf32>
    %16 = arith.mulf %15, %14 : vector<8x64xf32>
    %17 = vector.broadcast %13 : vector<1x64xf32> to vector<8x64xf32>
    %18 = arith.subf %17, %16 : vector<8x64xf32>
    %19 = vector.broadcast %4 : vector<8x1xf32> to vector<8x64xf32>
    %20 = arith.addf %18, %19 : vector<8x64xf32>
    %21 = vector.broadcast %1 : vector<8x1xf32> to vector<8x64xf32>
    %22 = arith.mulf %21, %20 : vector<8x64xf32>
    %cst_17 = arith.constant dense<0xFF800000> : vector<64xf32>
    %23 = vector.multi_reduction <maximumf>, %22, %cst_17 [0] : vector<8x64xf32> to vector<64xf32>
    %24 = vector.shape_cast %23 : vector<64xf32> to vector<1x64xf32>
    %25 = vector.broadcast %24 : vector<1x64xf32> to vector<8x64xf32>
    %26 = arith.subf %22, %25 : vector<8x64xf32>
    %27 = math.exp %26 : vector<8x64xf32>
    %cst_18 = arith.constant dense<0.000000e+00> : vector<64xf32>
    %28 = vector.multi_reduction <add>, %27, %cst_18 [0] : vector<8x64xf32> to vector<64xf32>
    %29 = vector.shape_cast %28 : vector<64xf32> to vector<1x64xf32>
    %30 = vector.broadcast %29 : vector<1x64xf32> to vector<8x64xf32>
    %31 = arith.divf %27, %30 : vector<8x64xf32>
    %cst_19 = arith.constant dense<0.000000e+00> : vector<256x64xf32>
    %32 = tpu.matmul %5, %31, %cst_19 {dimension_numbers = #tpu.dot_dimension_numbers<[1], [0], [0], [1], [0, 0, 1, 1], [], []>} : vector<256x8xf32>, vector<8x64xf32>, vector<256x64xf32> -> vector<256x64xf32>
    %cst_20 = arith.constant dense<0.000000e+00> : vector<256x64xf32>
    %33 = tpu.matmul %6, %10, %cst_20 {dimension_numbers = #tpu.dot_dimension_numbers<[1], [0], [0], [1], [0, 0, 1, 1], [], []>} : vector<256x32xf32>, vector<32x64xf32>, vector<256x64xf32> -> vector<256x64xf32>
    %34 = arith.mulf %32, %33 : vector<256x64xf32>
    %cst_21 = arith.constant dense<0.000000e+00> : vector<256x256xf32>
    %35 = tpu.matmul %34, %34, %cst_21 {dimension_numbers = #tpu.dot_dimension_numbers<[1], [1], [0], [0], [0, 0, 1, 0], [], []>} : vector<256x64xf32>, vector<256x64xf32>, vector<256x256xf32> -> vector<256x256xf32>
    %36 = arith.mulf %31, %31 : vector<8x64xf32>
    %37 = vector.broadcast %13 : vector<1x64xf32> to vector<8x64xf32>
    %38 = arith.mulf %36, %37 : vector<8x64xf32>
    %cst_22 = arith.constant dense<0.000000e+00> : vector<8xf32>
    %39 = vector.multi_reduction <add>, %38, %cst_22 [1] : vector<8x64xf32> to vector<8xf32>
    %40 = vector.shape_cast %39 : vector<8xf32> to vector<8x1xf32>
    %cst_23 = arith.constant 1.562500e-02 : f32
    %41 = vector.broadcast %cst_23 : f32 to vector<8x1xf32>
    %42 = arith.mulf %40, %41 : vector<8x1xf32>
    %cst_24 = arith.constant 9.99999996E-13 : f32
    %43 = vector.broadcast %cst_24 : f32 to vector<8x1xf32>
    %44 = arith.addf %42, %43 : vector<8x1xf32>
    %cst_25 = arith.constant 6.400000e+01 : f32
    %45 = vector.broadcast %cst_25 : f32 to vector<8x1xf32>
    %46 = arith.mulf %44, %45 : vector<8x1xf32>
    %cst_26 = arith.constant 1.000000e+00 : f32
    %47 = vector.broadcast %cst_26 : f32 to vector<8x1xf32>
    %48 = arith.divf %47, %46 : vector<8x1xf32>
    %cst_27 = arith.constant dense<0.000000e+00> : vector<256x1xf32>
    %49 = tpu.matmul %5, %48, %cst_27 {dimension_numbers = #tpu.dot_dimension_numbers<[1], [0], [0], [1], [0, 0, 1, 1], [], []>} : vector<256x8xf32>, vector<8x1xf32>, vector<256x1xf32> -> vector<256x1xf32>
    %50 = vector.broadcast %49 : vector<256x1xf32> to vector<256x256xf32>
    %51 = arith.mulf %7, %50 : vector<256x256xf32>
    %52 = arith.mulf %35, %51 : vector<256x256xf32>
    %cst_28 = arith.constant 3.000000e+00 : f32
    %53 = vector.broadcast %cst_28 : f32 to vector<256x256xf32>
    %54 = arith.mulf %53, %8 : vector<256x256xf32>
    %cst_29 = arith.constant dense<0.000000e+00> : vector<256x256xf32>
    %55 = tpu.matmul %8, %52, %cst_29 {dimension_numbers = #tpu.dot_dimension_numbers<[1], [0], [0], [1], [0, 0, 1, 1], [], []>} : vector<256x256xf32>, vector<256x256xf32>, vector<256x256xf32> -> vector<256x256xf32>
    %56 = arith.subf %54, %55 : vector<256x256xf32>
    %cst_30 = arith.constant 5.000000e-01 : f32
    %57 = vector.broadcast %cst_30 : f32 to vector<256x256xf32>
    %58 = arith.mulf %57, %56 : vector<256x256xf32>
    %cst_31 = arith.constant dense<0.000000e+00> : vector<256x256xf32>
    %59 = tpu.matmul %52, %58, %cst_31 {dimension_numbers = #tpu.dot_dimension_numbers<[1], [0], [0], [1], [0, 0, 1, 1], [], []>} : vector<256x256xf32>, vector<256x256xf32>, vector<256x256xf32> -> vector<256x256xf32>
    %cst_32 = arith.constant dense<0.000000e+00> : vector<256x256xf32>
    %60 = tpu.matmul %58, %8, %cst_32 {dimension_numbers = #tpu.dot_dimension_numbers<[1], [0], [0], [1], [0, 0, 1, 1], [], []>} : vector<256x256xf32>, vector<256x256xf32>, vector<256x256xf32> -> vector<256x256xf32>
    %cst_33 = arith.constant 3.000000e+00 : f32
    %61 = vector.broadcast %cst_33 : f32 to vector<256x256xf32>
    %62 = arith.mulf %61, %8 : vector<256x256xf32>
    %cst_34 = arith.constant dense<0.000000e+00> : vector<256x256xf32>
    %63 = tpu.matmul %60, %59, %cst_34 {dimension_numbers = #tpu.dot_dimension_numbers<[1], [0], [0], [1], [0, 0, 1, 1], [], []>} : vector<256x256xf32>, vector<256x256xf32>, vector<256x256xf32> -> vector<256x256xf32>
    %64 = arith.subf %62, %63 : vector<256x256xf32>
    %cst_35 = arith.constant 5.000000e-01 : f32
    %65 = vector.broadcast %cst_35 : f32 to vector<256x256xf32>
    %66 = arith.mulf %65, %64 : vector<256x256xf32>
    %cst_36 = arith.constant dense<0.000000e+00> : vector<256x256xf32>
    %67 = tpu.matmul %59, %66, %cst_36 {dimension_numbers = #tpu.dot_dimension_numbers<[1], [0], [0], [1], [0, 0, 1, 1], [], []>} : vector<256x256xf32>, vector<256x256xf32>, vector<256x256xf32> -> vector<256x256xf32>
    %cst_37 = arith.constant dense<0.000000e+00> : vector<256x256xf32>
    %68 = tpu.matmul %66, %60, %cst_37 {dimension_numbers = #tpu.dot_dimension_numbers<[1], [0], [0], [1], [0, 0, 1, 1], [], []>} : vector<256x256xf32>, vector<256x256xf32>, vector<256x256xf32> -> vector<256x256xf32>
    %cst_38 = arith.constant 3.000000e+00 : f32
    %69 = vector.broadcast %cst_38 : f32 to vector<256x256xf32>
    %70 = arith.mulf %69, %8 : vector<256x256xf32>
    %cst_39 = arith.constant dense<0.000000e+00> : vector<256x256xf32>
    %71 = tpu.matmul %68, %67, %cst_39 {dimension_numbers = #tpu.dot_dimension_numbers<[1], [0], [0], [1], [0, 0, 1, 1], [], []>} : vector<256x256xf32>, vector<256x256xf32>, vector<256x256xf32> -> vector<256x256xf32>
    %72 = arith.subf %70, %71 : vector<256x256xf32>
    %cst_40 = arith.constant 5.000000e-01 : f32
    %73 = vector.broadcast %cst_40 : f32 to vector<256x256xf32>
    %74 = arith.mulf %73, %72 : vector<256x256xf32>
    %cst_41 = arith.constant dense<0.000000e+00> : vector<256x256xf32>
    %75 = tpu.matmul %67, %74, %cst_41 {dimension_numbers = #tpu.dot_dimension_numbers<[1], [0], [0], [1], [0, 0, 1, 1], [], []>} : vector<256x256xf32>, vector<256x256xf32>, vector<256x256xf32> -> vector<256x256xf32>
    %cst_42 = arith.constant dense<0.000000e+00> : vector<256x256xf32>
    %76 = tpu.matmul %74, %68, %cst_42 {dimension_numbers = #tpu.dot_dimension_numbers<[1], [0], [0], [1], [0, 0, 1, 1], [], []>} : vector<256x256xf32>, vector<256x256xf32>, vector<256x256xf32> -> vector<256x256xf32>
    %cst_43 = arith.constant 3.000000e+00 : f32
    %77 = vector.broadcast %cst_43 : f32 to vector<256x256xf32>
    %78 = arith.mulf %77, %8 : vector<256x256xf32>
    %cst_44 = arith.constant dense<0.000000e+00> : vector<256x256xf32>
    %79 = tpu.matmul %76, %75, %cst_44 {dimension_numbers = #tpu.dot_dimension_numbers<[1], [0], [0], [1], [0, 0, 1, 1], [], []>} : vector<256x256xf32>, vector<256x256xf32>, vector<256x256xf32> -> vector<256x256xf32>
    %80 = arith.subf %78, %79 : vector<256x256xf32>
    %cst_45 = arith.constant 5.000000e-01 : f32
    %81 = vector.broadcast %cst_45 : f32 to vector<256x256xf32>
    %82 = arith.mulf %81, %80 : vector<256x256xf32>
    %cst_46 = arith.constant dense<0.000000e+00> : vector<256x256xf32>
    %83 = tpu.matmul %75, %82, %cst_46 {dimension_numbers = #tpu.dot_dimension_numbers<[1], [0], [0], [1], [0, 0, 1, 1], [], []>} : vector<256x256xf32>, vector<256x256xf32>, vector<256x256xf32> -> vector<256x256xf32>
    %cst_47 = arith.constant dense<0.000000e+00> : vector<256x256xf32>
    %84 = tpu.matmul %82, %76, %cst_47 {dimension_numbers = #tpu.dot_dimension_numbers<[1], [0], [0], [1], [0, 0, 1, 1], [], []>} : vector<256x256xf32>, vector<256x256xf32>, vector<256x256xf32> -> vector<256x256xf32>
    %cst_48 = arith.constant 3.000000e+00 : f32
    %85 = vector.broadcast %cst_48 : f32 to vector<256x256xf32>
    %86 = arith.mulf %85, %8 : vector<256x256xf32>
    %cst_49 = arith.constant dense<0.000000e+00> : vector<256x256xf32>
    %87 = tpu.matmul %84, %83, %cst_49 {dimension_numbers = #tpu.dot_dimension_numbers<[1], [0], [0], [1], [0, 0, 1, 1], [], []>} : vector<256x256xf32>, vector<256x256xf32>, vector<256x256xf32> -> vector<256x256xf32>
    %88 = arith.subf %86, %87 : vector<256x256xf32>
    %cst_50 = arith.constant 5.000000e-01 : f32
    %89 = vector.broadcast %cst_50 : f32 to vector<256x256xf32>
    %90 = arith.mulf %89, %88 : vector<256x256xf32>
    %cst_51 = arith.constant dense<0.000000e+00> : vector<256x256xf32>
    %91 = tpu.matmul %83, %90, %cst_51 {dimension_numbers = #tpu.dot_dimension_numbers<[1], [0], [0], [1], [0, 0, 1, 1], [], []>} : vector<256x256xf32>, vector<256x256xf32>, vector<256x256xf32> -> vector<256x256xf32>
    %92 = math.sqrt %44 : vector<8x1xf32>
    %cst_52 = arith.constant dense<0.000000e+00> : vector<256x1xf32>
    %93 = tpu.matmul %5, %92, %cst_52 {dimension_numbers = #tpu.dot_dimension_numbers<[1], [0], [0], [1], [0, 0, 1, 1], [], []>} : vector<256x8xf32>, vector<8x1xf32>, vector<256x1xf32> -> vector<256x1xf32>
    %94 = vector.broadcast %93 : vector<256x1xf32> to vector<256x256xf32>
    %95 = arith.mulf %91, %94 : vector<256x256xf32>
    %cst_53 = arith.constant dense<0.000000e+00> : vector<32x256xf32>
    %96 = tpu.matmul %6, %95, %cst_53 {dimension_numbers = #tpu.dot_dimension_numbers<[0], [0], [1], [1], [0, 1, 1, 1], [], []>} : vector<256x32xf32>, vector<256x256xf32>, vector<32x256xf32> -> vector<32x256xf32>
    %c0_54 = arith.constant 0 : index
    %c0_55 = arith.constant 0 : index
    %c0_56 = arith.constant 0 : index
    %97 = vector.load %arg11[%c0_54, %c0_55, %c0_56] : memref<1x32x256xf32, #tpu.memory_space<vmem>>, vector<1x32x256xf32>
    %98 = vector.shape_cast %97 : vector<1x32x256xf32> to vector<32x256xf32>
    %99 = vector.shape_cast %96 : vector<32x256xf32> to vector<1x32x256xf32>
    tpu.vector_store %arg11[%c0_54, %c0_55, %c0_56], %99 {strides = array<i32>} : memref<1x32x256xf32, #tpu.memory_space<vmem>>, vector<1x32x256xf32>,
    return
  }
  func.func @transform_0(%arg0: i32, %arg1: i32) -> (i32, i32, i32) {
    %c0_i32 = arith.constant 0 : i32
    %c0_i32_0 = arith.constant 0 : i32
    %c0_i32_1 = arith.constant 0 : i32
    return %arg0, %c0_i32, %c0_i32_0 : i32, i32, i32
  }
  func.func @transform_1(%arg0: i32, %arg1: i32) -> (i32, i32) {
    %c0_i32 = arith.constant 0 : i32
    %c0_i32_0 = arith.constant 0 : i32
    %c0_i32_1 = arith.constant 0 : i32
    return %c0_i32, %c0_i32_0 : i32, i32
  }
  func.func @transform_2(%arg0: i32, %arg1: i32) -> (i32, i32) {
    %c0_i32 = arith.constant 0 : i32
    %c0_i32_0 = arith.constant 0 : i32
    %c0_i32_1 = arith.constant 0 : i32
    return %c0_i32, %c0_i32_0 : i32, i32
  }
  func.func @transform_3(%arg0: i32, %arg1: i32) -> (i32, i32) {
    %c0_i32 = arith.constant 0 : i32
    %c0_i32_0 = arith.constant 0 : i32
    %c0_i32_1 = arith.constant 0 : i32
    return %c0_i32, %c0_i32_0 : i32, i32
  }
  func.func @transform_4(%arg0: i32, %arg1: i32) -> (i32, i32, i32) {
    %c0_i32 = arith.constant 0 : i32
    %c0_i32_0 = arith.constant 0 : i32
    %c0_i32_1 = arith.constant 0 : i32
    return %arg1, %c0_i32, %c0_i32_0 : i32, i32, i32
  }
  func.func @transform_5(%arg0: i32, %arg1: i32) -> (i32, i32) {
    %c0_i32 = arith.constant 0 : i32
    %c0_i32_0 = arith.constant 0 : i32
    %c0_i32_1 = arith.constant 0 : i32
    return %c0_i32, %c0_i32_0 : i32, i32
  }
  func.func @transform_6(%arg0: i32, %arg1: i32) -> (i32, i32) {
    %c0_i32 = arith.constant 0 : i32
    %c0_i32_0 = arith.constant 0 : i32
    %c0_i32_1 = arith.constant 0 : i32
    return %c0_i32, %c0_i32_0 : i32, i32
  }
  func.func @transform_7(%arg0: i32, %arg1: i32) -> (i32, i32) {
    %c0_i32 = arith.constant 0 : i32
    %c0_i32_0 = arith.constant 0 : i32
    %c0_i32_1 = arith.constant 0 : i32
    return %c0_i32, %c0_i32_0 : i32, i32
  }
  func.func @transform_8(%arg0: i32, %arg1: i32) -> (i32, i32) {
    %c0_i32 = arith.constant 0 : i32
    %c0_i32_0 = arith.constant 0 : i32
    %c0_i32_1 = arith.constant 0 : i32
    return %c0_i32, %c0_i32_0 : i32, i32
  }
  func.func @transform_9(%arg0: i32, %arg1: i32) -> (i32, i32, i32) {
    %c0_i32 = arith.constant 0 : i32
    %c0_i32_0 = arith.constant 0 : i32
    return %arg0, %c0_i32, %arg1 : i32, i32, i32
  }
}

</mosaic_0001>

<bundles_post_ra>
// kernel: tpu_custom_call.1
= control target key start
LH: loop header
LB: loop body
LE: loop exit
PB: predicated region body
PF: predicated region fallthrough
CT: control target
= control target key end

     0   :  { %14 = vsyncpa [#allocation3], 0  ;;  %s14101_s0 = inlined_call_operand.vmem [shape: f32[2,32,64], index: 0, kind: input, shape index: {}]   ;;  %s14102_s1 = inlined_call_operand.vmem [shape: f32[8,32], index: 1, kind: input, shape index: {}]   ;;  %s14103_s2 = inlined_call_operand.vmem [shape: f32[32,8], index: 2, kind: input, shape index: {}]   ;;  %s14104_s3 = inlined_call_operand.vmem [shape: f32[8,1], index: 3, kind: input, shape index: {}]   ;;  %s14105_s4 = inlined_call_operand.vmem [shape: f32[1,8,8], index: 4, kind: input, shape index: {}]   ;;  %s14106_s5 = inlined_call_operand.vmem [shape: f32[256,8], index: 5, kind: input, shape index: {}]   ;;  %s14107_s6 = inlined_call_operand.vmem [shape: f32[256,32], index: 6, kind: input, shape index: {}]   ;;  %s14108_s7 = inlined_call_operand.vmem [shape: f32[256,256], index: 7, kind: input, shape index: {}]   ;;  %s14109_s8 = inlined_call_operand.hbm [shape: f32[256,256], index: 8, kind: input, shape index: {}]   ;;  %s14110_s9 = inlined_call_operand.hbm [shape: f32[2,32,256], index: 9, kind: output, shape index: {}]  }
   0x1   :  { %15 = vsyncpa [#allocation4], 0 }
   0x2   :  { %17 = vsyncpa [#allocation4 + $0x1], 0  ;;  %s9315_s29 = smov 0   ;;  %s9317_s4 = smov 0  }
   0x3   :  { %s9319_s30 = smov 0   ;;  %s9321_s10 = smov 0  }
   0x4   :  { %s9323_s11 = smov 0   ;;  %s9325_s12 = smov 0  }
   0x5 LB: > { %s7286_s13 = sadd.s32 4294967295, %s9253_s12   ;;  %s7287_s14 = sadd.s32 4294967294, %s9253_s12   ;;  %s9253_s12 = sphi %s9325_s12, %s23_s12   ;;  %s9249_s11 = sphi %s9323_s11, %s15860_s11   ;;  %s9245_s10 = sphi %s9321_s10, %s15859_s10   ;;  %s9241_s30 = sphi %s9319_s30, %s15858_s30   ;;  %s9237_s4 = sphi %s9317_s4, %s15857_s4   ;;  %s9233_s29 = sphi %s9315_s29, %s15856_s29  }
   0x6   : > { %s35_s15 = sadd.s32 1, %s9249_s11  ;;  %s243_s16 = sadd.s32 1, %s9241_s30 }
   0x7   : > { %p37_p0 = scmp.ge.s32.totalorder %s35_s15, 2  ;;  %p253_p1 = scmp.ne.s32.totalorder %s9241_s30, %s9237_s4 }
   0x8   : > { %p254_p2 = scmp.eq.s32.totalorder %s7286_s13, 1  ;;  %p259_p3 = scmp.ne.s32.totalorder %s9237_s4, %s9233_s29 }
   0x9   : > { %s15862_s15 = smov (%p37_p0, %s35_s15), 0  ;;  %p260_p5 = scmp.eq.s32.totalorder %s7287_s14, 1 }
   0xa   : > { %p9355_p4 = por %p254_p2, %p253_p1  ;;  %s238_s18 = ssub.s32 %s9249_s11, %s15862_s15 }
   0xb   : > { %p7288_p6 = scmp.ge.s32.totalorder %s9253_s12, 1  ;;  %p241_p7 = scmp.eq.s32.totalorder %s238_s18, 0 }
   0xc   : > { %s14646_s17 = scalar_select %p9355_p4, 1, 0 }
   0xd   : > { %p9362_p8 = por %p260_p5, %p259_p3  ;;  %p267_p9 = scmp.lt.s32.totalorder %s9253_s12, 3 }
   0xe   : > { %s9368_s20 = scalar_select %p241_p7, %s9241_s30, %s243_s16  }
   0xf   : > { %s14647_s19 = scalar_select %p9362_p8, 1, 0 }
  0x10   : > { %p9370_p10 = pnand %p7288_p6, %p267_p9  ;;  %p9374_p11 = scmp.eq.s32.totalorder %s7286_s13, 0 }
  0x11   : > { %s9255_s23 = smov [#allocation2]   ;;  %s9143_s28 = scalar_lea.hbm %s14109_s8, 8192 }
  0x12   : > { %s14648_s21 = scalar_select %p9370_p10, 1, 0 }
  0x13   : > { %s14649_s22 = scalar_select %p9374_p11, 1, 0 }
  0x14   : > { %p8978_p12 = pneg %p9370_p10  ;;  %s304_s24 = sshll.u32 %s9255_s23, 4  ;;  %s305_s24 = int_to_ptr.vmem [resolvable:$true] %s304_s24 }
  0x15   : > { %p9144_p0 = scmp.ne.s32.totalorder %s14109_s8, %s9143_s28  ;;  %p9150_p5 = scmp.lt.u32.totalorder %s9143_s28, %s14109_s8 }
  0x16   : > { %p9382_p13 = pnand %p9374_p11, %p8978_p12 }
  0x18   : > { %p9145_p1 = pneg %p9382_p13 }
  0x1a   : > { %p9146_p2 = pnand %p9145_p1, %p9144_p0 }
  0x1c   : > { %p9147_p3 = pneg %p9146_p2 }
  0x1e   : > { %p9152_p6 = pnand %p9150_p5, %p9147_p3 }
  0x20   : > { %9155 = shalt.err (!%p9152_p6)
}
  0x21   : > { %s9156_s18 = scalar_lea.vmem %s305_s24, 8192  ;;  %p9164_p8 = scmp.lt.s32.totalorder %s305_s24, %s305_s24 }
  0x22   : > { %p9157_p7 = scmp.ne.s32.totalorder %s305_s24, %s9156_s18  ;;  %p9165_p4 = scmp.lt.s32.totalorder %s9156_s18, %s9156_s18 }
  0x24   : > { %p9159_p9 = pnand %p9157_p7, %p9145_p1  ;;  %p9166_p11 = por %p9165_p4, %p9164_p8 }
  0x26   : > { %p9160_p12 = pneg %p9159_p9 }
  0x28   : > { %p9167_p10 = pnand %p9166_p11, %p9160_p12 }
  0x2a   : > { %9170 = shalt.err (!%p9167_p10)
}
  0x2b   : > { %s9256_s23 = smov 256   ;;  %s9257_s26 = smov 16  }
  0x2c   : > { %8981 = dma.hbm_to_vmem [thread:$0]  (!%p9382_p13), %s14109_s8, 8192, %s305_s24, [#allocation3], %s9256_s23, %s9256_s23, %s9257_s26  }
  0x2d   : > { %p14651_p0 = scmp.ne.s32.totalorder %s14648_s21, 0 }
  0x2f   : > { %328 = sbr.rel (%p14651_p0) target bundleno = 4699 (0x125b), region = 56 }
  0x36   : > { %p14652_p2 = scmp.ne.s32.totalorder %s14649_s22, 0 }
  0x38   : > { %9224 = dma.done.wait (%p14652_p2), [#allocation3], 8192  }
  0x39   : > { %9226 = vsyncadd (%p14652_p2), [#allocation3], 4294959104  ;;  %p368_p4 = scmp.lt.s32.totalorder %s9245_s10, 1  ;;  %v9258_v0 = vmov 0.0|0.0   ;;  %vm9259_vm0 = vmmov 0   ;;  %v9260_v1 = vmov 0.0  }
  0x3a   : > { %7950 = vmatprep.subr.bf16.mxu0 %v9258_v0  ;;  %7741 = vmatprep.mubr.msk.f32.mxu0 %vm9259_vm0, %v9260_v1  ;;  %v9261_v2 = vmov 0   ;;  %vm585_vm1 = vcmask 523264   ;;  %v378_v11 = vld [vmem:[%s14102_s1] sm:$0xff]  ;;  %vm381_vm2 = vcmask 261120   ;;  %vm700_vm3 = vcmask 64512   ;;  %v9439_v26 = vld [vmem:[%s14107_s6 + $0x8] sm:$0xff] }
  0x3b   : > { %s369_s28 = scalar_select %p368_p4, %s9245_s10, 1  ;;  %9046 = vset.pattern.permute.xlu0 %v9261_v2  ;;  %9047 = vset.pattern.permute.xlu1 %v9261_v2  ;;  %v380_v13 = vmul.f32 %v378_v11, %v378_v11  ;;  %v379_v23 = vld [vmem:[%s14104_s3] sm:$0xff]  ;;  %14653 = vst [vmem:[#allocation8_spill] sm:$0xff] %v9439_v26  ;;  %v9448_v27 = vld [vmem:[%s14107_s6 + $0x10] sm:$0xff]  ;;  %v9453_v28 = vld [vmem:[%s14107_s6 + $0x18] sm:$0xff] }
  0x3c   : > { %v417_v24 = vld [vmem:[%s14107_s6] sm:$0xff]  ;;  %14654 = vst [vmem:[#allocation9_spill] sm:$0xff] %v9448_v27  ;;  %14655 = vst [vmem:[#allocation10_spill] sm:$0xff] %v9453_v28  ;;  %v9469_v30 = vld [vmem:[%s14107_s6 + $0x28] sm:$0xff]  ;;  %s365_s18 = sand.u32 1, %s9237_s4   ;;  %s7496_s2 = sshll.u32 %s9245_s10, 10 }
  0x3d   : > { %s7495_s21 = sshll.u32 %s369_s28, 5  ;;  %v382_v19 = vsel %vm381_vm2, %v380_v13, 0.0  ;;  %v9434_v25 = vld [vmem:[%s14106_s5] sm:$0xff]  ;;  %14657 = vst [vmem:[#allocation12_spill] sm:$0xff] %v9469_v30  ;;  %v9476_v31 = vld [vmem:[%s14107_s6 + $0x30] sm:$0xff]  ;;  %v9483_v32 = vld [vmem:[%s14107_s6 + $0x38] sm:$0xff]  ;;  %s14053_s24 = scalar_lea.hbm %s14110_s9, %s7496_s2 }
  0x3e   : > { %s372_s13 = scalar_lea.vmem %s14101_s0, %s7495_s21  ;;  %383 = vadd.xlane.f32.xlu0 %v382_v19  ;;  %7746 = vmatprep.mubr.msk.f32.mxu1 %vm700_vm3, %v9434_v25  ;;  %v9462_v29 = vld [vmem:[%s14107_s6 + $0x20] sm:$0xff]  ;;  %14658 = vst [vmem:[#allocation13_spill] sm:$0xff] %v9476_v31  ;;  %14659 = vst [vmem:[#allocation14_spill] sm:$0xff] %v9483_v32  ;;  %v9497_v34 = vld [vmem:[%s14107_s6 + $0x48] sm:$0xff]  ;;  %s7294_s23 = sshll.u32 %s365_s18, 6 }
  0x3f   : > { %v577_v3 = vld [vmem:[%s372_s13] sm:$0xff]  ;;  %v578_v4 = vld [vmem:[%s372_s13 + $0x8] sm:$0xff]  ;;  %v579_v5 = vld [vmem:[%s372_s13 + $0x10] sm:$0xff]  ;;  %14656 = vst [vmem:[#allocation11_spill] sm:$0xff] %v9462_v29  ;;  %s367_s26 = scalar_lea.vmem [#allocation5], %s7294_s23  ;;  %s14055_s25 = scalar_lea.sflag [#allocation4], %s365_s18 }
  0x40   : > { %v581_v6 = vmul.f32 %v577_v3, %v577_v3  ;;  %v582_v7 = vmul.f32 %v578_v4, %v578_v4  ;;  %v7951_v8 = vpack.c.bf16 %v578_v4, %v577_v3  ;;  %v580_v9 = vld [vmem:[%s372_s13 + $0x18] sm:$0xff]  ;;  %v583_v10 = vmul.f32 %v579_v5, %v579_v5  ;;  %v9490_v33 = vld [vmem:[%s14107_s6 + $0x40] sm:$0xff]  ;;  %14661 = vst [vmem:[#allocation16_spill] sm:$0xff] %v9497_v34  ;;  %v9504_v35 = vld [vmem:[%s14107_s6 + $0x50] sm:$0xff]  ;;  %s7186_s27 = sshll.u32 %s367_s26, 4  ;;  %p15854_p10 = scmp.ne.s32.totalorder %s14646_s17, 0  ;;  %s14048_s27 = int_to_ptr.vmem [resolvable:$true] %s7186_s27 }
  0x41   : > { %v584_v12 = vmul.f32 %v580_v9, %v580_v9  ;;  %v7954_v17 = vpack.c.bf16 %v580_v9, %v579_v5  ;;  %14660 = vst [vmem:[#allocation15_spill] sm:$0xff] %v9490_v33  ;;  %14662 = vst [vmem:[#allocation17_spill] sm:$0xff] %v9504_v35  ;;  %v9511_v36 = vld [vmem:[%s14107_s6 + $0x58] sm:$0xff]  ;;  %v9518_v37 = vld [vmem:[%s14107_s6 + $0x60] sm:$0xff]  ;;  %s9171_s13 = scalar_lea.vmem %s14048_s27, 1024  ;;  %s9262_s10 = smov [#allocation5]  }
  0x42   : > { %v586_v14 = vsel %vm585_vm1, %v581_v6, 0.0  ;;  %v587_v15 = vsel %vm585_vm1, %v582_v7, 0.0  ;;  %7952 = vmatpush3.bf16.msra.mxu0 %v7951_v8  ;;  %v589_v16 = vsel %vm585_vm1, %v583_v10, 0.0  ;;  %14663 = vst [vmem:[#allocation18_spill] sm:$0xff] %v9511_v36  ;;  %14664 = vst [vmem:[#allocation19_spill] sm:$0xff] %v9518_v37  ;;  %v9525_v38 = vld [vmem:[%s14107_s6 + $0x68] sm:$0xff]  ;;  %p9172_p8 = scmp.ne.s32.totalorder %s14048_s27, %s9171_s13 }
  0x43   : > { %v588_v18 = vadd.f32 %v587_v15, %v586_v14  ;;  %7953 = vmatprep.subr.bf16.mxu0 %v9258_v0  ;;  %v591_v20 = vsel %vm585_vm1, %v584_v12, 0.0  ;;  %14665 = vst [vmem:[#allocation20_spill] sm:$0xff] %v9525_v38  ;;  %v9532_v39 = vld [vmem:[%s14107_s6 + $0x70] sm:$0xff]  ;;  %v9539_v40 = vld [vmem:[%s14107_s6 + $0x78] sm:$0xff]  ;;  %v433_v41 = vld [vmem:[%s14107_s6 + $0x80] sm:$0xff]  ;;  %s9175_s22 = sshll.u32 %s9262_s10, 4  ;;  %s9176_s22 = int_to_ptr.vmem [resolvable:$false] %s9175_s22 }
  0x44   : > { %14666 = vst [vmem:[#allocation21_spill] sm:$0xff] %v9532_v39  ;;  %14667 = vst [vmem:[#allocation22_spill] sm:$0xff] %v9539_v40  ;;  %v9550_v42 = vld [vmem:[%s14107_s6 + $0x88] sm:$0xff]  ;;  %v9559_v44 = vld [vmem:[%s14107_s6 + $0x90] sm:$0xff]  ;;  %p9173_p11 = pnand %p9172_p8, %p15854_p10  ;;  %s9177_s14 = scalar_lea.vmem %s9176_s22, 2048 }
  0x45   : > { %v590_v21 = vadd.f32 %v589_v16, %v588_v18  ;;  %14668 = vst [vmem:[#allocation23_spill] sm:$0xff] %v9550_v42  ;;  %14669 = vst [vmem:[#allocation24_spill] sm:$0xff] %v9559_v44  ;;  %v9568_v46 = vld [vmem:[%s14107_s6 + $0x98] sm:$0xff]  ;;  %v9577_v48 = vld [vmem:[%s14107_s6 + $0xa0] sm:$0xff]  ;;  %p9178_p1 = scmp.lt.s32.totalorder %s14048_s27, %s9176_s22  ;;  %p9179_p3 = scmp.lt.s32.totalorder %s9177_s14, %s9171_s13 }
  0x46   : > { %7955 = vmatpush3.bf16.msra.mxu0 %v7954_v17  ;;  %14670 = vst [vmem:[#allocation25_spill] sm:$0xff] %v9568_v46  ;;  %14671 = vst [vmem:[#allocation26_spill] sm:$0xff] %v9577_v48  ;;  %v9586_v50 = vld [vmem:[%s14107_s6 + $0xa8] sm:$0xff]  ;;  %v9595_v52 = vld [vmem:[%s14107_s6 + $0xb0] sm:$0xff]  ;;  %p9174_p13 = pneg %p9173_p11 }
  0x47   : > { %v9421_v22 = vadd.f32 %v591_v20, %v590_v21  ;;  %7957 = vmatprep.subr.bf16.mxu0 %v7951_v8  ;;  %14672 = vst [vmem:[#allocation27_spill] sm:$0xff] %v9586_v50  ;;  %14673 = vst [vmem:[#allocation28_spill] sm:$0xff] %v9595_v52  ;;  %v9605_v55 = vld [vmem:[%s14107_s6 + $0xb8] sm:$0xff]  ;;  %v9614_v57 = vld [vmem:[%s14107_s6 + $0xc0] sm:$0xff]  ;;  %p9180_p5 = por %p9179_p3, %p9178_p1 }
  0x48   : > { %14674 = vst [vmem:[#allocation29_spill] sm:$0xff] %v9605_v55  ;;  %14675 = vst [vmem:[#allocation30_spill] sm:$0xff] %v9614_v57  ;;  %v9624_v60 = vld [vmem:[%s14107_s6 + $0xc8] sm:$0xff]  ;;  %v9633_v62 = vld [vmem:[%s14107_s6 + $0xd0] sm:$0xff] }
  0x49   : > { %7742 = vmatmul.mubr.msk.f32.vlgmr.msra.gmra.mrb[0].mxu0 %vm381_vm2, %v378_v11  ;;  %v593_v53 = vrot.slane %v9421_v22, 4  ;;  %14676 = vst [vmem:[#allocation31_spill] sm:$0xff] %v9624_v60  ;;  %14677 = vst [vmem:[#allocation32_spill] sm:$0xff] %v9633_v62  ;;  %v9642_v1 = vld [vmem:[%s14107_s6 + $0xd8] sm:$0xff]  ;;  %v9651_v3 = vld [vmem:[%s14107_s6 + $0xe0] sm:$0xff]  ;;  %p9181_p6 = pnand %p9180_p5, %p9174_p13 }
  0x4a   : > { %7959 = vmatpush3.bf16.msra.mxu0 %v7951_v8  ;;  %7802 = vmatprep.mubr.msk.f32.mxu0 %vm381_vm2, %v417_v24  ;;  %14678 = vst [vmem:[#allocation33_spill] sm:$0xff] %v9642_v1  ;;  %14679 = vst [vmem:[#allocation34_spill] sm:$0xff] %v9651_v3  ;;  %v9660_v6 = vld [vmem:[%s14107_s6 + $0xe8] sm:$0xff]  ;;  %v9669_v8 = vld [vmem:[%s14107_s6 + $0xf0] sm:$0xff] }
  0x4b   : > { %7961 = vmatprep.subr.bf16.mxu0 %v7954_v17  ;;  %v594_v58 = vadd.f32 %v593_v53, %v9421_v22  ;;  %14680 = vst [vmem:[#allocation35_spill] sm:$0xff] %v9660_v6  ;;  %14681 = vst [vmem:[#allocation36_spill] sm:$0xff] %v9669_v8  ;;  %v9678_v11 = vld [vmem:[%s14107_s6 + $0xf8] sm:$0xff]  ;;  %v9837_v7 = vld [vmem:[%s14106_s5 + $0xb0] sm:$0xff] }
  0x4c   : > { %14682 = vst [vmem:[#allocation37_spill] sm:$0xff] %v9678_v11  ;;  %v9846_v5 = vld [vmem:[%s14106_s5 + $0xb8] sm:$0xff]  ;;  %v9851_v2 = vld [vmem:[%s14106_s5 + $0xc0] sm:$0xff]  ;;  %v9860_v0 = vld [vmem:[%s14106_s5 + $0xc8] sm:$0xff] }
  0x4d   : > { %v595_v63 = vrot.slane %v594_v58, 2  ;;  %v9865_v61 = vld [vmem:[%s14106_s5 + $0xd0] sm:$0xff]  ;;  %v9874_v59 = vld [vmem:[%s14106_s5 + $0xd8] sm:$0xff]  ;;  %v9879_v56 = vld [vmem:[%s14106_s5 + $0xe0] sm:$0xff] }
  0x4e   : > { %7963 = vmatpush3.bf16.msra.mxu0 %v7954_v17  ;;  %v9888_v54 = vld [vmem:[%s14106_s5 + $0xe8] sm:$0xff]  ;;  %v9893_v51 = vld [vmem:[%s14106_s5 + $0xf0] sm:$0xff]  ;;  %v9902_v49 = vld [vmem:[%s14106_s5 + $0xf8] sm:$0xff] }
  0x4f   : > { %v596_v4 = vadd.f32 %v595_v63, %v594_v58  ;;  %vm10093_vm4 = vmpackc.low %vm585_vm1, %vm585_vm1 }
  0x51   : > { %7803 = vmatmul.mubr.msk.f32.vlgmr.msra.gmra.mrb[2].mxu0 %vm381_vm2, %v9439_v26  ;;  %v597_v9 = vrot.slane %v596_v4, 1 }
  0x52   : > { %7805 = vmatprep.mubr.msk.f32.mxu0 %vm381_vm2, %v9448_v27 }
  0x53   : > { %v598_v13 = vadd.f32 %v597_v9, %v596_v4 }
  0x54   : > { %677 = vperm.xlu0 %9046, %v379_v23  }
  0x55   : > { %7806 = vmatmul.mubr.msk.f32.gmra.mrb[4].mxu0 %vm381_vm2, %v9453_v28 }
  0x56   : > { %7808 = vmatprep.mubr.msk.f32.mxu0 %vm381_vm2, %v9462_v29 }
  0x59   : > { %7809 = vmatmul.mubr.msk.f32.gmra.mrb[6].mxu0 %vm381_vm2, %v9469_v30 }
  0x5a   : > { %7811 = vmatprep.mubr.msk.f32.mxu0 %vm381_vm2, %v9476_v31 }
  0x5d   : > { %7812 = vmatmul.mubr.msk.f32.gmra.mrb[8].mxu0 %vm381_vm2, %v9483_v32 }
  0x5e   : > { %7814 = vmatprep.mubr.msk.f32.mxu0 %vm381_vm2, %v9490_v33 }
  0x61   : > { %7815 = vmatmul.mubr.msk.f32.gmra.mrb[10].mxu0 %vm381_vm2, %v9497_v34 }
  0x62   : > { %7817 = vmatprep.mubr.msk.f32.mxu0 %vm381_vm2, %v9504_v35 }
  0x65   : > { %7818 = vmatmul.mubr.msk.f32.gmra.mrb[12].mxu0 %vm381_vm2, %v9511_v36 }
  0x66   : > { %7820 = vmatprep.mubr.msk.f32.mxu0 %vm381_vm2, %v9518_v37 }
  0x69   : > { %7821 = vmatmul.mubr.msk.f32.gmra.mrb[14].mxu0 %vm381_vm2, %v9525_v38 }
  0x6a   : > { %7823 = vmatprep.mubr.msk.f32.mxu0 %vm381_vm2, %v9532_v39 }
  0x6d   : > { %7824 = vmatmul.mubr.msk.f32.gmra.mrb[16].mxu0 %vm381_vm2, %v9539_v40 }
  0x6e   : > { %7826 = vmatprep.mubr.msk.f32.mxu0 %vm381_vm2, %v433_v41 }
  0x71   : > { %7827 = vmatmul.mubr.msk.f32.gmra.mrb[18].mxu0 %vm381_vm2, %v9550_v42 }
  0x72   : > { %7829 = vmatprep.mubr.msk.f32.mxu0 %vm381_vm2, %v9559_v44 }
  0x75   : > { %7830 = vmatmul.mubr.msk.f32.gmra.mrb[20].mxu0 %vm381_vm2, %v9568_v46 }
  0x76   : > { %7832 = vmatprep.mubr.msk.f32.mxu0 %vm381_vm2, %v9577_v48 }
  0x79   : > { %7833 = vmatmul.mubr.msk.f32.gmra.mrb[22].mxu0 %vm381_vm2, %v9586_v50 }
  0x7a   : > { %7835 = vmatprep.mubr.msk.f32.mxu0 %vm381_vm2, %v9595_v52 }
  0x7d   : > { %7836 = vmatmul.mubr.msk.f32.gmra.mrb[24].mxu0 %vm381_vm2, %v9605_v55 }
  0x7e   : > { %7838 = vmatprep.mubr.msk.f32.mxu0 %vm381_vm2, %v9614_v57 }
  0x81   : > { %7839 = vmatmul.mubr.msk.f32.gmra.mrb[26].mxu0 %vm381_vm2, %v9624_v60 }
  0x82   : > { %7841 = vmatprep.mubr.msk.f32.mxu0 %vm381_vm2, %v9633_v62 }
  0x85   : > { %7842 = vmatmul.mubr.msk.f32.gmra.mrb[28].mxu0 %vm381_vm2, %v9642_v1 }
  0x86   : > { %7844 = vmatprep.mubr.msk.f32.mxu0 %vm381_vm2, %v9651_v3 }
  0x89   : > { %7845 = vmatmul.mubr.msk.f32.gmra.mrb[30].mxu0 %vm381_vm2, %v9660_v6 }
  0x8a   : > { %7847 = vmatprep.mubr.msk.f32.mxu0 %vm381_vm2, %v9669_v8 }
  0x8d   : > { %7848 = vmatmul.mubr.msk.f32.gmra.mrb[32].mxu0 %vm381_vm2, %v9678_v11 }
  0x8e   : > { %7852 = vmatprep.mubr.msk.f32.mxu0 %vm700_vm3, %v9434_v25 }
  0xcb   : > { %v384_v14 = vpop.xlane.xlu0 %383 }
  0xd3   : > { %v678_v19 = vpop.permute.xlu0 %677 }
 0x11c   : > { %v668_v15 = vpop.f32.mrb[0].mxu0 }
 0x11d   : > { %v672_v16 = vmul.f32 2.0, %v668_v15  ;;  %v7743_v17 = vpop.f32.mrb[1].mxu0 }
 0x11f   : > { %v673_v18 = vsub.f32 %v598_v13, %v672_v16 }
 0x121   : > { %v674_v20 = vadd.f32 %v673_v18, %v384_v14 }
 0x123   : > { %v680_v21 = vmul.f32 %v678_v19, %v674_v20 }
 0x124   : > { %v9906_v47 = vpop.f32.mrb[2].mxu0 }
 0x125   : > { %v681_v22 = vsel %vm585_vm1, %v680_v21, -inf  ;;  %v9908_v45 = vpop.f32.mrb[3].mxu0 }
 0x126   : > { %v682_v23 = vrot.slane %v681_v22, 4 }
 0x128   : > { %v683_v24 = vmax.f32 %v681_v22, %v682_v23  ;;  %v9691_v22 = vld [vmem:[%s14106_s5 + $0x8] sm:$0xff]  ;;  %v9696_v23 = vld [vmem:[%s14106_s5 + $0x10] sm:$0xff]  ;;  %v9910_v43 = vpop.f32.mrb[4].mxu0 }
 0x129   : > { %v9912_v11 = vpop.f32.mrb[5].mxu0 }
 0x12a   : > { %v684_v41 = vrot.slane %v683_v24, 2 }
 0x12c   : > { %v685_v53 = vmax.f32 %v683_v24, %v684_v41  ;;  %v9711_v41 = vld [vmem:[%s14106_s5 + $0x20] sm:$0xff]  ;;  %v9914_v40 = vpop.f32.mrb[6].mxu0 }
 0x12d   : > { %v9916_v8 = vpop.f32.mrb[7].mxu0 }
 0x12e   : > { %v686_v58 = vrot.slane %v685_v53, 1 }
 0x130   : > { %v687_v63 = vmax.f32 %v685_v53, %v686_v58  ;;  %v9725_v53 = vld [vmem:[%s14106_s5 + $0x30] sm:$0xff]  ;;  %v9734_v58 = vld [vmem:[%s14106_s5 + $0x38] sm:$0xff]  ;;  %v9918_v39 = vpop.f32.mrb[8].mxu0 }
 0x131   : > { %v9920_v6 = vpop.f32.mrb[9].mxu0 }
 0x132   : > { %v688_v4 = vsub.f32 %v680_v21, %v687_v63  ;;  %v9739_v63 = vld [vmem:[%s14106_s5 + $0x40] sm:$0xff] }
 0x134   : > { %v689_v9 = vmul.f32 1.442695, %v688_v4  ;;  %v9748_v4 = vld [vmem:[%s14106_s5 + $0x48] sm:$0xff]  ;;  %v9922_v38 = vpop.f32.mrb[10].mxu0 }
 0x135   : > { %v9924_v3 = vpop.f32.mrb[11].mxu0 }
 0x136   : > { %9100 = vpow2.f32 %v689_v9  ;;  %v9753_v9 = vld [vmem:[%s14106_s5 + $0x50] sm:$0xff] }
 0x138   : > { %v9926_v37 = vpop.f32.mrb[12].mxu0 }
 0x139   : > { %v9928_v1 = vpop.f32.mrb[13].mxu0 }
 0x13c   : > { %v9930_v36 = vpop.f32.mrb[14].mxu0 }
 0x13d   : > { %v9932_v62 = vpop.f32.mrb[15].mxu0 }
 0x140   : > { %v9101_v25 = vpop.eup %9100  ;;  %v9934_v35 = vpop.f32.mrb[16].mxu0 }
 0x141   : > { %v691_v12 = vsel %vm585_vm1, %v9101_v25, 0.0  ;;  %v9936_v60 = vpop.f32.mrb[17].mxu0 }
 0x142   : > { %v692_v15 = vrot.slane %v691_v12, 4 }
 0x144   : > { %v693_v17 = vadd.f32 %v692_v15, %v691_v12  ;;  %v9705_v12 = vld [vmem:[%s14106_s5 + $0x18] sm:$0xff]  ;;  %v9767_v15 = vld [vmem:[%s14106_s5 + $0x60] sm:$0xff]  ;;  %v9938_v34 = vpop.f32.mrb[18].mxu0 }
 0x145   : > { %v9940_v57 = vpop.f32.mrb[19].mxu0 }
 0x146   : > { %v694_v16 = vrot.slane %v693_v17, 2 }
 0x148   : > { %v695_v10 = vadd.f32 %v694_v16, %v693_v17  ;;  %v9776_v17 = vld [vmem:[%s14106_s5 + $0x68] sm:$0xff]  ;;  %v9781_v16 = vld [vmem:[%s14106_s5 + $0x70] sm:$0xff]  ;;  %v9942_v33 = vpop.f32.mrb[20].mxu0 }
 0x149   : > { %v9944_v55 = vpop.f32.mrb[21].mxu0 }
 0x14a   : > { %v696_v14 = vrot.slane %v695_v10, 1 }
 0x14c   : > { %v697_v18 = vadd.f32 %v696_v14, %v695_v10  ;;  %v9790_v14 = vld [vmem:[%s14106_s5 + $0x78] sm:$0xff]  ;;  %v9946_v32 = vpop.f32.mrb[22].mxu0 }
 0x14d   : > { %v9948_v52 = vpop.f32.mrb[23].mxu0 }
 0x14e   : > { %9102 = vrcp.f32 %v697_v18  ;;  %v9795_v18 = vld [vmem:[%s14106_s5 + $0x80] sm:$0xff] }
 0x150   : > { %v9950_v31 = vpop.f32.mrb[24].mxu0 }
 0x151   : > { %14683 = vst [vmem:[#allocation38_spill] sm:$0xff] %v9950_v31  ;;  %v9952_v50 = vpop.f32.mrb[25].mxu0 }
 0x152   : > { %14684 = vst [vmem:[#allocation39_spill] sm:$0xff] %v9952_v50 }
 0x154   : > { %v9954_v30 = vpop.f32.mrb[26].mxu0 }
 0x155   : > { %14685 = vst [vmem:[#allocation40_spill] sm:$0xff] %v9954_v30  ;;  %v9956_v46 = vpop.f32.mrb[27].mxu0 }
 0x158   : > { %v9103_v19 = vpop.eup %9102  ;;  %v9960_v44 = vpop.f32.mrb[28].mxu0 }
 0x159   : > { %v699_v20 = vmul.f32 %v9103_v19, %v9101_v25  ;;  %v9762_v25 = vld [vmem:[%s14106_s5 + $0x58] sm:$0xff]  ;;  %v9804_v19 = vld [vmem:[%s14106_s5 + $0x88] sm:$0xff]  ;;  %v9963_v42 = vpop.f32.mrb[29].mxu0 }
 0x15b   : > { %7744 = vmatprep.subr.mxu1 %v699_v20  ;;  %v1728_v21 = vmul.f32 %v699_v20, %v699_v20 }
 0x15c   : > { %7745 = vmatpush3.msra.mxu1 %v699_v20  ;;  %v9809_v20 = vld [vmem:[%s14106_s5 + $0x90] sm:$0xff]  ;;  %v9965_v26 = vpop.f32.mrb[30].mxu0 }
 0x15d   : > { %7747 = vmatmul.mubr.msk.f32.vlgmr.msra.gmra.mrb[0].mxu1 %vm700_vm3, %v9691_v22  ;;  %v1729_v10 = vmul.f32 %v1728_v21, %v598_v13  ;;  %v9720_v13 = vld [vmem:[%s14106_s5 + $0x28] sm:$0xff]  ;;  %v9818_v21 = vld [vmem:[%s14106_s5 + $0x98] sm:$0xff]  ;;  %v9967_v50 = vpop.f32.mrb[31].mxu0 }
 0x15e   : > { %7749 = vmatprep.mubr.msk.f32.mxu1 %vm700_vm3, %v9696_v23 }
 0x15f   : > { %v1730_v24 = vsel %vm585_vm1, %v1729_v10, 0.0  ;;  %v9823_v10 = vld [vmem:[%s14106_s5 + $0xa0] sm:$0xff] }
 0x160   : > { %1731 = vadd.xlane.f32.xlu1 %v1730_v24  ;;  %v9832_v24 = vld [vmem:[%s14106_s5 + $0xa8] sm:$0xff]  ;;  %v9969_v30 = vpop.f32.mrb[32].mxu0 }
 0x161   : > { %7750 = vmatmul.mubr.msk.f32.gmra.mrb[2].mxu1 %vm700_vm3, %v9705_v12 }
 0x162   : > { %7752 = vmatprep.mubr.msk.f32.mxu1 %vm700_vm3, %v9711_v41 }
 0x165   : > { %7753 = vmatmul.mubr.msk.f32.gmra.mrb[4].mxu1 %vm700_vm3, %v9720_v13 }
 0x166   : > { %7755 = vmatprep.mubr.msk.f32.mxu1 %vm700_vm3, %v9725_v53 }
 0x169   : > { %7756 = vmatmul.mubr.msk.f32.gmra.mrb[6].mxu1 %vm700_vm3, %v9734_v58 }
 0x16a   : > { %7758 = vmatprep.mubr.msk.f32.mxu1 %vm700_vm3, %v9739_v63 }
 0x16d   : > { %7759 = vmatmul.mubr.msk.f32.gmra.mrb[8].mxu1 %vm700_vm3, %v9748_v4 }
 0x16e   : > { %7761 = vmatprep.mubr.msk.f32.mxu1 %vm700_vm3, %v9753_v9 }
 0x171   : > { %7762 = vmatmul.mubr.msk.f32.gmra.mrb[10].mxu1 %vm700_vm3, %v9762_v25 }
 0x172   : > { %7764 = vmatprep.mubr.msk.f32.mxu1 %vm700_vm3, %v9767_v15 }
 0x175   : > { %7765 = vmatmul.mubr.msk.f32.gmra.mrb[12].mxu1 %vm700_vm3, %v9776_v17 }
 0x176   : > { %7767 = vmatprep.mubr.msk.f32.mxu1 %vm700_vm3, %v9781_v16 }
 0x179   : > { %7768 = vmatmul.mubr.msk.f32.gmra.mrb[14].mxu1 %vm700_vm3, %v9790_v14 }
 0x17a   : > { %7770 = vmatprep.mubr.msk.f32.mxu1 %vm700_vm3, %v9795_v18 }
 0x17d   : > { %7771 = vmatmul.mubr.msk.f32.gmra.mrb[16].mxu1 %vm700_vm3, %v9804_v19 }
 0x17e   : > { %7773 = vmatprep.mubr.msk.f32.mxu1 %vm700_vm3, %v9809_v20 }
 0x181   : > { %7774 = vmatmul.mubr.msk.f32.gmra.mrb[18].mxu1 %vm700_vm3, %v9818_v21 }
 0x182   : > { %7776 = vmatprep.mubr.msk.f32.mxu1 %vm700_vm3, %v9823_v10 }
 0x185   : > { %7777 = vmatmul.mubr.msk.f32.gmra.mrb[20].mxu1 %vm700_vm3, %v9832_v24 }
 0x186   : > { %7779 = vmatprep.mubr.msk.f32.mxu1 %vm700_vm3, %v9837_v7 }
 0x189   : > { %7780 = vmatmul.mubr.msk.f32.gmra.mrb[22].mxu1 %vm700_vm3, %v9846_v5 }
 0x18a   : > { %7782 = vmatprep.mubr.msk.f32.mxu1 %vm700_vm3, %v9851_v2 }
 0x18d   : > { %7783 = vmatmul.mubr.msk.f32.gmra.mrb[24].mxu1 %vm700_vm3, %v9860_v0 }
 0x18e   : > { %7785 = vmatprep.mubr.msk.f32.mxu1 %vm700_vm3, %v9865_v61 }
 0x191   : > { %7786 = vmatmul.mubr.msk.f32.gmra.mrb[26].mxu1 %vm700_vm3, %v9874_v59 }
 0x192   : > { %7788 = vmatprep.mubr.msk.f32.mxu1 %vm700_vm3, %v9879_v56 }
 0x195   : > { %7789 = vmatmul.mubr.msk.f32.gmra.mrb[28].mxu1 %vm700_vm3, %v9888_v54 }
 0x196   : > { %7791 = vmatprep.mubr.msk.f32.mxu1 %vm700_vm3, %v9893_v51 }
 0x199   : > { %7792 = vmatmul.mubr.msk.f32.gmra.mrb[30].mxu1 %vm700_vm3, %v9902_v49 }
 0x1ed   : > { %v1732_v48 = vpop.xlane.xlu1 %1731 }
 0x1ee   : > { %v1733_v29 = vmul.f32 0.015625, %v1732_v48 }
 0x1f0   : > { %v9958_v28 = vadd.f32 1e-12, %v1733_v29 }
 0x1f2   : > { %14686 = vst [vmem:[#allocation41_spill] sm:$0xff] %v9958_v28  ;;  %v1735_v27 = vmul.f32 64.0, %v9958_v28 }
 0x1f4   : > { %9104 = vrcp.f32 %v1735_v27  ;;  %v9979_v27 = vpop.f32.mrb[33].mxu0 }
 0x1fe   : > { %v9105_v31 = vpop.eup %9104 }
 0x1ff   : > { %7850 = vmatprep.subr.mxu0 %v9105_v31 }
 0x200   : > { %7851 = vmatpush3.msra.mxu0 %v9105_v31 }
 0x201   : > { %7853 = vmatmul.mubr.msk.f32.vlgmr.msra.gmra.mrb[34].mxu0 %vm700_vm3, %v9691_v22 }
 0x202   : > { %7855 = vmatprep.mubr.msk.f32.mxu0 %vm700_vm3, %v9696_v23 }
 0x205   : > { %7856 = vmatmul.mubr.msk.f32.gmra.mrb[36].mxu0 %vm700_vm3, %v9705_v12 }
 0x206   : > { %7858 = vmatprep.mubr.msk.f32.mxu0 %vm700_vm3, %v9711_v41 }
 0x209   : > { %7859 = vmatmul.mubr.msk.f32.gmra.mrb[38].mxu0 %vm700_vm3, %v9720_v13 }
 0x20a   : > { %7861 = vmatprep.mubr.msk.f32.mxu0 %vm700_vm3, %v9725_v53 }
 0x20d   : > { %7862 = vmatmul.mubr.msk.f32.gmra.mrb[40].mxu0 %vm700_vm3, %v9734_v58 }
 0x20e   : > { %7864 = vmatprep.mubr.msk.f32.mxu0 %vm700_vm3, %v9739_v63 }
 0x211   : > { %7865 = vmatmul.mubr.msk.f32.gmra.mrb[42].mxu0 %vm700_vm3, %v9748_v4 }
 0x212   : > { %7867 = vmatprep.mubr.msk.f32.mxu0 %vm700_vm3, %v9753_v9 }
 0x215   : > { %7868 = vmatmul.mubr.msk.f32.gmra.mrb[44].mxu0 %vm700_vm3, %v9762_v25 }
 0x216   : > { %7870 = vmatprep.mubr.msk.f32.mxu0 %vm700_vm3, %v9767_v15 }
 0x219   : > { %7871 = vmatmul.mubr.msk.f32.gmra.mrb[46].mxu0 %vm700_vm3, %v9776_v17 }
 0x21a   : > { %7873 = vmatprep.mubr.msk.f32.mxu0 %vm700_vm3, %v9781_v16 }
 0x21d   : > { %7874 = vmatmul.mubr.msk.f32.gmra.mrb[48].mxu0 %vm700_vm3, %v9790_v14 }
 0x21e   : > { %7876 = vmatprep.mubr.msk.f32.mxu0 %vm700_vm3, %v9795_v18 }
 0x221   : > { %7877 = vmatmul.mubr.msk.f32.gmra.mrb[50].mxu0 %vm700_vm3, %v9804_v19 }
 0x222   : > { %7879 = vmatprep.mubr.msk.f32.mxu0 %vm700_vm3, %v9809_v20 }
 0x225   : > { %7880 = vmatmul.mubr.msk.f32.gmra.mrb[52].mxu0 %vm700_vm3, %v9818_v21  ;;  %v14689_v21 = vld [vmem:[#allocation38_spill] sm:$0xff] }
 0x226   : > { %7882 = vmatprep.mubr.msk.f32.mxu0 %vm700_vm3, %v9823_v10 }
 0x229   : > { %7883 = vmatmul.mubr.msk.f32.gmra.mrb[54].mxu0 %vm700_vm3, %v9832_v24 }
 0x22a   : > { %7885 = vmatprep.mubr.msk.f32.mxu0 %vm700_vm3, %v9837_v7 }
 0x22d   : > { %7886 = vmatmul.mubr.msk.f32.gmra.mrb[56].mxu0 %vm700_vm3, %v9846_v5 }
 0x22e   : > { %7888 = vmatprep.mubr.msk.f32.mxu0 %vm700_vm3, %v9851_v2 }
 0x230   : > { %v7748_v29 = vpop.f32.mrb[0].mxu1 }
 0x231   : > { %v10022_v31 = vmul.f32 %v9906_v47, %v7748_v29  ;;  %v863_v48 = vpop.f32.mrb[1].mxu1  ;;  %7889 = vmatmul.mubr.msk.f32.gmra.mrb[58].mxu0 %vm700_vm3, %v9860_v0 }
 0x232   : > { %v10027_v22 = vmul.f32 %v9908_v45, %v863_v48  ;;  %7891 = vmatprep.mubr.msk.f32.mxu0 %vm700_vm3, %v9865_v61  ;;  %v14691_v48 = vld [vmem:[#allocation40_spill] sm:$0xff] }
 0x234   : > { %v7751_v7 = vpop.f32.mrb[2].mxu1  ;;  %7603 = vmatprep.mubr.msk.f32.mxu1 %vm585_vm1, %v10027_v22 }
 0x235   : > { %v10034_v2 = vmul.f32 %v9910_v43, %v7751_v7  ;;  %v873_v5 = vpop.f32.mrb[3].mxu1  ;;  %7892 = vmatmul.mubr.msk.f32.gmra.mrb[60].mxu0 %vm700_vm3, %v9874_v59 }
 0x236   : > { %v10039_v47 = vmul.f32 %v9912_v11, %v873_v5  ;;  %7894 = vmatprep.mubr.msk.f32.mxu0 %vm700_vm3, %v9879_v56 }
 0x238   : > { %v7754_v45 = vpop.f32.mrb[4].mxu1  ;;  %v7973_v20 = vpack.c.bf16 %v10034_v2, %v10039_v47 }
 0x239   : > { %v10044_v61 = vmul.f32 %v9914_v40, %v7754_v45  ;;  %v883_v0 = vpop.f32.mrb[5].mxu1  ;;  %7895 = vmatmul.mubr.msk.f32.gmra.mrb[62].mxu0 %vm700_vm3, %v9888_v54 }
 0x23a   : > { %v10049_v43 = vmul.f32 %v9916_v8, %v883_v0  ;;  %7897 = vmatprep.mubr.msk.f32.mxu0 %vm700_vm3, %v9893_v51 }
 0x23c   : > { %v7757_v59 = vpop.f32.mrb[6].mxu1 }
 0x23d   : > { %v10054_v11 = vmul.f32 %v9918_v39, %v7757_v59  ;;  %v893_v23 = vpop.f32.mrb[7].mxu1  ;;  %7898 = vmatmul.mubr.msk.f32.gmra.mrb[64].mxu0 %vm700_vm3, %v9902_v49 }
 0x23e   : > { %v10059_v40 = vmul.f32 %v9920_v6, %v893_v23  ;;  %v7979_v23 = vpack.c.bf16 %v10044_v61, %v10049_v43 }
 0x240   : > { %v7760_v56 = vpop.f32.mrb[8].mxu1 }
 0x241   : > { %v10062_v54 = vmul.f32 %v9922_v38, %v7760_v56  ;;  %v903_v8 = vpop.f32.mrb[9].mxu1 }
 0x242   : > { %v10065_v12 = vmul.f32 %v9924_v3, %v903_v8 }
 0x244   : > { %v7763_v51 = vpop.f32.mrb[10].mxu1 }
 0x245   : > { %v10068_v41 = vmul.f32 %v9926_v37, %v7763_v51  ;;  %v913_v39 = vpop.f32.mrb[11].mxu1 }
 0x246   : > { %v10071_v13 = vmul.f32 %v9928_v1, %v913_v39 }
 0x248   : > { %v7766_v49 = vpop.f32.mrb[12].mxu1 }
 0x249   : > { %v10074_v6 = vmul.f32 %v9930_v36, %v7766_v49  ;;  %v923_v53 = vpop.f32.mrb[13].mxu1 }
 0x24a   : > { %v10077_v38 = vmul.f32 %v9932_v62, %v923_v53 }
 0x24c   : > { %v7769_v58 = vpop.f32.mrb[14].mxu1 }
 0x24d   : > { %v10080_v3 = vmul.f32 %v9934_v35, %v7769_v58  ;;  %v933_v63 = vpop.f32.mrb[15].mxu1 }
 0x24e   : > { %v10083_v37 = vmul.f32 %v9936_v60, %v933_v63  ;;  %v7967_v60 = vpack.c.bf16 %v10022_v31, %v10027_v22 }
 0x250   : > { %v7772_v4 = vpop.f32.mrb[16].mxu1 }
 0x251   : > { %v10086_v1 = vmul.f32 %v9938_v34, %v7772_v4  ;;  %v943_v9 = vpop.f32.mrb[17].mxu1 }
 0x252   : > { %v10089_v36 = vmul.f32 %v9940_v57, %v943_v9 }
 0x254   : > { %v7964_v35 = vpack.c.bf16 %v10086_v1, %v10089_v36  ;;  %v7775_v25 = vpop.f32.mrb[18].mxu1 }
 0x255   : > { %v10102_v34 = vmul.f32 %v9942_v33, %v7775_v25  ;;  %v953_v15 = vpop.f32.mrb[19].mxu1  ;;  %v8003_v25 = vpack.c.bf16 %v10074_v6, %v10077_v38 }
 0x256   : > { %7966 = vmatprep.subr.msk.bf16.mxu1 %vm10093_vm4, %v7964_v35  ;;  %v10107_v57 = vmul.f32 %v9944_v55, %v953_v15 }
 0x257   : > { %7969 = vmatpush3.bf16.xpose.msk.msra.mxu1 %vm10093_vm4, %v7967_v60  ;;  %v8009_v60 = vpack.c.bf16 %v10080_v3, %v10083_v37 }
 0x258   : > { %v7970_v17 = vpack.c.bf16 %v10102_v34, %v10107_v57  ;;  %v7778_v16 = vpop.f32.mrb[20].mxu1 }
 0x259   : > { %v10114_v14 = vmul.f32 %v9946_v32, %v7778_v16  ;;  %v963_v18 = vpop.f32.mrb[21].mxu1  ;;  %v14690_v32 = vld [vmem:[#allocation39_spill] sm:$0xff] }
 0x25a   : > { %7972 = vmatprep.subr.msk.bf16.mxu1 %vm10093_vm4, %v7970_v17  ;;  %v10119_v33 = vmul.f32 %v9948_v52, %v963_v18 }
 0x25c   : > { %v7976_v55 = vpack.c.bf16 %v10114_v14, %v10119_v33  ;;  %v7781_v19 = vpop.f32.mrb[22].mxu1 }
 0x25d   : > { %v10126_v10 = vmul.f32 %v14689_v21, %v7781_v19  ;;  %v973_v24 = vpop.f32.mrb[23].mxu1 }
 0x25e   : > { %v10129_v29 = vmul.f32 %v14690_v32, %v973_v24 }
 0x25f   : > { %7975 = vmatpush3.bf16.xpose.msk.msra.mxu1 %vm10093_vm4, %v7973_v20 }
 0x260   : > { %7978 = vmatprep.subr.msk.bf16.mxu1 %vm10093_vm4, %v7976_v55  ;;  %v7784_v52 = vpop.f32.mrb[24].mxu1  ;;  %v7982_v0 = vpack.c.bf16 %v10126_v10, %v10129_v29 }
 0x261   : > { %v10136_v7 = vmul.f32 %v14691_v48, %v7784_v52  ;;  %v983_v5 = vpop.f32.mrb[25].mxu1  ;;  %v451_v48 = vld [vmem:[%s14108_s7 + $0x10] sm:$0xff] }
 0x262   : > { %v10139_v45 = vmul.f32 %v9956_v46, %v983_v5  ;;  %v452_v5 = vld [vmem:[%s14108_s7 + $0x18] sm:$0xff] }
 0x264   : > { %v7787_v59 = vpop.f32.mrb[26].mxu1 }
 0x265   : > { %v10146_v56 = vmul.f32 %v9960_v44, %v7787_v59  ;;  %v993_v8 = vpop.f32.mrb[27].mxu1  ;;  %v7988_v44 = vpack.c.bf16 %v10136_v7, %v10139_v45 }
 0x266   : > { %v10149_v51 = vmul.f32 %v9963_v42, %v993_v8  ;;  %v7985_v42 = vpack.c.bf16 %v10054_v11, %v10059_v40 }
 0x267   : > { %7981 = vmatpush3.bf16.xpose.msk.msra.mxu1 %vm10093_vm4, %v7979_v23 }
 0x268   : > { %7984 = vmatprep.subr.msk.bf16.mxu1 %vm10093_vm4, %v7982_v0  ;;  %v7790_v46 = vpop.f32.mrb[28].mxu1 }
 0x269   : > { %v10156_v39 = vmul.f32 %v9965_v26, %v7790_v46  ;;  %v1003_v49 = vpop.f32.mrb[29].mxu1  ;;  %v7994_v26 = vpack.c.bf16 %v10146_v56, %v10149_v51 }
 0x26a   : > { %v10159_v53 = vmul.f32 %v9967_v50, %v1003_v49  ;;  %v7991_v50 = vpack.c.bf16 %v10062_v54, %v10065_v12 }
 0x26c   : > { %v7793_v58 = vpop.f32.mrb[30].mxu1 }
 0x26d   : > { %v10166_v63 = vmul.f32 %v9969_v30, %v7793_v58  ;;  %v1013_v4 = vpop.f32.mrb[31].mxu1  ;;  %v8000_v30 = vpack.c.bf16 %v10156_v39, %v10159_v53  ;;  %v455_v58 = vld [vmem:[%s14108_s7 + $0x30] sm:$0xff] }
 0x26e   : > { %v10169_v9 = vmul.f32 %v9979_v27, %v1013_v4  ;;  %v7997_v27 = vpack.c.bf16 %v10068_v41, %v10071_v13  ;;  %v454_v4 = vld [vmem:[%s14108_s7 + $0x28] sm:$0xff] }
 0x26f   : > { %7987 = vmatpush3.bf16.xpose.msk.msra.mxu1 %vm10093_vm4, %v7985_v42 }
 0x270   : > { %7990 = vmatprep.subr.msk.bf16.mxu1 %vm10093_vm4, %v7988_v44  ;;  %v8006_v35 = vpack.c.bf16 %v10166_v63, %v10169_v9 }
 0x277   : > { %7993 = vmatpush3.bf16.xpose.msk.msra.mxu1 %vm10093_vm4, %v7991_v50  ;;  %v453_v50 = vld [vmem:[%s14108_s7 + $0x20] sm:$0xff] }
 0x278   : > { %7996 = vmatprep.subr.msk.bf16.mxu1 %vm10093_vm4, %v7994_v26 }
 0x27f   : > { %7999 = vmatpush3.bf16.xpose.msk.msra.mxu1 %vm10093_vm4, %v7997_v27 }
 0x280   : > { %8002 = vmatprep.subr.msk.bf16.mxu1 %vm10093_vm4, %v8000_v30 }
 0x287   : > { %8005 = vmatpush3.bf16.xpose.msk.msra.mxu1 %vm10093_vm4, %v8003_v25 }
 0x288   : > { %8008 = vmatprep.subr.msk.bf16.mxu1 %vm10093_vm4, %v8006_v35 }
 0x28f   : > { %8011 = vmatpush3.bf16.xpose.msk.msra.mxu1 %vm10093_vm4, %v8009_v60 }
 0x296   : > { %7604 = vmatmul.mubr.msk.f32.vlgmr.msra.gmra.mrb[32].mxu1 %vm585_vm1, %v10027_v22 }
 0x297   : > { %7605 = vmatprep.mubr.msk.f32.mxu1 %vm585_vm1, %v10022_v31 }
 0x29a   : > { %7606 = vmatmul.mubr.msk.f32.gmra.mrb[34].mxu1 %vm585_vm1, %v10022_v31 }
 0x29b   : > { %7607 = vmatprep.mubr.msk.f32.mxu1 %vm585_vm1, %v10039_v47 }
 0x29e   : > { %7608 = vmatmul.mubr.msk.f32.gmra.mrb[36].mxu1 %vm585_vm1, %v10039_v47 }
 0x29f   : > { %7609 = vmatprep.mubr.msk.f32.mxu1 %vm585_vm1, %v10034_v2 }
 0x2a2   : > { %7610 = vmatmul.mubr.msk.f32.gmra.mrb[38].mxu1 %vm585_vm1, %v10034_v2 }
 0x2a3   : > { %7611 = vmatprep.mubr.msk.f32.mxu1 %vm585_vm1, %v10049_v43 }
 0x2a6   : > { %7612 = vmatmul.mubr.msk.f32.gmra.mrb[40].mxu1 %vm585_vm1, %v10049_v43 }
 0x2a7   : > { %7613 = vmatprep.mubr.msk.f32.mxu1 %vm585_vm1, %v10044_v61 }
 0x2aa   : > { %7614 = vmatmul.mubr.msk.f32.gmra.mrb[42].mxu1 %vm585_vm1, %v10044_v61 }
 0x2ab   : > { %7615 = vmatprep.mubr.msk.f32.mxu1 %vm585_vm1, %v10059_v40 }
 0x2ae   : > { %7616 = vmatmul.mubr.msk.f32.gmra.mrb[44].mxu1 %vm585_vm1, %v10059_v40 }
 0x2af   : > { %7617 = vmatprep.mubr.msk.f32.mxu1 %vm585_vm1, %v10054_v11 }
 0x2b2   : > { %7618 = vmatmul.mubr.msk.f32.gmra.mrb[46].mxu1 %vm585_vm1, %v10054_v11 }
 0x2b3   : > { %7619 = vmatprep.mubr.msk.f32.mxu1 %vm585_vm1, %v10065_v12 }
 0x2b6   : > { %7620 = vmatmul.mubr.msk.f32.gmra.mrb[48].mxu1 %vm585_vm1, %v10065_v12 }
 0x2b7   : > { %7621 = vmatprep.mubr.msk.f32.mxu1 %vm585_vm1, %v10062_v54 }
 0x2ba   : > { %7622 = vmatmul.mubr.msk.f32.gmra.mrb[50].mxu1 %vm585_vm1, %v10062_v54 }
 0x2bb   : > { %7623 = vmatprep.mubr.msk.f32.mxu1 %vm585_vm1, %v10071_v13 }
 0x2be   : > { %7624 = vmatmul.mubr.msk.f32.gmra.mrb[52].mxu1 %vm585_vm1, %v10071_v13 }
 0x2bf   : > { %7625 = vmatprep.mubr.msk.f32.mxu1 %vm585_vm1, %v10068_v41 }
 0x2c2   : > { %7626 = vmatmul.mubr.msk.f32.gmra.mrb[54].mxu1 %vm585_vm1, %v10068_v41 }
 0x2c3   : > { %7627 = vmatprep.mubr.msk.f32.mxu1 %vm585_vm1, %v10077_v38 }
 0x2c6   : > { %7628 = vmatmul.mubr.msk.f32.gmra.mrb[56].mxu1 %vm585_vm1, %v10077_v38 }
 0x2c7   : > { %7629 = vmatprep.mubr.msk.f32.mxu1 %vm585_vm1, %v10074_v6 }
 0x2ca   : > { %7630 = vmatmul.mubr.msk.f32.gmra.mrb[58].mxu1 %vm585_vm1, %v10074_v6 }
 0x2cb   : > { %7631 = vmatprep.mubr.msk.f32.mxu1 %vm585_vm1, %v10083_v37 }
 0x2ce   : > { %7632 = vmatmul.mubr.msk.f32.gmra.mrb[60].mxu1 %vm585_vm1, %v10083_v37 }
 0x2cf   : > { %7633 = vmatprep.mubr.msk.f32.mxu1 %vm585_vm1, %v10080_v3 }
 0x2d2   : > { %7634 = vmatmul.mubr.msk.f32.gmra.mrb[62].mxu1 %vm585_vm1, %v10080_v3 }
 0x2d3   : > { %7635 = vmatprep.mubr.msk.f32.mxu1 %vm585_vm1, %v10089_v36 }
 0x2d4   : > { %v7854_v31 = vpop.f32.mrb[34].mxu0 }
 0x2d5   : > { %1970 = vperm.xlu1 %9047, %v7854_v31   ;;  %v1804_v22 = vpop.f32.mrb[35].mxu0 }
 0x2d6   : > { %7636 = vmatmul.mubr.msk.f32.gmra.mrb[64].mxu1 %vm585_vm1, %v10089_v36 }
 0x2d7   : > { %7637 = vmatprep.mubr.msk.f32.mxu1 %vm585_vm1, %v10086_v1 }
 0x2d8   : > { %v7857_v2 = vpop.f32.mrb[36].mxu0 }
 0x2d9   : > { %1965 = vperm.xlu1 %9047, %v1804_v22   ;;  %v1814_v47 = vpop.f32.mrb[37].mxu0 }
 0x2da   : > { %7638 = vmatmul.mubr.msk.f32.gmra.mrb[66].mxu1 %vm585_vm1, %v10086_v1 }
 0x2db   : > { %7639 = vmatprep.mubr.msk.f32.mxu1 %vm585_vm1, %v10107_v57 }
 0x2dc   : > { %v7860_v61 = vpop.f32.mrb[38].mxu0 }
 0x2dd   : > { %1980 = vperm.xlu1 %9047, %v7857_v2   ;;  %v1824_v43 = vpop.f32.mrb[39].mxu0 }
 0x2de   : > { %7640 = vmatmul.mubr.msk.f32.gmra.mrb[68].mxu1 %vm585_vm1, %v10107_v57 }
 0x2df   : > { %7641 = vmatprep.mubr.msk.f32.mxu1 %vm585_vm1, %v10102_v34 }
 0x2e0   : > { %v7863_v11 = vpop.f32.mrb[40].mxu0 }
 0x2e1   : > { %1975 = vperm.xlu1 %9047, %v1814_v47   ;;  %v1834_v40 = vpop.f32.mrb[41].mxu0 }
 0x2e2   : > { %7642 = vmatmul.mubr.msk.f32.gmra.mrb[70].mxu1 %vm585_vm1, %v10102_v34 }
 0x2e3   : > { %7643 = vmatprep.mubr.msk.f32.mxu1 %vm585_vm1, %v10119_v33 }
 0x2e4   : > { %v7866_v54 = vpop.f32.mrb[42].mxu0 }
 0x2e5   : > { %1990 = vperm.xlu1 %9047, %v7860_v61   ;;  %v1844_v12 = vpop.f32.mrb[43].mxu0 }
 0x2e6   : > { %2005 = vperm.xlu0 %9046, %v1844_v12   ;;  %7644 = vmatmul.mubr.msk.f32.gmra.mrb[72].mxu1 %vm585_vm1, %v10119_v33 }
 0x2e7   : > { %7645 = vmatprep.mubr.msk.f32.mxu1 %vm585_vm1, %v10114_v14 }
 0x2e8   : > { %v7869_v41 = vpop.f32.mrb[44].mxu0 }
 0x2e9   : > { %1985 = vperm.xlu1 %9047, %v1824_v43   ;;  %v1854_v13 = vpop.f32.mrb[45].mxu0 }
 0x2ea   : > { %2015 = vperm.xlu0 %9046, %v1854_v13   ;;  %7646 = vmatmul.mubr.msk.f32.gmra.mrb[74].mxu1 %vm585_vm1, %v10114_v14  ;;  %v458_v13 = vld [vmem:[%s14108_s7 + $0x48] sm:$0xff] }
 0x2eb   : > { %7647 = vmatprep.mubr.msk.f32.mxu1 %vm585_vm1, %v10129_v29 }
 0x2ec   : > { %v7872_v6 = vpop.f32.mrb[46].mxu0 }
 0x2ed   : > { %2000 = vperm.xlu1 %9047, %v7863_v11   ;;  %v1864_v38 = vpop.f32.mrb[47].mxu0 }
 0x2ee   : > { %2025 = vperm.xlu0 %9046, %v1864_v38   ;;  %7648 = vmatmul.mubr.msk.f32.gmra.mrb[76].mxu1 %vm585_vm1, %v10129_v29  ;;  %v450_v29 = vld [vmem:[%s14108_s7 + $0x8] sm:$0xff]  ;;  %v457_v38 = vld [vmem:[%s14108_s7 + $0x40] sm:$0xff] }
 0x2ef   : > { %7649 = vmatprep.mubr.msk.f32.mxu1 %vm585_vm1, %v10126_v10 }
 0x2f0   : > { %v7875_v3 = vpop.f32.mrb[48].mxu0 }
 0x2f1   : > { %1995 = vperm.xlu1 %9047, %v1834_v40   ;;  %v1874_v37 = vpop.f32.mrb[49].mxu0  ;;  %v459_v40 = vld [vmem:[%s14108_s7 + $0x50] sm:$0xff] }
 0x2f2   : > { %2035 = vperm.xlu0 %9046, %v1874_v37   ;;  %7650 = vmatmul.mubr.msk.f32.gmra.mrb[78].mxu1 %vm585_vm1, %v10126_v10 }
 0x2f3   : > { %7651 = vmatprep.mubr.msk.f32.mxu1 %vm585_vm1, %v10139_v45 }
 0x2f4   : > { %v7878_v1 = vpop.f32.mrb[50].mxu0 }
 0x2f5   : > { %2010 = vperm.xlu1 %9047, %v7866_v54   ;;  %v1884_v36 = vpop.f32.mrb[51].mxu0 }
 0x2f6   : > { %2045 = vperm.xlu0 %9046, %v1884_v36   ;;  %7652 = vmatmul.mubr.msk.f32.gmra.mrb[80].mxu1 %vm585_vm1, %v10139_v45  ;;  %v449_v45 = vld [vmem:[%s14108_s7] sm:$0xff] }
 0x2f7   : > { %7653 = vmatprep.mubr.msk.f32.mxu1 %vm585_vm1, %v10136_v7 }
 0x2f8   : > { %v7881_v62 = vpop.f32.mrb[52].mxu0 }
 0x2f9   : > { %2020 = vperm.xlu1 %9047, %v7869_v41   ;;  %v1894_v34 = vpop.f32.mrb[53].mxu0  ;;  %v460_v41 = vld [vmem:[%s14108_s7 + $0x58] sm:$0xff] }
 0x2fa   : > { %2055 = vperm.xlu0 %9046, %v1894_v34   ;;  %7654 = vmatmul.mubr.msk.f32.gmra.mrb[82].mxu1 %vm585_vm1, %v10136_v7 }
 0x2fb   : > { %7655 = vmatprep.mubr.msk.f32.mxu1 %vm585_vm1, %v10149_v51 }
 0x2fc   : > { %v7884_v15 = vpop.f32.mrb[54].mxu0 }
 0x2fd   : > { %2030 = vperm.xlu1 %9047, %v7872_v6   ;;  %v1904_v57 = vpop.f32.mrb[55].mxu0 }
 0x2fe   : > { %2065 = vperm.xlu0 %9046, %v1904_v57   ;;  %7656 = vmatmul.mubr.msk.f32.gmra.mrb[84].mxu1 %vm585_vm1, %v10149_v51 }
 0x2ff   : > { %7657 = vmatprep.mubr.msk.f32.mxu1 %vm585_vm1, %v10146_v56 }
 0x300   : > { %v7887_v17 = vpop.f32.mrb[56].mxu0 }
 0x301   : > { %2040 = vperm.xlu1 %9047, %v7875_v3   ;;  %v1914_v16 = vpop.f32.mrb[57].mxu0 }
 0x302   : > { %2075 = vperm.xlu0 %9046, %v1914_v16   ;;  %7658 = vmatmul.mubr.msk.f32.gmra.mrb[86].mxu1 %vm585_vm1, %v10146_v56 }
 0x303   : > { %7659 = vmatprep.mubr.msk.f32.mxu1 %vm585_vm1, %v10159_v53 }
 0x304   : > { %v7890_v14 = vpop.f32.mrb[58].mxu0 }
 0x305   : > { %2050 = vperm.xlu1 %9047, %v7878_v1   ;;  %v1924_v18 = vpop.f32.mrb[59].mxu0 }
 0x306   : > { %2085 = vperm.xlu0 %9046, %v1924_v18   ;;  %7660 = vmatmul.mubr.msk.f32.gmra.mrb[88].mxu1 %vm585_vm1, %v10159_v53 }
 0x307   : > { %7661 = vmatprep.mubr.msk.f32.mxu1 %vm585_vm1, %v10156_v39 }
 0x308   : > { %v7893_v33 = vpop.f32.mrb[60].mxu0 }
 0x309   : > { %2060 = vperm.xlu1 %9047, %v7881_v62   ;;  %v1934_v55 = vpop.f32.mrb[61].mxu0 }
 0x30a   : > { %2095 = vperm.xlu0 %9046, %v1934_v55   ;;  %7662 = vmatmul.mubr.msk.f32.gmra.mrb[90].mxu1 %vm585_vm1, %v10156_v39  ;;  %v10341_v39 = vld [vmem:[#allocation2 + $0x8] sm:$0xff] }
 0x30b   : > { %7663 = vmatprep.mubr.msk.f32.mxu1 %vm585_vm1, %v10169_v9  ;;  %2379 = vmatprep.mubr.f32.mxu0 %v10341_v39 }
 0x30c   : > { %v7896_v19 = vpop.f32.mrb[62].mxu0 }
 0x30d   : > { %2070 = vperm.xlu1 %9047, %v7884_v15   ;;  %v1944_v20 = vpop.f32.mrb[63].mxu0 }
 0x30e   : > { %2105 = vperm.xlu0 %9046, %v1944_v20   ;;  %7664 = vmatmul.mubr.msk.f32.gmra.mrb[92].mxu1 %vm585_vm1, %v10169_v9  ;;  %v464_v20 = vld [vmem:[%s14108_s7 + $0x78] sm:$0xff] }
 0x30f   : > { %7665 = vmatprep.mubr.msk.f32.mxu1 %vm585_vm1, %v10166_v63 }
 0x310   : > { %v7899_v21 = vpop.f32.mrb[64].mxu0 }
 0x311   : > { %2080 = vperm.xlu1 %9047, %v7887_v17   ;;  %v1954_v10 = vpop.f32.mrb[65].mxu0 }
 0x312   : > { %2115 = vperm.xlu0 %9046, %v1954_v10   ;;  %7666 = vmatmul.mubr.msk.f32.gmra.mrb[94].mxu1 %vm585_vm1, %v10166_v63  ;;  %v456_v63 = vld [vmem:[%s14108_s7 + $0x38] sm:$0xff] }
 0x315   : > { %2090 = vperm.xlu1 %9047, %v7890_v14  }
 0x319   : > { %2100 = vperm.xlu1 %9047, %v7893_v33   ;;  %v463_v33 = vld [vmem:[%s14108_s7 + $0x70] sm:$0xff] }
 0x31d   : > { %2110 = vperm.xlu1 %9047, %v7896_v19  }
 0x321   : > { %2120 = vperm.xlu1 %9047, %v7899_v21   ;;  %v462_v21 = vld [vmem:[%s14108_s7 + $0x68] sm:$0xff] }
 0x354   : > { %v1971_v24 = vpop.permute.xlu1 %1970 }
 0x355   : > { %v2125_v59 = vmul.f32 %v1971_v24, %v451_v48  ;;  %v2126_v8 = vmul.f32 %v1971_v24, %v452_v5  ;;  %v461_v24 = vld [vmem:[%s14108_s7 + $0x60] sm:$0xff] }
 0x358   : > { %v1966_v32 = vpop.permute.xlu1 %1965 }
 0x359   : > { %v2124_v7 = vmul.f32 %v1966_v32, %v450_v29  ;;  %v2123_v46 = vmul.f32 %v1966_v32, %v449_v45 }
 0x35c   : > { %v1981_v52 = vpop.permute.xlu1 %1980 }
 0x35d   : > { %v2129_v35 = vmul.f32 %v1981_v52, %v455_v58  ;;  %v2130_v31 = vmul.f32 %v1981_v52, %v456_v63 }
 0x360   : > { %v1976_v23 = vpop.permute.xlu1 %1975 }
 0x361   : > { %v2128_v22 = vmul.f32 %v1976_v23, %v454_v4  ;;  %v2127_v2 = vmul.f32 %v1976_v23, %v453_v50  ;;  %v466_v50 = vld [vmem:[%s14108_s7 + $0x88] sm:$0xff] }
 0x364   : > { %v1991_v9 = vpop.permute.xlu1 %1990 }
 0x365   : > { %v2133_v1 = vmul.f32 %v1991_v9, %v459_v40  ;;  %v2134_v34 = vmul.f32 %v1991_v9, %v460_v41  ;;  %v471_v40 = vld [vmem:[%s14108_s7 + $0xb0] sm:$0xff] }
 0x368   : > { %v1986_v61 = vpop.permute.xlu1 %1985 }
 0x369   : > { %v1537_v0 = vpop.f32.mrb[32].mxu1  ;;  %v2132_v15 = vmul.f32 %v1986_v61, %v458_v13  ;;  %v2131_v57 = vmul.f32 %v1986_v61, %v457_v38  ;;  %v472_v38 = vld [vmem:[%s14108_s7 + $0xb8] sm:$0xff] }
 0x36a   : > { %v1539_v56 = vpop.f32.mrb[33].mxu1  ;;  %v10357_v26 = vmul.f32 %v2123_v46, %v1537_v0 }
 0x36b   : > { %v2188_v51 = vmul.f32 %v2124_v7, %v1539_v56 }
 0x36c   : > { %14694 = vst [vmem:[#allocation40_spill] sm:$0xff] %v10357_v26  ;;  %v2001_v17 = vpop.permute.xlu1 %2000 }
 0x36d   : > { %v1543_v49 = vpop.f32.mrb[34].mxu1  ;;  %2764 = vmatprep.mubr.f32.mxu1 %v2188_v51  ;;  %v2137_v52 = vmul.f32 %v2001_v17, %v463_v33  ;;  %v2138_v45 = vmul.f32 %v2001_v17, %v464_v20 }
 0x36e   : > { %v10344_v53 = vmul.f32 %v2125_v59, %v1543_v49  ;;  %v1545_v44 = vpop.f32.mrb[35].mxu1 }
 0x36f   : > { %v10349_v42 = vmul.f32 %v2126_v8, %v1545_v44  ;;  %v468_v44 = vld [vmem:[%s14108_s7 + $0x98] sm:$0xff] }
 0x370   : > { %14692 = vst [vmem:[#allocation38_spill] sm:$0xff] %v10344_v53  ;;  %v8014_v25 = vpack.c.bf16 %v10344_v53, %v10357_v26  ;;  %v1996_v48 = vpop.permute.xlu1 %1995  ;;  %v10907_v53 = vld [vmem:[#allocation2 + $0x1d8] sm:$0xff] }
 0x371   : > { %14693 = vst [vmem:[#allocation39_spill] sm:$0xff] %v10349_v42  ;;  %v1549_v30 = vpop.f32.mrb[36].mxu1  ;;  %v8012_v27 = vpack.c.bf16 %v10349_v42, %v2188_v51  ;;  %v2136_v0 = vmul.f32 %v1996_v48, %v462_v21  ;;  %v2135_v59 = vmul.f32 %v1996_v48, %v461_v24  ;;  %v467_v51 = vld [vmem:[%s14108_s7 + $0x90] sm:$0xff]  ;;  %14761 = vst [vmem:[#allocation108_spill] sm:$0xff] %v10907_v53 }
 0x372   : > { %v1551_v60 = vpop.f32.mrb[37].mxu1  ;;  %v10380_v6 = vmul.f32 %v2127_v2, %v1549_v30  ;;  %v2006_v30 = vpop.permute.xlu0 %2005  ;;  %v10914_v42 = vld [vmem:[#allocation2 + $0x1d0] sm:$0xff] }
 0x373   : > { %8013 = vmatprep.subr.bf16.mxu0 %v8012_v27  ;;  %v10370_v54 = vmul.f32 %v2128_v22, %v1551_v60  ;;  %v465_v60 = vld [vmem:[%s14108_s7 + $0x80] sm:$0xff]  ;;  %v2140_v22 = vmul.f32 %v2006_v30, %v466_v50  ;;  %14763 = vst [vmem:[#allocation110_spill] sm:$0xff] %v10914_v42 }
 0x374   : > { %8015 = vmatpush1.bf16.msra.mxu0 %v8014_v25  ;;  %14698 = vst [vmem:[#allocation45_spill] sm:$0xff] %v10380_v6  ;;  %v2011_v63 = vpop.permute.xlu1 %2010 }
 0x375   : > { %v1555_v47 = vpop.f32.mrb[38].mxu1  ;;  %14696 = vst [vmem:[#allocation43_spill] sm:$0xff] %v10370_v54  ;;  %v2141_v27 = vmul.f32 %v2011_v63, %v467_v51 }
 0x376   : > { %v10365_v43 = vmul.f32 %v2129_v35, %v1555_v47  ;;  %v1557_v11 = vpop.f32.mrb[39].mxu1  ;;  %v2139_v47 = vmul.f32 %v2006_v30, %v465_v60 }
 0x377   : > { %v10372_v12 = vmul.f32 %v2130_v31, %v1557_v11  ;;  %v2142_v31 = vmul.f32 %v2011_v63, %v468_v44  ;;  %v473_v44 = vld [vmem:[%s14108_s7 + $0xc0] sm:$0xff] }
 0x378   : > { %14695 = vst [vmem:[#allocation42_spill] sm:$0xff] %v10365_v43  ;;  %v8018_v36 = vpack.c.bf16 %v10365_v43, %v10380_v6  ;;  %v10893_v43 = vld [vmem:[#allocation2 + $0x1b8] sm:$0xff] }
 0x379   : > { %14697 = vst [vmem:[#allocation44_spill] sm:$0xff] %v10372_v12  ;;  %v1561_v3 = vpop.f32.mrb[40].mxu1  ;;  %v8016_v37 = vpack.c.bf16 %v10372_v12, %v10370_v54  ;;  %14757 = vst [vmem:[#allocation104_spill] sm:$0xff] %v10893_v43  ;;  %v10900_v12 = vld [vmem:[#allocation2 + $0x1b0] sm:$0xff]  ;;  %v10905_v54 = vld [vmem:[#allocation2 + $0x1c8] sm:$0xff] }
 0x37a   : > { %v1563_v62 = vpop.f32.mrb[41].mxu1  ;;  %v10404_v10 = vmul.f32 %v2131_v57, %v1561_v3  ;;  %14759 = vst [vmem:[#allocation106_spill] sm:$0xff] %v10900_v12  ;;  %14760 = vst [vmem:[#allocation107_spill] sm:$0xff] %v10905_v54 }
 0x37b   : > { %8017 = vmatprep.subr.bf16.mxu0 %v8016_v37  ;;  %v10394_v55 = vmul.f32 %v2132_v15, %v1563_v62  ;;  %v2021_v37 = vpop.permute.xlu1 %2020  ;;  %v470_v62 = vld [vmem:[%s14108_s7 + $0xa8] sm:$0xff] }
 0x37c   : > { %8019 = vmatpush1.bf16.msra.mxu0 %v8018_v36  ;;  %14702 = vst [vmem:[#allocation49_spill] sm:$0xff] %v10404_v10  ;;  %v2145_v15 = vmul.f32 %v2021_v37, %v471_v40  ;;  %v478_v40 = vld [vmem:[%s14108_s7 + $0xe8] sm:$0xff] }
 0x37d   : > { %v1567_v16 = vpop.f32.mrb[42].mxu1  ;;  %14700 = vst [vmem:[#allocation47_spill] sm:$0xff] %v10394_v55 }
 0x37e   : > { %v10389_v14 = vmul.f32 %v2133_v1, %v1567_v16  ;;  %v1569_v18 = vpop.f32.mrb[43].mxu1  ;;  %v469_v16 = vld [vmem:[%s14108_s7 + $0xa0] sm:$0xff] }
 0x37f   : > { %v10396_v19 = vmul.f32 %v2134_v34, %v1569_v18  ;;  %v2016_v34 = vpop.permute.xlu0 %2015  ;;  %v2146_v18 = vmul.f32 %v2021_v37, %v472_v38  ;;  %v2031_v63 = vpop.permute.xlu1 %2030  ;;  %v480_v37 = vld [vmem:[%s14108_s7 + $0xf8] sm:$0xff] }
 0x380   : > { %14699 = vst [vmem:[#allocation46_spill] sm:$0xff] %v10389_v14  ;;  %v8022_v7 = vpack.c.bf16 %v10389_v14, %v10404_v10  ;;  %v2144_v33 = vmul.f32 %v2016_v34, %v470_v62  ;;  %v2143_v21 = vmul.f32 %v2016_v34, %v469_v16  ;;  %v477_v62 = vld [vmem:[%s14108_s7 + $0xe0] sm:$0xff]  ;;  %v10879_v14 = vld [vmem:[#allocation2 + $0x198] sm:$0xff] }
 0x381   : > { %14701 = vst [vmem:[#allocation48_spill] sm:$0xff] %v10396_v19  ;;  %v1573_v32 = vpop.f32.mrb[44].mxu1  ;;  %v8020_v29 = vpack.c.bf16 %v10396_v19, %v10394_v55  ;;  %v10886_v19 = vld [vmem:[#allocation2 + $0x190] sm:$0xff]  ;;  %v10891_v55 = vld [vmem:[#allocation2 + $0x1a8] sm:$0xff] }
 0x382   : > { %v1575_v5 = vpop.f32.mrb[45].mxu1  ;;  %v10425_v58 = vmul.f32 %v2135_v59, %v1573_v32  ;;  %14756 = vst [vmem:[#allocation103_spill] sm:$0xff] %v10891_v55 }
 0x383   : > { %8021 = vmatprep.subr.bf16.mxu0 %v8020_v29  ;;  %v10418_v46 = vmul.f32 %v2136_v0, %v1575_v5  ;;  %v474_v0 = vld [vmem:[%s14108_s7 + $0xc8] sm:$0xff]  ;;  %v2026_v59 = vpop.permute.xlu0 %2025  ;;  %v2041_v34 = vpop.permute.xlu1 %2040 }
 0x384   : > { %8023 = vmatpush1.bf16.msra.mxu0 %v8022_v7  ;;  %14706 = vst [vmem:[#allocation53_spill] sm:$0xff] %v10425_v58  ;;  %v475_v7 = vld [vmem:[%s14108_s7 + $0xd0] sm:$0xff] }
 0x385   : > { %v1579_v23 = vpop.f32.mrb[46].mxu1  ;;  %14704 = vst [vmem:[#allocation51_spill] sm:$0xff] %v10418_v46 }
 0x386   : > { %v10413_v56 = vmul.f32 %v2137_v52, %v1579_v23  ;;  %v1581_v8 = vpop.f32.mrb[47].mxu1  ;;  %v476_v23 = vld [vmem:[%s14108_s7 + $0xd8] sm:$0xff] }
 0x387   : > { %v10420_v49 = vmul.f32 %v2138_v45, %v1581_v8  ;;  %v2150_v50 = vmul.f32 %v2031_v63, %v476_v23  ;;  %v2036_v38 = vpop.permute.xlu0 %2035 }
 0x388   : > { %14703 = vst [vmem:[#allocation50_spill] sm:$0xff] %v10413_v56  ;;  %v8026_v35 = vpack.c.bf16 %v10413_v56, %v10425_v58  ;;  %v10865_v56 = vld [vmem:[#allocation2 + $0x178] sm:$0xff] }
 0x389   : > { %14705 = vst [vmem:[#allocation52_spill] sm:$0xff] %v10420_v49  ;;  %v1585_v4 = vpop.f32.mrb[48].mxu1  ;;  %v8024_v9 = vpack.c.bf16 %v10420_v49, %v10418_v46  ;;  %v10872_v49 = vld [vmem:[#allocation2 + $0x170] sm:$0xff]  ;;  %v10877_v46 = vld [vmem:[#allocation2 + $0x188] sm:$0xff] }
 0x38a   : > { %v1587_v25 = vpop.f32.mrb[49].mxu1  ;;  %v10449_v3 = vmul.f32 %v2139_v47, %v1585_v4  ;;  %v2149_v4 = vmul.f32 %v2031_v63, %v475_v7  ;;  %v481_v63 = vld [vmem:[%s14108_s7 + $0x100] sm:$0xff] }
 0x38b   : > { %8025 = vmatprep.subr.bf16.mxu0 %v8024_v9  ;;  %v10442_v41 = vmul.f32 %v2140_v22, %v1587_v25  ;;  %v2148_v9 = vmul.f32 %v2026_v59, %v474_v0  ;;  %v2046_v23 = vpop.permute.xlu0 %2045 }
 0x38c   : > { %8027 = vmatpush1.bf16.msra.mxu0 %v8026_v35  ;;  %14710 = vst [vmem:[#allocation57_spill] sm:$0xff] %v10449_v3 }
 0x38d   : > { %v1591_v2 = vpop.f32.mrb[50].mxu1  ;;  %14708 = vst [vmem:[#allocation55_spill] sm:$0xff] %v10442_v41 }
 0x38e   : > { %v10437_v61 = vmul.f32 %v2141_v27, %v1591_v2  ;;  %v1593_v11 = vpop.f32.mrb[51].mxu1  ;;  %v2147_v27 = vmul.f32 %v2026_v59, %v473_v44  ;;  %v479_v2 = vld [vmem:[%s14108_s7 + $0xf0] sm:$0xff]  ;;  %v482_v59 = vld [vmem:[%s14108_s7 + $0x108] sm:$0xff] }
 0x38f   : > { %v10444_v13 = vmul.f32 %v2142_v31, %v1593_v11 }
 0x390   : > { %14707 = vst [vmem:[#allocation54_spill] sm:$0xff] %v10437_v61  ;;  %v8030_v57 = vpack.c.bf16 %v10437_v61, %v10449_v3  ;;  %v10851_v61 = vld [vmem:[#allocation2 + $0x158] sm:$0xff] }
 0x391   : > { %14709 = vst [vmem:[#allocation56_spill] sm:$0xff] %v10444_v13  ;;  %v1597_v1 = vpop.f32.mrb[52].mxu1  ;;  %v8028_v36 = vpack.c.bf16 %v10444_v13, %v10442_v41  ;;  %v10858_v13 = vld [vmem:[#allocation2 + $0x150] sm:$0xff]  ;;  %v10863_v41 = vld [vmem:[#allocation2 + $0x168] sm:$0xff] }
 0x392   : > { %v1599_v17 = vpop.f32.mrb[53].mxu1  ;;  %v10467_v48 = vmul.f32 %v2143_v21, %v1597_v1 }
 0x393   : > { %8029 = vmatprep.subr.bf16.mxu0 %v8028_v36  ;;  %v10463_v29 = vmul.f32 %v2144_v33, %v1599_v17  ;;  %v2154_v17 = vmul.f32 %v2041_v34, %v480_v37  ;;  %v487_v37 = vld [vmem:[%s14108_s7 + $0x130] sm:$0xff] }
 0x394   : > { %8031 = vmatpush1.bf16.msra.mxu0 %v8030_v57  ;;  %14714 = vst [vmem:[#allocation61_spill] sm:$0xff] %v10467_v48  ;;  %v2152_v57 = vmul.f32 %v2036_v38, %v478_v40 }
 0x395   : > { %v1603_v20 = vpop.f32.mrb[54].mxu1  ;;  %14712 = vst [vmem:[#allocation59_spill] sm:$0xff] %v10463_v29 }
 0x396   : > { %v10461_v24 = vmul.f32 %v2145_v15, %v1603_v20  ;;  %v1605_v32 = vpop.f32.mrb[55].mxu1  ;;  %v2153_v15 = vmul.f32 %v2041_v34, %v479_v2  ;;  %v2056_v34 = vpop.permute.xlu0 %2055 }
 0x397   : > { %v10465_v52 = vmul.f32 %v2146_v18, %v1605_v32  ;;  %v2151_v18 = vmul.f32 %v2036_v38, %v477_v62  ;;  %v486_v62 = vld [vmem:[%s14108_s7 + $0x128] sm:$0xff] }
 0x398   : > { %14711 = vst [vmem:[#allocation58_spill] sm:$0xff] %v10461_v24  ;;  %v8034_v8 = vpack.c.bf16 %v10461_v24, %v10467_v48  ;;  %v10837_v24 = vld [vmem:[#allocation2 + $0x138] sm:$0xff] }
 0x399   : > { %14713 = vst [vmem:[#allocation60_spill] sm:$0xff] %v10465_v52  ;;  %v1609_v5 = vpop.f32.mrb[56].mxu1  ;;  %v8032_v45 = vpack.c.bf16 %v10465_v52, %v10463_v29  ;;  %v10844_v52 = vld [vmem:[#allocation2 + $0x130] sm:$0xff]  ;;  %v10849_v29 = vld [vmem:[#allocation2 + $0x148] sm:$0xff] }
 0x39a   : > { %v1611_v51 = vpop.f32.mrb[57].mxu1  ;;  %v10491_v22 = vmul.f32 %v2147_v27, %v1609_v5  ;;  %v483_v5 = vld [vmem:[%s14108_s7 + $0x110] sm:$0xff]  ;;  %14755 = vst [vmem:[#allocation102_spill] sm:$0xff] %v10849_v29 }
 0x39b   : > { %8033 = vmatprep.subr.bf16.mxu0 %v8032_v45  ;;  %v10487_v60 = vmul.f32 %v2148_v9, %v1611_v51 }
 0x39c   : > { %8035 = vmatpush1.bf16.msra.mxu0 %v8034_v8  ;;  %14718 = vst [vmem:[#allocation65_spill] sm:$0xff] %v10491_v22  ;;  %v484_v8 = vld [vmem:[%s14108_s7 + $0x118] sm:$0xff] }
 0x39d   : > { %v1615_v30 = vpop.f32.mrb[58].mxu1  ;;  %14716 = vst [vmem:[#allocation63_spill] sm:$0xff] %v10487_v60 }
 0x39e   : > { %v10485_v35 = vmul.f32 %v2149_v4, %v1615_v30  ;;  %v1617_v25 = vpop.f32.mrb[59].mxu1  ;;  %v2051_v4 = vpop.permute.xlu1 %2050 }
 0x39f   : > { %v10489_v31 = vmul.f32 %v2150_v50, %v1617_v25  ;;  %v2157_v9 = vmul.f32 %v2051_v4, %v483_v5  ;;  %v2156_v50 = vmul.f32 %v2046_v23, %v482_v59  ;;  %v2158_v30 = vmul.f32 %v2051_v4, %v484_v8  ;;  %v491_v4 = vld [vmem:[%s14108_s7 + $0x150] sm:$0xff] }
 0x3a0   : > { %14715 = vst [vmem:[#allocation62_spill] sm:$0xff] %v10485_v35  ;;  %v8038_v1 = vpack.c.bf16 %v10485_v35, %v10491_v22  ;;  %v2155_v25 = vmul.f32 %v2046_v23, %v481_v63  ;;  %v2160_v5 = vmul.f32 %v2056_v34, %v486_v62  ;;  %v10823_v35 = vld [vmem:[#allocation2 + $0x118] sm:$0xff] }
 0x3a1   : > { %14717 = vst [vmem:[#allocation64_spill] sm:$0xff] %v10489_v31  ;;  %v1621_v47 = vpop.f32.mrb[60].mxu1  ;;  %v8036_v11 = vpack.c.bf16 %v10489_v31, %v10487_v60  ;;  %v10830_v31 = vld [vmem:[#allocation2 + $0x110] sm:$0xff]  ;;  %v10835_v60 = vld [vmem:[#allocation2 + $0x128] sm:$0xff] }
 0x3a2   : > { %v1623_v36 = vpop.f32.mrb[61].mxu1  ;;  %v10515_v7 = vmul.f32 %v2151_v18, %v1621_v47  ;;  %v2061_v18 = vpop.permute.xlu1 %2060 }
 0x3a3   : > { %8037 = vmatprep.subr.bf16.mxu0 %v8036_v11  ;;  %v10511_v21 = vmul.f32 %v2152_v57, %v1623_v36 }
 0x3a4   : > { %8039 = vmatpush1.bf16.msra.mxu0 %v8038_v1  ;;  %14722 = vst [vmem:[#allocation69_spill] sm:$0xff] %v10515_v7 }
 0x3a5   : > { %v1627_v16 = vpop.f32.mrb[62].mxu1  ;;  %14720 = vst [vmem:[#allocation67_spill] sm:$0xff] %v10511_v21 }
 0x3a6   : > { %v10509_v33 = vmul.f32 %v2153_v15, %v1627_v16  ;;  %v1629_v20 = vpop.f32.mrb[63].mxu1  ;;  %v488_v15 = vld [vmem:[%s14108_s7 + $0x138] sm:$0xff]  ;;  %v485_v16 = vld [vmem:[%s14108_s7 + $0x120] sm:$0xff] }
 0x3a7   : > { %v10513_v32 = vmul.f32 %v2154_v17, %v1629_v20  ;;  %v2161_v20 = vmul.f32 %v2061_v18, %v487_v37  ;;  %v2159_v59 = vmul.f32 %v2056_v34, %v485_v16 }
 0x3a8   : > { %14719 = vst [vmem:[#allocation66_spill] sm:$0xff] %v10509_v33  ;;  %v8042_v51 = vpack.c.bf16 %v10509_v33, %v10515_v7  ;;  %v10809_v33 = vld [vmem:[#allocation2 + $0xf8] sm:$0xff] }
 0x3a9   : > { %14721 = vst [vmem:[#allocation68_spill] sm:$0xff] %v10513_v32  ;;  %v1633_v45 = vpop.f32.mrb[64].mxu1  ;;  %v8040_v0 = vpack.c.bf16 %v10513_v32, %v10511_v21  ;;  %v10816_v32 = vld [vmem:[#allocation2 + $0xf0] sm:$0xff]  ;;  %v10821_v21 = vld [vmem:[#allocation2 + $0x108] sm:$0xff] }
 0x3aa   : > { %v1635_v44 = vpop.f32.mrb[65].mxu1  ;;  %v10539_v38 = vmul.f32 %v2155_v25, %v1633_v45  ;;  %v2162_v45 = vmul.f32 %v2061_v18, %v488_v15  ;;  %v492_v25 = vld [vmem:[%s14108_s7 + $0x158] sm:$0xff] }
 0x3ab   : > { %8041 = vmatprep.subr.bf16.mxu0 %v8040_v0  ;;  %v10535_v11 = vmul.f32 %v2156_v50, %v1635_v44 }
 0x3ac   : > { %8043 = vmatpush1.bf16.msra.mxu0 %v8042_v51  ;;  %14726 = vst [vmem:[#allocation73_spill] sm:$0xff] %v10539_v38 }
 0x3ad   : > { %v1639_v27 = vpop.f32.mrb[66].mxu1  ;;  %14724 = vst [vmem:[#allocation71_spill] sm:$0xff] %v10535_v11 }
 0x3ae   : > { %v10533_v2 = vmul.f32 %v2157_v9, %v1639_v27  ;;  %v1641_v47 = vpop.f32.mrb[67].mxu1  ;;  %v2066_v27 = vpop.permute.xlu0 %2065 }
 0x3af   : > { %v10537_v40 = vmul.f32 %v2158_v30, %v1641_v47  ;;  %v490_v30 = vld [vmem:[%s14108_s7 + $0x148] sm:$0xff] }
 0x3b0   : > { %14723 = vst [vmem:[#allocation70_spill] sm:$0xff] %v10533_v2  ;;  %v8046_v57 = vpack.c.bf16 %v10533_v2, %v10539_v38  ;;  %v2164_v34 = vmul.f32 %v2066_v27, %v490_v30  ;;  %v496_v30 = vld [vmem:[%s14108_s7 + $0x178] sm:$0xff] }
 0x3b1   : > { %14725 = vst [vmem:[#allocation72_spill] sm:$0xff] %v10537_v40  ;;  %v1645_v1 = vpop.f32.mrb[68].mxu1  ;;  %v8044_v36 = vpack.c.bf16 %v10537_v40, %v10535_v11  ;;  %v10795_v2 = vld [vmem:[#allocation2 + $0xd8] sm:$0xff]  ;;  %v10802_v40 = vld [vmem:[#allocation2 + $0xd0] sm:$0xff]  ;;  %v10807_v11 = vld [vmem:[#allocation2 + $0xe8] sm:$0xff] }
 0x3b2   : > { %v1647_v17 = vpop.f32.mrb[69].mxu1  ;;  %v10563_v63 = vmul.f32 %v2159_v59, %v1645_v1  ;;  %v489_v1 = vld [vmem:[%s14108_s7 + $0x140] sm:$0xff] }
 0x3b3   : > { %8045 = vmatprep.subr.bf16.mxu0 %v8044_v36  ;;  %v10559_v51 = vmul.f32 %v2160_v5, %v1647_v17  ;;  %v2071_v36 = vpop.permute.xlu1 %2070  ;;  %v2163_v17 = vmul.f32 %v2066_v27, %v489_v1 }
 0x3b4   : > { %8047 = vmatpush1.bf16.msra.mxu0 %v8046_v57  ;;  %14730 = vst [vmem:[#allocation77_spill] sm:$0xff] %v10563_v63  ;;  %v2165_v62 = vmul.f32 %v2071_v36, %v491_v4  ;;  %v2166_v15 = vmul.f32 %v2071_v36, %v492_v25  ;;  %v494_v4 = vld [vmem:[%s14108_s7 + $0x168] sm:$0xff]  ;;  %v493_v25 = vld [vmem:[%s14108_s7 + $0x160] sm:$0xff] }
 0x3b5   : > { %v1651_v0 = vpop.f32.mrb[70].mxu1  ;;  %14728 = vst [vmem:[#allocation75_spill] sm:$0xff] %v10559_v51 }
 0x3b6   : > { %v10557_v23 = vmul.f32 %v2161_v20, %v1651_v0  ;;  %v1653_v8 = vpop.f32.mrb[71].mxu1  ;;  %v495_v0 = vld [vmem:[%s14108_s7 + $0x170] sm:$0xff] }
 0x3b7   : > { %v10561_v44 = vmul.f32 %v2162_v45, %v1653_v8 }
 0x3b8   : > { %14727 = vst [vmem:[#allocation74_spill] sm:$0xff] %v10557_v23  ;;  %v8050_v47 = vpack.c.bf16 %v10557_v23, %v10563_v63  ;;  %v10781_v23 = vld [vmem:[#allocation2 + $0xb8] sm:$0xff] }
 0x3b9   : > { %14729 = vst [vmem:[#allocation76_spill] sm:$0xff] %v10561_v44  ;;  %v1657_v9 = vpop.f32.mrb[72].mxu1  ;;  %v8048_v50 = vpack.c.bf16 %v10561_v44, %v10559_v51  ;;  %v10788_v44 = vld [vmem:[#allocation2 + $0xb0] sm:$0xff]  ;;  %v10793_v51 = vld [vmem:[#allocation2 + $0xc8] sm:$0xff] }
 0x3ba   : > { %v1659_v37 = vpop.f32.mrb[73].mxu1  ;;  %v10587_v45 = vmul.f32 %v2163_v17, %v1657_v9 }
 0x3bb   : > { %8049 = vmatprep.subr.bf16.mxu0 %v8048_v50  ;;  %v10583_v20 = vmul.f32 %v2164_v34, %v1659_v37  ;;  %v2076_v50 = vpop.permute.xlu0 %2075 }
 0x3bc   : > { %8051 = vmatpush1.bf16.msra.mxu0 %v8050_v47  ;;  %14734 = vst [vmem:[#allocation81_spill] sm:$0xff] %v10587_v45  ;;  %v2081_v47 = vpop.permute.xlu1 %2080  ;;  %v2168_v1 = vmul.f32 %v2076_v50, %v494_v4  ;;  %v2167_v34 = vmul.f32 %v2076_v50, %v493_v25  ;;  %v498_v4 = vld [vmem:[%s14108_s7 + $0x188] sm:$0xff] }
 0x3bd   : > { %v1663_v57 = vpop.f32.mrb[74].mxu1  ;;  %14732 = vst [vmem:[#allocation79_spill] sm:$0xff] %v10583_v20  ;;  %v2169_v37 = vmul.f32 %v2081_v47, %v495_v0  ;;  %v2170_v36 = vmul.f32 %v2081_v47, %v496_v30  ;;  %v500_v30 = vld [vmem:[%s14108_s7 + $0x198] sm:$0xff] }
 0x3be   : > { %v10581_v16 = vmul.f32 %v2165_v62, %v1663_v57  ;;  %v1665_v18 = vpop.f32.mrb[75].mxu1 }
 0x3bf   : > { %v10585_v5 = vmul.f32 %v2166_v15, %v1665_v18  ;;  %v2086_v50 = vpop.permute.xlu0 %2085 }
 0x3c0   : > { %14731 = vst [vmem:[#allocation78_spill] sm:$0xff] %v10581_v16  ;;  %v8054_v9 = vpack.c.bf16 %v10581_v16, %v10587_v45  ;;  %v499_v16 = vld [vmem:[%s14108_s7 + $0x190] sm:$0xff]  ;;  %v2091_v25 = vpop.permute.xlu1 %2090 }
 0x3c1   : > { %14733 = vst [vmem:[#allocation80_spill] sm:$0xff] %v10585_v5  ;;  %v1669_v59 = vpop.f32.mrb[76].mxu1  ;;  %v8052_v8 = vpack.c.bf16 %v10585_v5, %v10583_v20  ;;  %v2173_v47 = vmul.f32 %v2091_v25, %v499_v16  ;;  %v10774_v5 = vld [vmem:[#allocation2 + $0x90] sm:$0xff]  ;;  %v10779_v20 = vld [vmem:[#allocation2 + $0xa8] sm:$0xff] }
 0x3c2   : > { %v1671_v27 = vpop.f32.mrb[77].mxu1  ;;  %v10611_v28 = vmul.f32 %v2167_v34, %v1669_v59 }
 0x3c3   : > { %8053 = vmatprep.subr.bf16.mxu0 %v8052_v8  ;;  %v10607_v17 = vmul.f32 %v2168_v1, %v1671_v27  ;;  %v497_v27 = vld [vmem:[%s14108_s7 + $0x180] sm:$0xff]  ;;  %v2174_v1 = vmul.f32 %v2091_v25, %v500_v30  ;;  %v2096_v30 = vpop.permute.xlu0 %2095 }
 0x3c4   : > { %8055 = vmatpush1.bf16.msra.mxu0 %v8054_v9  ;;  %14738 = vst [vmem:[#allocation85_spill] sm:$0xff] %v10611_v28 }
 0x3c5   : > { %v1675_v62 = vpop.f32.mrb[78].mxu1  ;;  %14736 = vst [vmem:[#allocation83_spill] sm:$0xff] %v10607_v17 }
 0x3c6   : > { %v10605_v15 = vmul.f32 %v2169_v37, %v1675_v62  ;;  %v1677_v57 = vpop.f32.mrb[79].mxu1  ;;  %v2172_v37 = vmul.f32 %v2086_v50, %v498_v4  ;;  %v2171_v62 = vmul.f32 %v2086_v50, %v497_v27  ;;  %v502_v50 = vld [vmem:[%s14108_s7 + $0x1a8] sm:$0xff]  ;;  %v501_v27 = vld [vmem:[%s14108_s7 + $0x1a0] sm:$0xff] }
 0x3c7   : > { %v10609_v18 = vmul.f32 %v2170_v36, %v1677_v57 }
 0x3c8   : > { %14735 = vst [vmem:[#allocation82_spill] sm:$0xff] %v10605_v15  ;;  %v8058_v59 = vpack.c.bf16 %v10605_v15, %v10611_v28  ;;  %v503_v28 = vld [vmem:[%s14108_s7 + $0x1b0] sm:$0xff] }
 0x3c9   : > { %14737 = vst [vmem:[#allocation84_spill] sm:$0xff] %v10609_v18  ;;  %v1681_v8 = vpop.f32.mrb[80].mxu1  ;;  %v8056_v0 = vpack.c.bf16 %v10609_v18, %v10607_v17 }
 0x3ca   : > { %v1683_v9 = vpop.f32.mrb[81].mxu1  ;;  %v10635_v15 = vmul.f32 %v2171_v62, %v1681_v8 }
 0x3cb   : > { %8057 = vmatprep.subr.bf16.mxu0 %v8056_v0  ;;  %v10631_v18 = vmul.f32 %v2172_v37, %v1683_v9  ;;  %v2101_v0 = vpop.permute.xlu1 %2100 }
 0x3cc   : > { %8059 = vmatpush1.bf16.msra.mxu0 %v8058_v59  ;;  %14742 = vst [vmem:[#allocation89_spill] sm:$0xff] %v10635_v15  ;;  %v504_v59 = vld [vmem:[%s14108_s7 + $0x1b8] sm:$0xff]  ;;  %v2177_v25 = vmul.f32 %v2101_v0, %v503_v28 }
 0x3cd   : > { %v1687_v36 = vpop.f32.mrb[82].mxu1  ;;  %14740 = vst [vmem:[#allocation87_spill] sm:$0xff] %v10631_v18  ;;  %v2178_v37 = vmul.f32 %v2101_v0, %v504_v59  ;;  %v508_v59 = vld [vmem:[%s14108_s7 + $0x1d8] sm:$0xff] }
 0x3ce   : > { %v10629_v34 = vmul.f32 %v2173_v47, %v1687_v36  ;;  %v1689_v57 = vpop.f32.mrb[83].mxu1  ;;  %v2176_v47 = vmul.f32 %v2096_v30, %v502_v50  ;;  %v2175_v36 = vmul.f32 %v2096_v30, %v501_v27  ;;  %v506_v50 = vld [vmem:[%s14108_s7 + $0x1c8] sm:$0xff]  ;;  %v2106_v30 = vpop.permute.xlu0 %2105 }
 0x3cf   : > { %v10633_v17 = vmul.f32 %v2174_v1, %v1689_v57 }
 0x3d0   : > { %14739 = vst [vmem:[#allocation86_spill] sm:$0xff] %v10629_v34  ;;  %v8062_v8 = vpack.c.bf16 %v10629_v34, %v10635_v15  ;;  %v507_v15 = vld [vmem:[%s14108_s7 + $0x1d0] sm:$0xff] }
 0x3d1   : > { %14741 = vst [vmem:[#allocation88_spill] sm:$0xff] %v10633_v17  ;;  %v1693_v16 = vpop.f32.mrb[84].mxu1  ;;  %v8060_v4 = vpack.c.bf16 %v10633_v17, %v10631_v18 }
 0x3d2   : > { %v1695_v9 = vpop.f32.mrb[85].mxu1  ;;  %v10659_v34 = vmul.f32 %v2175_v36, %v1693_v16 }
 0x3d3   : > { %8061 = vmatprep.subr.bf16.mxu0 %v8060_v4  ;;  %v10655_v17 = vmul.f32 %v2176_v47, %v1695_v9  ;;  %v2111_v4 = vpop.permute.xlu1 %2110  ;;  %v505_v9 = vld [vmem:[%s14108_s7 + $0x1c0] sm:$0xff] }
 0x3d4   : > { %8063 = vmatpush1.bf16.msra.mxu0 %v8062_v8  ;;  %14746 = vst [vmem:[#allocation93_spill] sm:$0xff] %v10659_v34  ;;  %v2181_v27 = vmul.f32 %v2111_v4, %v507_v15  ;;  %v2182_v47 = vmul.f32 %v2111_v4, %v508_v59  ;;  %v512_v59 = vld [vmem:[%s14108_s7 + $0x1f8] sm:$0xff] }
 0x3d5   : > { %v1699_v1 = vpop.f32.mrb[86].mxu1  ;;  %14744 = vst [vmem:[#allocation91_spill] sm:$0xff] %v10655_v17 }
 0x3d6   : > { %v10653_v62 = vmul.f32 %v2177_v25, %v1699_v1  ;;  %v1701_v57 = vpop.f32.mrb[87].mxu1  ;;  %v2180_v25 = vmul.f32 %v2106_v30, %v506_v50  ;;  %v2179_v1 = vmul.f32 %v2106_v30, %v505_v9  ;;  %v510_v50 = vld [vmem:[%s14108_s7 + $0x1e8] sm:$0xff]  ;;  %v2116_v30 = vpop.permute.xlu0 %2115 }
 0x3d7   : > { %v10657_v18 = vmul.f32 %v2178_v37, %v1701_v57 }
 0x3d8   : > { %14743 = vst [vmem:[#allocation90_spill] sm:$0xff] %v10653_v62  ;;  %v8066_v16 = vpack.c.bf16 %v10653_v62, %v10659_v34  ;;  %v511_v34 = vld [vmem:[%s14108_s7 + $0x1f0] sm:$0xff] }
 0x3d9   : > { %14745 = vst [vmem:[#allocation92_spill] sm:$0xff] %v10657_v18  ;;  %v1705_v28 = vpop.f32.mrb[88].mxu1  ;;  %v8064_v0 = vpack.c.bf16 %v10657_v18, %v10655_v17 }
 0x3da   : > { %v1707_v8 = vpop.f32.mrb[89].mxu1  ;;  %v10683_v62 = vmul.f32 %v2179_v1, %v1705_v28 }
 0x3db   : > { %8065 = vmatprep.subr.bf16.mxu0 %v8064_v0  ;;  %v10679_v18 = vmul.f32 %v2180_v25, %v1707_v8  ;;  %v2121_v0 = vpop.permute.xlu1 %2120  ;;  %v509_v8 = vld [vmem:[%s14108_s7 + $0x1e0] sm:$0xff] }
 0x3dc   : > { %8067 = vmatpush1.bf16.msra.mxu0 %v8066_v16  ;;  %14750 = vst [vmem:[#allocation97_spill] sm:$0xff] %v10683_v62  ;;  %v2185_v9 = vmul.f32 %v2121_v0, %v511_v34  ;;  %v2186_v25 = vmul.f32 %v2121_v0, %v512_v59  ;;  %v10715_v0 = vld [vmem:[#allocation2] sm:$0xff]  ;;  %v10723_v59 = vld [vmem:[#allocation2 + $0x28] sm:$0xff] }
 0x3dd   : > { %v1711_v37 = vpop.f32.mrb[90].mxu1  ;;  %14748 = vst [vmem:[#allocation95_spill] sm:$0xff] %v10679_v18 }
 0x3de   : > { %v10677_v36 = vmul.f32 %v2181_v27, %v1711_v37  ;;  %v1713_v57 = vpop.f32.mrb[91].mxu1  ;;  %v2184_v27 = vmul.f32 %v2116_v30, %v510_v50  ;;  %v2183_v37 = vmul.f32 %v2116_v30, %v509_v8  ;;  %v10717_v50 = vld [vmem:[#allocation2 + $0x10] sm:$0xff] }
 0x3df   : > { %v10681_v17 = vmul.f32 %v2182_v47, %v1713_v57  ;;  %v10732_v8 = vld [vmem:[#allocation2 + $0x30] sm:$0xff] }
 0x3e0   : > { %14747 = vst [vmem:[#allocation94_spill] sm:$0xff] %v10677_v36  ;;  %v8070_v28 = vpack.c.bf16 %v10677_v36, %v10683_v62 }
 0x3e1   : > { %14749 = vst [vmem:[#allocation96_spill] sm:$0xff] %v10681_v17  ;;  %v1717_v15 = vpop.f32.mrb[92].mxu1  ;;  %v8068_v4 = vpack.c.bf16 %v10681_v17, %v10679_v18 }
 0x3e2   : > { %v1719_v16 = vpop.f32.mrb[93].mxu1  ;;  %v10707_v36 = vmul.f32 %v2183_v37, %v1717_v15  ;;  %v8142_v15 = vpack.c.bf16 %v10717_v50, %v10715_v0  ;;  %v10746_v37 = vld [vmem:[#allocation2 + $0x50] sm:$0xff] }
 0x3e3   : > { %8069 = vmatprep.subr.bf16.mxu0 %v8068_v4  ;;  %v10703_v17 = vmul.f32 %v2184_v27, %v1719_v16  ;;  %v10713_v4 = vld [vmem:[#allocation2 + $0x18] sm:$0xff] }
 0x3e4   : > { %8071 = vmatpush1.bf16.msra.mxu0 %v8070_v28  ;;  %14754 = vst [vmem:[#allocation101_spill] sm:$0xff] %v10707_v36  ;;  %v8140_v30 = vpack.c.bf16 %v10713_v4, %v10341_v39  ;;  %v10725_v28 = vld [vmem:[#allocation2 + $0x38] sm:$0xff] }
 0x3e5   : > { %v1723_v47 = vpop.f32.mrb[94].mxu1  ;;  %14752 = vst [vmem:[#allocation99_spill] sm:$0xff] %v10703_v17  ;;  %v8144_v16 = vpack.c.bf16 %v10725_v28, %v10723_v59  ;;  %v10739_v27 = vld [vmem:[#allocation2 + $0x58] sm:$0xff] }
 0x3e6   : > { %v10701_v1 = vmul.f32 %v2185_v9, %v1723_v47  ;;  %v1725_v57 = vpop.f32.mrb[95].mxu1  ;;  %v10737_v9 = vld [vmem:[#allocation2 + $0x48] sm:$0xff]  ;;  %v10744_v47 = vld [vmem:[#allocation2 + $0x40] sm:$0xff] }
 0x3e7   : > { %v10705_v18 = vmul.f32 %v2186_v25, %v1725_v57  ;;  %v8148_v25 = vpack.c.bf16 %v10739_v27, %v10737_v9  ;;  %v8150_v57 = vpack.c.bf16 %v10746_v37, %v10744_v47 }
 0x3e8   : > { %14751 = vst [vmem:[#allocation98_spill] sm:$0xff] %v10701_v1  ;;  %v8074_v34 = vpack.c.bf16 %v10701_v1, %v10707_v36  ;;  %v10760_v1 = vld [vmem:[#allocation2 + $0x70] sm:$0xff]  ;;  %v10765_v36 = vld [vmem:[#allocation2 + $0x88] sm:$0xff] }
 0x3e9   : > { %14753 = vst [vmem:[#allocation100_spill] sm:$0xff] %v10705_v18  ;;  %v8072_v62 = vpack.c.bf16 %v10705_v18, %v10703_v17  ;;  %v10767_v17 = vld [vmem:[#allocation2 + $0x98] sm:$0xff] }
 0x3eb   : > { %8073 = vmatprep.subr.bf16.mxu0 %v8072_v62  ;;  %v10730_v62 = vld [vmem:[#allocation2 + $0x20] sm:$0xff] }
 0x3ec   : > { %8075 = vmatpush1.bf16.msra.mxu0 %v8074_v34  ;;  %v8146_v39 = vpack.c.bf16 %v10732_v8, %v10730_v62  ;;  %v10751_v34 = vld [vmem:[#allocation2 + $0x68] sm:$0xff] }
 0x3ed   : > { %8141 = vmatprep.subr.bf16.mxu0 %v8140_v30  ;;  %v10753_v30 = vld [vmem:[#allocation2 + $0x78] sm:$0xff] }
 0x3ef   : > { %2380 = vmatmul.mubr.f32.vlgmr.msra.gmra.mrb[66].mxu0 %v10715_v0 }
 0x3f0   : > { %2385 = vmatprep.mubr.f32.mxu0 %v10713_v4  ;;  %8143 = vmatpush1.bf16.msra.mxu0 %v8142_v15  ;;  %v8152_v15 = vpack.c.bf16 %v10753_v30, %v10751_v34 }
 0x3f1   : > { %8145 = vmatprep.subr.bf16.mxu0 %v8144_v16  ;;  %v10758_v16 = vld [vmem:[#allocation2 + $0x60] sm:$0xff] }
 0x3f2   : > { %v8154_v18 = vpack.c.bf16 %v10760_v1, %v10758_v16 }
 0x3f3   : > { %2386 = vmatmul.mubr.f32.gmra.mrb[68].mxu0 %v10717_v50 }
 0x3f4   : > { %2391 = vmatprep.mubr.f32.mxu0 %v10723_v59  ;;  %8147 = vmatpush1.bf16.msra.mxu0 %v8146_v39  ;;  %v8156_v39 = vpack.c.bf16 %v10767_v17, %v10765_v36 }
 0x3f5   : > { %8149 = vmatprep.subr.bf16.mxu0 %v8148_v25  ;;  %v10772_v25 = vld [vmem:[#allocation2 + $0x80] sm:$0xff] }
 0x3f6   : > { %v8158_v45 = vpack.c.bf16 %v10774_v5, %v10772_v25 }
 0x3f7   : > { %2392 = vmatmul.mubr.f32.gmra.mrb[70].mxu0 %v10730_v62 }
 0x3f8   : > { %2397 = vmatprep.mubr.f32.mxu0 %v10725_v28  ;;  %8151 = vmatpush1.bf16.msra.mxu0 %v8150_v57  ;;  %v8160_v57 = vpack.c.bf16 %v10781_v23, %v10779_v20 }
 0x3f9   : > { %8153 = vmatprep.subr.bf16.mxu0 %v8152_v15  ;;  %v10786_v15 = vld [vmem:[#allocation2 + $0xa0] sm:$0xff] }
 0x3fa   : > { %v8162_v63 = vpack.c.bf16 %v10788_v44, %v10786_v15 }
 0x3fb   : > { %2398 = vmatmul.mubr.f32.gmra.mrb[72].mxu0 %v10732_v8 }
 0x3fc   : > { %2403 = vmatprep.mubr.f32.mxu0 %v10737_v9  ;;  %8155 = vmatpush1.bf16.msra.mxu0 %v8154_v18  ;;  %v8164_v18 = vpack.c.bf16 %v10795_v2, %v10793_v51 }
 0x3fd   : > { %8157 = vmatprep.subr.bf16.mxu0 %v8156_v39  ;;  %v10800_v39 = vld [vmem:[#allocation2 + $0xc0] sm:$0xff] }
 0x3fe   : > { %v8166_v38 = vpack.c.bf16 %v10802_v40, %v10800_v39 }
 0x3ff   : > { %2404 = vmatmul.mubr.f32.gmra.mrb[74].mxu0 %v10744_v47 }
 0x400   : > { %2409 = vmatprep.mubr.f32.mxu0 %v10739_v27  ;;  %8159 = vmatpush1.bf16.msra.mxu0 %v8158_v45  ;;  %v8168_v45 = vpack.c.bf16 %v10809_v33, %v10807_v11 }
 0x401   : > { %8161 = vmatprep.subr.bf16.mxu0 %v8160_v57  ;;  %v10814_v57 = vld [vmem:[#allocation2 + $0xe0] sm:$0xff] }
 0x402   : > { %v8170_v7 = vpack.c.bf16 %v10816_v32, %v10814_v57 }
 0x403   : > { %2410 = vmatmul.mubr.f32.gmra.mrb[76].mxu0 %v10746_v37 }
 0x404   : > { %2415 = vmatprep.mubr.f32.mxu0 %v10751_v34  ;;  %8163 = vmatpush1.bf16.msra.mxu0 %v8162_v63  ;;  %v8172_v63 = vpack.c.bf16 %v10823_v35, %v10821_v21 }
 0x405   : > { %8165 = vmatprep.subr.bf16.mxu0 %v8164_v18  ;;  %v10828_v18 = vld [vmem:[#allocation2 + $0x100] sm:$0xff] }
 0x406   : > { %v8174_v22 = vpack.c.bf16 %v10830_v31, %v10828_v18 }
 0x407   : > { %2416 = vmatmul.mubr.f32.gmra.mrb[78].mxu0 %v10758_v16 }
 0x408   : > { %2421 = vmatprep.mubr.f32.mxu0 %v10753_v30  ;;  %8167 = vmatpush1.bf16.msra.mxu0 %v8166_v38  ;;  %v8176_v38 = vpack.c.bf16 %v10837_v24, %v10835_v60 }
 0x409   : > { %8169 = vmatprep.subr.bf16.mxu0 %v8168_v45  ;;  %v10842_v45 = vld [vmem:[#allocation2 + $0x120] sm:$0xff] }
 0x40a   : > { %v8178_v48 = vpack.c.bf16 %v10844_v52, %v10842_v45 }
 0x40b   : > { %2422 = vmatmul.mubr.f32.gmra.mrb[80].mxu0 %v10760_v1 }
 0x40c   : > { %2427 = vmatprep.mubr.f32.mxu0 %v10765_v36  ;;  %8171 = vmatpush1.bf16.msra.mxu0 %v8170_v7  ;;  %v8180_v7 = vpack.c.bf16 %v10851_v61, %v10849_v29 }
 0x40d   : > { %8173 = vmatprep.subr.bf16.mxu0 %v8172_v63  ;;  %v10856_v63 = vld [vmem:[#allocation2 + $0x140] sm:$0xff] }
 0x40e   : > { %v8182_v3 = vpack.c.bf16 %v10858_v13, %v10856_v63 }
 0x40f   : > { %2428 = vmatmul.mubr.f32.gmra.mrb[82].mxu0 %v10772_v25 }
 0x410   : > { %2433 = vmatprep.mubr.f32.mxu0 %v10767_v17  ;;  %8175 = vmatpush1.bf16.msra.mxu0 %v8174_v22  ;;  %v8184_v22 = vpack.c.bf16 %v10865_v56, %v10863_v41 }
 0x411   : > { %8177 = vmatprep.subr.bf16.mxu0 %v8176_v38  ;;  %v10870_v38 = vld [vmem:[#allocation2 + $0x160] sm:$0xff] }
 0x412   : > { %v8186_v58 = vpack.c.bf16 %v10872_v49, %v10870_v38 }
 0x413   : > { %2434 = vmatmul.mubr.f32.gmra.mrb[84].mxu0 %v10774_v5 }
 0x414   : > { %2439 = vmatprep.mubr.f32.mxu0 %v10779_v20  ;;  %8179 = vmatpush1.bf16.msra.mxu0 %v8178_v48  ;;  %v8188_v48 = vpack.c.bf16 %v10879_v14, %v10877_v46 }
 0x415   : > { %8181 = vmatprep.subr.bf16.mxu0 %v8180_v7  ;;  %v10884_v7 = vld [vmem:[#allocation2 + $0x180] sm:$0xff] }
 0x416   : > { %v8190_v10 = vpack.c.bf16 %v10886_v19, %v10884_v7 }
 0x417   : > { %2440 = vmatmul.mubr.f32.gmra.mrb[86].mxu0 %v10786_v15 }
 0x418   : > { %2445 = vmatprep.mubr.f32.mxu0 %v10781_v23  ;;  %8183 = vmatpush1.bf16.msra.mxu0 %v8182_v3  ;;  %v8192_v3 = vpack.c.bf16 %v10893_v43, %v10891_v55 }
 0x419   : > { %8185 = vmatprep.subr.bf16.mxu0 %v8184_v22  ;;  %v10898_v22 = vld [vmem:[#allocation2 + $0x1a0] sm:$0xff] }
 0x41a   : > { %14758 = vst [vmem:[#allocation105_spill] sm:$0xff] %v10898_v22  ;;  %v8194_v6 = vpack.c.bf16 %v10900_v12, %v10898_v22 }
 0x41b   : > { %2446 = vmatmul.mubr.f32.gmra.mrb[88].mxu0 %v10788_v44 }
 0x41c   : > { %2451 = vmatprep.mubr.f32.mxu0 %v10793_v51  ;;  %8187 = vmatpush1.bf16.msra.mxu0 %v8186_v58  ;;  %v8196_v58 = vpack.c.bf16 %v10907_v53, %v10905_v54 }
 0x41d   : > { %8189 = vmatprep.subr.bf16.mxu0 %v8188_v48  ;;  %v10912_v48 = vld [vmem:[#allocation2 + $0x1c0] sm:$0xff] }
 0x41e   : > { %14762 = vst [vmem:[#allocation109_spill] sm:$0xff] %v10912_v48  ;;  %v8198_v26 = vpack.c.bf16 %v10914_v42, %v10912_v48 }
 0x41f   : > { %2452 = vmatmul.mubr.f32.gmra.mrb[90].mxu0 %v10800_v39 }
 0x420   : > { %2457 = vmatprep.mubr.f32.mxu0 %v10795_v2  ;;  %8191 = vmatpush1.bf16.msra.mxu0 %v8190_v10  ;;  %v10937_v10 = vld [vmem:[#allocation2 + $0x1e8] sm:$0xff] }
 0x421   : > { %8193 = vmatprep.subr.bf16.mxu0 %v8192_v3  ;;  %14766 = vst [vmem:[#allocation113_spill] sm:$0xff] %v10937_v10  ;;  %v10939_v3 = vld [vmem:[#allocation2 + $0x1f8] sm:$0xff] }
 0x422   : > { %14767 = vst [vmem:[#allocation114_spill] sm:$0xff] %v10939_v3 }
 0x423   : > { %2458 = vmatmul.mubr.f32.gmra.mrb[92].mxu0 %v10802_v40 }
 0x424   : > { %2463 = vmatprep.mubr.f32.mxu0 %v10807_v11  ;;  %8195 = vmatpush1.bf16.msra.mxu0 %v8194_v6  ;;  %v10935_v6 = vld [vmem:[#allocation2 + $0x1f0] sm:$0xff] }
 0x425   : > { %8197 = vmatprep.subr.bf16.mxu0 %v8196_v58  ;;  %14765 = vst [vmem:[#allocation112_spill] sm:$0xff] %v10935_v6 }
 0x427   : > { %2464 = vmatmul.mubr.f32.gmra.mrb[94].mxu0 %v10814_v57 }
 0x428   : > { %2469 = vmatprep.mubr.f32.mxu0 %v10809_v33  ;;  %8199 = vmatpush1.bf16.msra.mxu0 %v8198_v26  ;;  %v10933_v26 = vld [vmem:[#allocation2 + $0x1e0] sm:$0xff] }
 0x429   : > { %14764 = vst [vmem:[#allocation111_spill] sm:$0xff] %v10933_v26  ;;  %v8202_v58 = vpack.c.bf16 %v10935_v6, %v10933_v26 }
 0x42b   : > { %2470 = vmatmul.mubr.f32.gmra.mrb[96].mxu0 %v10816_v32 }
 0x42c   : > { %2475 = vmatprep.mubr.f32.mxu0 %v10821_v21 }
 0x42f   : > { %2476 = vmatmul.mubr.f32.gmra.mrb[98].mxu0 %v10828_v18 }
 0x430   : > { %2481 = vmatprep.mubr.f32.mxu0 %v10823_v35 }
 0x433   : > { %2482 = vmatmul.mubr.f32.gmra.mrb[100].mxu0 %v10830_v31 }
 0x434   : > { %2487 = vmatprep.mubr.f32.mxu0 %v10835_v60 }
 0x437   : > { %2488 = vmatmul.mubr.f32.gmra.mrb[102].mxu0 %v10842_v45 }
 0x438   : > { %2493 = vmatprep.mubr.f32.mxu0 %v10837_v24 }
 0x43b   : > { %2494 = vmatmul.mubr.f32.gmra.mrb[104].mxu0 %v10844_v52 }
 0x43c   : > { %2499 = vmatprep.mubr.f32.mxu0 %v10849_v29  ;;  %v8200_v29 = vpack.c.bf16 %v10939_v3, %v10937_v10 }
 0x43e   : > { %8201 = vmatprep.subr.bf16.mxu0 %v8200_v29  ;;  %v10967_v29 = vmul.f32 3.0, %v10715_v0  ;;  %v10980_v0 = vmul.f32 3.0, %v10730_v62 }
 0x43f   : > { %2500 = vmatmul.mubr.f32.gmra.mrb[106].mxu0 %v10856_v63 }
 0x440   : > { %2505 = vmatprep.mubr.f32.mxu0 %v10851_v61  ;;  %8203 = vmatpush1.bf16.msra.mxu0 %v8202_v58  ;;  %14768 = vst [vmem:[#allocation115_spill] sm:$0xff] %v10967_v29  ;;  %v9108_v58 = vld [vmem:[#allocation2 + $0x8] sm:$0xff]  ;;  %14772 = vst [vmem:[#allocation119_spill] sm:$0xff] %v10980_v0 }
 0x443   : > { %2506 = vmatmul.mubr.f32.gmra.mrb[108].mxu0 %v10858_v13 }
 0x444   : > { %2511 = vmatprep.mubr.f32.mxu0 %v10863_v41 }
 0x447   : > { %2512 = vmatmul.mubr.f32.gmra.mrb[110].mxu0 %v10870_v38 }
 0x448   : > { %2517 = vmatprep.mubr.f32.mxu0 %v10865_v56 }
 0x44b   : > { %2518 = vmatmul.mubr.f32.gmra.mrb[112].mxu0 %v10872_v49 }
 0x44c   : > { %2523 = vmatprep.mubr.f32.mxu0 %v10877_v46 }
 0x44f   : > { %2524 = vmatmul.mubr.f32.gmra.mrb[114].mxu0 %v10884_v7 }
 0x450   : > { %2529 = vmatprep.mubr.f32.mxu0 %v10879_v14 }
 0x453   : > { %2530 = vmatmul.mubr.f32.gmra.mrb[116].mxu0 %v10886_v19 }
 0x454   : > { %2535 = vmatprep.mubr.f32.mxu0 %v10891_v55 }
 0x457   : > { %2536 = vmatmul.mubr.f32.gmra.mrb[118].mxu0 %v10898_v22 }
 0x458   : > { %2541 = vmatprep.mubr.f32.mxu0 %v10893_v43  ;;  %v10969_v43 = vmul.f32 3.0, %v9108_v58 }
 0x45a   : > { %14769 = vst [vmem:[#allocation116_spill] sm:$0xff] %v10969_v43 }
 0x45b   : > { %2542 = vmatmul.mubr.f32.gmra.mrb[120].mxu0 %v10900_v12 }
 0x45c   : > { %2547 = vmatprep.mubr.f32.mxu0 %v10905_v54 }
 0x45f   : > { %2548 = vmatmul.mubr.f32.gmra.mrb[122].mxu0 %v10912_v48  ;;  %v10972_v48 = vmul.f32 3.0, %v10717_v50  ;;  %v10984_v50 = vmul.f32 3.0, %v10723_v59 }
 0x460   : > { %2553 = vmatprep.mubr.f32.mxu0 %v10907_v53 }
 0x461   : > { %14770 = vst [vmem:[#allocation117_spill] sm:$0xff] %v10972_v48  ;;  %14773 = vst [vmem:[#allocation120_spill] sm:$0xff] %v10984_v50 }
 0x463   : > { %2554 = vmatmul.mubr.f32.gmra.mrb[124].mxu0 %v10914_v42 }
 0x464   : > { %2559 = vmatprep.mubr.f32.mxu0 %v10937_v10  ;;  %v10976_v10 = vmul.f32 3.0, %v10713_v4 }
 0x466   : > { %14771 = vst [vmem:[#allocation118_spill] sm:$0xff] %v10976_v10 }
 0x467   : > { %2560 = vmatmul.mubr.f32.gmra.mrb[126].mxu0 %v10933_v26 }
 0x468   : > { %2565 = vmatprep.mubr.f32.mxu0 %v10939_v3 }
 0x46b   : > { %2566 = vmatmul.mubr.f32.gmra.mrb[128].mxu0 %v10935_v6 }
 0x4c2   : > { %v2381_v54 = vpop.f32.mrb[66].mxu0 }
 0x4c3   : > { %v2572_v53 = vsub.f32 %v10967_v29, %v2381_v54  ;;  %v2383_v42 = vpop.f32.mrb[67].mxu0 }
 0x4c4   : > { %v2573_v3 = vsub.f32 %v10969_v43, %v2383_v42  ;;  %v10988_v42 = vmul.f32 3.0, %v10732_v8 }
 0x4c5   : > { %v2636_v12 = vmul.f32 0.5, %v2572_v53 }
 0x4c6   : > { %v2387_v26 = vpop.f32.mrb[68].mxu0  ;;  %v2637_v6 = vmul.f32 0.5, %v2573_v3  ;;  %14774 = vst [vmem:[#allocation121_spill] sm:$0xff] %v10988_v42 }
 0x4c7   : > { %v2574_v58 = vsub.f32 %v10972_v48, %v2387_v26  ;;  %v2389_v55 = vpop.f32.mrb[69].mxu0  ;;  %v10992_v26 = vmul.f32 3.0, %v10725_v28 }
 0x4c8   : > { %v2575_v54 = vsub.f32 %v10976_v10, %v2389_v55  ;;  %3021 = vmatprep.mubr.f32.mxu0 %v2637_v6 }
 0x4c9   : > { %3022 = vmatmul.mubr.f32.vlgmr.msra.gmra.mrb[130].mxu0 %v2636_v12  ;;  %v2638_v4 = vmul.f32 0.5, %v2574_v58  ;;  %14775 = vst [vmem:[#allocation122_spill] sm:$0xff] %v10992_v26 }
 0x4ca   : > { %v2393_v29 = vpop.f32.mrb[70].mxu0  ;;  %v2639_v22 = vmul.f32 0.5, %v2575_v54  ;;  %v10996_v54 = vmul.f32 3.0, %v10744_v47 }
 0x4cb   : > { %v2576_v62 = vsub.f32 %v10980_v0, %v2393_v29  ;;  %v2395_v3 = vpop.f32.mrb[71].mxu0  ;;  %v8078_v53 = vpack.c.bf16 %v2638_v4, %v2636_v12  ;;  %v11000_v12 = vmul.f32 3.0, %v10737_v9 }
 0x4cc   : > { %v2577_v59 = vsub.f32 %v10984_v50, %v2395_v3  ;;  %3027 = vmatprep.mubr.f32.mxu0 %v2639_v22  ;;  %v8076_v48 = vpack.c.bf16 %v2639_v22, %v2637_v6  ;;  %14776 = vst [vmem:[#allocation123_spill] sm:$0xff] %v10996_v54 }
 0x4cd   : > { %3028 = vmatmul.mubr.f32.gmra.mrb[132].mxu0 %v2638_v4  ;;  %v2640_v29 = vmul.f32 0.5, %v2576_v62  ;;  %14777 = vst [vmem:[#allocation124_spill] sm:$0xff] %v11000_v12 }
 0x4ce   : > { %v2399_v55 = vpop.f32.mrb[72].mxu0  ;;  %8077 = vmatprep.subr.bf16.mxu1 %v8076_v48  ;;  %v2641_v58 = vmul.f32 0.5, %v2577_v59  ;;  %v11004_v48 = vmul.f32 3.0, %v10746_v37 }
 0x4cf   : > { %v2578_v8 = vsub.f32 %v10988_v42, %v2399_v55  ;;  %v2401_v10 = vpop.f32.mrb[73].mxu0  ;;  %8079 = vmatpush1.bf16.msra.mxu1 %v8078_v53  ;;  %v11008_v53 = vmul.f32 3.0, %v10739_v27 }
 0x4d0   : > { %v2579_v28 = vsub.f32 %v10992_v26, %v2401_v10  ;;  %3033 = vmatprep.mubr.f32.mxu0 %v2641_v58  ;;  %14778 = vst [vmem:[#allocation125_spill] sm:$0xff] %v11004_v48 }
 0x4d1   : > { %3034 = vmatmul.mubr.f32.gmra.mrb[134].mxu0 %v2640_v29  ;;  %v2642_v22 = vmul.f32 0.5, %v2578_v8  ;;  %14779 = vst [vmem:[#allocation126_spill] sm:$0xff] %v11008_v53  ;;  %v11012_v8 = vmul.f32 3.0, %v10758_v16 }
 0x4d2   : > { %v2405_v6 = vpop.f32.mrb[74].mxu0  ;;  %v2643_v4 = vmul.f32 0.5, %v2579_v28 }
 0x4d3   : > { %v2580_v47 = vsub.f32 %v10996_v54, %v2405_v6  ;;  %v2407_v3 = vpop.f32.mrb[75].mxu0  ;;  %v8082_v59 = vpack.c.bf16 %v2642_v22, %v2640_v29  ;;  %14780 = vst [vmem:[#allocation127_spill] sm:$0xff] %v11012_v8  ;;  %v11016_v29 = vmul.f32 3.0, %v10751_v34 }
 0x4d4   : > { %v2581_v9 = vsub.f32 %v11000_v12, %v2407_v3  ;;  %3039 = vmatprep.mubr.f32.mxu0 %v2643_v4  ;;  %v8080_v62 = vpack.c.bf16 %v2643_v4, %v2641_v58  ;;  %v11020_v3 = vmul.f32 3.0, %v10760_v1 }
 0x4d5   : > { %3040 = vmatmul.mubr.f32.gmra.mrb[136].mxu0 %v2642_v22  ;;  %v2644_v6 = vmul.f32 0.5, %v2580_v47  ;;  %14781 = vst [vmem:[#allocation128_spill] sm:$0xff] %v11016_v29 }
 0x4d6   : > { %v2411_v10 = vpop.f32.mrb[76].mxu0  ;;  %8081 = vmatprep.subr.bf16.mxu1 %v8080_v62  ;;  %v2645_v55 = vmul.f32 0.5, %v2581_v9  ;;  %14782 = vst [vmem:[#allocation129_spill] sm:$0xff] %v11020_v3 }
 0x4d7   : > { %v2582_v37 = vsub.f32 %v11004_v48, %v2411_v10  ;;  %v2413_v28 = vpop.f32.mrb[77].mxu0  ;;  %8083 = vmatpush1.bf16.msra.mxu1 %v8082_v59  ;;  %v11024_v59 = vmul.f32 3.0, %v10753_v30 }
 0x4d8   : > { %v2583_v27 = vsub.f32 %v11008_v53, %v2413_v28  ;;  %3045 = vmatprep.mubr.f32.mxu0 %v2645_v55  ;;  %v11028_v28 = vmul.f32 3.0, %v10772_v25 }
 0x4d9   : > { %3046 = vmatmul.mubr.f32.gmra.mrb[138].mxu0 %v2644_v6  ;;  %v2646_v58 = vmul.f32 0.5, %v2582_v37  ;;  %14783 = vst [vmem:[#allocation130_spill] sm:$0xff] %v11024_v59 }
 0x4da   : > { %v2417_v22 = vpop.f32.mrb[78].mxu0  ;;  %v2647_v4 = vmul.f32 0.5, %v2583_v27  ;;  %14784 = vst [vmem:[#allocation131_spill] sm:$0xff] %v11028_v28 }
 0x4db   : > { %v2584_v16 = vsub.f32 %v11012_v8, %v2417_v22  ;;  %v2419_v9 = vpop.f32.mrb[79].mxu0  ;;  %v8086_v62 = vpack.c.bf16 %v2646_v58, %v2644_v6  ;;  %v11032_v6 = vmul.f32 3.0, %v10765_v36 }
 0x4dc   : > { %v2585_v34 = vsub.f32 %v11016_v29, %v2419_v9  ;;  %3051 = vmatprep.mubr.f32.mxu0 %v2647_v4  ;;  %v8084_v47 = vpack.c.bf16 %v2647_v4, %v2645_v55  ;;  %v11036_v9 = vmul.f32 3.0, %v10774_v5 }
 0x4dd   : > { %3052 = vmatmul.mubr.f32.gmra.mrb[140].mxu0 %v2646_v58  ;;  %v2648_v22 = vmul.f32 0.5, %v2584_v16  ;;  %14785 = vst [vmem:[#allocation132_spill] sm:$0xff] %v11032_v6 }
 0x4de   : > { %v2423_v10 = vpop.f32.mrb[80].mxu0  ;;  %8085 = vmatprep.subr.bf16.mxu1 %v8084_v47  ;;  %v2649_v37 = vmul.f32 0.5, %v2585_v34  ;;  %14786 = vst [vmem:[#allocation133_spill] sm:$0xff] %v11036_v9 }
 0x4df   : > { %v2586_v1 = vsub.f32 %v11020_v3, %v2423_v10  ;;  %v2425_v27 = vpop.f32.mrb[81].mxu0  ;;  %8087 = vmatpush1.bf16.msra.mxu1 %v8086_v62  ;;  %v11040_v62 = vmul.f32 3.0, %v10767_v17 }
 0x4e0   : > { %v2587_v30 = vsub.f32 %v11024_v59, %v2425_v27  ;;  %3057 = vmatprep.mubr.f32.mxu0 %v2649_v37  ;;  %v11044_v27 = vmul.f32 3.0, %v10786_v15 }
 0x4e1   : > { %3058 = vmatmul.mubr.f32.gmra.mrb[142].mxu0 %v2648_v22  ;;  %v2650_v55 = vmul.f32 0.5, %v2586_v1  ;;  %14787 = vst [vmem:[#allocation134_spill] sm:$0xff] %v11040_v62 }
 0x4e2   : > { %v2429_v58 = vpop.f32.mrb[82].mxu0  ;;  %v2651_v4 = vmul.f32 0.5, %v2587_v30  ;;  %14788 = vst [vmem:[#allocation135_spill] sm:$0xff] %v11044_v27 }
 0x4e3   : > { %v2588_v25 = vsub.f32 %v11028_v28, %v2429_v58  ;;  %v2431_v34 = vpop.f32.mrb[83].mxu0  ;;  %v8090_v47 = vpack.c.bf16 %v2650_v55, %v2648_v22  ;;  %v11048_v22 = vmul.f32 3.0, %v10779_v20 }
 0x4e4   : > { %v2589_v36 = vsub.f32 %v11032_v6, %v2431_v34  ;;  %3063 = vmatprep.mubr.f32.mxu0 %v2651_v4  ;;  %v8088_v16 = vpack.c.bf16 %v2651_v4, %v2649_v37  ;;  %v11052_v34 = vmul.f32 3.0, %v10788_v44 }
 0x4e5   : > { %3064 = vmatmul.mubr.f32.gmra.mrb[144].mxu0 %v2650_v55  ;;  %v2652_v58 = vmul.f32 0.5, %v2588_v25  ;;  %14789 = vst [vmem:[#allocation136_spill] sm:$0xff] %v11048_v22 }
 0x4e6   : > { %v2435_v10 = vpop.f32.mrb[84].mxu0  ;;  %8089 = vmatprep.subr.bf16.mxu1 %v8088_v16  ;;  %v2653_v1 = vmul.f32 0.5, %v2589_v36  ;;  %14790 = vst [vmem:[#allocation137_spill] sm:$0xff] %v11052_v34 }
 0x4e7   : > { %v2590_v5 = vsub.f32 %v11036_v9, %v2435_v10  ;;  %v2437_v30 = vpop.f32.mrb[85].mxu0  ;;  %8091 = vmatpush1.bf16.msra.mxu1 %v8090_v47  ;;  %v11056_v47 = vmul.f32 3.0, %v10781_v23 }
 0x4e8   : > { %v2591_v17 = vsub.f32 %v11040_v62, %v2437_v30  ;;  %3069 = vmatprep.mubr.f32.mxu0 %v2653_v1  ;;  %v11060_v30 = vmul.f32 3.0, %v10800_v39 }
 0x4e9   : > { %3070 = vmatmul.mubr.f32.gmra.mrb[146].mxu0 %v2652_v58  ;;  %v2654_v37 = vmul.f32 0.5, %v2590_v5  ;;  %14791 = vst [vmem:[#allocation138_spill] sm:$0xff] %v11056_v47 }
 0x4ea   : > { %v2441_v55 = vpop.f32.mrb[86].mxu0  ;;  %v2655_v4 = vmul.f32 0.5, %v2591_v17  ;;  %14792 = vst [vmem:[#allocation139_spill] sm:$0xff] %v11060_v30 }
 0x4eb   : > { %v2592_v15 = vsub.f32 %v11044_v27, %v2441_v55  ;;  %v2443_v36 = vpop.f32.mrb[87].mxu0  ;;  %v8094_v16 = vpack.c.bf16 %v2654_v37, %v2652_v58  ;;  %v11064_v58 = vmul.f32 3.0, %v10793_v51 }
 0x4ec   : > { %v2593_v20 = vsub.f32 %v11048_v22, %v2443_v36  ;;  %3075 = vmatprep.mubr.f32.mxu0 %v2655_v4  ;;  %v8092_v25 = vpack.c.bf16 %v2655_v4, %v2653_v1  ;;  %v11068_v36 = vmul.f32 3.0, %v10802_v40 }
 0x4ed   : > { %3076 = vmatmul.mubr.f32.gmra.mrb[148].mxu0 %v2654_v37  ;;  %v2656_v55 = vmul.f32 0.5, %v2592_v15  ;;  %14793 = vst [vmem:[#allocation140_spill] sm:$0xff] %v11064_v58 }
 0x4ee   : > { %v2447_v10 = vpop.f32.mrb[88].mxu0  ;;  %8093 = vmatprep.subr.bf16.mxu1 %v8092_v25  ;;  %v2657_v5 = vmul.f32 0.5, %v2593_v20  ;;  %14794 = vst [vmem:[#allocation141_spill] sm:$0xff] %v11068_v36 }
 0x4ef   : > { %v2594_v44 = vsub.f32 %v11052_v34, %v2447_v10  ;;  %v2449_v17 = vpop.f32.mrb[89].mxu0  ;;  %8095 = vmatpush1.bf16.msra.mxu1 %v8094_v16  ;;  %v11072_v16 = vmul.f32 3.0, %v10795_v2 }
 0x4f0   : > { %v2595_v23 = vsub.f32 %v11056_v47, %v2449_v17  ;;  %3081 = vmatprep.mubr.f32.mxu0 %v2657_v5  ;;  %v11076_v17 = vmul.f32 3.0, %v10814_v57 }
 0x4f1   : > { %3082 = vmatmul.mubr.f32.gmra.mrb[150].mxu0 %v2656_v55  ;;  %v2658_v1 = vmul.f32 0.5, %v2594_v44  ;;  %14795 = vst [vmem:[#allocation142_spill] sm:$0xff] %v11072_v16 }
 0x4f2   : > { %v2453_v37 = vpop.f32.mrb[90].mxu0  ;;  %v2659_v4 = vmul.f32 0.5, %v2595_v23  ;;  %14796 = vst [vmem:[#allocation143_spill] sm:$0xff] %v11076_v17 }
 0x4f3   : > { %v2596_v39 = vsub.f32 %v11060_v30, %v2453_v37  ;;  %v2455_v20 = vpop.f32.mrb[91].mxu0  ;;  %v8098_v25 = vpack.c.bf16 %v2658_v1, %v2656_v55  ;;  %v11080_v55 = vmul.f32 3.0, %v10807_v11 }
 0x4f4   : > { %v2597_v51 = vsub.f32 %v11064_v58, %v2455_v20  ;;  %3087 = vmatprep.mubr.f32.mxu0 %v2659_v4  ;;  %v8096_v15 = vpack.c.bf16 %v2659_v4, %v2657_v5  ;;  %v11084_v20 = vmul.f32 3.0, %v10816_v32 }
 0x4f5   : > { %3088 = vmatmul.mubr.f32.gmra.mrb[152].mxu0 %v2658_v1  ;;  %v2660_v37 = vmul.f32 0.5, %v2596_v39  ;;  %14797 = vst [vmem:[#allocation144_spill] sm:$0xff] %v11080_v55 }
 0x4f6   : > { %v2459_v10 = vpop.f32.mrb[92].mxu0  ;;  %8097 = vmatprep.subr.bf16.mxu1 %v8096_v15  ;;  %v2661_v44 = vmul.f32 0.5, %v2597_v51  ;;  %14798 = vst [vmem:[#allocation145_spill] sm:$0xff] %v11084_v20 }
 0x4f7   : > { %v2598_v40 = vsub.f32 %v11068_v36, %v2459_v10  ;;  %v2461_v23 = vpop.f32.mrb[93].mxu0  ;;  %8099 = vmatpush1.bf16.msra.mxu1 %v8098_v25  ;;  %v11088_v25 = vmul.f32 3.0, %v10809_v33 }
 0x4f8   : > { %v2599_v2 = vsub.f32 %v11072_v16, %v2461_v23  ;;  %3093 = vmatprep.mubr.f32.mxu0 %v2661_v44  ;;  %v11092_v23 = vmul.f32 3.0, %v10828_v18 }
 0x4f9   : > { %3094 = vmatmul.mubr.f32.gmra.mrb[154].mxu0 %v2660_v37  ;;  %v2662_v5 = vmul.f32 0.5, %v2598_v40  ;;  %14799 = vst [vmem:[#allocation146_spill] sm:$0xff] %v11088_v25 }
 0x4fa   : > { %v2465_v1 = vpop.f32.mrb[94].mxu0  ;;  %v2663_v4 = vmul.f32 0.5, %v2599_v2  ;;  %14800 = vst [vmem:[#allocation147_spill] sm:$0xff] %v11092_v23 }
 0x4fb   : > { %v2600_v57 = vsub.f32 %v11076_v17, %v2465_v1  ;;  %v2467_v51 = vpop.f32.mrb[95].mxu0  ;;  %v8102_v15 = vpack.c.bf16 %v2662_v5, %v2660_v37  ;;  %v11096_v37 = vmul.f32 3.0, %v10821_v21 }
 0x4fc   : > { %v2601_v11 = vsub.f32 %v11080_v55, %v2467_v51  ;;  %3099 = vmatprep.mubr.f32.mxu0 %v2663_v4  ;;  %v8100_v39 = vpack.c.bf16 %v2663_v4, %v2661_v44  ;;  %v11100_v51 = vmul.f32 3.0, %v10830_v31 }
 0x4fd   : > { %3100 = vmatmul.mubr.f32.gmra.mrb[156].mxu0 %v2662_v5  ;;  %v2664_v1 = vmul.f32 0.5, %v2600_v57  ;;  %14801 = vst [vmem:[#allocation148_spill] sm:$0xff] %v11096_v37 }
 0x4fe   : > { %v2471_v10 = vpop.f32.mrb[96].mxu0  ;;  %8101 = vmatprep.subr.bf16.mxu1 %v8100_v39  ;;  %v2665_v40 = vmul.f32 0.5, %v2601_v11  ;;  %14802 = vst [vmem:[#allocation149_spill] sm:$0xff] %v11100_v51 }
 0x4ff   : > { %v2602_v32 = vsub.f32 %v11084_v20, %v2471_v10  ;;  %v2473_v2 = vpop.f32.mrb[97].mxu0  ;;  %8103 = vmatpush1.bf16.msra.mxu1 %v8102_v15  ;;  %v11104_v15 = vmul.f32 3.0, %v10823_v35 }
 0x500   : > { %v2603_v33 = vsub.f32 %v11088_v25, %v2473_v2  ;;  %3105 = vmatprep.mubr.f32.mxu0 %v2665_v40  ;;  %v11108_v2 = vmul.f32 3.0, %v10842_v45 }
 0x501   : > { %3106 = vmatmul.mubr.f32.gmra.mrb[158].mxu0 %v2664_v1  ;;  %v2666_v44 = vmul.f32 0.5, %v2602_v32  ;;  %14803 = vst [vmem:[#allocation150_spill] sm:$0xff] %v11104_v15 }
 0x502   : > { %v2477_v5 = vpop.f32.mrb[98].mxu0  ;;  %v2667_v4 = vmul.f32 0.5, %v2603_v33  ;;  %14804 = vst [vmem:[#allocation151_spill] sm:$0xff] %v11108_v2 }
 0x503   : > { %v2604_v18 = vsub.f32 %v11092_v23, %v2477_v5  ;;  %v2479_v11 = vpop.f32.mrb[99].mxu0  ;;  %v8106_v39 = vpack.c.bf16 %v2666_v44, %v2664_v1  ;;  %v11112_v1 = vmul.f32 3.0, %v10835_v60 }
 0x504   : > { %v2605_v21 = vsub.f32 %v11096_v37, %v2479_v11  ;;  %3111 = vmatprep.mubr.f32.mxu0 %v2667_v4  ;;  %v8104_v57 = vpack.c.bf16 %v2667_v4, %v2665_v40  ;;  %v11116_v11 = vmul.f32 3.0, %v10844_v52 }
 0x505   : > { %3112 = vmatmul.mubr.f32.gmra.mrb[160].mxu0 %v2666_v44  ;;  %v2668_v5 = vmul.f32 0.5, %v2604_v18  ;;  %14805 = vst [vmem:[#allocation152_spill] sm:$0xff] %v11112_v1 }
 0x506   : > { %v2483_v10 = vpop.f32.mrb[100].mxu0  ;;  %8105 = vmatprep.subr.bf16.mxu1 %v8104_v57  ;;  %v2669_v32 = vmul.f32 0.5, %v2605_v21  ;;  %14806 = vst [vmem:[#allocation153_spill] sm:$0xff] %v11116_v11 }
 0x507   : > { %v2606_v31 = vsub.f32 %v11100_v51, %v2483_v10  ;;  %v2485_v33 = vpop.f32.mrb[101].mxu0  ;;  %8107 = vmatpush1.bf16.msra.mxu1 %v8106_v39  ;;  %v11120_v39 = vmul.f32 3.0, %v10837_v24 }
 0x508   : > { %v2607_v35 = vsub.f32 %v11104_v15, %v2485_v33  ;;  %3117 = vmatprep.mubr.f32.mxu0 %v2669_v32  ;;  %v11124_v33 = vmul.f32 3.0, %v10856_v63 }
 0x509   : > { %3118 = vmatmul.mubr.f32.gmra.mrb[162].mxu0 %v2668_v5  ;;  %v2670_v40 = vmul.f32 0.5, %v2606_v31  ;;  %14807 = vst [vmem:[#allocation154_spill] sm:$0xff] %v11120_v39 }
 0x50a   : > { %v2489_v44 = vpop.f32.mrb[102].mxu0  ;;  %v2671_v4 = vmul.f32 0.5, %v2607_v35  ;;  %14808 = vst [vmem:[#allocation155_spill] sm:$0xff] %v11124_v33 }
 0x50b   : > { %v2608_v45 = vsub.f32 %v11108_v2, %v2489_v44  ;;  %v2491_v21 = vpop.f32.mrb[103].mxu0  ;;  %v8110_v57 = vpack.c.bf16 %v2670_v40, %v2668_v5  ;;  %v14809_v5 = vld [vmem:[#allocation102_spill] sm:$0xff] }
 0x50c   : > { %v2609_v60 = vsub.f32 %v11112_v1, %v2491_v21  ;;  %3123 = vmatprep.mubr.f32.mxu0 %v2671_v4  ;;  %v8108_v18 = vpack.c.bf16 %v2671_v4, %v2669_v32  ;;  %v11128_v2 = vmul.f32 3.0, %v14809_v5  ;;  %v11132_v21 = vmul.f32 3.0, %v10858_v13 }
 0x50d   : > { %3124 = vmatmul.mubr.f32.gmra.mrb[164].mxu0 %v2670_v40  ;;  %v2672_v44 = vmul.f32 0.5, %v2608_v45  ;;  %v11140_v5 = vmul.f32 3.0, %v10870_v38 }
 0x50e   : > { %v2495_v10 = vpop.f32.mrb[104].mxu0  ;;  %8109 = vmatprep.subr.bf16.mxu1 %v8108_v18  ;;  %v2673_v31 = vmul.f32 0.5, %v2609_v60  ;;  %14810 = vst [vmem:[#allocation102_spill] sm:$0xff] %v11128_v2  ;;  %14811 = vst [vmem:[#allocation156_spill] sm:$0xff] %v11132_v21 }
 0x50f   : > { %v2610_v52 = vsub.f32 %v11116_v11, %v2495_v10  ;;  %v2497_v35 = vpop.f32.mrb[105].mxu0  ;;  %8111 = vmatpush1.bf16.msra.mxu1 %v8110_v57  ;;  %v11136_v57 = vmul.f32 3.0, %v10851_v61  ;;  %14813 = vst [vmem:[#allocation158_spill] sm:$0xff] %v11140_v5 }
 0x510   : > { %v2611_v24 = vsub.f32 %v11120_v39, %v2497_v35  ;;  %3129 = vmatprep.mubr.f32.mxu0 %v2673_v31 }
 0x511   : > { %3130 = vmatmul.mubr.f32.gmra.mrb[166].mxu0 %v2672_v44  ;;  %v2674_v32 = vmul.f32 0.5, %v2610_v52  ;;  %14812 = vst [vmem:[#allocation157_spill] sm:$0xff] %v11136_v57 }
 0x512   : > { %v2501_v40 = vpop.f32.mrb[106].mxu0  ;;  %v2675_v4 = vmul.f32 0.5, %v2611_v24 }
 0x513   : > { %v2612_v63 = vsub.f32 %v11124_v33, %v2501_v40  ;;  %v2503_v60 = vpop.f32.mrb[107].mxu0  ;;  %v8114_v18 = vpack.c.bf16 %v2674_v32, %v2672_v44  ;;  %v11144_v44 = vmul.f32 3.0, %v10863_v41 }
 0x514   : > { %v2613_v45 = vsub.f32 %v11128_v2, %v2503_v60  ;;  %3135 = vmatprep.mubr.f32.mxu0 %v2675_v4  ;;  %v8112_v10 = vpack.c.bf16 %v2675_v4, %v2673_v31  ;;  %v11148_v60 = vmul.f32 3.0, %v10872_v49 }
 0x515   : > { %3136 = vmatmul.mubr.f32.gmra.mrb[168].mxu0 %v2674_v32  ;;  %v2676_v40 = vmul.f32 0.5, %v2612_v63  ;;  %14814 = vst [vmem:[#allocation159_spill] sm:$0xff] %v11144_v44 }
 0x516   : > { %v2507_v35 = vpop.f32.mrb[108].mxu0  ;;  %8113 = vmatprep.subr.bf16.mxu1 %v8112_v10  ;;  %v2677_v52 = vmul.f32 0.5, %v2613_v45  ;;  %14815 = vst [vmem:[#allocation160_spill] sm:$0xff] %v11148_v60 }
 0x517   : > { %v2614_v13 = vsub.f32 %v11132_v21, %v2507_v35  ;;  %v2509_v24 = vpop.f32.mrb[109].mxu0  ;;  %8115 = vmatpush1.bf16.msra.mxu1 %v8114_v18  ;;  %v11152_v18 = vmul.f32 3.0, %v10865_v56 }
 0x518   : > { %v2615_v61 = vsub.f32 %v11136_v57, %v2509_v24  ;;  %3141 = vmatprep.mubr.f32.mxu0 %v2677_v52  ;;  %v11156_v24 = vmul.f32 3.0, %v10884_v7 }
 0x519   : > { %3142 = vmatmul.mubr.f32.gmra.mrb[170].mxu0 %v2676_v40  ;;  %v2678_v31 = vmul.f32 0.5, %v2614_v13  ;;  %14816 = vst [vmem:[#allocation161_spill] sm:$0xff] %v11152_v18 }
 0x51a   : > { %v2513_v32 = vpop.f32.mrb[110].mxu0  ;;  %v2679_v4 = vmul.f32 0.5, %v2615_v61  ;;  %14817 = vst [vmem:[#allocation162_spill] sm:$0xff] %v11156_v24 }
 0x51b   : > { %v2616_v38 = vsub.f32 %v11140_v5, %v2513_v32  ;;  %v2515_v45 = vpop.f32.mrb[111].mxu0  ;;  %v8118_v10 = vpack.c.bf16 %v2678_v31, %v2676_v40  ;;  %v11160_v40 = vmul.f32 3.0, %v10877_v46 }
 0x51c   : > { %v2617_v41 = vsub.f32 %v11144_v44, %v2515_v45  ;;  %3147 = vmatprep.mubr.f32.mxu0 %v2679_v4  ;;  %v8116_v63 = vpack.c.bf16 %v2679_v4, %v2677_v52  ;;  %v11164_v45 = vmul.f32 3.0, %v10886_v19 }
 0x51d   : > { %3148 = vmatmul.mubr.f32.gmra.mrb[172].mxu0 %v2678_v31  ;;  %v2680_v32 = vmul.f32 0.5, %v2616_v38  ;;  %14818 = vst [vmem:[#allocation163_spill] sm:$0xff] %v11160_v40 }
 0x51e   : > { %v2519_v35 = vpop.f32.mrb[112].mxu0  ;;  %8117 = vmatprep.subr.bf16.mxu1 %v8116_v63  ;;  %v2681_v13 = vmul.f32 0.5, %v2617_v41  ;;  %14819 = vst [vmem:[#allocation164_spill] sm:$0xff] %v11164_v45 }
 0x51f   : > { %v2618_v49 = vsub.f32 %v11148_v60, %v2519_v35  ;;  %v2521_v61 = vpop.f32.mrb[113].mxu0  ;;  %8119 = vmatpush1.bf16.msra.mxu1 %v8118_v10  ;;  %v11168_v10 = vmul.f32 3.0, %v10879_v14 }
 0x520   : > { %v2619_v56 = vsub.f32 %v11152_v18, %v2521_v61  ;;  %3153 = vmatprep.mubr.f32.mxu0 %v2681_v13  ;;  %v14821_v61 = vld [vmem:[#allocation105_spill] sm:$0xff] }
 0x521   : > { %3154 = vmatmul.mubr.f32.gmra.mrb[174].mxu0 %v2680_v32  ;;  %v2682_v52 = vmul.f32 0.5, %v2618_v49  ;;  %14820 = vst [vmem:[#allocation165_spill] sm:$0xff] %v11168_v10 }
 0x522   : > { %v2525_v31 = vpop.f32.mrb[114].mxu0  ;;  %v2683_v4 = vmul.f32 0.5, %v2619_v56  ;;  %v11172_v56 = vmul.f32 3.0, %v14821_v61 }
 0x523   : > { %v2620_v7 = vsub.f32 %v11156_v24, %v2525_v31  ;;  %v2527_v41 = vpop.f32.mrb[115].mxu0  ;;  %v8122_v63 = vpack.c.bf16 %v2682_v52, %v2680_v32  ;;  %v14823_v32 = vld [vmem:[#allocation103_spill] sm:$0xff] }
 0x524   : > { %v2621_v46 = vsub.f32 %v11160_v40, %v2527_v41  ;;  %3159 = vmatprep.mubr.f32.mxu0 %v2683_v4  ;;  %v8120_v38 = vpack.c.bf16 %v2683_v4, %v2681_v13  ;;  %14822 = vst [vmem:[#allocation105_spill] sm:$0xff] %v11172_v56  ;;  %v11176_v24 = vmul.f32 3.0, %v14823_v32  ;;  %v14825_v41 = vld [vmem:[#allocation106_spill] sm:$0xff] }
 0x525   : > { %3160 = vmatmul.mubr.f32.gmra.mrb[176].mxu0 %v2682_v52  ;;  %v2684_v31 = vmul.f32 0.5, %v2620_v7 }
 0x526   : > { %v2531_v35 = vpop.f32.mrb[116].mxu0  ;;  %8121 = vmatprep.subr.bf16.mxu1 %v8120_v38  ;;  %v2685_v49 = vmul.f32 0.5, %v2621_v46  ;;  %14824 = vst [vmem:[#allocation103_spill] sm:$0xff] %v11176_v24  ;;  %v11180_v46 = vmul.f32 3.0, %v14825_v41 }
 0x527   : > { %v2622_v19 = vsub.f32 %v11164_v45, %v2531_v35  ;;  %v2533_v18 = vpop.f32.mrb[117].mxu0  ;;  %8123 = vmatpush1.bf16.msra.mxu1 %v8122_v63  ;;  %v14827_v45 = vld [vmem:[#allocation104_spill] sm:$0xff] }
 0x528   : > { %v2623_v14 = vsub.f32 %v11168_v10, %v2533_v18  ;;  %3165 = vmatprep.mubr.f32.mxu0 %v2685_v49  ;;  %14826 = vst [vmem:[#allocation106_spill] sm:$0xff] %v11180_v46  ;;  %v11184_v63 = vmul.f32 3.0, %v14827_v45  ;;  %v14829_v10 = vld [vmem:[#allocation109_spill] sm:$0xff] }
 0x529   : > { %3166 = vmatmul.mubr.f32.gmra.mrb[178].mxu0 %v2684_v31  ;;  %v2686_v13 = vmul.f32 0.5, %v2622_v19 }
 0x52a   : > { %v2537_v52 = vpop.f32.mrb[118].mxu0  ;;  %v2687_v4 = vmul.f32 0.5, %v2623_v14  ;;  %14828 = vst [vmem:[#allocation104_spill] sm:$0xff] %v11184_v63  ;;  %v11188_v14 = vmul.f32 3.0, %v14829_v10 }
 0x52b   : > { %v2624_v38 = vsub.f32 %v11172_v56, %v2537_v52  ;;  %v2539_v61 = vpop.f32.mrb[119].mxu0  ;;  %v8126_v35 = vpack.c.bf16 %v2686_v13, %v2684_v31  ;;  %v14831_v31 = vld [vmem:[#allocation107_spill] sm:$0xff] }
 0x52c   : > { %v2625_v7 = vsub.f32 %v11176_v24, %v2539_v61  ;;  %3171 = vmatprep.mubr.f32.mxu0 %v2687_v4  ;;  %v8124_v32 = vpack.c.bf16 %v2687_v4, %v2685_v49  ;;  %14830 = vst [vmem:[#allocation109_spill] sm:$0xff] %v11188_v14  ;;  %v11192_v56 = vmul.f32 3.0, %v14831_v31  ;;  %v14833_v61 = vld [vmem:[#allocation110_spill] sm:$0xff] }
 0x52d   : > { %3172 = vmatmul.mubr.f32.gmra.mrb[180].mxu0 %v2686_v13  ;;  %v2688_v52 = vmul.f32 0.5, %v2624_v38 }
 0x52e   : > { %v2543_v18 = vpop.f32.mrb[120].mxu0  ;;  %8125 = vmatprep.subr.bf16.mxu1 %v8124_v32  ;;  %v2689_v19 = vmul.f32 0.5, %v2625_v7  ;;  %14832 = vst [vmem:[#allocation107_spill] sm:$0xff] %v11192_v56  ;;  %v11196_v7 = vmul.f32 3.0, %v14833_v61 }
 0x52f   : > { %v2626_v41 = vsub.f32 %v11180_v46, %v2543_v18  ;;  %v2545_v40 = vpop.f32.mrb[121].mxu0  ;;  %8127 = vmatpush1.bf16.msra.mxu1 %v8126_v35  ;;  %v14835_v46 = vld [vmem:[#allocation108_spill] sm:$0xff] }
 0x530   : > { %v2627_v45 = vsub.f32 %v11184_v63, %v2545_v40  ;;  %3177 = vmatprep.mubr.f32.mxu0 %v2689_v19  ;;  %14834 = vst [vmem:[#allocation110_spill] sm:$0xff] %v11196_v7  ;;  %v11200_v35 = vmul.f32 3.0, %v14835_v46  ;;  %v14837_v63 = vld [vmem:[#allocation111_spill] sm:$0xff] }
 0x531   : > { %3178 = vmatmul.mubr.f32.gmra.mrb[182].mxu0 %v2688_v52  ;;  %v2690_v49 = vmul.f32 0.5, %v2626_v41 }
 0x532   : > { %v2549_v13 = vpop.f32.mrb[122].mxu0  ;;  %v2691_v4 = vmul.f32 0.5, %v2627_v45  ;;  %14836 = vst [vmem:[#allocation108_spill] sm:$0xff] %v11200_v35  ;;  %v11204_v45 = vmul.f32 3.0, %v14837_v63 }
 0x533   : > { %v2628_v10 = vsub.f32 %v11188_v14, %v2549_v13  ;;  %v2551_v32 = vpop.f32.mrb[123].mxu0  ;;  %v8130_v18 = vpack.c.bf16 %v2690_v49, %v2688_v52  ;;  %v14839_v52 = vld [vmem:[#allocation113_spill] sm:$0xff] }
 0x534   : > { %v2629_v38 = vsub.f32 %v11192_v56, %v2551_v32  ;;  %3183 = vmatprep.mubr.f32.mxu0 %v2691_v4  ;;  %v8128_v31 = vpack.c.bf16 %v2691_v4, %v2689_v19  ;;  %14838 = vst [vmem:[#allocation111_spill] sm:$0xff] %v11204_v45  ;;  %v11208_v14 = vmul.f32 3.0, %v14839_v52  ;;  %v14841_v32 = vld [vmem:[#allocation112_spill] sm:$0xff] }
 0x535   : > { %3184 = vmatmul.mubr.f32.gmra.mrb[184].mxu0 %v2690_v49  ;;  %v2692_v13 = vmul.f32 0.5, %v2628_v10 }
 0x536   : > { %v2555_v40 = vpop.f32.mrb[124].mxu0  ;;  %8129 = vmatprep.subr.bf16.mxu1 %v8128_v31  ;;  %v2693_v41 = vmul.f32 0.5, %v2629_v38  ;;  %14840 = vst [vmem:[#allocation113_spill] sm:$0xff] %v11208_v14  ;;  %v11212_v38 = vmul.f32 3.0, %v14841_v32 }
 0x537   : > { %v2630_v61 = vsub.f32 %v11196_v7, %v2555_v40  ;;  %v2557_v24 = vpop.f32.mrb[125].mxu0  ;;  %8131 = vmatpush1.bf16.msra.mxu1 %v8130_v18  ;;  %v14843_v7 = vld [vmem:[#allocation114_spill] sm:$0xff] }
 0x538   : > { %v2631_v46 = vsub.f32 %v11200_v35, %v2557_v24  ;;  %3189 = vmatprep.mubr.f32.mxu0 %v2693_v41  ;;  %14842 = vst [vmem:[#allocation112_spill] sm:$0xff] %v11212_v38  ;;  %v11216_v18 = vmul.f32 3.0, %v14843_v7 }
 0x539   : > { %3190 = vmatmul.mubr.f32.gmra.mrb[186].mxu0 %v2692_v13  ;;  %v2694_v19 = vmul.f32 0.5, %v2630_v61 }
 0x53a   : > { %v2561_v49 = vpop.f32.mrb[126].mxu0  ;;  %v2695_v4 = vmul.f32 0.5, %v2631_v46  ;;  %14844 = vst [vmem:[#allocation114_spill] sm:$0xff] %v11216_v18 }
 0x53b   : > { %v2632_v63 = vsub.f32 %v11204_v45, %v2561_v49  ;;  %v2563_v31 = vpop.f32.mrb[127].mxu0  ;;  %v8134_v40 = vpack.c.bf16 %v2694_v19, %v2692_v13 }
 0x53c   : > { %v2633_v10 = vsub.f32 %v11208_v14, %v2563_v31  ;;  %3195 = vmatprep.mubr.f32.mxu0 %v2695_v4  ;;  %v8132_v52 = vpack.c.bf16 %v2695_v4, %v2693_v41  ;;  %v14845_v41 = vld [vmem:[#allocation40_spill] sm:$0xff]  ;;  %v14847_v4 = vld [vmem:[#allocation38_spill] sm:$0xff] }
 0x53d   : > { %3196 = vmatmul.mubr.f32.gmra.mrb[188].mxu0 %v2694_v19  ;;  %v2696_v32 = vmul.f32 0.5, %v2632_v63  ;;  %v14846_v19 = vld [vmem:[#allocation39_spill] sm:$0xff]  ;;  %v14849_v63 = vld [vmem:[#allocation45_spill] sm:$0xff] }
 0x53e   : > { %v2567_v24 = vpop.f32.mrb[128].mxu0  ;;  %8133 = vmatprep.subr.bf16.mxu1 %v8132_v52  ;;  %v2697_v61 = vmul.f32 0.5, %v2633_v10  ;;  %v14851_v10 = vld [vmem:[#allocation42_spill] sm:$0xff]  ;;  %v14852_v52 = vld [vmem:[#allocation47_spill] sm:$0xff] }
 0x53f   : > { %v2634_v46 = vsub.f32 %v11212_v38, %v2567_v24  ;;  %v2569_v35 = vpop.f32.mrb[129].mxu0  ;;  %8135 = vmatpush1.bf16.msra.mxu1 %v8134_v40  ;;  %v14848_v40 = vld [vmem:[#allocation43_spill] sm:$0xff]  ;;  %v14853_v24 = vld [vmem:[#allocation49_spill] sm:$0xff] }
 0x540   : > { %v2635_v49 = vsub.f32 %v11216_v18, %v2569_v35  ;;  %3201 = vmatprep.mubr.f32.mxu0 %v2697_v61  ;;  %v14850_v35 = vld [vmem:[#allocation44_spill] sm:$0xff] }
 0x541   : > { %3202 = vmatmul.mubr.f32.gmra.mrb[190].mxu0 %v2696_v32  ;;  %v2698_v13 = vmul.f32 0.5, %v2634_v46  ;;  %v14856_v46 = vld [vmem:[#allocation51_spill] sm:$0xff] }
 0x542   : > { %v2699_v7 = vmul.f32 0.5, %v2635_v49  ;;  %v14858_v49 = vld [vmem:[#allocation52_spill] sm:$0xff] }
 0x543   : > { %v8138_v45 = vpack.c.bf16 %v2698_v13, %v2696_v32  ;;  %v14857_v32 = vld [vmem:[#allocation53_spill] sm:$0xff] }
 0x544   : > { %3207 = vmatprep.mubr.f32.mxu0 %v2699_v7  ;;  %v8136_v31 = vpack.c.bf16 %v2699_v7, %v2697_v61  ;;  %v14854_v61 = vld [vmem:[#allocation48_spill] sm:$0xff]  ;;  %v14860_v7 = vld [vmem:[#allocation55_spill] sm:$0xff] }
 0x545   : > { %3208 = vmatmul.mubr.f32.gmra.mrb[192].mxu0 %v2698_v13  ;;  %v14859_v13 = vld [vmem:[#allocation50_spill] sm:$0xff] }
 0x546   : > { %8137 = vmatprep.subr.bf16.mxu1 %v8136_v31  ;;  %v14861_v31 = vld [vmem:[#allocation57_spill] sm:$0xff] }
 0x547   : > { %8139 = vmatpush1.bf16.msra.mxu1 %v8138_v45  ;;  %v14855_v45 = vld [vmem:[#allocation46_spill] sm:$0xff] }
 0x54a   : > { %2765 = vmatmul.mubr.f32.vlgmr.msra.gmra.mrb[96].mxu1 %v14845_v41  ;;  %v14862_v41 = vld [vmem:[#allocation56_spill] sm:$0xff] }
 0x54b   : > { %2770 = vmatprep.mubr.f32.mxu1 %v14846_v19  ;;  %v14863_v19 = vld [vmem:[#allocation54_spill] sm:$0xff] }
 0x54e   : > { %2771 = vmatmul.mubr.f32.gmra.mrb[98].mxu1 %v14847_v4  ;;  %v14864_v4 = vld [vmem:[#allocation59_spill] sm:$0xff] }
 0x54f   : > { %2776 = vmatprep.mubr.f32.mxu1 %v14848_v40  ;;  %v14865_v40 = vld [vmem:[#allocation61_spill] sm:$0xff] }
 0x552   : > { %2777 = vmatmul.mubr.f32.gmra.mrb[100].mxu1 %v14849_v63  ;;  %v14866_v63 = vld [vmem:[#allocation60_spill] sm:$0xff] }
 0x553   : > { %2782 = vmatprep.mubr.f32.mxu1 %v14850_v35  ;;  %v14867_v35 = vld [vmem:[#allocation58_spill] sm:$0xff] }
 0x556   : > { %2783 = vmatmul.mubr.f32.gmra.mrb[102].mxu1 %v14851_v10  ;;  %v14868_v10 = vld [vmem:[#allocation63_spill] sm:$0xff] }
 0x557   : > { %2788 = vmatprep.mubr.f32.mxu1 %v14852_v52  ;;  %v14869_v52 = vld [vmem:[#allocation65_spill] sm:$0xff] }
 0x55a   : > { %2789 = vmatmul.mubr.f32.gmra.mrb[104].mxu1 %v14853_v24  ;;  %v14870_v24 = vld [vmem:[#allocation64_spill] sm:$0xff] }
 0x55b   : > { %2794 = vmatprep.mubr.f32.mxu1 %v14854_v61  ;;  %v14871_v61 = vld [vmem:[#allocation62_spill] sm:$0xff] }
 0x55e   : > { %2795 = vmatmul.mubr.f32.gmra.mrb[106].mxu1 %v14855_v45  ;;  %v14872_v45 = vld [vmem:[#allocation67_spill] sm:$0xff] }
 0x55f   : > { %2800 = vmatprep.mubr.f32.mxu1 %v14856_v46  ;;  %v14873_v46 = vld [vmem:[#allocation69_spill] sm:$0xff] }
 0x562   : > { %2801 = vmatmul.mubr.f32.gmra.mrb[108].mxu1 %v14857_v32  ;;  %v14874_v32 = vld [vmem:[#allocation68_spill] sm:$0xff] }
 0x563   : > { %2806 = vmatprep.mubr.f32.mxu1 %v14858_v49  ;;  %v14875_v49 = vld [vmem:[#allocation66_spill] sm:$0xff] }
 0x566   : > { %2807 = vmatmul.mubr.f32.gmra.mrb[110].mxu1 %v14859_v13  ;;  %v14876_v13 = vld [vmem:[#allocation71_spill] sm:$0xff] }
 0x567   : > { %2812 = vmatprep.mubr.f32.mxu1 %v14860_v7  ;;  %v14877_v7 = vld [vmem:[#allocation73_spill] sm:$0xff] }
 0x56a   : > { %2813 = vmatmul.mubr.f32.gmra.mrb[112].mxu1 %v14861_v31  ;;  %v14878_v31 = vld [vmem:[#allocation72_spill] sm:$0xff] }
 0x56b   : > { %2818 = vmatprep.mubr.f32.mxu1 %v14862_v41  ;;  %v14879_v41 = vld [vmem:[#allocation70_spill] sm:$0xff] }
 0x56e   : > { %2819 = vmatmul.mubr.f32.gmra.mrb[114].mxu1 %v14863_v19  ;;  %v14880_v19 = vld [vmem:[#allocation75_spill] sm:$0xff] }
 0x56f   : > { %2824 = vmatprep.mubr.f32.mxu1 %v14864_v4  ;;  %v14881_v4 = vld [vmem:[#allocation77_spill] sm:$0xff] }
 0x572   : > { %2825 = vmatmul.mubr.f32.gmra.mrb[116].mxu1 %v14865_v40  ;;  %v14882_v40 = vld [vmem:[#allocation76_spill] sm:$0xff] }
 0x573   : > { %2830 = vmatprep.mubr.f32.mxu1 %v14866_v63  ;;  %v14883_v63 = vld [vmem:[#allocation74_spill] sm:$0xff] }
 0x576   : > { %2831 = vmatmul.mubr.f32.gmra.mrb[118].mxu1 %v14867_v35  ;;  %v14884_v35 = vld [vmem:[#allocation79_spill] sm:$0xff] }
 0x577   : > { %2836 = vmatprep.mubr.f32.mxu1 %v14868_v10  ;;  %v14885_v10 = vld [vmem:[#allocation81_spill] sm:$0xff] }
 0x57a   : > { %2837 = vmatmul.mubr.f32.gmra.mrb[120].mxu1 %v14869_v52  ;;  %v14886_v52 = vld [vmem:[#allocation80_spill] sm:$0xff] }
 0x57b   : > { %2842 = vmatprep.mubr.f32.mxu1 %v14870_v24 }
 0x57e   : > { %2843 = vmatmul.mubr.f32.gmra.mrb[122].mxu1 %v14871_v61 }
 0x57f   : > { %2848 = vmatprep.mubr.f32.mxu1 %v14872_v45  ;;  %v14887_v45 = vld [vmem:[#allocation78_spill] sm:$0xff] }
 0x582   : > { %2849 = vmatmul.mubr.f32.gmra.mrb[124].mxu1 %v14873_v46  ;;  %v14888_v46 = vld [vmem:[#allocation83_spill] sm:$0xff] }
 0x583   : > { %2854 = vmatprep.mubr.f32.mxu1 %v14874_v32 }
 0x586   : > { %2855 = vmatmul.mubr.f32.gmra.mrb[126].mxu1 %v14875_v49 }
 0x587   : > { %2860 = vmatprep.mubr.f32.mxu1 %v14876_v13 }
 0x58a   : > { %2861 = vmatmul.mubr.f32.gmra.mrb[128].mxu1 %v14877_v7  ;;  %v14889_v7 = vld [vmem:[#allocation85_spill] sm:$0xff] }
 0x58b   : > { %2866 = vmatprep.mubr.f32.mxu1 %v14878_v31 }
 0x58e   : > { %2867 = vmatmul.mubr.f32.gmra.mrb[130].mxu1 %v14879_v41  ;;  %v14890_v41 = vld [vmem:[#allocation84_spill] sm:$0xff] }
 0x58f   : > { %2872 = vmatprep.mubr.f32.mxu1 %v14880_v19 }
 0x592   : > { %2873 = vmatmul.mubr.f32.gmra.mrb[132].mxu1 %v14881_v4 }
 0x593   : > { %2878 = vmatprep.mubr.f32.mxu1 %v14882_v40  ;;  %v14891_v40 = vld [vmem:[#allocation82_spill] sm:$0xff] }
 0x596   : > { %2879 = vmatmul.mubr.f32.gmra.mrb[134].mxu1 %v14883_v63  ;;  %v14892_v63 = vld [vmem:[#allocation87_spill] sm:$0xff] }
 0x597   : > { %2884 = vmatprep.mubr.f32.mxu1 %v14884_v35 }
 0x59a   : > { %2885 = vmatmul.mubr.f32.gmra.mrb[136].mxu1 %v14885_v10 }
 0x59b   : > { %2890 = vmatprep.mubr.f32.mxu1 %v14886_v52 }
 0x59c   : > { %v11263_v24 = vpop.f32.mrb[130].mxu0 }
 0x59d   : > { %v11265_v61 = vpop.f32.mrb[131].mxu0 }
 0x59e   : > { %2891 = vmatmul.mubr.f32.gmra.mrb[138].mxu1 %v14887_v45  ;;  %v14893_v45 = vld [vmem:[#allocation89_spill] sm:$0xff] }
 0x59f   : > { %2896 = vmatprep.mubr.f32.mxu1 %v14888_v46  ;;  %v14898_v46 = vld [vmem:[#allocation92_spill] sm:$0xff] }
 0x5a0   : > { %v11269_v32 = vpop.f32.mrb[132].mxu0 }
 0x5a1   : > { %v11273_v13 = vpop.f32.mrb[133].mxu0 }
 0x5a2   : > { %2897 = vmatmul.mubr.f32.gmra.mrb[140].mxu1 %v14889_v7  ;;  %v14894_v7 = vld [vmem:[#allocation88_spill] sm:$0xff] }
 0x5a3   : > { %2902 = vmatprep.mubr.f32.mxu1 %v14890_v41 }
 0x5a4   : > { %v11279_v19 = vpop.f32.mrb[134].mxu0 }
 0x5a5   : > { %v11281_v4 = vpop.f32.mrb[135].mxu0 }
 0x5a6   : > { %2903 = vmatmul.mubr.f32.gmra.mrb[142].mxu1 %v14891_v40  ;;  %v14895_v40 = vld [vmem:[#allocation86_spill] sm:$0xff] }
 0x5a7   : > { %2908 = vmatprep.mubr.f32.mxu1 %v14892_v63  ;;  %v14896_v63 = vld [vmem:[#allocation91_spill] sm:$0xff] }
 0x5a8   : > { %v11285_v35 = vpop.f32.mrb[136].mxu0 }
 0x5a9   : > { %v11289_v52 = vpop.f32.mrb[137].mxu0 }
 0x5aa   : > { %2909 = vmatmul.mubr.f32.gmra.mrb[144].mxu1 %v14893_v45  ;;  %v14897_v45 = vld [vmem:[#allocation93_spill] sm:$0xff] }
 0x5ab   : > { %2914 = vmatprep.mubr.f32.mxu1 %v14894_v7  ;;  %v14902_v7 = vld [vmem:[#allocation96_spill] sm:$0xff] }
 0x5ac   : > { %v11295_v41 = vpop.f32.mrb[138].mxu0 }
 0x5ad   : > { %v11297_v49 = vpop.f32.mrb[139].mxu0 }
 0x5ae   : > { %2915 = vmatmul.mubr.f32.gmra.mrb[146].mxu1 %v14895_v40  ;;  %v14899_v40 = vld [vmem:[#allocation90_spill] sm:$0xff] }
 0x5af   : > { %2920 = vmatprep.mubr.f32.mxu1 %v14896_v63  ;;  %v14900_v63 = vld [vmem:[#allocation95_spill] sm:$0xff] }
 0x5b0   : > { %v11301_v31 = vpop.f32.mrb[140].mxu0 }
 0x5b1   : > { %v11305_v18 = vpop.f32.mrb[141].mxu0 }
 0x5b2   : > { %2921 = vmatmul.mubr.f32.gmra.mrb[148].mxu1 %v14897_v45  ;;  %v14901_v45 = vld [vmem:[#allocation97_spill] sm:$0xff] }
 0x5b3   : > { %2926 = vmatprep.mubr.f32.mxu1 %v14898_v46  ;;  %v14906_v46 = vld [vmem:[#allocation100_spill] sm:$0xff] }
 0x5b4   : > { %v11311_v38 = vpop.f32.mrb[142].mxu0 }
 0x5b5   : > { %v11313_v14 = vpop.f32.mrb[143].mxu0 }
 0x5b6   : > { %2927 = vmatmul.mubr.f32.gmra.mrb[150].mxu1 %v14899_v40  ;;  %v14903_v40 = vld [vmem:[#allocation94_spill] sm:$0xff] }
 0x5b7   : > { %2932 = vmatprep.mubr.f32.mxu1 %v14900_v63  ;;  %v14904_v63 = vld [vmem:[#allocation99_spill] sm:$0xff] }
 0x5b8   : > { %v11317_v56 = vpop.f32.mrb[144].mxu0 }
 0x5b9   : > { %v11321_v60 = vpop.f32.mrb[145].mxu0 }
 0x5ba   : > { %2933 = vmatmul.mubr.f32.gmra.mrb[152].mxu1 %v14901_v45  ;;  %v14905_v45 = vld [vmem:[#allocation101_spill] sm:$0xff] }
 0x5bb   : > { %2938 = vmatprep.mubr.f32.mxu1 %v14902_v7 }
 0x5bc   : > { %v11327_v44 = vpop.f32.mrb[146].mxu0 }
 0x5bd   : > { %v11329_v5 = vpop.f32.mrb[147].mxu0 }
 0x5be   : > { %2939 = vmatmul.mubr.f32.gmra.mrb[154].mxu1 %v14903_v40  ;;  %v14907_v40 = vld [vmem:[#allocation98_spill] sm:$0xff] }
 0x5bf   : > { %2944 = vmatprep.mubr.f32.mxu1 %v14904_v63 }
 0x5c0   : > { %v11333_v57 = vpop.f32.mrb[148].mxu0 }
 0x5c1   : > { %v11337_v21 = vpop.f32.mrb[149].mxu0 }
 0x5c2   : > { %2945 = vmatmul.mubr.f32.gmra.mrb[156].mxu1 %v14905_v45 }
 0x5c3   : > { %2950 = vmatprep.mubr.f32.mxu1 %v14906_v46 }
 0x5c4   : > { %v11343_v2 = vpop.f32.mrb[150].mxu0 }
 0x5c5   : > { %v11345_v33 = vpop.f32.mrb[151].mxu0 }
 0x5c6   : > { %2951 = vmatmul.mubr.f32.gmra.mrb[158].mxu1 %v14907_v40 }
 0x5c7   : > { %3278 = vmatprep.mubr.f32.mxu1 %v11265_v61 }
 0x5c8   : > { %v11349_v63 = vpop.f32.mrb[152].mxu0 }
 0x5c9   : > { %v11353_v39 = vpop.f32.mrb[153].mxu0 }
 0x5cc   : > { %v11357_v7 = vpop.f32.mrb[154].mxu0 }
 0x5cd   : > { %v11359_v46 = vpop.f32.mrb[155].mxu0 }
 0x5d0   : > { %v11361_v11 = vpop.f32.mrb[156].mxu0 }
 0x5d1   : > { %v11365_v1 = vpop.f32.mrb[157].mxu0 }
 0x5d4   : > { %v11369_v10 = vpop.f32.mrb[158].mxu0 }
 0x5d5   : > { %v11371_v51 = vpop.f32.mrb[159].mxu0 }
 0x5d8   : > { %v11373_v37 = vpop.f32.mrb[160].mxu0 }
 0x5d9   : > { %v11377_v23 = vpop.f32.mrb[161].mxu0 }
 0x5dc   : > { %v11381_v40 = vpop.f32.mrb[162].mxu0 }
 0x5dd   : > { %v11383_v20 = vpop.f32.mrb[163].mxu0 }
 0x5e0   : > { %v11385_v55 = vpop.f32.mrb[164].mxu0 }
 0x5e1   : > { %v11389_v17 = vpop.f32.mrb[165].mxu0 }
 0x5e4   : > { %v11393_v45 = vpop.f32.mrb[166].mxu0 }
 0x5e5   : > { %v11395_v36 = vpop.f32.mrb[167].mxu0 }
 0x5e8   : > { %v11397_v58 = vpop.f32.mrb[168].mxu0 }
 0x5e9   : > { %v11401_v30 = vpop.f32.mrb[169].mxu0 }
 0x5ec   : > { %v11405_v15 = vpop.f32.mrb[170].mxu0 }
 0x5ed   : > { %v11407_v34 = vpop.f32.mrb[171].mxu0 }
 0x5f0   : > { %v11409_v22 = vpop.f32.mrb[172].mxu0 }
 0x5f1   : > { %v11413_v27 = vpop.f32.mrb[173].mxu0 }
 0x5f4   : > { %v11417_v25 = vpop.f32.mrb[174].mxu0 }
 0x5f5   : > { %v11419_v9 = vpop.f32.mrb[175].mxu0 }
 0x5f8   : > { %v11421_v6 = vpop.f32.mrb[176].mxu0 }
 0x5f9   : > { %v11425_v28 = vpop.f32.mrb[177].mxu0 }
 0x5fc   : > { %v11429_v16 = vpop.f32.mrb[178].mxu0 }
 0x5fd   : > { %14908 = vst [vmem:[#allocation40_spill] sm:$0xff] %v11429_v16  ;;  %v11431_v3 = vpop.f32.mrb[179].mxu0 }
 0x600   : > { %v11433_v29 = vpop.f32.mrb[180].mxu0 }
 0x601   : > { %v11437_v8 = vpop.f32.mrb[181].mxu0 }
 0x604   : > { %v11441_v47 = vpop.f32.mrb[182].mxu0 }
 0x605   : > { %14909 = vst [vmem:[#allocation39_spill] sm:$0xff] %v11441_v47  ;;  %v11443_v48 = vpop.f32.mrb[183].mxu0 }
 0x606   : > { %14910 = vst [vmem:[#allocation38_spill] sm:$0xff] %v11443_v48 }
 0x608   : > { %v11445_v12 = vpop.f32.mrb[184].mxu0 }
 0x609   : > { %14911 = vst [vmem:[#allocation43_spill] sm:$0xff] %v11445_v12  ;;  %v11449_v54 = vpop.f32.mrb[185].mxu0 }
 0x60a   : > { %14912 = vst [vmem:[#allocation45_spill] sm:$0xff] %v11449_v54 }
 0x60c   : > { %v11453_v62 = vpop.f32.mrb[186].mxu0 }
 0x60d   : > { %14913 = vst [vmem:[#allocation44_spill] sm:$0xff] %v11453_v62  ;;  %v11455_v42 = vpop.f32.mrb[187].mxu0 }
 0x60e   : > { %14914 = vst [vmem:[#allocation42_spill] sm:$0xff] %v11455_v42 }
 0x610   : > { %v11457_v50 = vpop.f32.mrb[188].mxu0 }
 0x611   : > { %14915 = vst [vmem:[#allocation47_spill] sm:$0xff] %v11457_v50  ;;  %v11461_v0 = vpop.f32.mrb[189].mxu0 }
 0x612   : > { %14916 = vst [vmem:[#allocation49_spill] sm:$0xff] %v11461_v0 }
 0x614   : > { %v11465_v59 = vpop.f32.mrb[190].mxu0 }
 0x615   : > { %14917 = vst [vmem:[#allocation48_spill] sm:$0xff] %v11465_v59  ;;  %v11467_v47 = vpop.f32.mrb[191].mxu0 }
 0x618   : > { %v11469_v12 = vpop.f32.mrb[192].mxu0 }
 0x619   : > { %14918 = vst [vmem:[#allocation46_spill] sm:$0xff] %v11469_v12  ;;  %v11473_v48 = vpop.f32.mrb[193].mxu0 }
 0x61d   : > { %v11477_v53 = vpop.f32.mrb[96].mxu1 }
 0x61e   : > { %14919 = vst [vmem:[#allocation51_spill] sm:$0xff] %v11477_v53  ;;  %v2768_v62 = vpop.f32.mrb[97].mxu1 }
 0x61f   : > { %3663 = vmatprep.mubr.f32.mxu0 %v2768_v62 }
 0x621   : > { %v11479_v50 = vpop.f32.mrb[98].mxu1 }
 0x622   : > { %14920 = vst [vmem:[#allocation53_spill] sm:$0xff] %v11479_v50  ;;  %v8206_v43 = vpack.c.bf16 %v11479_v50, %v11477_v53  ;;  %v11483_v42 = vpop.f32.mrb[99].mxu1 }
 0x623   : > { %14921 = vst [vmem:[#allocation52_spill] sm:$0xff] %v11483_v42  ;;  %v8204_v0 = vpack.c.bf16 %v11483_v42, %v2768_v62 }
 0x625   : > { %v11486_v16 = vpop.f32.mrb[100].mxu1  ;;  %8205 = vmatprep.subr.bf16.mxu1 %v8204_v0 }
 0x626   : > { %14922 = vst [vmem:[#allocation50_spill] sm:$0xff] %v11486_v16  ;;  %v11488_v26 = vpop.f32.mrb[101].mxu1  ;;  %8207 = vmatpush1.bf16.msra.mxu1 %v8206_v43 }
 0x627   : > { %14923 = vst [vmem:[#allocation55_spill] sm:$0xff] %v11488_v26 }
 0x629   : > { %v11490_v54 = vpop.f32.mrb[102].mxu1 }
 0x62a   : > { %14924 = vst [vmem:[#allocation57_spill] sm:$0xff] %v11490_v54  ;;  %v8210_v59 = vpack.c.bf16 %v11490_v54, %v11486_v16  ;;  %v11494_v12 = vpop.f32.mrb[103].mxu1 }
 0x62b   : > { %14925 = vst [vmem:[#allocation56_spill] sm:$0xff] %v11494_v12  ;;  %v8208_v50 = vpack.c.bf16 %v11494_v12, %v11488_v26 }
 0x62d   : > { %v11498_v53 = vpop.f32.mrb[104].mxu1  ;;  %8209 = vmatprep.subr.bf16.mxu1 %v8208_v50 }
 0x62e   : > { %14926 = vst [vmem:[#allocation54_spill] sm:$0xff] %v11498_v53  ;;  %v11500_v62 = vpop.f32.mrb[105].mxu1  ;;  %8211 = vmatpush1.bf16.msra.mxu1 %v8210_v59 }
 0x62f   : > { %14927 = vst [vmem:[#allocation59_spill] sm:$0xff] %v11500_v62 }
 0x631   : > { %v11502_v0 = vpop.f32.mrb[106].mxu1 }
 0x632   : > { %14928 = vst [vmem:[#allocation61_spill] sm:$0xff] %v11502_v0  ;;  %v8214_v43 = vpack.c.bf16 %v11502_v0, %v11498_v53  ;;  %v11506_v42 = vpop.f32.mrb[107].mxu1 }
 0x633   : > { %14929 = vst [vmem:[#allocation60_spill] sm:$0xff] %v11506_v42  ;;  %v8212_v54 = vpack.c.bf16 %v11506_v42, %v11500_v62 }
 0x635   : > { %v11510_v16 = vpop.f32.mrb[108].mxu1  ;;  %8213 = vmatprep.subr.bf16.mxu1 %v8212_v54 }
 0x636   : > { %14930 = vst [vmem:[#allocation58_spill] sm:$0xff] %v11510_v16  ;;  %v11512_v12 = vpop.f32.mrb[109].mxu1  ;;  %8215 = vmatpush1.bf16.msra.mxu1 %v8214_v43 }
 0x637   : > { %14931 = vst [vmem:[#allocation63_spill] sm:$0xff] %v11512_v12 }
 0x639   : > { %v11514_v50 = vpop.f32.mrb[110].mxu1 }
 0x63a   : > { %14932 = vst [vmem:[#allocation65_spill] sm:$0xff] %v11514_v50  ;;  %v8218_v59 = vpack.c.bf16 %v11514_v50, %v11510_v16  ;;  %v11518_v26 = vpop.f32.mrb[111].mxu1 }
 0x63b   : > { %14933 = vst [vmem:[#allocation64_spill] sm:$0xff] %v11518_v26  ;;  %v8216_v0 = vpack.c.bf16 %v11518_v26, %v11512_v12 }
 0x63d   : > { %v11522_v53 = vpop.f32.mrb[112].mxu1  ;;  %8217 = vmatprep.subr.bf16.mxu1 %v8216_v0 }
 0x63e   : > { %14934 = vst [vmem:[#allocation62_spill] sm:$0xff] %v11522_v53  ;;  %v11524_v42 = vpop.f32.mrb[113].mxu1  ;;  %8219 = vmatpush1.bf16.msra.mxu1 %v8218_v59 }
 0x63f   : > { %14935 = vst [vmem:[#allocation67_spill] sm:$0xff] %v11524_v42 }
 0x641   : > { %v11526_v54 = vpop.f32.mrb[114].mxu1 }
 0x642   : > { %14936 = vst [vmem:[#allocation69_spill] sm:$0xff] %v11526_v54  ;;  %v8222_v43 = vpack.c.bf16 %v11526_v54, %v11522_v53  ;;  %v11530_v62 = vpop.f32.mrb[115].mxu1 }
 0x643   : > { %14937 = vst [vmem:[#allocation68_spill] sm:$0xff] %v11530_v62  ;;  %v8220_v50 = vpack.c.bf16 %v11530_v62, %v11524_v42 }
 0x645   : > { %v11534_v16 = vpop.f32.mrb[116].mxu1  ;;  %8221 = vmatprep.subr.bf16.mxu1 %v8220_v50 }
 0x646   : > { %14938 = vst [vmem:[#allocation66_spill] sm:$0xff] %v11534_v16  ;;  %v11536_v26 = vpop.f32.mrb[117].mxu1  ;;  %8223 = vmatpush1.bf16.msra.mxu1 %v8222_v43 }
 0x647   : > { %14939 = vst [vmem:[#allocation71_spill] sm:$0xff] %v11536_v26 }
 0x649   : > { %v11538_v0 = vpop.f32.mrb[118].mxu1 }
 0x64a   : > { %14940 = vst [vmem:[#allocation73_spill] sm:$0xff] %v11538_v0  ;;  %v8226_v59 = vpack.c.bf16 %v11538_v0, %v11534_v16  ;;  %v11542_v12 = vpop.f32.mrb[119].mxu1 }
 0x64b   : > { %14941 = vst [vmem:[#allocation72_spill] sm:$0xff] %v11542_v12  ;;  %v8224_v54 = vpack.c.bf16 %v11542_v12, %v11536_v26 }
 0x64d   : > { %v11546_v53 = vpop.f32.mrb[120].mxu1  ;;  %8225 = vmatprep.subr.bf16.mxu1 %v8224_v54 }
 0x64e   : > { %14942 = vst [vmem:[#allocation70_spill] sm:$0xff] %v11546_v53  ;;  %v11548_v62 = vpop.f32.mrb[121].mxu1  ;;  %8227 = vmatpush1.bf16.msra.mxu1 %v8226_v59 }
 0x64f   : > { %14943 = vst [vmem:[#allocation75_spill] sm:$0xff] %v11548_v62 }
 0x651   : > { %v11550_v50 = vpop.f32.mrb[122].mxu1 }
 0x652   : > { %14944 = vst [vmem:[#allocation77_spill] sm:$0xff] %v11550_v50  ;;  %v8230_v43 = vpack.c.bf16 %v11550_v50, %v11546_v53  ;;  %v11554_v42 = vpop.f32.mrb[123].mxu1 }
 0x653   : > { %14945 = vst [vmem:[#allocation76_spill] sm:$0xff] %v11554_v42  ;;  %v8228_v0 = vpack.c.bf16 %v11554_v42, %v11548_v62 }
 0x655   : > { %v11558_v16 = vpop.f32.mrb[124].mxu1  ;;  %8229 = vmatprep.subr.bf16.mxu1 %v8228_v0 }
 0x656   : > { %14946 = vst [vmem:[#allocation74_spill] sm:$0xff] %v11558_v16  ;;  %v11560_v12 = vpop.f32.mrb[125].mxu1  ;;  %8231 = vmatpush1.bf16.msra.mxu1 %v8230_v43 }
 0x657   : > { %14947 = vst [vmem:[#allocation79_spill] sm:$0xff] %v11560_v12 }
 0x659   : > { %v11562_v54 = vpop.f32.mrb[126].mxu1 }
 0x65a   : > { %14948 = vst [vmem:[#allocation81_spill] sm:$0xff] %v11562_v54  ;;  %v8234_v59 = vpack.c.bf16 %v11562_v54, %v11558_v16  ;;  %v11566_v26 = vpop.f32.mrb[127].mxu1 }
 0x65b   : > { %14949 = vst [vmem:[#allocation80_spill] sm:$0xff] %v11566_v26  ;;  %v8232_v50 = vpack.c.bf16 %v11566_v26, %v11560_v12 }
 0x65d   : > { %v11570_v53 = vpop.f32.mrb[128].mxu1  ;;  %8233 = vmatprep.subr.bf16.mxu1 %v8232_v50 }
 0x65e   : > { %14950 = vst [vmem:[#allocation78_spill] sm:$0xff] %v11570_v53  ;;  %v11572_v42 = vpop.f32.mrb[129].mxu1  ;;  %8235 = vmatpush1.bf16.msra.mxu1 %v8234_v59 }
 0x65f   : > { %14951 = vst [vmem:[#allocation83_spill] sm:$0xff] %v11572_v42 }
 0x661   : > { %v11574_v0 = vpop.f32.mrb[130].mxu1 }
 0x662   : > { %14952 = vst [vmem:[#allocation85_spill] sm:$0xff] %v11574_v0  ;;  %v8238_v43 = vpack.c.bf16 %v11574_v0, %v11570_v53  ;;  %v11578_v62 = vpop.f32.mrb[131].mxu1 }
 0x663   : > { %14953 = vst [vmem:[#allocation84_spill] sm:$0xff] %v11578_v62  ;;  %v8236_v54 = vpack.c.bf16 %v11578_v62, %v11572_v42 }
 0x665   : > { %v11582_v16 = vpop.f32.mrb[132].mxu1  ;;  %8237 = vmatprep.subr.bf16.mxu1 %v8236_v54 }
 0x666   : > { %14954 = vst [vmem:[#allocation82_spill] sm:$0xff] %v11582_v16  ;;  %v11584_v26 = vpop.f32.mrb[133].mxu1  ;;  %8239 = vmatpush1.bf16.msra.mxu1 %v8238_v43 }
 0x667   : > { %14955 = vst [vmem:[#allocation87_spill] sm:$0xff] %v11584_v26 }
 0x669   : > { %v11586_v50 = vpop.f32.mrb[134].mxu1 }
 0x66a   : > { %14956 = vst [vmem:[#allocation89_spill] sm:$0xff] %v11586_v50  ;;  %v8242_v59 = vpack.c.bf16 %v11586_v50, %v11582_v16  ;;  %v11590_v12 = vpop.f32.mrb[135].mxu1 }
 0x66b   : > { %14957 = vst [vmem:[#allocation88_spill] sm:$0xff] %v11590_v12  ;;  %v8240_v0 = vpack.c.bf16 %v11590_v12, %v11584_v26 }
 0x66d   : > { %v11594_v53 = vpop.f32.mrb[136].mxu1  ;;  %8241 = vmatprep.subr.bf16.mxu1 %v8240_v0 }
 0x66e   : > { %14958 = vst [vmem:[#allocation86_spill] sm:$0xff] %v11594_v53  ;;  %v11596_v62 = vpop.f32.mrb[137].mxu1  ;;  %8243 = vmatpush1.bf16.msra.mxu1 %v8242_v59 }
 0x66f   : > { %14959 = vst [vmem:[#allocation91_spill] sm:$0xff] %v11596_v62 }
 0x671   : > { %v11598_v54 = vpop.f32.mrb[138].mxu1 }
 0x672   : > { %14960 = vst [vmem:[#allocation93_spill] sm:$0xff] %v11598_v54  ;;  %v8246_v43 = vpack.c.bf16 %v11598_v54, %v11594_v53  ;;  %v11602_v42 = vpop.f32.mrb[139].mxu1 }
 0x673   : > { %14961 = vst [vmem:[#allocation92_spill] sm:$0xff] %v11602_v42  ;;  %v8244_v50 = vpack.c.bf16 %v11602_v42, %v11596_v62 }
 0x675   : > { %v11606_v16 = vpop.f32.mrb[140].mxu1  ;;  %8245 = vmatprep.subr.bf16.mxu1 %v8244_v50 }
 0x676   : > { %14962 = vst [vmem:[#allocation90_spill] sm:$0xff] %v11606_v16  ;;  %v11608_v12 = vpop.f32.mrb[141].mxu1  ;;  %8247 = vmatpush1.bf16.msra.mxu1 %v8246_v43 }
 0x677   : > { %14963 = vst [vmem:[#allocation95_spill] sm:$0xff] %v11608_v12 }
 0x679   : > { %v11610_v0 = vpop.f32.mrb[142].mxu1 }
 0x67a   : > { %14964 = vst [vmem:[#allocation97_spill] sm:$0xff] %v11610_v0  ;;  %v8250_v59 = vpack.c.bf16 %v11610_v0, %v11606_v16  ;;  %v11614_v26 = vpop.f32.mrb[143].mxu1 }
 0x67b   : > { %14965 = vst [vmem:[#allocation96_spill] sm:$0xff] %v11614_v26  ;;  %v8248_v54 = vpack.c.bf16 %v11614_v26, %v11608_v12 }
 0x67d   : > { %v11618_v53 = vpop.f32.mrb[144].mxu1  ;;  %8249 = vmatprep.subr.bf16.mxu1 %v8248_v54 }
 0x67e   : > { %14966 = vst [vmem:[#allocation94_spill] sm:$0xff] %v11618_v53  ;;  %v11620_v42 = vpop.f32.mrb[145].mxu1  ;;  %8251 = vmatpush1.bf16.msra.mxu1 %v8250_v59 }
 0x67f   : > { %14967 = vst [vmem:[#allocation99_spill] sm:$0xff] %v11620_v42 }
 0x681   : > { %v11622_v50 = vpop.f32.mrb[146].mxu1 }
 0x682   : > { %14968 = vst [vmem:[#allocation101_spill] sm:$0xff] %v11622_v50  ;;  %v8254_v43 = vpack.c.bf16 %v11622_v50, %v11618_v53  ;;  %v11626_v62 = vpop.f32.mrb[147].mxu1 }
 0x683   : > { %14969 = vst [vmem:[#allocation100_spill] sm:$0xff] %v11626_v62  ;;  %v8252_v0 = vpack.c.bf16 %v11626_v62, %v11620_v42 }
 0x685   : > { %v11630_v16 = vpop.f32.mrb[148].mxu1  ;;  %8253 = vmatprep.subr.bf16.mxu1 %v8252_v0 }
 0x686   : > { %14970 = vst [vmem:[#allocation98_spill] sm:$0xff] %v11630_v16  ;;  %v11632_v26 = vpop.f32.mrb[149].mxu1  ;;  %8255 = vmatpush1.bf16.msra.mxu1 %v8254_v43 }
 0x687   : > { %14971 = vst [vmem:[#allocation166_spill] sm:$0xff] %v11632_v26 }
 0x689   : > { %v11634_v54 = vpop.f32.mrb[150].mxu1 }
 0x68a   : > { %14972 = vst [vmem:[#allocation167_spill] sm:$0xff] %v11634_v54  ;;  %v8258_v59 = vpack.c.bf16 %v11634_v54, %v11630_v16  ;;  %v11638_v12 = vpop.f32.mrb[151].mxu1 }
 0x68b   : > { %14973 = vst [vmem:[#allocation168_spill] sm:$0xff] %v11638_v12  ;;  %v8256_v50 = vpack.c.bf16 %v11638_v12, %v11632_v26 }
 0x68d   : > { %v11642_v53 = vpop.f32.mrb[152].mxu1  ;;  %8257 = vmatprep.subr.bf16.mxu1 %v8256_v50 }
 0x68e   : > { %v11644_v62 = vpop.f32.mrb[153].mxu1  ;;  %8259 = vmatpush1.bf16.msra.mxu1 %v8258_v59 }
 0x691   : > { %v11646_v0 = vpop.f32.mrb[154].mxu1 }
 0x692   : > { %14974 = vst [vmem:[#allocation169_spill] sm:$0xff] %v11646_v0  ;;  %v8262_v43 = vpack.c.bf16 %v11646_v0, %v11642_v53  ;;  %v11650_v42 = vpop.f32.mrb[155].mxu1 }
 0x693   : > { %14975 = vst [vmem:[#allocation170_spill] sm:$0xff] %v11650_v42  ;;  %v8260_v54 = vpack.c.bf16 %v11650_v42, %v11644_v62  ;;  %v14976_v42 = vpack.c.bf16 %v11273_v13, %v11265_v61  ;;  %v14979_v61 = vpack.c.bf16 %v11285_v35, %v11279_v19 }
 0x695   : > { %v11654_v16 = vpop.f32.mrb[156].mxu1  ;;  %8261 = vmatprep.subr.bf16.mxu1 %v8260_v54  ;;  %v14977_v54 = vpack.c.bf16 %v11269_v32, %v11263_v24 }
 0x696   : > { %v11656_v12 = vpop.f32.mrb[157].mxu1  ;;  %8263 = vmatpush1.bf16.msra.mxu1 %v8262_v43  ;;  %v14978_v43 = vpack.c.bf16 %v11289_v52, %v11281_v4 }
 0x699   : > { %v11658_v50 = vpop.f32.mrb[158].mxu1 }
 0x69a   : > { %v8266_v59 = vpack.c.bf16 %v11658_v50, %v11654_v16  ;;  %v11662_v26 = vpop.f32.mrb[159].mxu1 }
 0x69b   : > { %v8264_v0 = vpack.c.bf16 %v11662_v26, %v11656_v12 }
 0x69d   : > { %8265 = vmatprep.subr.bf16.mxu1 %v8264_v0  ;;  %v15003_v0 = vld [vmem:[#allocation45_spill] sm:$0xff] }
 0x69e   : > { %8267 = vmatpush1.bf16.msra.mxu1 %v8266_v59 }
 0x69f   : > { %8333 = vmatprep.subr.bf16.mxu1 %v14976_v42  ;;  %v14980_v42 = vpack.c.bf16 %v11305_v18, %v11297_v49 }
 0x6a1   : > { %3279 = vmatmul.mubr.f32.vlgmr.msra.gmra.mrb[160].mxu1 %v11263_v24  ;;  %v14981_v24 = vpack.c.bf16 %v11301_v31, %v11295_v41 }
 0x6a2   : > { %3284 = vmatprep.mubr.f32.mxu1 %v11273_v13  ;;  %8335 = vmatpush1.bf16.msra.mxu1 %v14977_v54  ;;  %v14983_v13 = vpack.c.bf16 %v11317_v56, %v11311_v38  ;;  %v15007_v54 = vld [vmem:[#allocation39_spill] sm:$0xff] }
 0x6a3   : > { %8337 = vmatprep.subr.bf16.mxu1 %v14978_v43 }
 0x6a5   : > { %3285 = vmatmul.mubr.f32.gmra.mrb[162].mxu1 %v11269_v32  ;;  %v14982_v32 = vpack.c.bf16 %v11321_v60, %v11313_v14 }
 0x6a6   : > { %3290 = vmatprep.mubr.f32.mxu1 %v11281_v4  ;;  %8339 = vmatpush1.bf16.msra.mxu1 %v14979_v61  ;;  %v14985_v4 = vpack.c.bf16 %v11333_v57, %v11327_v44  ;;  %v15009_v61 = vld [vmem:[#allocation49_spill] sm:$0xff] }
 0x6a7   : > { %8341 = vmatprep.subr.bf16.mxu1 %v14980_v42 }
 0x6a9   : > { %3291 = vmatmul.mubr.f32.gmra.mrb[164].mxu1 %v11279_v19  ;;  %v14984_v19 = vpack.c.bf16 %v11337_v21, %v11329_v5 }
 0x6aa   : > { %3296 = vmatprep.mubr.f32.mxu1 %v11289_v52  ;;  %8343 = vmatpush1.bf16.msra.mxu1 %v14981_v24  ;;  %v14988_v52 = vpack.c.bf16 %v11365_v1, %v11359_v46  ;;  %v15013_v24 = vld [vmem:[#allocation44_spill] sm:$0xff] }
 0x6ab   : > { %8345 = vmatprep.subr.bf16.mxu1 %v14982_v32 }
 0x6ad   : > { %3297 = vmatmul.mubr.f32.gmra.mrb[166].mxu1 %v11285_v35  ;;  %v14986_v35 = vpack.c.bf16 %v11353_v39, %v11345_v33 }
 0x6ae   : > { %3302 = vmatprep.mubr.f32.mxu1 %v11297_v49  ;;  %8347 = vmatpush1.bf16.msra.mxu1 %v14983_v13  ;;  %v14987_v49 = vpack.c.bf16 %v11349_v63, %v11343_v2  ;;  %v15017_v13 = vld [vmem:[#allocation48_spill] sm:$0xff] }
 0x6af   : > { %8349 = vmatprep.subr.bf16.mxu1 %v14984_v19 }
 0x6b1   : > { %3303 = vmatmul.mubr.f32.gmra.mrb[168].mxu1 %v11295_v41 }
 0x6b2   : > { %3308 = vmatprep.mubr.f32.mxu1 %v11305_v18  ;;  %8351 = vmatpush1.bf16.msra.mxu1 %v14985_v4  ;;  %v14989_v18 = vpack.c.bf16 %v11361_v11, %v11357_v7 }
 0x6b3   : > { %8353 = vmatprep.subr.bf16.mxu1 %v14986_v35 }
 0x6b5   : > { %3309 = vmatmul.mubr.f32.gmra.mrb[170].mxu1 %v11301_v31  ;;  %v14990_v31 = vpack.c.bf16 %v11377_v23, %v11371_v51 }
 0x6b6   : > { %3314 = vmatprep.mubr.f32.mxu1 %v11313_v14  ;;  %8355 = vmatpush1.bf16.msra.mxu1 %v14987_v49  ;;  %v14991_v14 = vpack.c.bf16 %v11373_v37, %v11369_v10  ;;  %v15025_v49 = vld [vmem:[#allocation121_spill] sm:$0xff] }
 0x6b7   : > { %8357 = vmatprep.subr.bf16.mxu1 %v14988_v52 }
 0x6b9   : > { %3315 = vmatmul.mubr.f32.gmra.mrb[172].mxu1 %v11311_v38  ;;  %v14992_v38 = vpack.c.bf16 %v11389_v17, %v11383_v20 }
 0x6ba   : > { %3320 = vmatprep.mubr.f32.mxu1 %v11321_v60  ;;  %8359 = vmatpush1.bf16.msra.mxu1 %v14989_v18  ;;  %v14993_v60 = vpack.c.bf16 %v11385_v55, %v11381_v40 }
 0x6bb   : > { %8361 = vmatprep.subr.bf16.mxu1 %v14990_v31 }
 0x6bd   : > { %3321 = vmatmul.mubr.f32.gmra.mrb[174].mxu1 %v11317_v56  ;;  %v14994_v56 = vpack.c.bf16 %v11401_v30, %v11395_v36 }
 0x6be   : > { %3326 = vmatprep.mubr.f32.mxu1 %v11329_v5  ;;  %8363 = vmatpush1.bf16.msra.mxu1 %v14991_v14  ;;  %v14995_v5 = vpack.c.bf16 %v11397_v58, %v11393_v45  ;;  %v15026_v14 = vld [vmem:[#allocation122_spill] sm:$0xff] }
 0x6bf   : > { %8365 = vmatprep.subr.bf16.mxu1 %v14992_v38 }
 0x6c1   : > { %3327 = vmatmul.mubr.f32.gmra.mrb[176].mxu1 %v11327_v44  ;;  %v14996_v44 = vpack.c.bf16 %v11413_v27, %v11407_v34 }
 0x6c2   : > { %3332 = vmatprep.mubr.f32.mxu1 %v11337_v21  ;;  %8367 = vmatpush1.bf16.msra.mxu1 %v14993_v60  ;;  %v14997_v21 = vpack.c.bf16 %v11409_v22, %v11405_v15 }
 0x6c3   : > { %8369 = vmatprep.subr.bf16.mxu1 %v14994_v56 }
 0x6c5   : > { %3333 = vmatmul.mubr.f32.gmra.mrb[178].mxu1 %v11333_v57  ;;  %v14998_v57 = vpack.c.bf16 %v11425_v28, %v11419_v9 }
 0x6c6   : > { %3338 = vmatprep.mubr.f32.mxu1 %v11345_v33  ;;  %8371 = vmatpush1.bf16.msra.mxu1 %v14995_v5  ;;  %v14999_v33 = vpack.c.bf16 %v11421_v6, %v11417_v25 }
 0x6c7   : > { %8373 = vmatprep.subr.bf16.mxu1 %v14996_v44  ;;  %v15027_v44 = vld [vmem:[#allocation123_spill] sm:$0xff] }
 0x6c9   : > { %3339 = vmatmul.mubr.f32.gmra.mrb[180].mxu1 %v11343_v2  ;;  %v15000_v2 = vpack.c.bf16 %v11437_v8, %v11431_v3 }
 0x6ca   : > { %3344 = vmatprep.mubr.f32.mxu1 %v11353_v39  ;;  %8375 = vmatpush1.bf16.msra.mxu1 %v14997_v21  ;;  %v15001_v39 = vld [vmem:[#allocation40_spill] sm:$0xff] }
 0x6cb   : > { %8377 = vmatprep.subr.bf16.mxu1 %v14998_v57  ;;  %v15002_v41 = vpack.c.bf16 %v11433_v29, %v15001_v39 }
 0x6cd   : > { %3345 = vmatmul.mubr.f32.gmra.mrb[182].mxu1 %v11349_v63  ;;  %v15004_v63 = vld [vmem:[#allocation38_spill] sm:$0xff] }
 0x6ce   : > { %3350 = vmatprep.mubr.f32.mxu1 %v11359_v46  ;;  %8379 = vmatpush1.bf16.msra.mxu1 %v14999_v33  ;;  %v15005_v59 = vpack.c.bf16 %v15003_v0, %v15004_v63  ;;  %v15006_v46 = vld [vmem:[#allocation43_spill] sm:$0xff] }
 0x6cf   : > { %8381 = vmatprep.subr.bf16.mxu1 %v15000_v2  ;;  %v15008_v43 = vpack.c.bf16 %v15006_v46, %v15007_v54  ;;  %v15028_v2 = vld [vmem:[#allocation124_spill] sm:$0xff] }
 0x6d1   : > { %3351 = vmatmul.mubr.f32.gmra.mrb[184].mxu1 %v11357_v7  ;;  %v15010_v7 = vld [vmem:[#allocation42_spill] sm:$0xff] }
 0x6d2   : > { %3356 = vmatprep.mubr.f32.mxu1 %v11365_v1  ;;  %8383 = vmatpush1.bf16.msra.mxu1 %v15002_v41  ;;  %v15011_v42 = vpack.c.bf16 %v15009_v61, %v15010_v7  ;;  %v15012_v1 = vld [vmem:[#allocation47_spill] sm:$0xff] }
 0x6d3   : > { %8385 = vmatprep.subr.bf16.mxu1 %v15005_v59  ;;  %v15014_v32 = vpack.c.bf16 %v15012_v1, %v15013_v24  ;;  %v15029_v59 = vld [vmem:[#allocation125_spill] sm:$0xff] }
 0x6d5   : > { %3357 = vmatmul.mubr.f32.gmra.mrb[186].mxu1 %v11361_v11  ;;  %v15015_v11 = vpack.c.bf16 %v11473_v48, %v11467_v47 }
 0x6d6   : > { %3362 = vmatprep.mubr.f32.mxu1 %v11371_v51  ;;  %8387 = vmatpush1.bf16.msra.mxu1 %v15008_v43  ;;  %v15016_v51 = vld [vmem:[#allocation46_spill] sm:$0xff] }
 0x6d7   : > { %8389 = vmatprep.subr.bf16.mxu1 %v15011_v42  ;;  %v15018_v19 = vpack.c.bf16 %v15016_v51, %v15017_v13 }
 0x6d9   : > { %3363 = vmatmul.mubr.f32.gmra.mrb[188].mxu1 %v11369_v10  ;;  %v15024_v10 = vld [vmem:[#allocation120_spill] sm:$0xff] }
 0x6da   : > { %3368 = vmatprep.mubr.f32.mxu1 %v11377_v23  ;;  %8391 = vmatpush1.bf16.msra.mxu1 %v15014_v32  ;;  %v15031_v32 = vld [vmem:[#allocation127_spill] sm:$0xff] }
 0x6db   : > { %8393 = vmatprep.subr.bf16.mxu1 %v15015_v11 }
 0x6dd   : > { %3369 = vmatmul.mubr.f32.gmra.mrb[190].mxu1 %v11373_v37 }
 0x6de   : > { %3374 = vmatprep.mubr.f32.mxu1 %v11383_v20  ;;  %8395 = vmatpush1.bf16.msra.mxu1 %v15018_v19  ;;  %v15032_v19 = vld [vmem:[#allocation128_spill] sm:$0xff] }
 0x6e1   : > { %3375 = vmatmul.mubr.f32.gmra.mrb[192].mxu1 %v11381_v40 }
 0x6e2   : > { %3380 = vmatprep.mubr.f32.mxu1 %v11389_v17  ;;  %v15022_v17 = vld [vmem:[#allocation118_spill] sm:$0xff] }
 0x6e5   : > { %3381 = vmatmul.mubr.f32.gmra.mrb[194].mxu1 %v11385_v55 }
 0x6e6   : > { %3386 = vmatprep.mubr.f32.mxu1 %v11395_v36 }
 0x6e9   : > { %3387 = vmatmul.mubr.f32.gmra.mrb[196].mxu1 %v11393_v45 }
 0x6ea   : > { %3392 = vmatprep.mubr.f32.mxu1 %v11401_v30  ;;  %v15021_v30 = vld [vmem:[#allocation117_spill] sm:$0xff] }
 0x6ed   : > { %3393 = vmatmul.mubr.f32.gmra.mrb[198].mxu1 %v11397_v58 }
 0x6ee   : > { %3398 = vmatprep.mubr.f32.mxu1 %v11407_v34 }
 0x6f1   : > { %3399 = vmatmul.mubr.f32.gmra.mrb[200].mxu1 %v11405_v15 }
 0x6f2   : > { %3404 = vmatprep.mubr.f32.mxu1 %v11413_v27 }
 0x6f5   : > { %3405 = vmatmul.mubr.f32.gmra.mrb[202].mxu1 %v11409_v22 }
 0x6f6   : > { %3410 = vmatprep.mubr.f32.mxu1 %v11419_v9 }
 0x6f9   : > { %3411 = vmatmul.mubr.f32.gmra.mrb[204].mxu1 %v11417_v25  ;;  %v15023_v25 = vld [vmem:[#allocation119_spill] sm:$0xff] }
 0x6fa   : > { %3416 = vmatprep.mubr.f32.mxu1 %v11425_v28 }
 0x6fd   : > { %3417 = vmatmul.mubr.f32.gmra.mrb[206].mxu1 %v11421_v6  ;;  %v15020_v6 = vld [vmem:[#allocation116_spill] sm:$0xff] }
 0x6fe   : > { %3422 = vmatprep.mubr.f32.mxu1 %v11431_v3 }
 0x701   : > { %3423 = vmatmul.mubr.f32.gmra.mrb[208].mxu1 %v15001_v39 }
 0x702   : > { %3428 = vmatprep.mubr.f32.mxu1 %v11437_v8 }
 0x705   : > { %3429 = vmatmul.mubr.f32.gmra.mrb[210].mxu1 %v11433_v29  ;;  %v15019_v29 = vld [vmem:[#allocation115_spill] sm:$0xff] }
 0x706   : > { %3434 = vmatprep.mubr.f32.mxu1 %v15004_v63 }
 0x709   : > { %3435 = vmatmul.mubr.f32.gmra.mrb[212].mxu1 %v15007_v54 }
 0x70a   : > { %3440 = vmatprep.mubr.f32.mxu1 %v15003_v0 }
 0x70d   : > { %3441 = vmatmul.mubr.f32.gmra.mrb[214].mxu1 %v15006_v46 }
 0x70e   : > { %3446 = vmatprep.mubr.f32.mxu1 %v15010_v7 }
 0x711   : > { %3447 = vmatmul.mubr.f32.gmra.mrb[216].mxu1 %v15013_v24 }
 0x712   : > { %3452 = vmatprep.mubr.f32.mxu1 %v15009_v61  ;;  %v15030_v61 = vld [vmem:[#allocation126_spill] sm:$0xff] }
 0x715   : > { %3453 = vmatmul.mubr.f32.gmra.mrb[218].mxu1 %v15012_v1 }
 0x716   : > { %3458 = vmatprep.mubr.f32.mxu1 %v11467_v47 }
 0x719   : > { %3459 = vmatmul.mubr.f32.gmra.mrb[220].mxu1 %v15017_v13 }
 0x71a   : > { %3464 = vmatprep.mubr.f32.mxu1 %v11473_v48 }
 0x71d   : > { %3465 = vmatmul.mubr.f32.gmra.mrb[222].mxu1 %v15016_v51 }
 0x774   : > { %v3280_v8 = vpop.f32.mrb[160].mxu1 }
 0x775   : > { %v3471_v3 = vsub.f32 %v15019_v29, %v3280_v8  ;;  %v3282_v28 = vpop.f32.mrb[161].mxu1 }
 0x776   : > { %v3472_v9 = vsub.f32 %v15020_v6, %v3282_v28 }
 0x777   : > { %v3535_v34 = vmul.f32 0.5, %v3471_v3 }
 0x778   : > { %v3286_v27 = vpop.f32.mrb[162].mxu1  ;;  %v3536_v22 = vmul.f32 0.5, %v3472_v9 }
 0x779   : > { %v3473_v58 = vsub.f32 %v15021_v30, %v3286_v27  ;;  %v3288_v36 = vpop.f32.mrb[163].mxu1  ;;  %v15033_v27 = vld [vmem:[#allocation129_spill] sm:$0xff] }
 0x77a   : > { %v3474_v47 = vsub.f32 %v15022_v17, %v3288_v36  ;;  %3920 = vmatprep.mubr.f32.mxu1 %v3536_v22  ;;  %v15034_v36 = vld [vmem:[#allocation130_spill] sm:$0xff] }
 0x77b   : > { %3921 = vmatmul.mubr.f32.vlgmr.msra.gmra.mrb[224].mxu1 %v3535_v34  ;;  %v3537_v55 = vmul.f32 0.5, %v3473_v58 }
 0x77c   : > { %v3292_v48 = vpop.f32.mrb[164].mxu1  ;;  %v3538_v20 = vmul.f32 0.5, %v3474_v47 }
 0x77d   : > { %v3475_v23 = vsub.f32 %v15023_v25, %v3292_v48  ;;  %v3294_v37 = vpop.f32.mrb[165].mxu1  ;;  %v8270_v15 = vpack.c.bf16 %v3537_v55, %v3535_v34 }
 0x77e   : > { %v3476_v45 = vsub.f32 %v15024_v10, %v3294_v37  ;;  %3926 = vmatprep.mubr.f32.mxu1 %v3538_v20  ;;  %v8268_v40 = vpack.c.bf16 %v3538_v20, %v3536_v22 }
 0x77f   : > { %3927 = vmatmul.mubr.f32.gmra.mrb[226].mxu1 %v3537_v55  ;;  %v3539_v31 = vmul.f32 0.5, %v3475_v23  ;;  %v15035_v23 = vld [vmem:[#allocation131_spill] sm:$0xff] }
 0x780   : > { %v3298_v4 = vpop.f32.mrb[166].mxu1  ;;  %8269 = vmatprep.subr.bf16.mxu0 %v8268_v40  ;;  %v3540_v35 = vmul.f32 0.5, %v3476_v45  ;;  %v15036_v40 = vld [vmem:[#allocation132_spill] sm:$0xff] }
 0x781   : > { %v3477_v52 = vsub.f32 %v15025_v49, %v3298_v4  ;;  %v3300_v18 = vpop.f32.mrb[167].mxu1  ;;  %8271 = vmatpush1.bf16.msra.mxu0 %v8270_v15 }
 0x782   : > { %v3478_v38 = vsub.f32 %v15026_v14, %v3300_v18  ;;  %3932 = vmatprep.mubr.f32.mxu1 %v3540_v35 }
 0x783   : > { %3933 = vmatmul.mubr.f32.gmra.mrb[228].mxu1 %v3539_v31  ;;  %v3541_v60 = vmul.f32 0.5, %v3477_v52 }
 0x784   : > { %v3304_v56 = vpop.f32.mrb[168].mxu1  ;;  %v3542_v5 = vmul.f32 0.5, %v3478_v38 }
 0x785   : > { %v3479_v21 = vsub.f32 %v15027_v44, %v3304_v56  ;;  %v3306_v57 = vpop.f32.mrb[169].mxu1  ;;  %v8274_v33 = vpack.c.bf16 %v3541_v60, %v3539_v31  ;;  %v15037_v31 = vld [vmem:[#allocation133_spill] sm:$0xff] }
 0x786   : > { %v3480_v39 = vsub.f32 %v15028_v2, %v3306_v57  ;;  %3938 = vmatprep.mubr.f32.mxu1 %v3542_v5  ;;  %v8272_v41 = vpack.c.bf16 %v3542_v5, %v3540_v35  ;;  %v15038_v5 = vld [vmem:[#allocation134_spill] sm:$0xff] }
 0x787   : > { %3939 = vmatmul.mubr.f32.gmra.mrb[230].mxu1 %v3541_v60  ;;  %v3543_v43 = vmul.f32 0.5, %v3479_v21 }
 0x788   : > { %v3310_v0 = vpop.f32.mrb[170].mxu1  ;;  %8273 = vmatprep.subr.bf16.mxu0 %v8272_v41  ;;  %v3544_v63 = vmul.f32 0.5, %v3480_v39  ;;  %v15039_v41 = vld [vmem:[#allocation135_spill] sm:$0xff] }
 0x789   : > { %v3481_v46 = vsub.f32 %v15029_v59, %v3310_v0  ;;  %v3312_v54 = vpop.f32.mrb[171].mxu1  ;;  %8275 = vmatpush1.bf16.msra.mxu0 %v8274_v33 }
 0x78a   : > { %v3482_v7 = vsub.f32 %v15030_v61, %v3312_v54  ;;  %3944 = vmatprep.mubr.f32.mxu1 %v3544_v63  ;;  %v15040_v54 = vld [vmem:[#allocation136_spill] sm:$0xff] }
 0x78b   : > { %3945 = vmatmul.mubr.f32.gmra.mrb[232].mxu1 %v3543_v43  ;;  %v3545_v42 = vmul.f32 0.5, %v3481_v46 }
 0x78c   : > { %v3316_v1 = vpop.f32.mrb[172].mxu1  ;;  %v3546_v24 = vmul.f32 0.5, %v3482_v7 }
 0x78d   : > { %v3483_v11 = vsub.f32 %v15031_v32, %v3316_v1  ;;  %v3318_v51 = vpop.f32.mrb[173].mxu1  ;;  %v8278_v13 = vpack.c.bf16 %v3545_v42, %v3543_v43 }
 0x78e   : > { %v3484_v8 = vsub.f32 %v15032_v19, %v3318_v51  ;;  %3950 = vmatprep.mubr.f32.mxu1 %v3546_v24  ;;  %v8276_v3 = vpack.c.bf16 %v3546_v24, %v3544_v63  ;;  %v15041_v24 = vld [vmem:[#allocation137_spill] sm:$0xff] }
 0x78f   : > { %3951 = vmatmul.mubr.f32.gmra.mrb[234].mxu1 %v3545_v42  ;;  %v3547_v58 = vmul.f32 0.5, %v3483_v11 }
 0x790   : > { %v3322_v28 = vpop.f32.mrb[174].mxu1  ;;  %8277 = vmatprep.subr.bf16.mxu0 %v8276_v3  ;;  %v3548_v9 = vmul.f32 0.5, %v3484_v8  ;;  %v15042_v8 = vld [vmem:[#allocation138_spill] sm:$0xff] }
 0x791   : > { %v3485_v22 = vsub.f32 %v15033_v27, %v3322_v28  ;;  %v3324_v34 = vpop.f32.mrb[175].mxu1  ;;  %8279 = vmatpush1.bf16.msra.mxu0 %v8278_v13 }
 0x792   : > { %v3486_v47 = vsub.f32 %v15034_v36, %v3324_v34  ;;  %3956 = vmatprep.mubr.f32.mxu1 %v3548_v9  ;;  %v15043_v34 = vld [vmem:[#allocation139_spill] sm:$0xff] }
 0x793   : > { %3957 = vmatmul.mubr.f32.gmra.mrb[236].mxu1 %v3547_v58  ;;  %v3549_v55 = vmul.f32 0.5, %v3485_v22 }
 0x794   : > { %v3328_v48 = vpop.f32.mrb[176].mxu1  ;;  %v3550_v20 = vmul.f32 0.5, %v3486_v47 }
 0x795   : > { %v3487_v37 = vsub.f32 %v15035_v23, %v3328_v48  ;;  %v3330_v15 = vpop.f32.mrb[177].mxu1  ;;  %v8282_v45 = vpack.c.bf16 %v3549_v55, %v3547_v58  ;;  %v15044_v48 = vld [vmem:[#allocation140_spill] sm:$0xff] }
 0x796   : > { %v3488_v4 = vsub.f32 %v15036_v40, %v3330_v15  ;;  %3962 = vmatprep.mubr.f32.mxu1 %v3550_v20  ;;  %v8280_v35 = vpack.c.bf16 %v3550_v20, %v3548_v9 }
 0x797   : > { %3963 = vmatmul.mubr.f32.gmra.mrb[238].mxu1 %v3549_v55  ;;  %v3551_v56 = vmul.f32 0.5, %v3487_v37 }
 0x798   : > { %v3334_v52 = vpop.f32.mrb[178].mxu1  ;;  %8281 = vmatprep.subr.bf16.mxu0 %v8280_v35  ;;  %v3552_v18 = vmul.f32 0.5, %v3488_v4  ;;  %v15045_v4 = vld [vmem:[#allocation141_spill] sm:$0xff] }
 0x799   : > { %v3489_v38 = vsub.f32 %v15037_v31, %v3334_v52  ;;  %v3336_v60 = vpop.f32.mrb[179].mxu1  ;;  %8283 = vmatpush1.bf16.msra.mxu0 %v8282_v45 }
 0x79a   : > { %v3490_v21 = vsub.f32 %v15038_v5, %v3336_v60  ;;  %3968 = vmatprep.mubr.f32.mxu1 %v3552_v18 }
 0x79b   : > { %3969 = vmatmul.mubr.f32.gmra.mrb[240].mxu1 %v3551_v56  ;;  %v3553_v57 = vmul.f32 0.5, %v3489_v38  ;;  %v15046_v38 = vld [vmem:[#allocation142_spill] sm:$0xff] }
 0x79c   : > { %v3340_v33 = vpop.f32.mrb[180].mxu1  ;;  %v3554_v39 = vmul.f32 0.5, %v3490_v21 }
 0x79d   : > { %v3491_v0 = vsub.f32 %v15039_v41, %v3340_v33  ;;  %v3342_v63 = vpop.f32.mrb[181].mxu1  ;;  %v8286_v46 = vpack.c.bf16 %v3553_v57, %v3551_v56  ;;  %v15047_v33 = vld [vmem:[#allocation143_spill] sm:$0xff] }
 0x79e   : > { %v3492_v43 = vsub.f32 %v15040_v54, %v3342_v63  ;;  %3974 = vmatprep.mubr.f32.mxu1 %v3554_v39  ;;  %v8284_v7 = vpack.c.bf16 %v3554_v39, %v3552_v18 }
 0x79f   : > { %3975 = vmatmul.mubr.f32.gmra.mrb[242].mxu1 %v3553_v57  ;;  %v3555_v13 = vmul.f32 0.5, %v3491_v0 }
 0x7a0   : > { %v3346_v42 = vpop.f32.mrb[182].mxu1  ;;  %8285 = vmatprep.subr.bf16.mxu0 %v8284_v7  ;;  %v3556_v1 = vmul.f32 0.5, %v3492_v43 }
 0x7a1   : > { %v3493_v11 = vsub.f32 %v15041_v24, %v3346_v42  ;;  %v3348_v51 = vpop.f32.mrb[183].mxu1  ;;  %8287 = vmatpush1.bf16.msra.mxu0 %v8286_v46  ;;  %v15048_v46 = vld [vmem:[#allocation144_spill] sm:$0xff] }
 0x7a2   : > { %v3494_v3 = vsub.f32 %v15042_v8, %v3348_v51  ;;  %3980 = vmatprep.mubr.f32.mxu1 %v3556_v1 }
 0x7a3   : > { %3981 = vmatmul.mubr.f32.gmra.mrb[244].mxu1 %v3555_v13  ;;  %v3557_v28 = vmul.f32 0.5, %v3493_v11  ;;  %v15049_v11 = vld [vmem:[#allocation145_spill] sm:$0xff] }
 0x7a4   : > { %v3352_v9 = vpop.f32.mrb[184].mxu1  ;;  %v3558_v22 = vmul.f32 0.5, %v3494_v3 }
 0x7a5   : > { %v3495_v58 = vsub.f32 %v15043_v34, %v3352_v9  ;;  %v3354_v47 = vpop.f32.mrb[185].mxu1  ;;  %v8290_v55 = vpack.c.bf16 %v3557_v28, %v3555_v13 }
 0x7a6   : > { %v3496_v20 = vsub.f32 %v15044_v48, %v3354_v47  ;;  %3986 = vmatprep.mubr.f32.mxu1 %v3558_v22  ;;  %v8288_v37 = vpack.c.bf16 %v3558_v22, %v3556_v1 }
 0x7a7   : > { %3987 = vmatmul.mubr.f32.gmra.mrb[246].mxu1 %v3557_v28  ;;  %v3559_v18 = vmul.f32 0.5, %v3495_v58  ;;  %v15050_v28 = vld [vmem:[#allocation146_spill] sm:$0xff] }
 0x7a8   : > { %v3358_v15 = vpop.f32.mrb[186].mxu1  ;;  %8289 = vmatprep.subr.bf16.mxu0 %v8288_v37  ;;  %v3560_v45 = vmul.f32 0.5, %v3496_v20 }
 0x7a9   : > { %v3497_v35 = vsub.f32 %v15045_v4, %v3358_v15  ;;  %v3360_v52 = vpop.f32.mrb[187].mxu1  ;;  %8291 = vmatpush1.bf16.msra.mxu0 %v8290_v55  ;;  %v15051_v55 = vld [vmem:[#allocation147_spill] sm:$0xff] }
 0x7aa   : > { %v3498_v60 = vsub.f32 %v15046_v38, %v3360_v52  ;;  %3992 = vmatprep.mubr.f32.mxu1 %v3560_v45 }
 0x7ab   : > { %3993 = vmatmul.mubr.f32.gmra.mrb[248].mxu1 %v3559_v18  ;;  %v3561_v56 = vmul.f32 0.5, %v3497_v35 }
 0x7ac   : > { %v3364_v21 = vpop.f32.mrb[188].mxu1  ;;  %v3562_v57 = vmul.f32 0.5, %v3498_v60 }
 0x7ad   : > { %v3499_v39 = vsub.f32 %v15047_v33, %v3364_v21  ;;  %v3366_v0 = vpop.f32.mrb[189].mxu1  ;;  %v8294_v63 = vpack.c.bf16 %v3561_v56, %v3559_v18  ;;  %v15053_v21 = vld [vmem:[#allocation149_spill] sm:$0xff] }
 0x7ae   : > { %v3500_v43 = vsub.f32 %v15048_v46, %v3366_v0  ;;  %3998 = vmatprep.mubr.f32.mxu1 %v3562_v57  ;;  %v8292_v7 = vpack.c.bf16 %v3562_v57, %v3560_v45  ;;  %v15052_v45 = vld [vmem:[#allocation148_spill] sm:$0xff]  ;;  %v15054_v0 = vld [vmem:[#allocation150_spill] sm:$0xff] }
 0x7af   : > { %3999 = vmatmul.mubr.f32.gmra.mrb[250].mxu1 %v3561_v56  ;;  %v3563_v3 = vmul.f32 0.5, %v3499_v39 }
 0x7b0   : > { %v3370_v42 = vpop.f32.mrb[190].mxu1  ;;  %8293 = vmatprep.subr.bf16.mxu0 %v8292_v7  ;;  %v3564_v1 = vmul.f32 0.5, %v3500_v43 }
 0x7b1   : > { %v3501_v51 = vsub.f32 %v15049_v11, %v3370_v42  ;;  %v3372_v13 = vpop.f32.mrb[191].mxu1  ;;  %8295 = vmatpush1.bf16.msra.mxu0 %v8294_v63 }
 0x7b2   : > { %v3502_v9 = vsub.f32 %v15050_v28, %v3372_v13  ;;  %4004 = vmatprep.mubr.f32.mxu1 %v3564_v1  ;;  %v15055_v13 = vld [vmem:[#allocation151_spill] sm:$0xff] }
 0x7b3   : > { %4005 = vmatmul.mubr.f32.gmra.mrb[252].mxu1 %v3563_v3  ;;  %v3565_v22 = vmul.f32 0.5, %v3501_v51 }
 0x7b4   : > { %v3376_v58 = vpop.f32.mrb[192].mxu1  ;;  %v3566_v47 = vmul.f32 0.5, %v3502_v9  ;;  %v15056_v9 = vld [vmem:[#allocation152_spill] sm:$0xff] }
 0x7b5   : > { %v3503_v20 = vsub.f32 %v15051_v55, %v3376_v58  ;;  %v3378_v37 = vpop.f32.mrb[193].mxu1  ;;  %v8298_v15 = vpack.c.bf16 %v3565_v22, %v3563_v3 }
 0x7b6   : > { %v3504_v35 = vsub.f32 %v15052_v45, %v3378_v37  ;;  %4010 = vmatprep.mubr.f32.mxu1 %v3566_v47  ;;  %v8296_v52 = vpack.c.bf16 %v3566_v47, %v3564_v1 }
 0x7b7   : > { %4011 = vmatmul.mubr.f32.gmra.mrb[254].mxu1 %v3565_v22  ;;  %v3567_v56 = vmul.f32 0.5, %v3503_v20 }
 0x7b8   : > { %v3382_v18 = vpop.f32.mrb[194].mxu1  ;;  %8297 = vmatprep.subr.bf16.mxu0 %v8296_v52  ;;  %v3568_v60 = vmul.f32 0.5, %v3504_v35 }
 0x7b9   : > { %v3505_v57 = vsub.f32 %v15053_v21, %v3382_v18  ;;  %v3384_v39 = vpop.f32.mrb[195].mxu1  ;;  %8299 = vmatpush1.bf16.msra.mxu0 %v8298_v15  ;;  %v15057_v15 = vld [vmem:[#allocation153_spill] sm:$0xff]  ;;  %v15058_v18 = vld [vmem:[#allocation154_spill] sm:$0xff] }
 0x7ba   : > { %v3506_v63 = vsub.f32 %v15054_v0, %v3384_v39  ;;  %4016 = vmatprep.mubr.f32.mxu1 %v3568_v60 }
 0x7bb   : > { %v3569_v43 = vmul.f32 0.5, %v3505_v57  ;;  %4017 = vmatmul.mubr.f32.gmra.mrb[0].mxu1 %v3567_v56 }
 0x7bc   : > { %v3388_v7 = vpop.f32.mrb[196].mxu1  ;;  %v3570_v42 = vmul.f32 0.5, %v3506_v63 }
 0x7bd   : > { %v8302_v51 = vpack.c.bf16 %v3569_v43, %v3567_v56  ;;  %v3507_v3 = vsub.f32 %v15055_v13, %v3388_v7  ;;  %v3390_v1 = vpop.f32.mrb[197].mxu1 }
 0x7be   : > { %v3508_v22 = vsub.f32 %v15056_v9, %v3390_v1  ;;  %4022 = vmatprep.mubr.f32.mxu1 %v3570_v42  ;;  %v8300_v58 = vpack.c.bf16 %v3570_v42, %v3568_v60  ;;  %v15059_v1 = vld [vmem:[#allocation155_spill] sm:$0xff] }
 0x7bf   : > { %4023 = vmatmul.mubr.f32.gmra.mrb[2].mxu1 %v3569_v43  ;;  %v3571_v37 = vmul.f32 0.5, %v3507_v3  ;;  %v15060_v43 = vld [vmem:[#allocation102_spill] sm:$0xff] }
 0x7c0   : > { %v3394_v47 = vpop.f32.mrb[198].mxu1  ;;  %8301 = vmatprep.subr.bf16.mxu0 %v8300_v58  ;;  %v3572_v20 = vmul.f32 0.5, %v3508_v22 }
 0x7c1   : > { %v3509_v35 = vsub.f32 %v15057_v15, %v3394_v47  ;;  %v3396_v52 = vpop.f32.mrb[199].mxu1  ;;  %8303 = vmatpush1.bf16.msra.mxu0 %v8302_v51  ;;  %v15061_v47 = vld [vmem:[#allocation156_spill] sm:$0xff] }
 0x7c2   : > { %v3510_v57 = vsub.f32 %v15058_v18, %v3396_v52  ;;  %4028 = vmatprep.mubr.f32.mxu1 %v3572_v20 }
 0x7c3   : > { %v3573_v56 = vmul.f32 0.5, %v3509_v35  ;;  %4029 = vmatmul.mubr.f32.gmra.mrb[4].mxu1 %v3571_v37  ;;  %v15062_v35 = vld [vmem:[#allocation157_spill] sm:$0xff] }
 0x7c4   : > { %v3400_v39 = vpop.f32.mrb[200].mxu1  ;;  %v3574_v63 = vmul.f32 0.5, %v3510_v57 }
 0x7c5   : > { %v8306_v7 = vpack.c.bf16 %v3573_v56, %v3571_v37  ;;  %v3511_v9 = vsub.f32 %v15059_v1, %v3400_v39  ;;  %v3402_v60 = vpop.f32.mrb[201].mxu1 }
 0x7c6   : > { %v3512_v42 = vsub.f32 %v15060_v43, %v3402_v60  ;;  %4034 = vmatprep.mubr.f32.mxu1 %v3574_v63  ;;  %v8304_v22 = vpack.c.bf16 %v3574_v63, %v3572_v20  ;;  %v15063_v60 = vld [vmem:[#allocation158_spill] sm:$0xff] }
 0x7c7   : > { %4035 = vmatmul.mubr.f32.gmra.mrb[6].mxu1 %v3573_v56  ;;  %v3575_v51 = vmul.f32 0.5, %v3511_v9  ;;  %v15064_v56 = vld [vmem:[#allocation159_spill] sm:$0xff] }
 0x7c8   : > { %v3406_v3 = vpop.f32.mrb[202].mxu1  ;;  %8305 = vmatprep.subr.bf16.mxu0 %v8304_v22  ;;  %v3576_v58 = vmul.f32 0.5, %v3512_v42 }
 0x7c9   : > { %v3513_v52 = vsub.f32 %v15061_v47, %v3406_v3  ;;  %v3408_v18 = vpop.f32.mrb[203].mxu1  ;;  %8307 = vmatpush1.bf16.msra.mxu0 %v8306_v7  ;;  %v15065_v3 = vld [vmem:[#allocation160_spill] sm:$0xff] }
 0x7ca   : > { %v3514_v15 = vsub.f32 %v15062_v35, %v3408_v18  ;;  %4040 = vmatprep.mubr.f32.mxu1 %v3576_v58 }
 0x7cb   : > { %v3577_v37 = vmul.f32 0.5, %v3513_v52  ;;  %4041 = vmatmul.mubr.f32.gmra.mrb[8].mxu1 %v3575_v51  ;;  %v15066_v52 = vld [vmem:[#allocation161_spill] sm:$0xff] }
 0x7cc   : > { %v3412_v57 = vpop.f32.mrb[204].mxu1  ;;  %v3578_v39 = vmul.f32 0.5, %v3514_v15 }
 0x7cd   : > { %v8310_v1 = vpack.c.bf16 %v3577_v37, %v3575_v51  ;;  %v3515_v43 = vsub.f32 %v15063_v60, %v3412_v57  ;;  %v3414_v20 = vpop.f32.mrb[205].mxu1 }
 0x7ce   : > { %v3516_v63 = vsub.f32 %v15064_v56, %v3414_v20  ;;  %4046 = vmatprep.mubr.f32.mxu1 %v3578_v39  ;;  %v8308_v42 = vpack.c.bf16 %v3578_v39, %v3576_v58  ;;  %v15067_v20 = vld [vmem:[#allocation162_spill] sm:$0xff] }
 0x7cf   : > { %4047 = vmatmul.mubr.f32.gmra.mrb[10].mxu1 %v3577_v37  ;;  %v3579_v7 = vmul.f32 0.5, %v3515_v43  ;;  %v15068_v37 = vld [vmem:[#allocation163_spill] sm:$0xff] }
 0x7d0   : > { %v3418_v9 = vpop.f32.mrb[206].mxu1  ;;  %8309 = vmatprep.subr.bf16.mxu0 %v8308_v42  ;;  %v3580_v22 = vmul.f32 0.5, %v3516_v63 }
 0x7d1   : > { %v3517_v18 = vsub.f32 %v15065_v3, %v3418_v9  ;;  %v3420_v35 = vpop.f32.mrb[207].mxu1  ;;  %8311 = vmatpush1.bf16.msra.mxu0 %v8310_v1  ;;  %v15069_v9 = vld [vmem:[#allocation164_spill] sm:$0xff] }
 0x7d2   : > { %v3518_v47 = vsub.f32 %v15066_v52, %v3420_v35  ;;  %4052 = vmatprep.mubr.f32.mxu1 %v3580_v22 }
 0x7d3   : > { %v3581_v15 = vmul.f32 0.5, %v3517_v18  ;;  %4053 = vmatmul.mubr.f32.gmra.mrb[12].mxu1 %v3579_v7  ;;  %v15070_v18 = vld [vmem:[#allocation165_spill] sm:$0xff] }
 0x7d4   : > { %v3424_v51 = vpop.f32.mrb[208].mxu1  ;;  %v3582_v57 = vmul.f32 0.5, %v3518_v47 }
 0x7d5   : > { %v8314_v60 = vpack.c.bf16 %v3581_v15, %v3579_v7  ;;  %v3519_v56 = vsub.f32 %v15067_v20, %v3424_v51  ;;  %v3426_v58 = vpop.f32.mrb[209].mxu1 }
 0x7d6   : > { %v3520_v39 = vsub.f32 %v15068_v37, %v3426_v58  ;;  %4058 = vmatprep.mubr.f32.mxu1 %v3582_v57  ;;  %v8312_v63 = vpack.c.bf16 %v3582_v57, %v3580_v22  ;;  %v15071_v58 = vld [vmem:[#allocation105_spill] sm:$0xff] }
 0x7d7   : > { %4059 = vmatmul.mubr.f32.gmra.mrb[14].mxu1 %v3581_v15  ;;  %v3583_v1 = vmul.f32 0.5, %v3519_v56  ;;  %v15072_v15 = vld [vmem:[#allocation103_spill] sm:$0xff] }
 0x7d8   : > { %v3430_v43 = vpop.f32.mrb[210].mxu1  ;;  %8313 = vmatprep.subr.bf16.mxu0 %v8312_v63  ;;  %v3584_v42 = vmul.f32 0.5, %v3520_v39 }
 0x7d9   : > { %v3521_v35 = vsub.f32 %v15069_v9, %v3430_v43  ;;  %v3432_v52 = vpop.f32.mrb[211].mxu1  ;;  %8315 = vmatpush1.bf16.msra.mxu0 %v8314_v60  ;;  %v15073_v43 = vld [vmem:[#allocation106_spill] sm:$0xff] }
 0x7da   : > { %v3522_v3 = vsub.f32 %v15070_v18, %v3432_v52  ;;  %4064 = vmatprep.mubr.f32.mxu1 %v3584_v42 }
 0x7db   : > { %v3585_v47 = vmul.f32 0.5, %v3521_v35  ;;  %4065 = vmatmul.mubr.f32.gmra.mrb[16].mxu1 %v3583_v1  ;;  %v15074_v35 = vld [vmem:[#allocation104_spill] sm:$0xff] }
 0x7dc   : > { %v3436_v7 = vpop.f32.mrb[212].mxu1  ;;  %v3586_v51 = vmul.f32 0.5, %v3522_v3 }
 0x7dd   : > { %v8318_v20 = vpack.c.bf16 %v3585_v47, %v3583_v1  ;;  %v3523_v37 = vsub.f32 %v15071_v58, %v3436_v7  ;;  %v3438_v22 = vpop.f32.mrb[213].mxu1 }
 0x7de   : > { %v3524_v57 = vsub.f32 %v15072_v15, %v3438_v22  ;;  %4070 = vmatprep.mubr.f32.mxu1 %v3586_v51  ;;  %v8316_v39 = vpack.c.bf16 %v3586_v51, %v3584_v42  ;;  %v15075_v22 = vld [vmem:[#allocation109_spill] sm:$0xff] }
 0x7df   : > { %4071 = vmatmul.mubr.f32.gmra.mrb[18].mxu1 %v3585_v47  ;;  %v3587_v60 = vmul.f32 0.5, %v3523_v37  ;;  %v15076_v47 = vld [vmem:[#allocation107_spill] sm:$0xff] }
 0x7e0   : > { %v3442_v56 = vpop.f32.mrb[214].mxu1  ;;  %8317 = vmatprep.subr.bf16.mxu0 %v8316_v39  ;;  %v3588_v63 = vmul.f32 0.5, %v3524_v57 }
 0x7e1   : > { %v3525_v52 = vsub.f32 %v15073_v43, %v3442_v56  ;;  %v3444_v18 = vpop.f32.mrb[215].mxu1  ;;  %8319 = vmatpush1.bf16.msra.mxu0 %v8318_v20  ;;  %v15077_v56 = vld [vmem:[#allocation110_spill] sm:$0xff] }
 0x7e2   : > { %v3526_v9 = vsub.f32 %v15074_v35, %v3444_v18  ;;  %4076 = vmatprep.mubr.f32.mxu1 %v3588_v63 }
 0x7e3   : > { %v3589_v3 = vmul.f32 0.5, %v3525_v52  ;;  %4077 = vmatmul.mubr.f32.gmra.mrb[20].mxu1 %v3587_v60  ;;  %v15078_v52 = vld [vmem:[#allocation108_spill] sm:$0xff] }
 0x7e4   : > { %v3448_v1 = vpop.f32.mrb[216].mxu1  ;;  %v3590_v7 = vmul.f32 0.5, %v3526_v9 }
 0x7e5   : > { %v8322_v58 = vpack.c.bf16 %v3589_v3, %v3587_v60  ;;  %v3527_v15 = vsub.f32 %v15075_v22, %v3448_v1  ;;  %v3450_v42 = vpop.f32.mrb[217].mxu1 }
 0x7e6   : > { %v3528_v51 = vsub.f32 %v15076_v47, %v3450_v42  ;;  %4082 = vmatprep.mubr.f32.mxu1 %v3590_v7  ;;  %v8320_v57 = vpack.c.bf16 %v3590_v7, %v3588_v63  ;;  %v15079_v42 = vld [vmem:[#allocation111_spill] sm:$0xff] }
 0x7e7   : > { %4083 = vmatmul.mubr.f32.gmra.mrb[22].mxu1 %v3589_v3  ;;  %v3591_v20 = vmul.f32 0.5, %v3527_v15  ;;  %v15080_v3 = vld [vmem:[#allocation113_spill] sm:$0xff] }
 0x7e8   : > { %v3454_v37 = vpop.f32.mrb[218].mxu1  ;;  %8321 = vmatprep.subr.bf16.mxu0 %v8320_v57  ;;  %v3592_v39 = vmul.f32 0.5, %v3528_v51 }
 0x7e9   : > { %v3529_v18 = vsub.f32 %v15077_v56, %v3454_v37  ;;  %v3456_v35 = vpop.f32.mrb[219].mxu1  ;;  %8323 = vmatpush1.bf16.msra.mxu0 %v8322_v58  ;;  %v15081_v37 = vld [vmem:[#allocation112_spill] sm:$0xff] }
 0x7ea   : > { %v3530_v43 = vsub.f32 %v15078_v52, %v3456_v35  ;;  %4088 = vmatprep.mubr.f32.mxu1 %v3592_v39 }
 0x7eb   : > { %v3593_v9 = vmul.f32 0.5, %v3529_v18  ;;  %4089 = vmatmul.mubr.f32.gmra.mrb[24].mxu1 %v3591_v20  ;;  %v15082_v18 = vld [vmem:[#allocation114_spill] sm:$0xff] }
 0x7ec   : > { %v3460_v60 = vpop.f32.mrb[220].mxu1  ;;  %v3594_v1 = vmul.f32 0.5, %v3530_v43 }
 0x7ed   : > { %v8326_v22 = vpack.c.bf16 %v3593_v9, %v3591_v20  ;;  %v3531_v47 = vsub.f32 %v15079_v42, %v3460_v60  ;;  %v3462_v63 = vpop.f32.mrb[221].mxu1 }
 0x7ee   : > { %v3532_v7 = vsub.f32 %v15080_v3, %v3462_v63  ;;  %4094 = vmatprep.mubr.f32.mxu1 %v3594_v1  ;;  %v8324_v51 = vpack.c.bf16 %v3594_v1, %v3592_v39  ;;  %v15083_v39 = vld [vmem:[#allocation51_spill] sm:$0xff] }
 0x7ef   : > { %4095 = vmatmul.mubr.f32.gmra.mrb[26].mxu1 %v3593_v9  ;;  %v3595_v58 = vmul.f32 0.5, %v3531_v47  ;;  %v15084_v9 = vld [vmem:[#allocation52_spill] sm:$0xff]  ;;  %v15085_v47 = vld [vmem:[#allocation53_spill] sm:$0xff]  ;;  %v15086_v1 = vld [vmem:[#allocation55_spill] sm:$0xff] }
 0x7f0   : > { %v3466_v15 = vpop.f32.mrb[222].mxu1  ;;  %8325 = vmatprep.subr.bf16.mxu0 %v8324_v51  ;;  %v3596_v57 = vmul.f32 0.5, %v3532_v7  ;;  %v15089_v7 = vld [vmem:[#allocation57_spill] sm:$0xff]  ;;  %v15091_v51 = vld [vmem:[#allocation54_spill] sm:$0xff] }
 0x7f1   : > { %v3533_v35 = vsub.f32 %v15081_v37, %v3466_v15  ;;  %v3468_v52 = vpop.f32.mrb[223].mxu1  ;;  %8327 = vmatpush1.bf16.msra.mxu0 %v8326_v22  ;;  %v15087_v22 = vld [vmem:[#allocation50_spill] sm:$0xff]  ;;  %v15092_v15 = vld [vmem:[#allocation60_spill] sm:$0xff] }
 0x7f2   : > { %v3534_v56 = vsub.f32 %v15082_v18, %v3468_v52  ;;  %4100 = vmatprep.mubr.f32.mxu1 %v3596_v57  ;;  %v15088_v52 = vld [vmem:[#allocation56_spill] sm:$0xff] }
 0x7f3   : > { %v3597_v43 = vmul.f32 0.5, %v3533_v35  ;;  %4101 = vmatmul.mubr.f32.gmra.mrb[28].mxu1 %v3595_v58  ;;  %v15095_v35 = vld [vmem:[#allocation58_spill] sm:$0xff] }
 0x7f4   : > { %v3598_v20 = vmul.f32 0.5, %v3534_v56  ;;  %v15090_v56 = vld [vmem:[#allocation59_spill] sm:$0xff] }
 0x7f5   : > { %v8330_v60 = vpack.c.bf16 %v3597_v43, %v3595_v58  ;;  %v15094_v58 = vld [vmem:[#allocation63_spill] sm:$0xff] }
 0x7f6   : > { %4106 = vmatprep.mubr.f32.mxu1 %v3598_v20  ;;  %v8328_v63 = vpack.c.bf16 %v3598_v20, %v3596_v57  ;;  %v15093_v57 = vld [vmem:[#allocation61_spill] sm:$0xff] }
 0x7f7   : > { %4107 = vmatmul.mubr.f32.gmra.mrb[30].mxu1 %v3597_v43  ;;  %v15096_v43 = vld [vmem:[#allocation64_spill] sm:$0xff]  ;;  %v15097_v20 = vld [vmem:[#allocation65_spill] sm:$0xff] }
 0x7f8   : > { %8329 = vmatprep.subr.bf16.mxu0 %v8328_v63  ;;  %v15099_v63 = vld [vmem:[#allocation62_spill] sm:$0xff] }
 0x7f9   : > { %8331 = vmatpush1.bf16.msra.mxu0 %v8330_v60  ;;  %v15098_v60 = vld [vmem:[#allocation67_spill] sm:$0xff] }
 0x7fc   : > { %3664 = vmatmul.mubr.f32.vlgmr.msra.gmra.mrb[194].mxu0 %v15083_v39  ;;  %v15100_v39 = vld [vmem:[#allocation68_spill] sm:$0xff] }
 0x7fd   : > { %3669 = vmatprep.mubr.f32.mxu0 %v15084_v9  ;;  %v15101_v9 = vld [vmem:[#allocation69_spill] sm:$0xff] }
 0x800   : > { %3670 = vmatmul.mubr.f32.gmra.mrb[196].mxu0 %v15085_v47  ;;  %v15102_v47 = vld [vmem:[#allocation71_spill] sm:$0xff] }
 0x801   : > { %3675 = vmatprep.mubr.f32.mxu0 %v15086_v1  ;;  %v15103_v1 = vld [vmem:[#allocation66_spill] sm:$0xff] }
 0x804   : > { %3676 = vmatmul.mubr.f32.gmra.mrb[198].mxu0 %v15087_v22  ;;  %v15104_v22 = vld [vmem:[#allocation72_spill] sm:$0xff] }
 0x805   : > { %3681 = vmatprep.mubr.f32.mxu0 %v15088_v52  ;;  %v15105_v52 = vld [vmem:[#allocation73_spill] sm:$0xff] }
 0x808   : > { %3682 = vmatmul.mubr.f32.gmra.mrb[200].mxu0 %v15089_v7  ;;  %v15106_v7 = vld [vmem:[#allocation75_spill] sm:$0xff] }
 0x809   : > { %3687 = vmatprep.mubr.f32.mxu0 %v15090_v56  ;;  %v15107_v56 = vld [vmem:[#allocation70_spill] sm:$0xff] }
 0x80c   : > { %3688 = vmatmul.mubr.f32.gmra.mrb[202].mxu0 %v15091_v51  ;;  %v15108_v51 = vld [vmem:[#allocation76_spill] sm:$0xff] }
 0x80d   : > { %3693 = vmatprep.mubr.f32.mxu0 %v15092_v15  ;;  %v15109_v15 = vld [vmem:[#allocation77_spill] sm:$0xff] }
 0x810   : > { %3694 = vmatmul.mubr.f32.gmra.mrb[204].mxu0 %v15093_v57  ;;  %v15110_v57 = vld [vmem:[#allocation79_spill] sm:$0xff] }
 0x811   : > { %3699 = vmatprep.mubr.f32.mxu0 %v15094_v58  ;;  %v15111_v58 = vld [vmem:[#allocation74_spill] sm:$0xff] }
 0x814   : > { %3700 = vmatmul.mubr.f32.gmra.mrb[206].mxu0 %v15095_v35  ;;  %v15112_v35 = vld [vmem:[#allocation80_spill] sm:$0xff] }
 0x815   : > { %3705 = vmatprep.mubr.f32.mxu0 %v15096_v43  ;;  %v15113_v43 = vld [vmem:[#allocation81_spill] sm:$0xff] }
 0x818   : > { %3706 = vmatmul.mubr.f32.gmra.mrb[208].mxu0 %v15097_v20  ;;  %v15114_v20 = vld [vmem:[#allocation83_spill] sm:$0xff] }
 0x819   : > { %3711 = vmatprep.mubr.f32.mxu0 %v15098_v60  ;;  %v15115_v60 = vld [vmem:[#allocation78_spill] sm:$0xff] }
 0x81c   : > { %3712 = vmatmul.mubr.f32.gmra.mrb[210].mxu0 %v15099_v63  ;;  %v15116_v63 = vld [vmem:[#allocation84_spill] sm:$0xff] }
 0x81d   : > { %3717 = vmatprep.mubr.f32.mxu0 %v15100_v39  ;;  %v15117_v39 = vld [vmem:[#allocation85_spill] sm:$0xff] }
 0x820   : > { %3718 = vmatmul.mubr.f32.gmra.mrb[212].mxu0 %v15101_v9  ;;  %v15118_v9 = vld [vmem:[#allocation87_spill] sm:$0xff] }
 0x821   : > { %3723 = vmatprep.mubr.f32.mxu0 %v15102_v47  ;;  %v15119_v47 = vld [vmem:[#allocation82_spill] sm:$0xff] }
 0x824   : > { %3724 = vmatmul.mubr.f32.gmra.mrb[214].mxu0 %v15103_v1  ;;  %v15120_v1 = vld [vmem:[#allocation88_spill] sm:$0xff] }
 0x825   : > { %3729 = vmatprep.mubr.f32.mxu0 %v15104_v22  ;;  %v15121_v22 = vld [vmem:[#allocation89_spill] sm:$0xff] }
 0x828   : > { %3730 = vmatmul.mubr.f32.gmra.mrb[216].mxu0 %v15105_v52  ;;  %v15122_v52 = vld [vmem:[#allocation91_spill] sm:$0xff] }
 0x829   : > { %3735 = vmatprep.mubr.f32.mxu0 %v15106_v7  ;;  %v15123_v7 = vld [vmem:[#allocation86_spill] sm:$0xff] }
 0x82c   : > { %3736 = vmatmul.mubr.f32.gmra.mrb[218].mxu0 %v15107_v56  ;;  %v15124_v56 = vld [vmem:[#allocation92_spill] sm:$0xff] }
 0x82d   : > { %3741 = vmatprep.mubr.f32.mxu0 %v15108_v51 }
 0x830   : > { %3742 = vmatmul.mubr.f32.gmra.mrb[220].mxu0 %v15109_v15 }
 0x831   : > { %3747 = vmatprep.mubr.f32.mxu0 %v15110_v57  ;;  %v15125_v57 = vld [vmem:[#allocation93_spill] sm:$0xff] }
 0x834   : > { %3748 = vmatmul.mubr.f32.gmra.mrb[222].mxu0 %v15111_v58  ;;  %v15126_v58 = vld [vmem:[#allocation95_spill] sm:$0xff] }
 0x835   : > { %3753 = vmatprep.mubr.f32.mxu0 %v15112_v35 }
 0x838   : > { %3754 = vmatmul.mubr.f32.gmra.mrb[224].mxu0 %v15113_v43 }
 0x839   : > { %3759 = vmatprep.mubr.f32.mxu0 %v15114_v20 }
 0x83c   : > { %3760 = vmatmul.mubr.f32.gmra.mrb[226].mxu0 %v15115_v60  ;;  %v15127_v60 = vld [vmem:[#allocation90_spill] sm:$0xff] }
 0x83d   : > { %3765 = vmatprep.mubr.f32.mxu0 %v15116_v63 }
 0x840   : > { %3766 = vmatmul.mubr.f32.gmra.mrb[228].mxu0 %v15117_v39  ;;  %v15128_v39 = vld [vmem:[#allocation96_spill] sm:$0xff] }
 0x841   : > { %3771 = vmatprep.mubr.f32.mxu0 %v15118_v9 }
 0x844   : > { %3772 = vmatmul.mubr.f32.gmra.mrb[230].mxu0 %v15119_v47 }
 0x845   : > { %3777 = vmatprep.mubr.f32.mxu0 %v15120_v1  ;;  %v15129_v1 = vld [vmem:[#allocation97_spill] sm:$0xff] }
 0x848   : > { %3778 = vmatmul.mubr.f32.gmra.mrb[232].mxu0 %v15121_v22  ;;  %v15130_v22 = vld [vmem:[#allocation99_spill] sm:$0xff] }
 0x849   : > { %3783 = vmatprep.mubr.f32.mxu0 %v15122_v52 }
 0x84c   : > { %3784 = vmatmul.mubr.f32.gmra.mrb[234].mxu0 %v15123_v7 }
 0x84d   : > { %3789 = vmatprep.mubr.f32.mxu0 %v15124_v56 }
 0x84e   : > { %v11931_v51 = vpop.f32.mrb[224].mxu1 }
 0x84f   : > { %v11933_v15 = vpop.f32.mrb[225].mxu1 }
 0x850   : > { %3790 = vmatmul.mubr.f32.gmra.mrb[236].mxu0 %v15125_v57  ;;  %v15131_v57 = vld [vmem:[#allocation94_spill] sm:$0xff] }
 0x851   : > { %3795 = vmatprep.mubr.f32.mxu0 %v15126_v58  ;;  %v15136_v58 = vld [vmem:[#allocation168_spill] sm:$0xff] }
 0x852   : > { %v11937_v35 = vpop.f32.mrb[226].mxu1 }
 0x853   : > { %v11941_v20 = vpop.f32.mrb[227].mxu1 }
 0x854   : > { %3796 = vmatmul.mubr.f32.gmra.mrb[238].mxu0 %v15127_v60  ;;  %v15132_v60 = vld [vmem:[#allocation100_spill] sm:$0xff] }
 0x855   : > { %3801 = vmatprep.mubr.f32.mxu0 %v15128_v39 }
 0x856   : > { %v11947_v9 = vpop.f32.mrb[228].mxu1 }
 0x857   : > { %v11949_v47 = vpop.f32.mrb[229].mxu1 }
 0x858   : > { %3802 = vmatmul.mubr.f32.gmra.mrb[240].mxu0 %v15129_v1  ;;  %v15133_v1 = vld [vmem:[#allocation101_spill] sm:$0xff] }
 0x859   : > { %3807 = vmatprep.mubr.f32.mxu0 %v15130_v22  ;;  %v15134_v22 = vld [vmem:[#allocation166_spill] sm:$0xff] }
 0x85a   : > { %v11953_v52 = vpop.f32.mrb[230].mxu1 }
 0x85b   : > { %v11957_v56 = vpop.f32.mrb[231].mxu1 }
 0x85c   : > { %3808 = vmatmul.mubr.f32.gmra.mrb[242].mxu0 %v15131_v57  ;;  %v15135_v57 = vld [vmem:[#allocation98_spill] sm:$0xff] }
 0x85d   : > { %3813 = vmatprep.mubr.f32.mxu0 %v15132_v60 }
 0x85e   : > { %v11963_v39 = vpop.f32.mrb[232].mxu1 }
 0x85f   : > { %v11965_v43 = vpop.f32.mrb[233].mxu1 }
 0x860   : > { %3814 = vmatmul.mubr.f32.gmra.mrb[244].mxu0 %v15133_v1  ;;  %v15137_v1 = vld [vmem:[#allocation167_spill] sm:$0xff] }
 0x861   : > { %3819 = vmatprep.mubr.f32.mxu0 %v15134_v22 }
 0x862   : > { %v11969_v63 = vpop.f32.mrb[234].mxu1 }
 0x863   : > { %v11973_v18 = vpop.f32.mrb[235].mxu1 }
 0x864   : > { %3820 = vmatmul.mubr.f32.gmra.mrb[246].mxu0 %v15135_v57  ;;  %v15138_v57 = vld [vmem:[#allocation170_spill] sm:$0xff] }
 0x865   : > { %3825 = vmatprep.mubr.f32.mxu0 %v15136_v58 }
 0x866   : > { %v11979_v37 = vpop.f32.mrb[236].mxu1 }
 0x867   : > { %v11981_v3 = vpop.f32.mrb[237].mxu1 }
 0x868   : > { %3826 = vmatmul.mubr.f32.gmra.mrb[248].mxu0 %v15137_v1  ;;  %v15139_v1 = vld [vmem:[#allocation169_spill] sm:$0xff] }
 0x869   : > { %3831 = vmatprep.mubr.f32.mxu0 %v11644_v62 }
 0x86a   : > { %v11985_v22 = vpop.f32.mrb[238].mxu1 }
 0x86b   : > { %v11989_v42 = vpop.f32.mrb[239].mxu1 }
 0x86c   : > { %3832 = vmatmul.mubr.f32.gmra.mrb[250].mxu0 %v11642_v53 }
 0x86d   : > { %3837 = vmatprep.mubr.f32.mxu0 %v15138_v57 }
 0x86e   : > { %v11995_v60 = vpop.f32.mrb[240].mxu1 }
 0x86f   : > { %v11997_v13 = vpop.f32.mrb[241].mxu1 }
 0x870   : > { %3838 = vmatmul.mubr.f32.gmra.mrb[252].mxu0 %v15139_v1 }
 0x871   : > { %3843 = vmatprep.mubr.f32.mxu0 %v11656_v12 }
 0x872   : > { %v12001_v62 = vpop.f32.mrb[242].mxu1 }
 0x873   : > { %v12005_v0 = vpop.f32.mrb[243].mxu1 }
 0x874   : > { %3844 = vmatmul.mubr.f32.gmra.mrb[254].mxu0 %v11654_v16 }
 0x875   : > { %3849 = vmatprep.mubr.f32.mxu0 %v11662_v26 }
 0x876   : > { %v12011_v57 = vpop.f32.mrb[244].mxu1 }
 0x877   : > { %v12013_v58 = vpop.f32.mrb[245].mxu1 }
 0x878   : > { %3850 = vmatmul.mubr.f32.gmra.mrb[0].mxu0 %v11658_v50 }
 0x879   : > { %4177 = vmatprep.mubr.f32.mxu0 %v11933_v15 }
 0x87a   : > { %v12017_v12 = vpop.f32.mrb[246].mxu1 }
 0x87b   : > { %v12021_v7 = vpop.f32.mrb[247].mxu1 }
 0x87e   : > { %v12025_v53 = vpop.f32.mrb[248].mxu1 }
 0x87f   : > { %v12027_v26 = vpop.f32.mrb[249].mxu1 }
 0x882   : > { %v12029_v21 = vpop.f32.mrb[250].mxu1 }
 0x883   : > { %v12033_v45 = vpop.f32.mrb[251].mxu1 }
 0x886   : > { %v12037_v1 = vpop.f32.mrb[252].mxu1 }
 0x887   : > { %v12039_v28 = vpop.f32.mrb[253].mxu1 }
 0x88a   : > { %v12041_v11 = vpop.f32.mrb[254].mxu1 }
 0x88b   : > { %v12045_v46 = vpop.f32.mrb[255].mxu1 }
 0x88e   : > { %v12049_v50 = vpop.f32.mrb[0].mxu1 }
 0x88f   : > { %v12051_v38 = vpop.f32.mrb[1].mxu1 }
 0x892   : > { %v12053_v4 = vpop.f32.mrb[2].mxu1 }
 0x893   : > { %v12057_v48 = vpop.f32.mrb[3].mxu1 }
 0x896   : > { %v12061_v16 = vpop.f32.mrb[4].mxu1 }
 0x897   : > { %v12063_v8 = vpop.f32.mrb[5].mxu1 }
 0x89a   : > { %v12065_v24 = vpop.f32.mrb[6].mxu1 }
 0x89b   : > { %v12069_v54 = vpop.f32.mrb[7].mxu1 }
 0x89e   : > { %v12073_v55 = vpop.f32.mrb[8].mxu1 }
 0x89f   : > { %v12075_v5 = vpop.f32.mrb[9].mxu1 }
 0x8a2   : > { %v12077_v31 = vpop.f32.mrb[10].mxu1 }
 0x8a3   : > { %v12081_v40 = vpop.f32.mrb[11].mxu1 }
 0x8a6   : > { %v12085_v33 = vpop.f32.mrb[12].mxu1 }
 0x8a7   : > { %v12087_v36 = vpop.f32.mrb[13].mxu1 }
 0x8aa   : > { %v12089_v27 = vpop.f32.mrb[14].mxu1 }
 0x8ab   : > { %v12093_v19 = vpop.f32.mrb[15].mxu1 }
 0x8ae   : > { %v12097_v34 = vpop.f32.mrb[16].mxu1 }
 0x8af   : > { %15140 = vst [vmem:[#allocation40_spill] sm:$0xff] %v12097_v34  ;;  %v12099_v61 = vpop.f32.mrb[17].mxu1 }
 0x8b2   : > { %v12101_v59 = vpop.f32.mrb[18].mxu1 }
 0x8b3   : > { %v12105_v2 = vpop.f32.mrb[19].mxu1 }
 0x8b6   : > { %v12109_v41 = vpop.f32.mrb[20].mxu1 }
 0x8b7   : > { %15141 = vst [vmem:[#allocation45_spill] sm:$0xff] %v12109_v41  ;;  %v12111_v14 = vpop.f32.mrb[21].mxu1 }
 0x8b8   : > { %15142 = vst [vmem:[#allocation38_spill] sm:$0xff] %v12111_v14 }
 0x8ba   : > { %v12113_v49 = vpop.f32.mrb[22].mxu1 }
 0x8bb   : > { %15143 = vst [vmem:[#allocation43_spill] sm:$0xff] %v12113_v49  ;;  %v12117_v10 = vpop.f32.mrb[23].mxu1 }
 0x8bc   : > { %15144 = vst [vmem:[#allocation39_spill] sm:$0xff] %v12117_v10 }
 0x8be   : > { %v12121_v23 = vpop.f32.mrb[24].mxu1 }
 0x8bf   : > { %15145 = vst [vmem:[#allocation49_spill] sm:$0xff] %v12121_v23  ;;  %v12123_v17 = vpop.f32.mrb[25].mxu1 }
 0x8c0   : > { %15146 = vst [vmem:[#allocation42_spill] sm:$0xff] %v12123_v17 }
 0x8c2   : > { %v12125_v30 = vpop.f32.mrb[26].mxu1 }
 0x8c3   : > { %15147 = vst [vmem:[#allocation47_spill] sm:$0xff] %v12125_v30  ;;  %v12129_v6 = vpop.f32.mrb[27].mxu1 }
 0x8c4   : > { %15148 = vst [vmem:[#allocation44_spill] sm:$0xff] %v12129_v6 }
 0x8c6   : > { %v12133_v32 = vpop.f32.mrb[28].mxu1 }
 0x8c7   : > { %15149 = vst [vmem:[#allocation46_spill] sm:$0xff] %v12133_v32  ;;  %v12135_v41 = vpop.f32.mrb[29].mxu1 }
 0x8ca   : > { %v12137_v49 = vpop.f32.mrb[30].mxu1 }
 0x8cb   : > { %15150 = vst [vmem:[#allocation48_spill] sm:$0xff] %v12137_v49  ;;  %v12141_v14 = vpop.f32.mrb[31].mxu1 }
 0x8cf   : > { %v12145_v44 = vpop.f32.mrb[194].mxu0 }
 0x8d0   : > { %15151 = vst [vmem:[#allocation51_spill] sm:$0xff] %v12145_v44  ;;  %v3667_v23 = vpop.f32.mrb[195].mxu0 }
 0x8d1   : > { %4562 = vmatprep.mubr.f32.mxu1 %v3667_v23 }
 0x8d3   : > { %v12147_v30 = vpop.f32.mrb[196].mxu0 }
 0x8d4   : > { %15152 = vst [vmem:[#allocation52_spill] sm:$0xff] %v12147_v30  ;;  %v8398_v29 = vpack.c.bf16 %v12147_v30, %v12145_v44  ;;  %v12151_v17 = vpop.f32.mrb[197].mxu0 }
 0x8d5   : > { %15153 = vst [vmem:[#allocation53_spill] sm:$0xff] %v12151_v17  ;;  %v8396_v6 = vpack.c.bf16 %v12151_v17, %v3667_v23 }
 0x8d7   : > { %v12154_v34 = vpop.f32.mrb[198].mxu0  ;;  %8397 = vmatprep.subr.bf16.mxu0 %v8396_v6 }
 0x8d8   : > { %15154 = vst [vmem:[#allocation55_spill] sm:$0xff] %v12154_v34  ;;  %v12156_v25 = vpop.f32.mrb[199].mxu0  ;;  %8399 = vmatpush1.bf16.msra.mxu0 %v8398_v29 }
 0x8d9   : > { %15155 = vst [vmem:[#allocation50_spill] sm:$0xff] %v12156_v25 }
 0x8db   : > { %v12158_v10 = vpop.f32.mrb[200].mxu0 }
 0x8dc   : > { %15156 = vst [vmem:[#allocation56_spill] sm:$0xff] %v12158_v10  ;;  %v8402_v32 = vpack.c.bf16 %v12158_v10, %v12154_v34  ;;  %v12162_v49 = vpop.f32.mrb[201].mxu0 }
 0x8dd   : > { %15157 = vst [vmem:[#allocation57_spill] sm:$0xff] %v12162_v49  ;;  %v8400_v30 = vpack.c.bf16 %v12162_v49, %v12156_v25 }
 0x8df   : > { %v12166_v44 = vpop.f32.mrb[202].mxu0  ;;  %8401 = vmatprep.subr.bf16.mxu0 %v8400_v30 }
 0x8e0   : > { %15158 = vst [vmem:[#allocation59_spill] sm:$0xff] %v12166_v44  ;;  %v12168_v23 = vpop.f32.mrb[203].mxu0  ;;  %8403 = vmatpush1.bf16.msra.mxu0 %v8402_v32 }
 0x8e1   : > { %15159 = vst [vmem:[#allocation54_spill] sm:$0xff] %v12168_v23 }
 0x8e3   : > { %v12170_v6 = vpop.f32.mrb[204].mxu0 }
 0x8e4   : > { %15160 = vst [vmem:[#allocation60_spill] sm:$0xff] %v12170_v6  ;;  %v8406_v29 = vpack.c.bf16 %v12170_v6, %v12166_v44  ;;  %v12174_v17 = vpop.f32.mrb[205].mxu0 }
 0x8e5   : > { %15161 = vst [vmem:[#allocation61_spill] sm:$0xff] %v12174_v17  ;;  %v8404_v10 = vpack.c.bf16 %v12174_v17, %v12168_v23 }
 0x8e7   : > { %v12178_v34 = vpop.f32.mrb[206].mxu0  ;;  %8405 = vmatprep.subr.bf16.mxu0 %v8404_v10 }
 0x8e8   : > { %15162 = vst [vmem:[#allocation63_spill] sm:$0xff] %v12178_v34  ;;  %v12180_v49 = vpop.f32.mrb[207].mxu0  ;;  %8407 = vmatpush1.bf16.msra.mxu0 %v8406_v29 }
 0x8e9   : > { %15163 = vst [vmem:[#allocation58_spill] sm:$0xff] %v12180_v49 }
 0x8eb   : > { %v12182_v30 = vpop.f32.mrb[208].mxu0 }
 0x8ec   : > { %15164 = vst [vmem:[#allocation64_spill] sm:$0xff] %v12182_v30  ;;  %v8410_v32 = vpack.c.bf16 %v12182_v30, %v12178_v34  ;;  %v12186_v25 = vpop.f32.mrb[209].mxu0 }
 0x8ed   : > { %15165 = vst [vmem:[#allocation65_spill] sm:$0xff] %v12186_v25  ;;  %v8408_v6 = vpack.c.bf16 %v12186_v25, %v12180_v49 }
 0x8ef   : > { %v12190_v44 = vpop.f32.mrb[210].mxu0  ;;  %8409 = vmatprep.subr.bf16.mxu0 %v8408_v6 }
 0x8f0   : > { %15166 = vst [vmem:[#allocation67_spill] sm:$0xff] %v12190_v44  ;;  %v12192_v17 = vpop.f32.mrb[211].mxu0  ;;  %8411 = vmatpush1.bf16.msra.mxu0 %v8410_v32 }
 0x8f1   : > { %15167 = vst [vmem:[#allocation62_spill] sm:$0xff] %v12192_v17 }
 0x8f3   : > { %v12194_v10 = vpop.f32.mrb[212].mxu0 }
 0x8f4   : > { %15168 = vst [vmem:[#allocation68_spill] sm:$0xff] %v12194_v10  ;;  %v8414_v29 = vpack.c.bf16 %v12194_v10, %v12190_v44  ;;  %v12198_v23 = vpop.f32.mrb[213].mxu0 }
 0x8f5   : > { %15169 = vst [vmem:[#allocation69_spill] sm:$0xff] %v12198_v23  ;;  %v8412_v30 = vpack.c.bf16 %v12198_v23, %v12192_v17 }
 0x8f7   : > { %v12202_v34 = vpop.f32.mrb[214].mxu0  ;;  %8413 = vmatprep.subr.bf16.mxu0 %v8412_v30 }
 0x8f8   : > { %15170 = vst [vmem:[#allocation71_spill] sm:$0xff] %v12202_v34  ;;  %v12204_v25 = vpop.f32.mrb[215].mxu0  ;;  %8415 = vmatpush1.bf16.msra.mxu0 %v8414_v29 }
 0x8f9   : > { %15171 = vst [vmem:[#allocation66_spill] sm:$0xff] %v12204_v25 }
 0x8fb   : > { %v12206_v6 = vpop.f32.mrb[216].mxu0 }
 0x8fc   : > { %15172 = vst [vmem:[#allocation72_spill] sm:$0xff] %v12206_v6  ;;  %v8418_v32 = vpack.c.bf16 %v12206_v6, %v12202_v34  ;;  %v12210_v49 = vpop.f32.mrb[217].mxu0 }
 0x8fd   : > { %15173 = vst [vmem:[#allocation73_spill] sm:$0xff] %v12210_v49  ;;  %v8416_v10 = vpack.c.bf16 %v12210_v49, %v12204_v25 }
 0x8ff   : > { %v12214_v44 = vpop.f32.mrb[218].mxu0  ;;  %8417 = vmatprep.subr.bf16.mxu0 %v8416_v10 }
 0x900   : > { %15174 = vst [vmem:[#allocation75_spill] sm:$0xff] %v12214_v44  ;;  %v12216_v23 = vpop.f32.mrb[219].mxu0  ;;  %8419 = vmatpush1.bf16.msra.mxu0 %v8418_v32 }
 0x901   : > { %15175 = vst [vmem:[#allocation70_spill] sm:$0xff] %v12216_v23 }
 0x903   : > { %v12218_v30 = vpop.f32.mrb[220].mxu0 }
 0x904   : > { %15176 = vst [vmem:[#allocation76_spill] sm:$0xff] %v12218_v30  ;;  %v8422_v29 = vpack.c.bf16 %v12218_v30, %v12214_v44  ;;  %v12222_v17 = vpop.f32.mrb[221].mxu0 }
 0x905   : > { %15177 = vst [vmem:[#allocation77_spill] sm:$0xff] %v12222_v17  ;;  %v8420_v6 = vpack.c.bf16 %v12222_v17, %v12216_v23 }
 0x907   : > { %v12226_v34 = vpop.f32.mrb[222].mxu0  ;;  %8421 = vmatprep.subr.bf16.mxu0 %v8420_v6 }
 0x908   : > { %15178 = vst [vmem:[#allocation79_spill] sm:$0xff] %v12226_v34  ;;  %v12228_v49 = vpop.f32.mrb[223].mxu0  ;;  %8423 = vmatpush1.bf16.msra.mxu0 %v8422_v29 }
 0x909   : > { %15179 = vst [vmem:[#allocation74_spill] sm:$0xff] %v12228_v49 }
 0x90b   : > { %v12230_v10 = vpop.f32.mrb[224].mxu0 }
 0x90c   : > { %15180 = vst [vmem:[#allocation80_spill] sm:$0xff] %v12230_v10  ;;  %v8426_v32 = vpack.c.bf16 %v12230_v10, %v12226_v34  ;;  %v12234_v25 = vpop.f32.mrb[225].mxu0 }
 0x90d   : > { %15181 = vst [vmem:[#allocation81_spill] sm:$0xff] %v12234_v25  ;;  %v8424_v30 = vpack.c.bf16 %v12234_v25, %v12228_v49 }
 0x90f   : > { %v12238_v44 = vpop.f32.mrb[226].mxu0  ;;  %8425 = vmatprep.subr.bf16.mxu0 %v8424_v30 }
 0x910   : > { %15182 = vst [vmem:[#allocation83_spill] sm:$0xff] %v12238_v44  ;;  %v12240_v17 = vpop.f32.mrb[227].mxu0  ;;  %8427 = vmatpush1.bf16.msra.mxu0 %v8426_v32 }
 0x911   : > { %15183 = vst [vmem:[#allocation78_spill] sm:$0xff] %v12240_v17 }
 0x913   : > { %v12242_v6 = vpop.f32.mrb[228].mxu0 }
 0x914   : > { %15184 = vst [vmem:[#allocation84_spill] sm:$0xff] %v12242_v6  ;;  %v8430_v29 = vpack.c.bf16 %v12242_v6, %v12238_v44  ;;  %v12246_v23 = vpop.f32.mrb[229].mxu0 }
 0x915   : > { %15185 = vst [vmem:[#allocation85_spill] sm:$0xff] %v12246_v23  ;;  %v8428_v10 = vpack.c.bf16 %v12246_v23, %v12240_v17 }
 0x917   : > { %v12250_v34 = vpop.f32.mrb[230].mxu0  ;;  %8429 = vmatprep.subr.bf16.mxu0 %v8428_v10 }
 0x918   : > { %15186 = vst [vmem:[#allocation87_spill] sm:$0xff] %v12250_v34  ;;  %v12252_v25 = vpop.f32.mrb[231].mxu0  ;;  %8431 = vmatpush1.bf16.msra.mxu0 %v8430_v29 }
 0x919   : > { %15187 = vst [vmem:[#allocation82_spill] sm:$0xff] %v12252_v25 }
 0x91b   : > { %v12254_v30 = vpop.f32.mrb[232].mxu0 }
 0x91c   : > { %15188 = vst [vmem:[#allocation88_spill] sm:$0xff] %v12254_v30  ;;  %v8434_v32 = vpack.c.bf16 %v12254_v30, %v12250_v34  ;;  %v12258_v49 = vpop.f32.mrb[233].mxu0 }
 0x91d   : > { %15189 = vst [vmem:[#allocation89_spill] sm:$0xff] %v12258_v49  ;;  %v8432_v6 = vpack.c.bf16 %v12258_v49, %v12252_v25 }
 0x91f   : > { %v12262_v44 = vpop.f32.mrb[234].mxu0  ;;  %8433 = vmatprep.subr.bf16.mxu0 %v8432_v6 }
 0x920   : > { %15190 = vst [vmem:[#allocation91_spill] sm:$0xff] %v12262_v44  ;;  %v12264_v23 = vpop.f32.mrb[235].mxu0  ;;  %8435 = vmatpush1.bf16.msra.mxu0 %v8434_v32 }
 0x921   : > { %15191 = vst [vmem:[#allocation86_spill] sm:$0xff] %v12264_v23 }
 0x923   : > { %v12266_v10 = vpop.f32.mrb[236].mxu0 }
 0x924   : > { %15192 = vst [vmem:[#allocation92_spill] sm:$0xff] %v12266_v10  ;;  %v8438_v29 = vpack.c.bf16 %v12266_v10, %v12262_v44  ;;  %v12270_v17 = vpop.f32.mrb[237].mxu0 }
 0x925   : > { %15193 = vst [vmem:[#allocation93_spill] sm:$0xff] %v12270_v17  ;;  %v8436_v30 = vpack.c.bf16 %v12270_v17, %v12264_v23 }
 0x927   : > { %v12274_v34 = vpop.f32.mrb[238].mxu0  ;;  %8437 = vmatprep.subr.bf16.mxu0 %v8436_v30 }
 0x928   : > { %15194 = vst [vmem:[#allocation95_spill] sm:$0xff] %v12274_v34  ;;  %v12276_v49 = vpop.f32.mrb[239].mxu0  ;;  %8439 = vmatpush1.bf16.msra.mxu0 %v8438_v29 }
 0x929   : > { %15195 = vst [vmem:[#allocation90_spill] sm:$0xff] %v12276_v49 }
 0x92b   : > { %v12278_v6 = vpop.f32.mrb[240].mxu0 }
 0x92c   : > { %15196 = vst [vmem:[#allocation96_spill] sm:$0xff] %v12278_v6  ;;  %v8442_v32 = vpack.c.bf16 %v12278_v6, %v12274_v34  ;;  %v12282_v25 = vpop.f32.mrb[241].mxu0 }
 0x92d   : > { %15197 = vst [vmem:[#allocation97_spill] sm:$0xff] %v12282_v25  ;;  %v8440_v10 = vpack.c.bf16 %v12282_v25, %v12276_v49 }
 0x92f   : > { %v12286_v44 = vpop.f32.mrb[242].mxu0  ;;  %8441 = vmatprep.subr.bf16.mxu0 %v8440_v10 }
 0x930   : > { %15198 = vst [vmem:[#allocation99_spill] sm:$0xff] %v12286_v44  ;;  %v12288_v17 = vpop.f32.mrb[243].mxu0  ;;  %8443 = vmatpush1.bf16.msra.mxu0 %v8442_v32 }
 0x931   : > { %15199 = vst [vmem:[#allocation94_spill] sm:$0xff] %v12288_v17 }
 0x933   : > { %v12290_v30 = vpop.f32.mrb[244].mxu0 }
 0x934   : > { %15200 = vst [vmem:[#allocation100_spill] sm:$0xff] %v12290_v30  ;;  %v8446_v29 = vpack.c.bf16 %v12290_v30, %v12286_v44  ;;  %v12294_v23 = vpop.f32.mrb[245].mxu0 }
 0x935   : > { %15201 = vst [vmem:[#allocation101_spill] sm:$0xff] %v12294_v23  ;;  %v8444_v6 = vpack.c.bf16 %v12294_v23, %v12288_v17 }
 0x937   : > { %v12298_v34 = vpop.f32.mrb[246].mxu0  ;;  %8445 = vmatprep.subr.bf16.mxu0 %v8444_v6 }
 0x938   : > { %15202 = vst [vmem:[#allocation166_spill] sm:$0xff] %v12298_v34  ;;  %v12300_v25 = vpop.f32.mrb[247].mxu0  ;;  %8447 = vmatpush1.bf16.msra.mxu0 %v8446_v29 }
 0x939   : > { %15203 = vst [vmem:[#allocation98_spill] sm:$0xff] %v12300_v25 }
 0x93b   : > { %v12302_v10 = vpop.f32.mrb[248].mxu0 }
 0x93c   : > { %15204 = vst [vmem:[#allocation168_spill] sm:$0xff] %v12302_v10  ;;  %v8450_v32 = vpack.c.bf16 %v12302_v10, %v12298_v34  ;;  %v12306_v49 = vpop.f32.mrb[249].mxu0 }
 0x93d   : > { %15205 = vst [vmem:[#allocation167_spill] sm:$0xff] %v12306_v49  ;;  %v8448_v30 = vpack.c.bf16 %v12306_v49, %v12300_v25 }
 0x93f   : > { %v12310_v44 = vpop.f32.mrb[250].mxu0  ;;  %8449 = vmatprep.subr.bf16.mxu0 %v8448_v30 }
 0x940   : > { %v12312_v23 = vpop.f32.mrb[251].mxu0  ;;  %8451 = vmatpush1.bf16.msra.mxu0 %v8450_v32 }
 0x943   : > { %v12314_v6 = vpop.f32.mrb[252].mxu0 }
 0x944   : > { %15206 = vst [vmem:[#allocation170_spill] sm:$0xff] %v12314_v6  ;;  %v8454_v29 = vpack.c.bf16 %v12314_v6, %v12310_v44  ;;  %v12318_v17 = vpop.f32.mrb[253].mxu0 }
 0x945   : > { %15207 = vst [vmem:[#allocation169_spill] sm:$0xff] %v12318_v17  ;;  %v8452_v10 = vpack.c.bf16 %v12318_v17, %v12312_v23  ;;  %v15208_v17 = vpack.c.bf16 %v11941_v20, %v11933_v15  ;;  %v15211_v15 = vpack.c.bf16 %v11953_v52, %v11947_v9 }
 0x947   : > { %v12322_v34 = vpop.f32.mrb[254].mxu0  ;;  %8453 = vmatprep.subr.bf16.mxu0 %v8452_v10  ;;  %v15209_v10 = vpack.c.bf16 %v11937_v35, %v11931_v51 }
 0x948   : > { %v12324_v49 = vpop.f32.mrb[255].mxu0  ;;  %8455 = vmatpush1.bf16.msra.mxu0 %v8454_v29  ;;  %v15210_v29 = vpack.c.bf16 %v11957_v56, %v11949_v47 }
 0x94b   : > { %v12326_v30 = vpop.f32.mrb[0].mxu0 }
 0x94c   : > { %v8458_v32 = vpack.c.bf16 %v12326_v30, %v12322_v34  ;;  %v12330_v25 = vpop.f32.mrb[1].mxu0 }
 0x94d   : > { %v8456_v6 = vpack.c.bf16 %v12330_v25, %v12324_v49 }
 0x94f   : > { %8457 = vmatprep.subr.bf16.mxu0 %v8456_v6  ;;  %v15235_v6 = vld [vmem:[#allocation39_spill] sm:$0xff] }
 0x950   : > { %8459 = vmatpush1.bf16.msra.mxu0 %v8458_v32 }
 0x951   : > { %8525 = vmatprep.subr.bf16.mxu0 %v15208_v17  ;;  %v15212_v17 = vpack.c.bf16 %v11973_v18, %v11965_v43 }
 0x953   : > { %4178 = vmatmul.mubr.f32.vlgmr.msra.gmra.mrb[2].mxu0 %v11931_v51  ;;  %v15213_v51 = vpack.c.bf16 %v11969_v63, %v11963_v39 }
 0x954   : > { %4183 = vmatprep.mubr.f32.mxu0 %v11941_v20  ;;  %8527 = vmatpush1.bf16.msra.mxu0 %v15209_v10  ;;  %v15215_v20 = vpack.c.bf16 %v11985_v22, %v11979_v37  ;;  %v15239_v10 = vld [vmem:[#allocation45_spill] sm:$0xff] }
 0x955   : > { %8529 = vmatprep.subr.bf16.mxu0 %v15210_v29 }
 0x957   : > { %4184 = vmatmul.mubr.f32.gmra.mrb[4].mxu0 %v11937_v35  ;;  %v15214_v35 = vpack.c.bf16 %v11989_v42, %v11981_v3 }
 0x958   : > { %4189 = vmatprep.mubr.f32.mxu0 %v11949_v47  ;;  %8531 = vmatpush1.bf16.msra.mxu0 %v15211_v15  ;;  %v15217_v47 = vpack.c.bf16 %v12001_v62, %v11995_v60  ;;  %v15241_v15 = vld [vmem:[#allocation44_spill] sm:$0xff] }
 0x959   : > { %8533 = vmatprep.subr.bf16.mxu0 %v15212_v17 }
 0x95b   : > { %4190 = vmatmul.mubr.f32.gmra.mrb[6].mxu0 %v11947_v9  ;;  %v15216_v9 = vpack.c.bf16 %v12005_v0, %v11997_v13 }
 0x95c   : > { %4195 = vmatprep.mubr.f32.mxu0 %v11957_v56  ;;  %8535 = vmatpush1.bf16.msra.mxu0 %v15213_v51  ;;  %v15220_v56 = vpack.c.bf16 %v12033_v45, %v12027_v26  ;;  %v15245_v51 = vld [vmem:[#allocation49_spill] sm:$0xff] }
 0x95d   : > { %8537 = vmatprep.subr.bf16.mxu0 %v15214_v35 }
 0x95f   : > { %4196 = vmatmul.mubr.f32.gmra.mrb[8].mxu0 %v11953_v52  ;;  %v15218_v52 = vpack.c.bf16 %v12021_v7, %v12013_v58 }
 0x960   : > { %4201 = vmatprep.mubr.f32.mxu0 %v11965_v43  ;;  %8539 = vmatpush1.bf16.msra.mxu0 %v15215_v20  ;;  %v15219_v43 = vpack.c.bf16 %v12017_v12, %v12011_v57  ;;  %v15249_v20 = vld [vmem:[#allocation46_spill] sm:$0xff] }
 0x961   : > { %8541 = vmatprep.subr.bf16.mxu0 %v15216_v9 }
 0x963   : > { %4202 = vmatmul.mubr.f32.gmra.mrb[10].mxu0 %v11963_v39  ;;  %v15226_v39 = vpack.c.bf16 %v12069_v54, %v12063_v8 }
 0x964   : > { %4207 = vmatprep.mubr.f32.mxu0 %v11973_v18  ;;  %8543 = vmatpush1.bf16.msra.mxu0 %v15217_v47  ;;  %v15221_v18 = vpack.c.bf16 %v12029_v21, %v12025_v53 }
 0x965   : > { %8545 = vmatprep.subr.bf16.mxu0 %v15218_v52 }
 0x967   : > { %4208 = vmatmul.mubr.f32.gmra.mrb[12].mxu0 %v11969_v63  ;;  %v15222_v63 = vpack.c.bf16 %v12045_v46, %v12039_v28 }
 0x968   : > { %4213 = vmatprep.mubr.f32.mxu0 %v11981_v3  ;;  %8547 = vmatpush1.bf16.msra.mxu0 %v15219_v43  ;;  %v15223_v3 = vpack.c.bf16 %v12041_v11, %v12037_v1 }
 0x969   : > { %8549 = vmatprep.subr.bf16.mxu0 %v15220_v56  ;;  %v15257_v56 = vld [vmem:[#allocation121_spill] sm:$0xff] }
 0x96b   : > { %4214 = vmatmul.mubr.f32.gmra.mrb[14].mxu0 %v11979_v37  ;;  %v15224_v37 = vpack.c.bf16 %v12057_v48, %v12051_v38 }
 0x96c   : > { %4219 = vmatprep.mubr.f32.mxu0 %v11989_v42  ;;  %8551 = vmatpush1.bf16.msra.mxu0 %v15221_v18  ;;  %v15225_v42 = vpack.c.bf16 %v12053_v4, %v12049_v50 }
 0x96d   : > { %8553 = vmatprep.subr.bf16.mxu0 %v15222_v63 }
 0x96f   : > { %4220 = vmatmul.mubr.f32.gmra.mrb[16].mxu0 %v11985_v22  ;;  %v15230_v22 = vpack.c.bf16 %v12093_v19, %v12087_v36 }
 0x970   : > { %4225 = vmatprep.mubr.f32.mxu0 %v11997_v13  ;;  %8555 = vmatpush1.bf16.msra.mxu0 %v15223_v3  ;;  %v15227_v13 = vpack.c.bf16 %v12065_v24, %v12061_v16  ;;  %v15258_v3 = vld [vmem:[#allocation122_spill] sm:$0xff] }
 0x971   : > { %8557 = vmatprep.subr.bf16.mxu0 %v15224_v37 }
 0x973   : > { %4226 = vmatmul.mubr.f32.gmra.mrb[18].mxu0 %v11995_v60  ;;  %v15228_v60 = vpack.c.bf16 %v12081_v40, %v12075_v5 }
 0x974   : > { %4231 = vmatprep.mubr.f32.mxu0 %v12005_v0  ;;  %8559 = vmatpush1.bf16.msra.mxu0 %v15225_v42  ;;  %v15229_v0 = vpack.c.bf16 %v12077_v31, %v12073_v55 }
 0x975   : > { %8561 = vmatprep.subr.bf16.mxu0 %v15226_v39 }
 0x977   : > { %4232 = vmatmul.mubr.f32.gmra.mrb[20].mxu0 %v12001_v62  ;;  %v15232_v62 = vpack.c.bf16 %v12105_v2, %v12099_v61 }
 0x978   : > { %4237 = vmatprep.mubr.f32.mxu0 %v12013_v58  ;;  %8563 = vmatpush1.bf16.msra.mxu0 %v15227_v13  ;;  %v15231_v58 = vpack.c.bf16 %v12089_v27, %v12085_v33 }
 0x979   : > { %8565 = vmatprep.subr.bf16.mxu0 %v15228_v60 }
 0x97b   : > { %4238 = vmatmul.mubr.f32.gmra.mrb[22].mxu0 %v12011_v57 }
 0x97c   : > { %4243 = vmatprep.mubr.f32.mxu0 %v12021_v7  ;;  %8567 = vmatpush1.bf16.msra.mxu0 %v15229_v0  ;;  %v15233_v7 = vld [vmem:[#allocation40_spill] sm:$0xff]  ;;  %v15259_v0 = vld [vmem:[#allocation123_spill] sm:$0xff] }
 0x97d   : > { %8569 = vmatprep.subr.bf16.mxu0 %v15230_v22  ;;  %v15234_v57 = vpack.c.bf16 %v12101_v59, %v15233_v7 }
 0x97f   : > { %4244 = vmatmul.mubr.f32.gmra.mrb[24].mxu0 %v12017_v12  ;;  %v15236_v12 = vld [vmem:[#allocation38_spill] sm:$0xff] }
 0x980   : > { %4249 = vmatprep.mubr.f32.mxu0 %v12027_v26  ;;  %8571 = vmatpush1.bf16.msra.mxu0 %v15231_v58  ;;  %v15237_v32 = vpack.c.bf16 %v15235_v6, %v15236_v12  ;;  %v15238_v26 = vld [vmem:[#allocation43_spill] sm:$0xff] }
 0x981   : > { %8573 = vmatprep.subr.bf16.mxu0 %v15232_v62  ;;  %v15240_v29 = vpack.c.bf16 %v15238_v26, %v15239_v10  ;;  %v15260_v62 = vld [vmem:[#allocation124_spill] sm:$0xff] }
 0x983   : > { %4250 = vmatmul.mubr.f32.gmra.mrb[26].mxu0 %v12025_v53  ;;  %v15242_v53 = vld [vmem:[#allocation42_spill] sm:$0xff] }
 0x984   : > { %4255 = vmatprep.mubr.f32.mxu0 %v12033_v45  ;;  %8575 = vmatpush1.bf16.msra.mxu0 %v15234_v57  ;;  %v15243_v17 = vpack.c.bf16 %v15241_v15, %v15242_v53  ;;  %v15244_v45 = vld [vmem:[#allocation47_spill] sm:$0xff] }
 0x985   : > { %8577 = vmatprep.subr.bf16.mxu0 %v15237_v32  ;;  %v15246_v35 = vpack.c.bf16 %v15244_v45, %v15245_v51 }
 0x987   : > { %4256 = vmatmul.mubr.f32.gmra.mrb[28].mxu0 %v12029_v21  ;;  %v15247_v21 = vpack.c.bf16 %v12141_v14, %v12135_v41 }
 0x988   : > { %4261 = vmatprep.mubr.f32.mxu0 %v12039_v28  ;;  %8579 = vmatpush1.bf16.msra.mxu0 %v15240_v29  ;;  %v15248_v28 = vld [vmem:[#allocation48_spill] sm:$0xff] }
 0x989   : > { %8581 = vmatprep.subr.bf16.mxu0 %v15243_v17  ;;  %v15250_v9 = vpack.c.bf16 %v15248_v28, %v15249_v20 }
 0x98b   : > { %4262 = vmatmul.mubr.f32.gmra.mrb[30].mxu0 %v12037_v1  ;;  %v15256_v1 = vld [vmem:[#allocation120_spill] sm:$0xff] }
 0x98c   : > { %4267 = vmatprep.mubr.f32.mxu0 %v12045_v46  ;;  %8583 = vmatpush1.bf16.msra.mxu0 %v15246_v35  ;;  %v15255_v46 = vld [vmem:[#allocation119_spill] sm:$0xff] }
 0x98d   : > { %8585 = vmatprep.subr.bf16.mxu0 %v15247_v21  ;;  %v15263_v21 = vld [vmem:[#allocation127_spill] sm:$0xff] }
 0x98f   : > { %4268 = vmatmul.mubr.f32.gmra.mrb[32].mxu0 %v12041_v11 }
 0x990   : > { %4273 = vmatprep.mubr.f32.mxu0 %v12051_v38  ;;  %8587 = vmatpush1.bf16.msra.mxu0 %v15250_v9  ;;  %v15264_v9 = vld [vmem:[#allocation128_spill] sm:$0xff] }
 0x993   : > { %4274 = vmatmul.mubr.f32.gmra.mrb[34].mxu0 %v12049_v50 }
 0x994   : > { %4279 = vmatprep.mubr.f32.mxu0 %v12057_v48  ;;  %v15254_v48 = vld [vmem:[#allocation118_spill] sm:$0xff] }
 0x997   : > { %4280 = vmatmul.mubr.f32.gmra.mrb[36].mxu0 %v12053_v4 }
 0x998   : > { %4285 = vmatprep.mubr.f32.mxu0 %v12063_v8 }
 0x99b   : > { %4286 = vmatmul.mubr.f32.gmra.mrb[38].mxu0 %v12061_v16 }
 0x99c   : > { %4291 = vmatprep.mubr.f32.mxu0 %v12069_v54  ;;  %v15253_v54 = vld [vmem:[#allocation117_spill] sm:$0xff] }
 0x99f   : > { %4292 = vmatmul.mubr.f32.gmra.mrb[40].mxu0 %v12065_v24 }
 0x9a0   : > { %4297 = vmatprep.mubr.f32.mxu0 %v12075_v5 }
 0x9a3   : > { %4298 = vmatmul.mubr.f32.gmra.mrb[42].mxu0 %v12073_v55 }
 0x9a4   : > { %4303 = vmatprep.mubr.f32.mxu0 %v12081_v40 }
 0x9a7   : > { %4304 = vmatmul.mubr.f32.gmra.mrb[44].mxu0 %v12077_v31 }
 0x9a8   : > { %4309 = vmatprep.mubr.f32.mxu0 %v12087_v36 }
 0x9ab   : > { %4310 = vmatmul.mubr.f32.gmra.mrb[46].mxu0 %v12085_v33 }
 0x9ac   : > { %4315 = vmatprep.mubr.f32.mxu0 %v12093_v19 }
 0x9af   : > { %4316 = vmatmul.mubr.f32.gmra.mrb[48].mxu0 %v12089_v27  ;;  %v15252_v27 = vld [vmem:[#allocation116_spill] sm:$0xff] }
 0x9b0   : > { %4321 = vmatprep.mubr.f32.mxu0 %v12099_v61 }
 0x9b3   : > { %4322 = vmatmul.mubr.f32.gmra.mrb[50].mxu0 %v15233_v7 }
 0x9b4   : > { %4327 = vmatprep.mubr.f32.mxu0 %v12105_v2 }
 0x9b7   : > { %4328 = vmatmul.mubr.f32.gmra.mrb[52].mxu0 %v12101_v59  ;;  %v15251_v59 = vld [vmem:[#allocation115_spill] sm:$0xff] }
 0x9b8   : > { %4333 = vmatprep.mubr.f32.mxu0 %v15236_v12 }
 0x9bb   : > { %4334 = vmatmul.mubr.f32.gmra.mrb[54].mxu0 %v15239_v10 }
 0x9bc   : > { %4339 = vmatprep.mubr.f32.mxu0 %v15235_v6 }
 0x9bf   : > { %4340 = vmatmul.mubr.f32.gmra.mrb[56].mxu0 %v15238_v26  ;;  %v15261_v26 = vld [vmem:[#allocation125_spill] sm:$0xff] }
 0x9c0   : > { %4345 = vmatprep.mubr.f32.mxu0 %v15242_v53 }
 0x9c3   : > { %4346 = vmatmul.mubr.f32.gmra.mrb[58].mxu0 %v15245_v51 }
 0x9c4   : > { %4351 = vmatprep.mubr.f32.mxu0 %v15241_v15  ;;  %v15262_v15 = vld [vmem:[#allocation126_spill] sm:$0xff] }
 0x9c7   : > { %4352 = vmatmul.mubr.f32.gmra.mrb[60].mxu0 %v15244_v45 }
 0x9c8   : > { %4357 = vmatprep.mubr.f32.mxu0 %v12135_v41 }
 0x9cb   : > { %4358 = vmatmul.mubr.f32.gmra.mrb[62].mxu0 %v15249_v20 }
 0x9cc   : > { %4363 = vmatprep.mubr.f32.mxu0 %v12141_v14 }
 0x9cf   : > { %4364 = vmatmul.mubr.f32.gmra.mrb[64].mxu0 %v15248_v28 }
 0xa26   : > { %v4179_v2 = vpop.f32.mrb[2].mxu0 }
 0xa27   : > { %v4370_v61 = vsub.f32 %v15251_v59, %v4179_v2  ;;  %v4181_v19 = vpop.f32.mrb[3].mxu0 }
 0xa28   : > { %v4371_v36 = vsub.f32 %v15252_v27, %v4181_v19 }
 0xa29   : > { %v4434_v5 = vmul.f32 0.5, %v4370_v61 }
 0xa2a   : > { %v4185_v40 = vpop.f32.mrb[4].mxu0  ;;  %v4435_v31 = vmul.f32 0.5, %v4371_v36 }
 0xa2b   : > { %v4372_v24 = vsub.f32 %v15253_v54, %v4185_v40  ;;  %v4187_v8 = vpop.f32.mrb[5].mxu0 }
 0xa2c   : > { %v4373_v41 = vsub.f32 %v15254_v48, %v4187_v8  ;;  %4819 = vmatprep.mubr.f32.mxu0 %v4435_v31  ;;  %v15266_v8 = vld [vmem:[#allocation130_spill] sm:$0xff] }
 0xa2d   : > { %v4436_v4 = vmul.f32 0.5, %v4372_v24  ;;  %4820 = vmatmul.mubr.f32.vlgmr.msra.gmra.mrb[66].mxu0 %v4434_v5 }
 0xa2e   : > { %v4191_v14 = vpop.f32.mrb[6].mxu0  ;;  %v4437_v38 = vmul.f32 0.5, %v4373_v41 }
 0xa2f   : > { %v8462_v33 = vpack.c.bf16 %v4436_v4, %v4434_v5  ;;  %v4374_v11 = vsub.f32 %v15255_v46, %v4191_v14  ;;  %v4193_v55 = vpop.f32.mrb[7].mxu0 }
 0xa30   : > { %v4375_v16 = vsub.f32 %v15256_v1, %v4193_v55  ;;  %4825 = vmatprep.mubr.f32.mxu0 %v4437_v38  ;;  %v8460_v50 = vpack.c.bf16 %v4437_v38, %v4435_v31  ;;  %v15265_v31 = vld [vmem:[#allocation129_spill] sm:$0xff] }
 0xa31   : > { %4826 = vmatmul.mubr.f32.gmra.mrb[68].mxu0 %v4436_v4  ;;  %v4438_v43 = vmul.f32 0.5, %v4374_v11  ;;  %v15267_v11 = vld [vmem:[#allocation131_spill] sm:$0xff] }
 0xa32   : > { %v4197_v47 = vpop.f32.mrb[8].mxu0  ;;  %8461 = vmatprep.subr.bf16.mxu1 %v8460_v50  ;;  %v4439_v52 = vmul.f32 0.5, %v4375_v16  ;;  %v15268_v50 = vld [vmem:[#allocation132_spill] sm:$0xff] }
 0xa33   : > { %v4376_v18 = vsub.f32 %v15257_v56, %v4197_v47  ;;  %v4199_v63 = vpop.f32.mrb[9].mxu0  ;;  %8463 = vmatpush1.bf16.msra.mxu1 %v8462_v33 }
 0xa34   : > { %v4377_v37 = vsub.f32 %v15258_v3, %v4199_v63  ;;  %4831 = vmatprep.mubr.f32.mxu0 %v4439_v52 }
 0xa35   : > { %v4440_v42 = vmul.f32 0.5, %v4376_v18  ;;  %4832 = vmatmul.mubr.f32.gmra.mrb[70].mxu0 %v4438_v43 }
 0xa36   : > { %v4203_v39 = vpop.f32.mrb[10].mxu0  ;;  %v4441_v13 = vmul.f32 0.5, %v4377_v37  ;;  %v15269_v37 = vld [vmem:[#allocation133_spill] sm:$0xff] }
 0xa37   : > { %v8466_v60 = vpack.c.bf16 %v4440_v42, %v4438_v43  ;;  %v4378_v22 = vsub.f32 %v15259_v0, %v4203_v39  ;;  %v4205_v58 = vpop.f32.mrb[11].mxu0 }
 0xa38   : > { %v4379_v7 = vsub.f32 %v15260_v62, %v4205_v58  ;;  %4837 = vmatprep.mubr.f32.mxu0 %v4441_v13  ;;  %v8464_v57 = vpack.c.bf16 %v4441_v13, %v4439_v52  ;;  %v15270_v13 = vld [vmem:[#allocation134_spill] sm:$0xff] }
 0xa39   : > { %4838 = vmatmul.mubr.f32.gmra.mrb[72].mxu0 %v4440_v42  ;;  %v4442_v32 = vmul.f32 0.5, %v4378_v22 }
 0xa3a   : > { %v4209_v6 = vpop.f32.mrb[12].mxu0  ;;  %8465 = vmatprep.subr.bf16.mxu1 %v8464_v57  ;;  %v4443_v12 = vmul.f32 0.5, %v4379_v7 }
 0xa3b   : > { %v4380_v10 = vsub.f32 %v15261_v26, %v4209_v6  ;;  %v4211_v29 = vpop.f32.mrb[13].mxu0  ;;  %8467 = vmatpush1.bf16.msra.mxu1 %v8466_v60  ;;  %v15271_v6 = vld [vmem:[#allocation135_spill] sm:$0xff] }
 0xa3c   : > { %v4381_v53 = vsub.f32 %v15262_v15, %v4211_v29  ;;  %4843 = vmatprep.mubr.f32.mxu0 %v4443_v12 }
 0xa3d   : > { %v4444_v17 = vmul.f32 0.5, %v4380_v10  ;;  %4844 = vmatmul.mubr.f32.gmra.mrb[74].mxu0 %v4442_v32  ;;  %v15272_v10 = vld [vmem:[#allocation136_spill] sm:$0xff] }
 0xa3e   : > { %v4215_v45 = vpop.f32.mrb[14].mxu0  ;;  %v4445_v51 = vmul.f32 0.5, %v4381_v53 }
 0xa3f   : > { %v8470_v35 = vpack.c.bf16 %v4444_v17, %v4442_v32  ;;  %v4382_v28 = vsub.f32 %v15263_v21, %v4215_v45  ;;  %v4217_v20 = vpop.f32.mrb[15].mxu0 }
 0xa40   : > { %v4383_v2 = vsub.f32 %v15264_v9, %v4217_v20  ;;  %4849 = vmatprep.mubr.f32.mxu0 %v4445_v51  ;;  %v8468_v61 = vpack.c.bf16 %v4445_v51, %v4443_v12 }
 0xa41   : > { %4850 = vmatmul.mubr.f32.gmra.mrb[76].mxu0 %v4444_v17  ;;  %v4446_v40 = vmul.f32 0.5, %v4382_v28 }
 0xa42   : > { %v4221_v19 = vpop.f32.mrb[16].mxu0  ;;  %8469 = vmatprep.subr.bf16.mxu1 %v8468_v61  ;;  %v4447_v36 = vmul.f32 0.5, %v4383_v2  ;;  %v15274_v2 = vld [vmem:[#allocation138_spill] sm:$0xff] }
 0xa43   : > { %v4384_v5 = vsub.f32 %v15265_v31, %v4221_v19  ;;  %v4223_v24 = vpop.f32.mrb[17].mxu0  ;;  %8471 = vmatpush1.bf16.msra.mxu1 %v8470_v35  ;;  %v15273_v35 = vld [vmem:[#allocation137_spill] sm:$0xff] }
 0xa44   : > { %v4385_v41 = vsub.f32 %v15266_v8, %v4223_v24  ;;  %4855 = vmatprep.mubr.f32.mxu0 %v4447_v36  ;;  %v15275_v24 = vld [vmem:[#allocation139_spill] sm:$0xff] }
 0xa45   : > { %v4448_v4 = vmul.f32 0.5, %v4384_v5  ;;  %4856 = vmatmul.mubr.f32.gmra.mrb[78].mxu0 %v4446_v40 }
 0xa46   : > { %v4227_v14 = vpop.f32.mrb[18].mxu0  ;;  %v4449_v38 = vmul.f32 0.5, %v4385_v41 }
 0xa47   : > { %v8474_v33 = vpack.c.bf16 %v4448_v4, %v4446_v40  ;;  %v4386_v55 = vsub.f32 %v15267_v11, %v4227_v14  ;;  %v4229_v16 = vpop.f32.mrb[19].mxu0  ;;  %v15276_v14 = vld [vmem:[#allocation140_spill] sm:$0xff] }
 0xa48   : > { %v4387_v47 = vsub.f32 %v15268_v50, %v4229_v16  ;;  %4861 = vmatprep.mubr.f32.mxu0 %v4449_v38  ;;  %v8472_v52 = vpack.c.bf16 %v4449_v38, %v4447_v36 }
 0xa49   : > { %4862 = vmatmul.mubr.f32.gmra.mrb[80].mxu0 %v4448_v4  ;;  %v4450_v63 = vmul.f32 0.5, %v4386_v55 }
 0xa4a   : > { %v4233_v43 = vpop.f32.mrb[20].mxu0  ;;  %8473 = vmatprep.subr.bf16.mxu1 %v8472_v52  ;;  %v4451_v18 = vmul.f32 0.5, %v4387_v47  ;;  %v15277_v52 = vld [vmem:[#allocation141_spill] sm:$0xff] }
 0xa4b   : > { %v4388_v42 = vsub.f32 %v15269_v37, %v4233_v43  ;;  %v4235_v39 = vpop.f32.mrb[21].mxu0  ;;  %8475 = vmatpush1.bf16.msra.mxu1 %v8474_v33 }
 0xa4c   : > { %v4389_v60 = vsub.f32 %v15270_v13, %v4235_v39  ;;  %4867 = vmatprep.mubr.f32.mxu0 %v4451_v18 }
 0xa4d   : > { %v4452_v22 = vmul.f32 0.5, %v4388_v42  ;;  %4868 = vmatmul.mubr.f32.gmra.mrb[82].mxu0 %v4450_v63 }
 0xa4e   : > { %v4239_v58 = vpop.f32.mrb[22].mxu0  ;;  %v4453_v7 = vmul.f32 0.5, %v4389_v60 }
 0xa4f   : > { %v8478_v57 = vpack.c.bf16 %v4452_v22, %v4450_v63  ;;  %v4390_v12 = vsub.f32 %v15271_v6, %v4239_v58  ;;  %v4241_v32 = vpop.f32.mrb[23].mxu0  ;;  %v15278_v63 = vld [vmem:[#allocation142_spill] sm:$0xff] }
 0xa50   : > { %v4391_v29 = vsub.f32 %v15272_v10, %v4241_v32  ;;  %4873 = vmatprep.mubr.f32.mxu0 %v4453_v7  ;;  %v8476_v53 = vpack.c.bf16 %v4453_v7, %v4451_v18  ;;  %v15279_v7 = vld [vmem:[#allocation143_spill] sm:$0xff]  ;;  %v15280_v32 = vld [vmem:[#allocation144_spill] sm:$0xff] }
 0xa51   : > { %4874 = vmatmul.mubr.f32.gmra.mrb[84].mxu0 %v4452_v22  ;;  %v4454_v51 = vmul.f32 0.5, %v4390_v12 }
 0xa52   : > { %v4245_v17 = vpop.f32.mrb[24].mxu0  ;;  %8477 = vmatprep.subr.bf16.mxu1 %v8476_v53  ;;  %v4455_v45 = vmul.f32 0.5, %v4391_v29 }
 0xa53   : > { %v4392_v28 = vsub.f32 %v15273_v35, %v4245_v17  ;;  %v4247_v20 = vpop.f32.mrb[25].mxu0  ;;  %8479 = vmatpush1.bf16.msra.mxu1 %v8478_v57 }
 0xa54   : > { %v4393_v61 = vsub.f32 %v15274_v2, %v4247_v20  ;;  %4879 = vmatprep.mubr.f32.mxu0 %v4455_v45 }
 0xa55   : > { %v4456_v19 = vmul.f32 0.5, %v4392_v28  ;;  %4880 = vmatmul.mubr.f32.gmra.mrb[86].mxu0 %v4454_v51  ;;  %v15281_v28 = vld [vmem:[#allocation145_spill] sm:$0xff] }
 0xa56   : > { %v4251_v36 = vpop.f32.mrb[26].mxu0  ;;  %v4457_v40 = vmul.f32 0.5, %v4393_v61 }
 0xa57   : > { %v8482_v5 = vpack.c.bf16 %v4456_v19, %v4454_v51  ;;  %v4394_v41 = vsub.f32 %v15275_v24, %v4251_v36  ;;  %v4253_v4 = vpop.f32.mrb[27].mxu0 }
 0xa58   : > { %v4395_v38 = vsub.f32 %v15276_v14, %v4253_v4  ;;  %4885 = vmatprep.mubr.f32.mxu0 %v4457_v40  ;;  %v8480_v33 = vpack.c.bf16 %v4457_v40, %v4455_v45 }
 0xa59   : > { %4886 = vmatmul.mubr.f32.gmra.mrb[88].mxu0 %v4456_v19  ;;  %v4458_v47 = vmul.f32 0.5, %v4394_v41  ;;  %v15282_v19 = vld [vmem:[#allocation146_spill] sm:$0xff] }
 0xa5a   : > { %v4257_v55 = vpop.f32.mrb[28].mxu0  ;;  %8481 = vmatprep.subr.bf16.mxu1 %v8480_v33  ;;  %v4459_v16 = vmul.f32 0.5, %v4395_v38  ;;  %v15283_v38 = vld [vmem:[#allocation147_spill] sm:$0xff] }
 0xa5b   : > { %v4396_v43 = vsub.f32 %v15277_v52, %v4257_v55  ;;  %v4259_v18 = vpop.f32.mrb[29].mxu0  ;;  %8483 = vmatpush1.bf16.msra.mxu1 %v8482_v5 }
 0xa5c   : > { %v4397_v42 = vsub.f32 %v15278_v63, %v4259_v18  ;;  %4891 = vmatprep.mubr.f32.mxu0 %v4459_v16 }
 0xa5d   : > { %v4460_v39 = vmul.f32 0.5, %v4396_v43  ;;  %4892 = vmatmul.mubr.f32.gmra.mrb[90].mxu0 %v4458_v47 }
 0xa5e   : > { %v4263_v60 = vpop.f32.mrb[30].mxu0  ;;  %v4461_v22 = vmul.f32 0.5, %v4397_v42 }
 0xa5f   : > { %v8486_v58 = vpack.c.bf16 %v4460_v39, %v4458_v47  ;;  %v4398_v57 = vsub.f32 %v15279_v7, %v4263_v60  ;;  %v4265_v12 = vpop.f32.mrb[31].mxu0  ;;  %v15285_v60 = vld [vmem:[#allocation149_spill] sm:$0xff] }
 0xa60   : > { %v4399_v29 = vsub.f32 %v15280_v32, %v4265_v12  ;;  %4897 = vmatprep.mubr.f32.mxu0 %v4461_v22  ;;  %v8484_v53 = vpack.c.bf16 %v4461_v22, %v4459_v16  ;;  %v15284_v16 = vld [vmem:[#allocation148_spill] sm:$0xff] }
 0xa61   : > { %4898 = vmatmul.mubr.f32.gmra.mrb[92].mxu0 %v4460_v39  ;;  %v4462_v51 = vmul.f32 0.5, %v4398_v57  ;;  %v15286_v57 = vld [vmem:[#allocation150_spill] sm:$0xff] }
 0xa62   : > { %v4269_v17 = vpop.f32.mrb[32].mxu0  ;;  %8485 = vmatprep.subr.bf16.mxu1 %v8484_v53  ;;  %v4463_v45 = vmul.f32 0.5, %v4399_v29 }
 0xa63   : > { %v4400_v20 = vsub.f32 %v15281_v28, %v4269_v17  ;;  %v4271_v61 = vpop.f32.mrb[33].mxu0  ;;  %8487 = vmatpush1.bf16.msra.mxu1 %v8486_v58 }
 0xa64   : > { %v4401_v36 = vsub.f32 %v15282_v19, %v4271_v61  ;;  %4903 = vmatprep.mubr.f32.mxu0 %v4463_v45 }
 0xa65   : > { %v4464_v40 = vmul.f32 0.5, %v4400_v20  ;;  %4904 = vmatmul.mubr.f32.gmra.mrb[94].mxu0 %v4462_v51  ;;  %v15287_v20 = vld [vmem:[#allocation151_spill] sm:$0xff] }
 0xa66   : > { %v4275_v5 = vpop.f32.mrb[34].mxu0  ;;  %v4465_v41 = vmul.f32 0.5, %v4401_v36 }
 0xa67   : > { %v8490_v4 = vpack.c.bf16 %v4464_v40, %v4462_v51  ;;  %v4402_v33 = vsub.f32 %v15283_v38, %v4275_v5  ;;  %v4277_v55 = vpop.f32.mrb[35].mxu0 }
 0xa68   : > { %v4403_v47 = vsub.f32 %v15284_v16, %v4277_v55  ;;  %4909 = vmatprep.mubr.f32.mxu0 %v4465_v41  ;;  %v8488_v43 = vpack.c.bf16 %v4465_v41, %v4463_v45  ;;  %v15289_v55 = vld [vmem:[#allocation153_spill] sm:$0xff] }
 0xa69   : > { %4910 = vmatmul.mubr.f32.gmra.mrb[96].mxu0 %v4464_v40  ;;  %v4466_v39 = vmul.f32 0.5, %v4402_v33  ;;  %v15288_v40 = vld [vmem:[#allocation152_spill] sm:$0xff] }
 0xa6a   : > { %v4467_v18 = vmul.f32 0.5, %v4403_v47  ;;  %v4281_v42 = vpop.f32.mrb[36].mxu0  ;;  %8489 = vmatprep.subr.bf16.mxu1 %v8488_v43 }
 0xa6b   : > { %v4404_v22 = vsub.f32 %v15285_v60, %v4281_v42  ;;  %v4283_v58 = vpop.f32.mrb[37].mxu0  ;;  %8491 = vmatpush1.bf16.msra.mxu1 %v8490_v4  ;;  %v15290_v42 = vld [vmem:[#allocation154_spill] sm:$0xff] }
 0xa6c   : > { %v4405_v12 = vsub.f32 %v15286_v57, %v4283_v58  ;;  %4915 = vmatprep.mubr.f32.mxu0 %v4467_v18 }
 0xa6d   : > { %v4468_v29 = vmul.f32 0.5, %v4404_v22  ;;  %4916 = vmatmul.mubr.f32.gmra.mrb[98].mxu0 %v4466_v39 }
 0xa6e   : > { %v4469_v53 = vmul.f32 0.5, %v4405_v12  ;;  %v4287_v17 = vpop.f32.mrb[38].mxu0 }
 0xa6f   : > { %v8494_v51 = vpack.c.bf16 %v4468_v29, %v4466_v39  ;;  %v4406_v61 = vsub.f32 %v15287_v20, %v4287_v17  ;;  %v4289_v45 = vpop.f32.mrb[39].mxu0  ;;  %v15291_v17 = vld [vmem:[#allocation155_spill] sm:$0xff] }
 0xa70   : > { %v8492_v36 = vpack.c.bf16 %v4469_v53, %v4467_v18  ;;  %v4407_v5 = vsub.f32 %v15288_v40, %v4289_v45  ;;  %4921 = vmatprep.mubr.f32.mxu0 %v4469_v53 }
 0xa71   : > { %4922 = vmatmul.mubr.f32.gmra.mrb[100].mxu0 %v4468_v29  ;;  %v4470_v4 = vmul.f32 0.5, %v4406_v61 }
 0xa72   : > { %v4471_v41 = vmul.f32 0.5, %v4407_v5  ;;  %v4293_v33 = vpop.f32.mrb[40].mxu0  ;;  %8493 = vmatprep.subr.bf16.mxu1 %v8492_v36  ;;  %v15292_v5 = vld [vmem:[#allocation102_spill] sm:$0xff] }
 0xa73   : > { %v4408_v47 = vsub.f32 %v15289_v55, %v4293_v33  ;;  %v4295_v43 = vpop.f32.mrb[41].mxu0  ;;  %8495 = vmatpush1.bf16.msra.mxu1 %v8494_v51  ;;  %v15293_v33 = vld [vmem:[#allocation156_spill] sm:$0xff]  ;;  %v15295_v55 = vld [vmem:[#allocation158_spill] sm:$0xff] }
 0xa74   : > { %v4409_v22 = vsub.f32 %v15290_v42, %v4295_v43  ;;  %4927 = vmatprep.mubr.f32.mxu0 %v4471_v41 }
 0xa75   : > { %v4472_v39 = vmul.f32 0.5, %v4408_v47  ;;  %4928 = vmatmul.mubr.f32.gmra.mrb[102].mxu0 %v4470_v4  ;;  %v15294_v47 = vld [vmem:[#allocation157_spill] sm:$0xff] }
 0xa76   : > { %v4473_v58 = vmul.f32 0.5, %v4409_v22  ;;  %v4299_v12 = vpop.f32.mrb[42].mxu0 }
 0xa77   : > { %v8498_v18 = vpack.c.bf16 %v4472_v39, %v4470_v4  ;;  %v4410_v45 = vsub.f32 %v15291_v17, %v4299_v12  ;;  %v4301_v53 = vpop.f32.mrb[43].mxu0 }
 0xa78   : > { %v8496_v29 = vpack.c.bf16 %v4473_v58, %v4471_v41  ;;  %v4411_v40 = vsub.f32 %v15292_v5, %v4301_v53  ;;  %4933 = vmatprep.mubr.f32.mxu0 %v4473_v58 }
 0xa79   : > { %4934 = vmatmul.mubr.f32.gmra.mrb[104].mxu0 %v4472_v39  ;;  %v4474_v51 = vmul.f32 0.5, %v4410_v45 }
 0xa7a   : > { %v4475_v61 = vmul.f32 0.5, %v4411_v40  ;;  %v4305_v36 = vpop.f32.mrb[44].mxu0  ;;  %8497 = vmatprep.subr.bf16.mxu1 %v8496_v29  ;;  %v15296_v40 = vld [vmem:[#allocation159_spill] sm:$0xff] }
 0xa7b   : > { %v4412_v43 = vsub.f32 %v15293_v33, %v4305_v36  ;;  %v4307_v42 = vpop.f32.mrb[45].mxu0  ;;  %8499 = vmatpush1.bf16.msra.mxu1 %v8498_v18  ;;  %v15297_v36 = vld [vmem:[#allocation160_spill] sm:$0xff]  ;;  %v15299_v33 = vld [vmem:[#allocation162_spill] sm:$0xff] }
 0xa7c   : > { %v4413_v22 = vsub.f32 %v15294_v47, %v4307_v42  ;;  %4939 = vmatprep.mubr.f32.mxu0 %v4475_v61 }
 0xa7d   : > { %v4476_v4 = vmul.f32 0.5, %v4412_v43  ;;  %4940 = vmatmul.mubr.f32.gmra.mrb[106].mxu0 %v4474_v51  ;;  %v15298_v43 = vld [vmem:[#allocation161_spill] sm:$0xff] }
 0xa7e   : > { %v4477_v12 = vmul.f32 0.5, %v4413_v22  ;;  %v4311_v17 = vpop.f32.mrb[46].mxu0 }
 0xa7f   : > { %v8502_v41 = vpack.c.bf16 %v4476_v4, %v4474_v51  ;;  %v4414_v53 = vsub.f32 %v15295_v55, %v4311_v17  ;;  %v4313_v58 = vpop.f32.mrb[47].mxu0 }
 0xa80   : > { %v8500_v39 = vpack.c.bf16 %v4477_v12, %v4475_v61  ;;  %v4415_v5 = vsub.f32 %v15296_v40, %v4313_v58  ;;  %4945 = vmatprep.mubr.f32.mxu0 %v4477_v12 }
 0xa81   : > { %4946 = vmatmul.mubr.f32.gmra.mrb[108].mxu0 %v4476_v4  ;;  %v4478_v18 = vmul.f32 0.5, %v4414_v53 }
 0xa82   : > { %v4479_v45 = vmul.f32 0.5, %v4415_v5  ;;  %v4317_v29 = vpop.f32.mrb[48].mxu0  ;;  %8501 = vmatprep.subr.bf16.mxu1 %v8500_v39  ;;  %v15300_v5 = vld [vmem:[#allocation163_spill] sm:$0xff] }
 0xa83   : > { %v4416_v42 = vsub.f32 %v15297_v36, %v4317_v29  ;;  %v4319_v47 = vpop.f32.mrb[49].mxu0  ;;  %8503 = vmatpush1.bf16.msra.mxu1 %v8502_v41  ;;  %v15301_v29 = vld [vmem:[#allocation164_spill] sm:$0xff]  ;;  %v15303_v36 = vld [vmem:[#allocation105_spill] sm:$0xff] }
 0xa84   : > { %v4417_v22 = vsub.f32 %v15298_v43, %v4319_v47  ;;  %4951 = vmatprep.mubr.f32.mxu0 %v4479_v45 }
 0xa85   : > { %v4480_v51 = vmul.f32 0.5, %v4416_v42  ;;  %4952 = vmatmul.mubr.f32.gmra.mrb[110].mxu0 %v4478_v18  ;;  %v15302_v42 = vld [vmem:[#allocation165_spill] sm:$0xff] }
 0xa86   : > { %v4481_v17 = vmul.f32 0.5, %v4417_v22  ;;  %v4323_v55 = vpop.f32.mrb[50].mxu0 }
 0xa87   : > { %v8506_v61 = vpack.c.bf16 %v4480_v51, %v4478_v18  ;;  %v4418_v58 = vsub.f32 %v15299_v33, %v4323_v55  ;;  %v4325_v12 = vpop.f32.mrb[51].mxu0 }
 0xa88   : > { %v8504_v4 = vpack.c.bf16 %v4481_v17, %v4479_v45  ;;  %v4419_v40 = vsub.f32 %v15300_v5, %v4325_v12  ;;  %4957 = vmatprep.mubr.f32.mxu0 %v4481_v17 }
 0xa89   : > { %4958 = vmatmul.mubr.f32.gmra.mrb[112].mxu0 %v4480_v51  ;;  %v4482_v41 = vmul.f32 0.5, %v4418_v58 }
 0xa8a   : > { %v4483_v53 = vmul.f32 0.5, %v4419_v40  ;;  %v4329_v39 = vpop.f32.mrb[52].mxu0  ;;  %8505 = vmatprep.subr.bf16.mxu1 %v8504_v4  ;;  %v15304_v40 = vld [vmem:[#allocation103_spill] sm:$0xff] }
 0xa8b   : > { %v4420_v47 = vsub.f32 %v15301_v29, %v4329_v39  ;;  %v4331_v43 = vpop.f32.mrb[53].mxu0  ;;  %8507 = vmatpush1.bf16.msra.mxu1 %v8506_v61  ;;  %v15305_v39 = vld [vmem:[#allocation106_spill] sm:$0xff]  ;;  %v15307_v29 = vld [vmem:[#allocation109_spill] sm:$0xff] }
 0xa8c   : > { %v4421_v22 = vsub.f32 %v15302_v42, %v4331_v43  ;;  %4963 = vmatprep.mubr.f32.mxu0 %v4483_v53 }
 0xa8d   : > { %v4484_v18 = vmul.f32 0.5, %v4420_v47  ;;  %4964 = vmatmul.mubr.f32.gmra.mrb[114].mxu0 %v4482_v41  ;;  %v15306_v47 = vld [vmem:[#allocation104_spill] sm:$0xff] }
 0xa8e   : > { %v4485_v55 = vmul.f32 0.5, %v4421_v22  ;;  %v4335_v33 = vpop.f32.mrb[54].mxu0 }
 0xa8f   : > { %v8510_v45 = vpack.c.bf16 %v4484_v18, %v4482_v41  ;;  %v4422_v12 = vsub.f32 %v15303_v36, %v4335_v33  ;;  %v4337_v17 = vpop.f32.mrb[55].mxu0 }
 0xa90   : > { %v8508_v51 = vpack.c.bf16 %v4485_v55, %v4483_v53  ;;  %v4423_v5 = vsub.f32 %v15304_v40, %v4337_v17  ;;  %4969 = vmatprep.mubr.f32.mxu0 %v4485_v55 }
 0xa91   : > { %4970 = vmatmul.mubr.f32.gmra.mrb[116].mxu0 %v4484_v18  ;;  %v4486_v61 = vmul.f32 0.5, %v4422_v12 }
 0xa92   : > { %v4487_v58 = vmul.f32 0.5, %v4423_v5  ;;  %v4341_v4 = vpop.f32.mrb[56].mxu0  ;;  %8509 = vmatprep.subr.bf16.mxu1 %v8508_v51  ;;  %v15308_v5 = vld [vmem:[#allocation107_spill] sm:$0xff] }
 0xa93   : > { %v4424_v43 = vsub.f32 %v15305_v39, %v4341_v4  ;;  %v4343_v42 = vpop.f32.mrb[57].mxu0  ;;  %8511 = vmatpush1.bf16.msra.mxu1 %v8510_v45  ;;  %v15309_v4 = vld [vmem:[#allocation110_spill] sm:$0xff]  ;;  %v15311_v39 = vld [vmem:[#allocation111_spill] sm:$0xff] }
 0xa94   : > { %v4425_v22 = vsub.f32 %v15306_v47, %v4343_v42  ;;  %4975 = vmatprep.mubr.f32.mxu0 %v4487_v58 }
 0xa95   : > { %v4488_v41 = vmul.f32 0.5, %v4424_v43  ;;  %4976 = vmatmul.mubr.f32.gmra.mrb[118].mxu0 %v4486_v61  ;;  %v15310_v43 = vld [vmem:[#allocation108_spill] sm:$0xff] }
 0xa96   : > { %v4489_v33 = vmul.f32 0.5, %v4425_v22  ;;  %v4347_v36 = vpop.f32.mrb[58].mxu0 }
 0xa97   : > { %v8514_v53 = vpack.c.bf16 %v4488_v41, %v4486_v61  ;;  %v4426_v17 = vsub.f32 %v15307_v29, %v4347_v36  ;;  %v4349_v55 = vpop.f32.mrb[59].mxu0 }
 0xa98   : > { %v8512_v18 = vpack.c.bf16 %v4489_v33, %v4487_v58  ;;  %v4427_v40 = vsub.f32 %v15308_v5, %v4349_v55  ;;  %4981 = vmatprep.mubr.f32.mxu0 %v4489_v33 }
 0xa99   : > { %4982 = vmatmul.mubr.f32.gmra.mrb[120].mxu0 %v4488_v41  ;;  %v4490_v45 = vmul.f32 0.5, %v4426_v17 }
 0xa9a   : > { %v4491_v12 = vmul.f32 0.5, %v4427_v40  ;;  %v4353_v51 = vpop.f32.mrb[60].mxu0  ;;  %8513 = vmatprep.subr.bf16.mxu1 %v8512_v18  ;;  %v15312_v40 = vld [vmem:[#allocation113_spill] sm:$0xff] }
 0xa9b   : > { %v4428_v42 = vsub.f32 %v15309_v4, %v4353_v51  ;;  %v4355_v47 = vpop.f32.mrb[61].mxu0  ;;  %8515 = vmatpush1.bf16.msra.mxu1 %v8514_v53  ;;  %v15313_v51 = vld [vmem:[#allocation112_spill] sm:$0xff] }
 0xa9c   : > { %v4429_v22 = vsub.f32 %v15310_v43, %v4355_v47  ;;  %4987 = vmatprep.mubr.f32.mxu0 %v4491_v12 }
 0xa9d   : > { %v4492_v61 = vmul.f32 0.5, %v4428_v42  ;;  %4988 = vmatmul.mubr.f32.gmra.mrb[122].mxu0 %v4490_v45  ;;  %v15314_v42 = vld [vmem:[#allocation114_spill] sm:$0xff] }
 0xa9e   : > { %v4493_v36 = vmul.f32 0.5, %v4429_v22  ;;  %v4359_v29 = vpop.f32.mrb[62].mxu0 }
 0xa9f   : > { %v8518_v58 = vpack.c.bf16 %v4492_v61, %v4490_v45  ;;  %v4430_v55 = vsub.f32 %v15311_v39, %v4359_v29  ;;  %v4361_v33 = vpop.f32.mrb[63].mxu0 }
 0xaa0   : > { %v8516_v41 = vpack.c.bf16 %v4493_v36, %v4491_v12  ;;  %v4431_v5 = vsub.f32 %v15312_v40, %v4361_v33  ;;  %4993 = vmatprep.mubr.f32.mxu0 %v4493_v36  ;;  %v15317_v36 = vld [vmem:[#allocation52_spill] sm:$0xff] }
 0xaa1   : > { %4994 = vmatmul.mubr.f32.gmra.mrb[124].mxu0 %v4492_v61  ;;  %v4494_v53 = vmul.f32 0.5, %v4430_v55  ;;  %v15316_v61 = vld [vmem:[#allocation53_spill] sm:$0xff]  ;;  %v15318_v55 = vld [vmem:[#allocation50_spill] sm:$0xff]  ;;  %v15321_v33 = vld [vmem:[#allocation56_spill] sm:$0xff] }
 0xaa2   : > { %v4495_v17 = vmul.f32 0.5, %v4431_v5  ;;  %v4365_v18 = vpop.f32.mrb[64].mxu0  ;;  %8517 = vmatprep.subr.bf16.mxu1 %v8516_v41  ;;  %v15315_v5 = vld [vmem:[#allocation51_spill] sm:$0xff]  ;;  %v15322_v41 = vld [vmem:[#allocation54_spill] sm:$0xff] }
 0xaa3   : > { %v4432_v47 = vsub.f32 %v15313_v51, %v4365_v18  ;;  %v4367_v43 = vpop.f32.mrb[65].mxu0  ;;  %8519 = vmatpush1.bf16.msra.mxu1 %v8518_v58  ;;  %v15319_v58 = vld [vmem:[#allocation55_spill] sm:$0xff]  ;;  %v15324_v18 = vld [vmem:[#allocation61_spill] sm:$0xff] }
 0xaa4   : > { %v4433_v22 = vsub.f32 %v15314_v42, %v4367_v43  ;;  %4999 = vmatprep.mubr.f32.mxu0 %v4495_v17  ;;  %v15320_v43 = vld [vmem:[#allocation57_spill] sm:$0xff] }
 0xaa5   : > { %v4496_v45 = vmul.f32 0.5, %v4432_v47  ;;  %5000 = vmatmul.mubr.f32.gmra.mrb[126].mxu0 %v4494_v53  ;;  %v15327_v47 = vld [vmem:[#allocation63_spill] sm:$0xff] }
 0xaa6   : > { %v4497_v29 = vmul.f32 0.5, %v4433_v22  ;;  %v15328_v22 = vld [vmem:[#allocation65_spill] sm:$0xff] }
 0xaa7   : > { %v8522_v39 = vpack.c.bf16 %v4496_v45, %v4494_v53  ;;  %v15326_v53 = vld [vmem:[#allocation58_spill] sm:$0xff] }
 0xaa8   : > { %v8520_v12 = vpack.c.bf16 %v4497_v29, %v4495_v17  ;;  %5005 = vmatprep.mubr.f32.mxu0 %v4497_v29  ;;  %v15323_v17 = vld [vmem:[#allocation59_spill] sm:$0xff]  ;;  %v15330_v29 = vld [vmem:[#allocation62_spill] sm:$0xff] }
 0xaa9   : > { %5006 = vmatmul.mubr.f32.gmra.mrb[128].mxu0 %v4496_v45  ;;  %v15329_v45 = vld [vmem:[#allocation64_spill] sm:$0xff] }
 0xaaa   : > { %8521 = vmatprep.subr.bf16.mxu1 %v8520_v12  ;;  %v15331_v12 = vld [vmem:[#allocation67_spill] sm:$0xff] }
 0xaab   : > { %8523 = vmatpush1.bf16.msra.mxu1 %v8522_v39  ;;  %v15325_v39 = vld [vmem:[#allocation60_spill] sm:$0xff] }
 0xaae   : > { %4563 = vmatmul.mubr.f32.vlgmr.msra.gmra.mrb[32].mxu1 %v15315_v5  ;;  %v15332_v5 = vld [vmem:[#allocation69_spill] sm:$0xff] }
 0xaaf   : > { %4568 = vmatprep.mubr.f32.mxu1 %v15316_v61  ;;  %v15333_v61 = vld [vmem:[#allocation68_spill] sm:$0xff] }
 0xab2   : > { %4569 = vmatmul.mubr.f32.gmra.mrb[34].mxu1 %v15317_v36  ;;  %v15334_v36 = vld [vmem:[#allocation66_spill] sm:$0xff] }
 0xab3   : > { %4574 = vmatprep.mubr.f32.mxu1 %v15318_v55  ;;  %v15335_v55 = vld [vmem:[#allocation71_spill] sm:$0xff] }
 0xab6   : > { %4575 = vmatmul.mubr.f32.gmra.mrb[36].mxu1 %v15319_v58  ;;  %v15336_v58 = vld [vmem:[#allocation73_spill] sm:$0xff] }
 0xab7   : > { %4580 = vmatprep.mubr.f32.mxu1 %v15320_v43  ;;  %v15337_v43 = vld [vmem:[#allocation72_spill] sm:$0xff] }
 0xaba   : > { %4581 = vmatmul.mubr.f32.gmra.mrb[38].mxu1 %v15321_v33  ;;  %v15338_v33 = vld [vmem:[#allocation70_spill] sm:$0xff] }
 0xabb   : > { %4586 = vmatprep.mubr.f32.mxu1 %v15322_v41  ;;  %v15339_v41 = vld [vmem:[#allocation75_spill] sm:$0xff] }
 0xabe   : > { %4587 = vmatmul.mubr.f32.gmra.mrb[40].mxu1 %v15323_v17  ;;  %v15340_v17 = vld [vmem:[#allocation77_spill] sm:$0xff] }
 0xabf   : > { %4592 = vmatprep.mubr.f32.mxu1 %v15324_v18  ;;  %v15341_v18 = vld [vmem:[#allocation76_spill] sm:$0xff] }
 0xac2   : > { %4593 = vmatmul.mubr.f32.gmra.mrb[42].mxu1 %v15325_v39  ;;  %v15342_v39 = vld [vmem:[#allocation74_spill] sm:$0xff] }
 0xac3   : > { %4598 = vmatprep.mubr.f32.mxu1 %v15326_v53  ;;  %v15343_v53 = vld [vmem:[#allocation79_spill] sm:$0xff] }
 0xac6   : > { %4599 = vmatmul.mubr.f32.gmra.mrb[44].mxu1 %v15327_v47  ;;  %v15344_v47 = vld [vmem:[#allocation81_spill] sm:$0xff] }
 0xac7   : > { %4604 = vmatprep.mubr.f32.mxu1 %v15328_v22  ;;  %v15345_v22 = vld [vmem:[#allocation80_spill] sm:$0xff] }
 0xaca   : > { %4605 = vmatmul.mubr.f32.gmra.mrb[46].mxu1 %v15329_v45  ;;  %v15346_v45 = vld [vmem:[#allocation78_spill] sm:$0xff] }
 0xacb   : > { %4610 = vmatprep.mubr.f32.mxu1 %v15330_v29  ;;  %v15347_v29 = vld [vmem:[#allocation83_spill] sm:$0xff] }
 0xace   : > { %4611 = vmatmul.mubr.f32.gmra.mrb[48].mxu1 %v15331_v12  ;;  %v15348_v12 = vld [vmem:[#allocation85_spill] sm:$0xff] }
 0xacf   : > { %4616 = vmatprep.mubr.f32.mxu1 %v15332_v5  ;;  %v15349_v5 = vld [vmem:[#allocation84_spill] sm:$0xff] }
 0xad2   : > { %4617 = vmatmul.mubr.f32.gmra.mrb[50].mxu1 %v15333_v61  ;;  %v15350_v61 = vld [vmem:[#allocation82_spill] sm:$0xff] }
 0xad3   : > { %4622 = vmatprep.mubr.f32.mxu1 %v15334_v36  ;;  %v15351_v36 = vld [vmem:[#allocation87_spill] sm:$0xff] }
 0xad6   : > { %4623 = vmatmul.mubr.f32.gmra.mrb[52].mxu1 %v15335_v55  ;;  %v15352_v55 = vld [vmem:[#allocation89_spill] sm:$0xff] }
 0xad7   : > { %4628 = vmatprep.mubr.f32.mxu1 %v15336_v58  ;;  %v15353_v58 = vld [vmem:[#allocation88_spill] sm:$0xff] }
 0xada   : > { %4629 = vmatmul.mubr.f32.gmra.mrb[54].mxu1 %v15337_v43  ;;  %v15354_v43 = vld [vmem:[#allocation86_spill] sm:$0xff] }
 0xadb   : > { %4634 = vmatprep.mubr.f32.mxu1 %v15338_v33  ;;  %v15355_v33 = vld [vmem:[#allocation91_spill] sm:$0xff] }
 0xade   : > { %4635 = vmatmul.mubr.f32.gmra.mrb[56].mxu1 %v15339_v41  ;;  %v15356_v41 = vld [vmem:[#allocation93_spill] sm:$0xff] }
 0xadf   : > { %4640 = vmatprep.mubr.f32.mxu1 %v15340_v17 }
 0xae2   : > { %4641 = vmatmul.mubr.f32.gmra.mrb[58].mxu1 %v15341_v18 }
 0xae3   : > { %4646 = vmatprep.mubr.f32.mxu1 %v15342_v39  ;;  %v15357_v39 = vld [vmem:[#allocation92_spill] sm:$0xff] }
 0xae6   : > { %4647 = vmatmul.mubr.f32.gmra.mrb[60].mxu1 %v15343_v53  ;;  %v15358_v53 = vld [vmem:[#allocation90_spill] sm:$0xff] }
 0xae7   : > { %4652 = vmatprep.mubr.f32.mxu1 %v15344_v47 }
 0xaea   : > { %4653 = vmatmul.mubr.f32.gmra.mrb[62].mxu1 %v15345_v22 }
 0xaeb   : > { %4658 = vmatprep.mubr.f32.mxu1 %v15346_v45 }
 0xaee   : > { %4659 = vmatmul.mubr.f32.gmra.mrb[64].mxu1 %v15347_v29 }
 0xaef   : > { %4664 = vmatprep.mubr.f32.mxu1 %v15348_v12  ;;  %v15359_v12 = vld [vmem:[#allocation95_spill] sm:$0xff] }
 0xaf2   : > { %4665 = vmatmul.mubr.f32.gmra.mrb[66].mxu1 %v15349_v5  ;;  %v15360_v5 = vld [vmem:[#allocation97_spill] sm:$0xff] }
 0xaf3   : > { %4670 = vmatprep.mubr.f32.mxu1 %v15350_v61 }
 0xaf6   : > { %4671 = vmatmul.mubr.f32.gmra.mrb[68].mxu1 %v15351_v36 }
 0xaf7   : > { %4676 = vmatprep.mubr.f32.mxu1 %v15352_v55  ;;  %v15361_v55 = vld [vmem:[#allocation96_spill] sm:$0xff] }
 0xafa   : > { %4677 = vmatmul.mubr.f32.gmra.mrb[70].mxu1 %v15353_v58  ;;  %v15362_v58 = vld [vmem:[#allocation94_spill] sm:$0xff] }
 0xafb   : > { %4682 = vmatprep.mubr.f32.mxu1 %v15354_v43 }
 0xafe   : > { %4683 = vmatmul.mubr.f32.gmra.mrb[72].mxu1 %v15355_v33 }
 0xaff   : > { %4688 = vmatprep.mubr.f32.mxu1 %v15356_v41 }
 0xb00   : > { %v12599_v17 = vpop.f32.mrb[66].mxu0 }
 0xb01   : > { %v12601_v18 = vpop.f32.mrb[67].mxu0 }
 0xb02   : > { %4689 = vmatmul.mubr.f32.gmra.mrb[74].mxu1 %v15357_v39  ;;  %v15367_v39 = vld [vmem:[#allocation166_spill] sm:$0xff] }
 0xb03   : > { %4694 = vmatprep.mubr.f32.mxu1 %v15358_v53  ;;  %v15363_v53 = vld [vmem:[#allocation99_spill] sm:$0xff] }
 0xb04   : > { %v12605_v47 = vpop.f32.mrb[68].mxu0 }
 0xb05   : > { %v12609_v45 = vpop.f32.mrb[69].mxu0 }
 0xb06   : > { %4695 = vmatmul.mubr.f32.gmra.mrb[76].mxu1 %v15359_v12  ;;  %v15364_v12 = vld [vmem:[#allocation101_spill] sm:$0xff] }
 0xb07   : > { %4700 = vmatprep.mubr.f32.mxu1 %v15360_v5 }
 0xb08   : > { %v12615_v61 = vpop.f32.mrb[70].mxu0 }
 0xb09   : > { %v12617_v36 = vpop.f32.mrb[71].mxu0 }
 0xb0a   : > { %4701 = vmatmul.mubr.f32.gmra.mrb[78].mxu1 %v15361_v55  ;;  %v15365_v55 = vld [vmem:[#allocation100_spill] sm:$0xff] }
 0xb0b   : > { %4706 = vmatprep.mubr.f32.mxu1 %v15362_v58  ;;  %v15366_v58 = vld [vmem:[#allocation98_spill] sm:$0xff] }
 0xb0c   : > { %v12621_v43 = vpop.f32.mrb[72].mxu0 }
 0xb0d   : > { %v12625_v41 = vpop.f32.mrb[73].mxu0 }
 0xb0e   : > { %4707 = vmatmul.mubr.f32.gmra.mrb[80].mxu1 %v15363_v53 }
 0xb0f   : > { %4712 = vmatprep.mubr.f32.mxu1 %v15364_v12  ;;  %v15368_v12 = vld [vmem:[#allocation167_spill] sm:$0xff] }
 0xb10   : > { %v12631_v5 = vpop.f32.mrb[74].mxu0 }
 0xb11   : > { %v12633_v22 = vpop.f32.mrb[75].mxu0 }
 0xb12   : > { %4713 = vmatmul.mubr.f32.gmra.mrb[82].mxu1 %v15365_v55  ;;  %v15369_v55 = vld [vmem:[#allocation168_spill] sm:$0xff] }
 0xb13   : > { %4718 = vmatprep.mubr.f32.mxu1 %v15366_v58 }
 0xb14   : > { %v12637_v29 = vpop.f32.mrb[76].mxu0 }
 0xb15   : > { %v12641_v42 = vpop.f32.mrb[77].mxu0 }
 0xb16   : > { %4719 = vmatmul.mubr.f32.gmra.mrb[84].mxu1 %v15367_v39 }
 0xb17   : > { %4724 = vmatprep.mubr.f32.mxu1 %v15368_v12  ;;  %v15370_v12 = vld [vmem:[#allocation169_spill] sm:$0xff] }
 0xb18   : > { %v12647_v51 = vpop.f32.mrb[78].mxu0 }
 0xb19   : > { %v12649_v40 = vpop.f32.mrb[79].mxu0 }
 0xb1a   : > { %4725 = vmatmul.mubr.f32.gmra.mrb[86].mxu1 %v15369_v55  ;;  %v15371_v55 = vld [vmem:[#allocation170_spill] sm:$0xff] }
 0xb1b   : > { %4730 = vmatprep.mubr.f32.mxu1 %v12312_v23 }
 0xb1c   : > { %v12653_v58 = vpop.f32.mrb[80].mxu0 }
 0xb1d   : > { %v12657_v4 = vpop.f32.mrb[81].mxu0 }
 0xb1e   : > { %4731 = vmatmul.mubr.f32.gmra.mrb[88].mxu1 %v12310_v44 }
 0xb1f   : > { %4736 = vmatprep.mubr.f32.mxu1 %v15370_v12 }
 0xb20   : > { %v12663_v53 = vpop.f32.mrb[82].mxu0 }
 0xb21   : > { %v12665_v20 = vpop.f32.mrb[83].mxu0 }
 0xb22   : > { %4737 = vmatmul.mubr.f32.gmra.mrb[90].mxu1 %v15371_v55 }
 0xb23   : > { %4742 = vmatprep.mubr.f32.mxu1 %v12324_v49 }
 0xb24   : > { %v12669_v23 = vpop.f32.mrb[84].mxu0 }
 0xb25   : > { %v12673_v57 = vpop.f32.mrb[85].mxu0 }
 0xb26   : > { %4743 = vmatmul.mubr.f32.gmra.mrb[92].mxu1 %v12322_v34 }
 0xb27   : > { %4748 = vmatprep.mubr.f32.mxu1 %v12330_v25 }
 0xb28   : > { %v12679_v12 = vpop.f32.mrb[86].mxu0 }
 0xb29   : > { %v12681_v39 = vpop.f32.mrb[87].mxu0 }
 0xb2a   : > { %4749 = vmatmul.mubr.f32.gmra.mrb[94].mxu1 %v12326_v30 }
 0xb2b   : > { %5076 = vmatprep.mubr.f32.mxu1 %v12601_v18 }
 0xb2c   : > { %v12685_v49 = vpop.f32.mrb[88].mxu0 }
 0xb2d   : > { %v12689_v33 = vpop.f32.mrb[89].mxu0 }
 0xb30   : > { %v12693_v44 = vpop.f32.mrb[90].mxu0 }
 0xb31   : > { %v12695_v25 = vpop.f32.mrb[91].mxu0 }
 0xb34   : > { %v12697_v60 = vpop.f32.mrb[92].mxu0 }
 0xb35   : > { %v12701_v16 = vpop.f32.mrb[93].mxu0 }
 0xb38   : > { %v12705_v55 = vpop.f32.mrb[94].mxu0 }
 0xb39   : > { %v12707_v19 = vpop.f32.mrb[95].mxu0 }
 0xb3c   : > { %v12709_v28 = vpop.f32.mrb[96].mxu0 }
 0xb3d   : > { %v12713_v32 = vpop.f32.mrb[97].mxu0 }
 0xb40   : > { %v12717_v30 = vpop.f32.mrb[98].mxu0 }
 0xb41   : > { %v12719_v63 = vpop.f32.mrb[99].mxu0 }
 0xb44   : > { %v12721_v52 = vpop.f32.mrb[100].mxu0 }
 0xb45   : > { %v12725_v14 = vpop.f32.mrb[101].mxu0 }
 0xb48   : > { %v12729_v34 = vpop.f32.mrb[102].mxu0 }
 0xb49   : > { %v12731_v2 = vpop.f32.mrb[103].mxu0 }
 0xb4c   : > { %v12733_v35 = vpop.f32.mrb[104].mxu0 }
 0xb4d   : > { %v12737_v10 = vpop.f32.mrb[105].mxu0 }
 0xb50   : > { %v12741_v38 = vpop.f32.mrb[106].mxu0 }
 0xb51   : > { %v12743_v13 = vpop.f32.mrb[107].mxu0 }
 0xb54   : > { %v12745_v37 = vpop.f32.mrb[108].mxu0 }
 0xb55   : > { %v12749_v50 = vpop.f32.mrb[109].mxu0 }
 0xb58   : > { %v12753_v7 = vpop.f32.mrb[110].mxu0 }
 0xb59   : > { %v12755_v8 = vpop.f32.mrb[111].mxu0 }
 0xb5c   : > { %v12757_v31 = vpop.f32.mrb[112].mxu0 }
 0xb5d   : > { %v12761_v9 = vpop.f32.mrb[113].mxu0 }
 0xb60   : > { %v12765_v24 = vpop.f32.mrb[114].mxu0 }
 0xb61   : > { %15372 = vst [vmem:[#allocation40_spill] sm:$0xff] %v12765_v24  ;;  %v12767_v15 = vpop.f32.mrb[115].mxu0 }
 0xb64   : > { %v12769_v26 = vpop.f32.mrb[116].mxu0 }
 0xb65   : > { %v12773_v62 = vpop.f32.mrb[117].mxu0 }
 0xb68   : > { %v12777_v6 = vpop.f32.mrb[118].mxu0 }
 0xb69   : > { %15373 = vst [vmem:[#allocation39_spill] sm:$0xff] %v12777_v6  ;;  %v12779_v3 = vpop.f32.mrb[119].mxu0 }
 0xb6a   : > { %15374 = vst [vmem:[#allocation38_spill] sm:$0xff] %v12779_v3 }
 0xb6c   : > { %v12781_v56 = vpop.f32.mrb[120].mxu0 }
 0xb6d   : > { %15375 = vst [vmem:[#allocation43_spill] sm:$0xff] %v12781_v56  ;;  %v12785_v1 = vpop.f32.mrb[121].mxu0 }
 0xb6e   : > { %15376 = vst [vmem:[#allocation45_spill] sm:$0xff] %v12785_v1 }
 0xb70   : > { %v12789_v11 = vpop.f32.mrb[122].mxu0 }
 0xb71   : > { %15377 = vst [vmem:[#allocation44_spill] sm:$0xff] %v12789_v11  ;;  %v12791_v48 = vpop.f32.mrb[123].mxu0 }
 0xb72   : > { %15378 = vst [vmem:[#allocation42_spill] sm:$0xff] %v12791_v48 }
 0xb74   : > { %v12793_v54 = vpop.f32.mrb[124].mxu0 }
 0xb75   : > { %15379 = vst [vmem:[#allocation47_spill] sm:$0xff] %v12793_v54  ;;  %v12797_v27 = vpop.f32.mrb[125].mxu0 }
 0xb76   : > { %15380 = vst [vmem:[#allocation49_spill] sm:$0xff] %v12797_v27 }
 0xb78   : > { %v12801_v21 = vpop.f32.mrb[126].mxu0 }
 0xb79   : > { %15381 = vst [vmem:[#allocation48_spill] sm:$0xff] %v12801_v21  ;;  %v12803_v6 = vpop.f32.mrb[127].mxu0 }
 0xb7c   : > { %v12805_v56 = vpop.f32.mrb[128].mxu0 }
 0xb7d   : > { %15382 = vst [vmem:[#allocation46_spill] sm:$0xff] %v12805_v56  ;;  %v12809_v3 = vpop.f32.mrb[129].mxu0 }
 0xb81   : > { %v12813_v0 = vpop.f32.mrb[32].mxu1 }
 0xb82   : > { %15383 = vst [vmem:[#allocation51_spill] sm:$0xff] %v12813_v0  ;;  %v4566_v11 = vpop.f32.mrb[33].mxu1 }
 0xb83   : > { %5461 = vmatprep.mubr.f32.mxu0 %v4566_v11 }
 0xb85   : > { %v12815_v54 = vpop.f32.mrb[34].mxu1 }
 0xb86   : > { %15384 = vst [vmem:[#allocation53_spill] sm:$0xff] %v12815_v54  ;;  %v8590_v59 = vpack.c.bf16 %v12815_v54, %v12813_v0  ;;  %v12819_v48 = vpop.f32.mrb[35].mxu1 }
 0xb87   : > { %15385 = vst [vmem:[#allocation52_spill] sm:$0xff] %v12819_v48  ;;  %v8588_v27 = vpack.c.bf16 %v12819_v48, %v4566_v11 }
 0xb89   : > { %v12822_v24 = vpop.f32.mrb[36].mxu1  ;;  %8589 = vmatprep.subr.bf16.mxu1 %v8588_v27 }
 0xb8a   : > { %15386 = vst [vmem:[#allocation50_spill] sm:$0xff] %v12822_v24  ;;  %v12824_v46 = vpop.f32.mrb[37].mxu1  ;;  %8591 = vmatpush1.bf16.msra.mxu1 %v8590_v59 }
 0xb8b   : > { %15387 = vst [vmem:[#allocation55_spill] sm:$0xff] %v12824_v46 }
 0xb8d   : > { %v12826_v1 = vpop.f32.mrb[38].mxu1 }
 0xb8e   : > { %15388 = vst [vmem:[#allocation57_spill] sm:$0xff] %v12826_v1  ;;  %v8594_v21 = vpack.c.bf16 %v12826_v1, %v12822_v24  ;;  %v12830_v56 = vpop.f32.mrb[39].mxu1 }
 0xb8f   : > { %15389 = vst [vmem:[#allocation56_spill] sm:$0xff] %v12830_v56  ;;  %v8592_v54 = vpack.c.bf16 %v12830_v56, %v12824_v46 }
 0xb91   : > { %v12834_v0 = vpop.f32.mrb[40].mxu1  ;;  %8593 = vmatprep.subr.bf16.mxu1 %v8592_v54 }
 0xb92   : > { %15390 = vst [vmem:[#allocation54_spill] sm:$0xff] %v12834_v0  ;;  %v12836_v11 = vpop.f32.mrb[41].mxu1  ;;  %8595 = vmatpush1.bf16.msra.mxu1 %v8594_v21 }
 0xb93   : > { %15391 = vst [vmem:[#allocation59_spill] sm:$0xff] %v12836_v11 }
 0xb95   : > { %v12838_v27 = vpop.f32.mrb[42].mxu1 }
 0xb96   : > { %15392 = vst [vmem:[#allocation61_spill] sm:$0xff] %v12838_v27  ;;  %v8598_v59 = vpack.c.bf16 %v12838_v27, %v12834_v0  ;;  %v12842_v48 = vpop.f32.mrb[43].mxu1 }
 0xb97   : > { %15393 = vst [vmem:[#allocation60_spill] sm:$0xff] %v12842_v48  ;;  %v8596_v1 = vpack.c.bf16 %v12842_v48, %v12836_v11 }
 0xb99   : > { %v12846_v24 = vpop.f32.mrb[44].mxu1  ;;  %8597 = vmatprep.subr.bf16.mxu1 %v8596_v1 }
 0xb9a   : > { %15394 = vst [vmem:[#allocation58_spill] sm:$0xff] %v12846_v24  ;;  %v12848_v56 = vpop.f32.mrb[45].mxu1  ;;  %8599 = vmatpush1.bf16.msra.mxu1 %v8598_v59 }
 0xb9b   : > { %15395 = vst [vmem:[#allocation63_spill] sm:$0xff] %v12848_v56 }
 0xb9d   : > { %v12850_v54 = vpop.f32.mrb[46].mxu1 }
 0xb9e   : > { %15396 = vst [vmem:[#allocation65_spill] sm:$0xff] %v12850_v54  ;;  %v8602_v21 = vpack.c.bf16 %v12850_v54, %v12846_v24  ;;  %v12854_v46 = vpop.f32.mrb[47].mxu1 }
 0xb9f   : > { %15397 = vst [vmem:[#allocation64_spill] sm:$0xff] %v12854_v46  ;;  %v8600_v27 = vpack.c.bf16 %v12854_v46, %v12848_v56 }
 0xba1   : > { %v12858_v0 = vpop.f32.mrb[48].mxu1  ;;  %8601 = vmatprep.subr.bf16.mxu1 %v8600_v27 }
 0xba2   : > { %15398 = vst [vmem:[#allocation62_spill] sm:$0xff] %v12858_v0  ;;  %v12860_v48 = vpop.f32.mrb[49].mxu1  ;;  %8603 = vmatpush1.bf16.msra.mxu1 %v8602_v21 }
 0xba3   : > { %15399 = vst [vmem:[#allocation67_spill] sm:$0xff] %v12860_v48 }
 0xba5   : > { %v12862_v1 = vpop.f32.mrb[50].mxu1 }
 0xba6   : > { %15400 = vst [vmem:[#allocation69_spill] sm:$0xff] %v12862_v1  ;;  %v8606_v59 = vpack.c.bf16 %v12862_v1, %v12858_v0  ;;  %v12866_v11 = vpop.f32.mrb[51].mxu1 }
 0xba7   : > { %15401 = vst [vmem:[#allocation68_spill] sm:$0xff] %v12866_v11  ;;  %v8604_v54 = vpack.c.bf16 %v12866_v11, %v12860_v48 }
 0xba9   : > { %v12870_v24 = vpop.f32.mrb[52].mxu1  ;;  %8605 = vmatprep.subr.bf16.mxu1 %v8604_v54 }
 0xbaa   : > { %15402 = vst [vmem:[#allocation66_spill] sm:$0xff] %v12870_v24  ;;  %v12872_v46 = vpop.f32.mrb[53].mxu1  ;;  %8607 = vmatpush1.bf16.msra.mxu1 %v8606_v59 }
 0xbab   : > { %15403 = vst [vmem:[#allocation71_spill] sm:$0xff] %v12872_v46 }
 0xbad   : > { %v12874_v27 = vpop.f32.mrb[54].mxu1 }
 0xbae   : > { %15404 = vst [vmem:[#allocation73_spill] sm:$0xff] %v12874_v27  ;;  %v8610_v21 = vpack.c.bf16 %v12874_v27, %v12870_v24  ;;  %v12878_v56 = vpop.f32.mrb[55].mxu1 }
 0xbaf   : > { %15405 = vst [vmem:[#allocation72_spill] sm:$0xff] %v12878_v56  ;;  %v8608_v1 = vpack.c.bf16 %v12878_v56, %v12872_v46 }
 0xbb1   : > { %v12882_v0 = vpop.f32.mrb[56].mxu1  ;;  %8609 = vmatprep.subr.bf16.mxu1 %v8608_v1 }
 0xbb2   : > { %15406 = vst [vmem:[#allocation70_spill] sm:$0xff] %v12882_v0  ;;  %v12884_v11 = vpop.f32.mrb[57].mxu1  ;;  %8611 = vmatpush1.bf16.msra.mxu1 %v8610_v21 }
 0xbb3   : > { %15407 = vst [vmem:[#allocation75_spill] sm:$0xff] %v12884_v11 }
 0xbb5   : > { %v12886_v54 = vpop.f32.mrb[58].mxu1 }
 0xbb6   : > { %15408 = vst [vmem:[#allocation77_spill] sm:$0xff] %v12886_v54  ;;  %v8614_v59 = vpack.c.bf16 %v12886_v54, %v12882_v0  ;;  %v12890_v48 = vpop.f32.mrb[59].mxu1 }
 0xbb7   : > { %15409 = vst [vmem:[#allocation76_spill] sm:$0xff] %v12890_v48  ;;  %v8612_v27 = vpack.c.bf16 %v12890_v48, %v12884_v11 }
 0xbb9   : > { %v12894_v24 = vpop.f32.mrb[60].mxu1  ;;  %8613 = vmatprep.subr.bf16.mxu1 %v8612_v27 }
 0xbba   : > { %15410 = vst [vmem:[#allocation74_spill] sm:$0xff] %v12894_v24  ;;  %v12896_v56 = vpop.f32.mrb[61].mxu1  ;;  %8615 = vmatpush1.bf16.msra.mxu1 %v8614_v59 }
 0xbbb   : > { %15411 = vst [vmem:[#allocation79_spill] sm:$0xff] %v12896_v56 }
 0xbbd   : > { %v12898_v1 = vpop.f32.mrb[62].mxu1 }
 0xbbe   : > { %15412 = vst [vmem:[#allocation81_spill] sm:$0xff] %v12898_v1  ;;  %v8618_v21 = vpack.c.bf16 %v12898_v1, %v12894_v24  ;;  %v12902_v46 = vpop.f32.mrb[63].mxu1 }
 0xbbf   : > { %15413 = vst [vmem:[#allocation80_spill] sm:$0xff] %v12902_v46  ;;  %v8616_v54 = vpack.c.bf16 %v12902_v46, %v12896_v56 }
 0xbc1   : > { %v12906_v0 = vpop.f32.mrb[64].mxu1  ;;  %8617 = vmatprep.subr.bf16.mxu1 %v8616_v54 }
 0xbc2   : > { %15414 = vst [vmem:[#allocation78_spill] sm:$0xff] %v12906_v0  ;;  %v12908_v48 = vpop.f32.mrb[65].mxu1  ;;  %8619 = vmatpush1.bf16.msra.mxu1 %v8618_v21 }
 0xbc3   : > { %15415 = vst [vmem:[#allocation83_spill] sm:$0xff] %v12908_v48 }
 0xbc5   : > { %v12910_v27 = vpop.f32.mrb[66].mxu1 }
 0xbc6   : > { %15416 = vst [vmem:[#allocation85_spill] sm:$0xff] %v12910_v27  ;;  %v8622_v59 = vpack.c.bf16 %v12910_v27, %v12906_v0  ;;  %v12914_v11 = vpop.f32.mrb[67].mxu1 }
 0xbc7   : > { %15417 = vst [vmem:[#allocation84_spill] sm:$0xff] %v12914_v11  ;;  %v8620_v1 = vpack.c.bf16 %v12914_v11, %v12908_v48 }
 0xbc9   : > { %v12918_v24 = vpop.f32.mrb[68].mxu1  ;;  %8621 = vmatprep.subr.bf16.mxu1 %v8620_v1 }
 0xbca   : > { %15418 = vst [vmem:[#allocation82_spill] sm:$0xff] %v12918_v24  ;;  %v12920_v46 = vpop.f32.mrb[69].mxu1  ;;  %8623 = vmatpush1.bf16.msra.mxu1 %v8622_v59 }
 0xbcb   : > { %15419 = vst [vmem:[#allocation87_spill] sm:$0xff] %v12920_v46 }
 0xbcd   : > { %v12922_v54 = vpop.f32.mrb[70].mxu1 }
 0xbce   : > { %15420 = vst [vmem:[#allocation89_spill] sm:$0xff] %v12922_v54  ;;  %v8626_v21 = vpack.c.bf16 %v12922_v54, %v12918_v24  ;;  %v12926_v56 = vpop.f32.mrb[71].mxu1 }
 0xbcf   : > { %15421 = vst [vmem:[#allocation88_spill] sm:$0xff] %v12926_v56  ;;  %v8624_v27 = vpack.c.bf16 %v12926_v56, %v12920_v46 }
 0xbd1   : > { %v12930_v0 = vpop.f32.mrb[72].mxu1  ;;  %8625 = vmatprep.subr.bf16.mxu1 %v8624_v27 }
 0xbd2   : > { %15422 = vst [vmem:[#allocation86_spill] sm:$0xff] %v12930_v0  ;;  %v12932_v11 = vpop.f32.mrb[73].mxu1  ;;  %8627 = vmatpush1.bf16.msra.mxu1 %v8626_v21 }
 0xbd3   : > { %15423 = vst [vmem:[#allocation91_spill] sm:$0xff] %v12932_v11 }
 0xbd5   : > { %v12934_v1 = vpop.f32.mrb[74].mxu1 }
 0xbd6   : > { %15424 = vst [vmem:[#allocation93_spill] sm:$0xff] %v12934_v1  ;;  %v8630_v59 = vpack.c.bf16 %v12934_v1, %v12930_v0  ;;  %v12938_v48 = vpop.f32.mrb[75].mxu1 }
 0xbd7   : > { %15425 = vst [vmem:[#allocation92_spill] sm:$0xff] %v12938_v48  ;;  %v8628_v54 = vpack.c.bf16 %v12938_v48, %v12932_v11 }
 0xbd9   : > { %v12942_v24 = vpop.f32.mrb[76].mxu1  ;;  %8629 = vmatprep.subr.bf16.mxu1 %v8628_v54 }
 0xbda   : > { %15426 = vst [vmem:[#allocation90_spill] sm:$0xff] %v12942_v24  ;;  %v12944_v56 = vpop.f32.mrb[77].mxu1  ;;  %8631 = vmatpush1.bf16.msra.mxu1 %v8630_v59 }
 0xbdb   : > { %15427 = vst [vmem:[#allocation95_spill] sm:$0xff] %v12944_v56 }
 0xbdd   : > { %v12946_v27 = vpop.f32.mrb[78].mxu1 }
 0xbde   : > { %15428 = vst [vmem:[#allocation97_spill] sm:$0xff] %v12946_v27  ;;  %v8634_v21 = vpack.c.bf16 %v12946_v27, %v12942_v24  ;;  %v12950_v46 = vpop.f32.mrb[79].mxu1 }
 0xbdf   : > { %15429 = vst [vmem:[#allocation96_spill] sm:$0xff] %v12950_v46  ;;  %v8632_v1 = vpack.c.bf16 %v12950_v46, %v12944_v56 }
 0xbe1   : > { %v12954_v0 = vpop.f32.mrb[80].mxu1  ;;  %8633 = vmatprep.subr.bf16.mxu1 %v8632_v1 }
 0xbe2   : > { %15430 = vst [vmem:[#allocation94_spill] sm:$0xff] %v12954_v0  ;;  %v12956_v48 = vpop.f32.mrb[81].mxu1  ;;  %8635 = vmatpush1.bf16.msra.mxu1 %v8634_v21 }
 0xbe3   : > { %15431 = vst [vmem:[#allocation99_spill] sm:$0xff] %v12956_v48 }
 0xbe5   : > { %v12958_v54 = vpop.f32.mrb[82].mxu1 }
 0xbe6   : > { %15432 = vst [vmem:[#allocation101_spill] sm:$0xff] %v12958_v54  ;;  %v8638_v59 = vpack.c.bf16 %v12958_v54, %v12954_v0  ;;  %v12962_v11 = vpop.f32.mrb[83].mxu1 }
 0xbe7   : > { %15433 = vst [vmem:[#allocation100_spill] sm:$0xff] %v12962_v11  ;;  %v8636_v27 = vpack.c.bf16 %v12962_v11, %v12956_v48 }
 0xbe9   : > { %v12966_v24 = vpop.f32.mrb[84].mxu1  ;;  %8637 = vmatprep.subr.bf16.mxu1 %v8636_v27 }
 0xbea   : > { %15434 = vst [vmem:[#allocation98_spill] sm:$0xff] %v12966_v24  ;;  %v12968_v46 = vpop.f32.mrb[85].mxu1  ;;  %8639 = vmatpush1.bf16.msra.mxu1 %v8638_v59 }
 0xbeb   : > { %15435 = vst [vmem:[#allocation166_spill] sm:$0xff] %v12968_v46 }
 0xbed   : > { %v12970_v1 = vpop.f32.mrb[86].mxu1 }
 0xbee   : > { %15436 = vst [vmem:[#allocation167_spill] sm:$0xff] %v12970_v1  ;;  %v8642_v21 = vpack.c.bf16 %v12970_v1, %v12966_v24  ;;  %v12974_v56 = vpop.f32.mrb[87].mxu1 }
 0xbef   : > { %15437 = vst [vmem:[#allocation168_spill] sm:$0xff] %v12974_v56  ;;  %v8640_v54 = vpack.c.bf16 %v12974_v56, %v12968_v46 }
 0xbf1   : > { %v12978_v0 = vpop.f32.mrb[88].mxu1  ;;  %8641 = vmatprep.subr.bf16.mxu1 %v8640_v54 }
 0xbf2   : > { %v12980_v11 = vpop.f32.mrb[89].mxu1  ;;  %8643 = vmatpush1.bf16.msra.mxu1 %v8642_v21 }
 0xbf5   : > { %v12982_v27 = vpop.f32.mrb[90].mxu1 }
 0xbf6   : > { %15438 = vst [vmem:[#allocation169_spill] sm:$0xff] %v12982_v27  ;;  %v8646_v59 = vpack.c.bf16 %v12982_v27, %v12978_v0  ;;  %v12986_v48 = vpop.f32.mrb[91].mxu1 }
 0xbf7   : > { %15439 = vst [vmem:[#allocation170_spill] sm:$0xff] %v12986_v48  ;;  %v8644_v1 = vpack.c.bf16 %v12986_v48, %v12980_v11  ;;  %v15440_v48 = vpack.c.bf16 %v12609_v45, %v12601_v18  ;;  %v15443_v18 = vpack.c.bf16 %v12621_v43, %v12615_v61 }
 0xbf9   : > { %v12990_v24 = vpop.f32.mrb[92].mxu1  ;;  %8645 = vmatprep.subr.bf16.mxu1 %v8644_v1  ;;  %v15441_v1 = vpack.c.bf16 %v12605_v47, %v12599_v17 }
 0xbfa   : > { %v12992_v56 = vpop.f32.mrb[93].mxu1  ;;  %8647 = vmatpush1.bf16.msra.mxu1 %v8646_v59  ;;  %v15442_v59 = vpack.c.bf16 %v12625_v41, %v12617_v36 }
 0xbfd   : > { %v12994_v54 = vpop.f32.mrb[94].mxu1 }
 0xbfe   : > { %v8650_v21 = vpack.c.bf16 %v12994_v54, %v12990_v24  ;;  %v12998_v46 = vpop.f32.mrb[95].mxu1 }
 0xbff   : > { %v8648_v27 = vpack.c.bf16 %v12998_v46, %v12992_v56 }
 0xc01   : > { %8649 = vmatprep.subr.bf16.mxu1 %v8648_v27  ;;  %v15467_v27 = vld [vmem:[#allocation45_spill] sm:$0xff] }
 0xc02   : > { %8651 = vmatpush1.bf16.msra.mxu1 %v8650_v21 }
 0xc03   : > { %8717 = vmatprep.subr.bf16.mxu1 %v15440_v48  ;;  %v15444_v48 = vpack.c.bf16 %v12641_v42, %v12633_v22 }
 0xc05   : > { %5077 = vmatmul.mubr.f32.vlgmr.msra.gmra.mrb[96].mxu1 %v12599_v17  ;;  %v15445_v17 = vpack.c.bf16 %v12637_v29, %v12631_v5 }
 0xc06   : > { %5082 = vmatprep.mubr.f32.mxu1 %v12609_v45  ;;  %8719 = vmatpush1.bf16.msra.mxu1 %v15441_v1  ;;  %v15447_v45 = vpack.c.bf16 %v12653_v58, %v12647_v51  ;;  %v15471_v1 = vld [vmem:[#allocation39_spill] sm:$0xff] }
 0xc07   : > { %8721 = vmatprep.subr.bf16.mxu1 %v15442_v59 }
 0xc09   : > { %5083 = vmatmul.mubr.f32.gmra.mrb[98].mxu1 %v12605_v47  ;;  %v15446_v47 = vpack.c.bf16 %v12657_v4, %v12649_v40 }
 0xc0a   : > { %5088 = vmatprep.mubr.f32.mxu1 %v12617_v36  ;;  %8723 = vmatpush1.bf16.msra.mxu1 %v15443_v18  ;;  %v15449_v36 = vpack.c.bf16 %v12669_v23, %v12663_v53  ;;  %v15473_v18 = vld [vmem:[#allocation49_spill] sm:$0xff] }
 0xc0b   : > { %8725 = vmatprep.subr.bf16.mxu1 %v15444_v48 }
 0xc0d   : > { %5089 = vmatmul.mubr.f32.gmra.mrb[100].mxu1 %v12615_v61  ;;  %v15448_v61 = vpack.c.bf16 %v12673_v57, %v12665_v20 }
 0xc0e   : > { %5094 = vmatprep.mubr.f32.mxu1 %v12625_v41  ;;  %8727 = vmatpush1.bf16.msra.mxu1 %v15445_v17  ;;  %v15452_v41 = vpack.c.bf16 %v12701_v16, %v12695_v25  ;;  %v15477_v17 = vld [vmem:[#allocation44_spill] sm:$0xff] }
 0xc0f   : > { %8729 = vmatprep.subr.bf16.mxu1 %v15446_v47 }
 0xc11   : > { %5095 = vmatmul.mubr.f32.gmra.mrb[102].mxu1 %v12621_v43  ;;  %v15450_v43 = vpack.c.bf16 %v12689_v33, %v12681_v39 }
 0xc12   : > { %5100 = vmatprep.mubr.f32.mxu1 %v12633_v22  ;;  %8731 = vmatpush1.bf16.msra.mxu1 %v15447_v45  ;;  %v15451_v22 = vpack.c.bf16 %v12685_v49, %v12679_v12  ;;  %v15481_v45 = vld [vmem:[#allocation48_spill] sm:$0xff] }
 0xc13   : > { %8733 = vmatprep.subr.bf16.mxu1 %v15448_v61 }
 0xc15   : > { %5101 = vmatmul.mubr.f32.gmra.mrb[104].mxu1 %v12631_v5  ;;  %v15458_v5 = vpack.c.bf16 %v12737_v10, %v12731_v2 }
 0xc16   : > { %5106 = vmatprep.mubr.f32.mxu1 %v12641_v42  ;;  %8735 = vmatpush1.bf16.msra.mxu1 %v15449_v36  ;;  %v15453_v42 = vpack.c.bf16 %v12697_v60, %v12693_v44 }
 0xc17   : > { %8737 = vmatprep.subr.bf16.mxu1 %v15450_v43 }
 0xc19   : > { %5107 = vmatmul.mubr.f32.gmra.mrb[106].mxu1 %v12637_v29  ;;  %v15454_v29 = vpack.c.bf16 %v12713_v32, %v12707_v19 }
 0xc1a   : > { %5112 = vmatprep.mubr.f32.mxu1 %v12649_v40  ;;  %8739 = vmatpush1.bf16.msra.mxu1 %v15451_v22  ;;  %v15455_v40 = vpack.c.bf16 %v12709_v28, %v12705_v55 }
 0xc1b   : > { %8741 = vmatprep.subr.bf16.mxu1 %v15452_v41  ;;  %v15489_v41 = vld [vmem:[#allocation121_spill] sm:$0xff] }
 0xc1d   : > { %5113 = vmatmul.mubr.f32.gmra.mrb[108].mxu1 %v12647_v51  ;;  %v15456_v51 = vpack.c.bf16 %v12725_v14, %v12719_v63 }
 0xc1e   : > { %5118 = vmatprep.mubr.f32.mxu1 %v12657_v4  ;;  %8743 = vmatpush1.bf16.msra.mxu1 %v15453_v42  ;;  %v15457_v4 = vpack.c.bf16 %v12721_v52, %v12717_v30 }
 0xc1f   : > { %8745 = vmatprep.subr.bf16.mxu1 %v15454_v29 }
 0xc21   : > { %5119 = vmatmul.mubr.f32.gmra.mrb[110].mxu1 %v12653_v58  ;;  %v15462_v58 = vpack.c.bf16 %v12761_v9, %v12755_v8 }
 0xc22   : > { %5124 = vmatprep.mubr.f32.mxu1 %v12665_v20  ;;  %8747 = vmatpush1.bf16.msra.mxu1 %v15455_v40  ;;  %v15459_v20 = vpack.c.bf16 %v12733_v35, %v12729_v34  ;;  %v15490_v40 = vld [vmem:[#allocation122_spill] sm:$0xff] }
 0xc23   : > { %8749 = vmatprep.subr.bf16.mxu1 %v15456_v51 }
 0xc25   : > { %5125 = vmatmul.mubr.f32.gmra.mrb[112].mxu1 %v12663_v53  ;;  %v15460_v53 = vpack.c.bf16 %v12749_v50, %v12743_v13 }
 0xc26   : > { %5130 = vmatprep.mubr.f32.mxu1 %v12673_v57  ;;  %8751 = vmatpush1.bf16.msra.mxu1 %v15457_v4  ;;  %v15461_v57 = vpack.c.bf16 %v12745_v37, %v12741_v38 }
 0xc27   : > { %8753 = vmatprep.subr.bf16.mxu1 %v15458_v5 }
 0xc29   : > { %5131 = vmatmul.mubr.f32.gmra.mrb[114].mxu1 %v12669_v23  ;;  %v15464_v23 = vpack.c.bf16 %v12773_v62, %v12767_v15 }
 0xc2a   : > { %5136 = vmatprep.mubr.f32.mxu1 %v12681_v39  ;;  %8755 = vmatpush1.bf16.msra.mxu1 %v15459_v20  ;;  %v15463_v39 = vpack.c.bf16 %v12757_v31, %v12753_v7 }
 0xc2b   : > { %8757 = vmatprep.subr.bf16.mxu1 %v15460_v53 }
 0xc2d   : > { %5137 = vmatmul.mubr.f32.gmra.mrb[116].mxu1 %v12679_v12 }
 0xc2e   : > { %5142 = vmatprep.mubr.f32.mxu1 %v12689_v33  ;;  %8759 = vmatpush1.bf16.msra.mxu1 %v15461_v57  ;;  %v15465_v33 = vld [vmem:[#allocation40_spill] sm:$0xff]  ;;  %v15491_v57 = vld [vmem:[#allocation123_spill] sm:$0xff] }
 0xc2f   : > { %8761 = vmatprep.subr.bf16.mxu1 %v15462_v58  ;;  %v15466_v12 = vpack.c.bf16 %v12769_v26, %v15465_v33 }
 0xc31   : > { %5143 = vmatmul.mubr.f32.gmra.mrb[118].mxu1 %v12685_v49  ;;  %v15468_v49 = vld [vmem:[#allocation38_spill] sm:$0xff] }
 0xc32   : > { %5148 = vmatprep.mubr.f32.mxu1 %v12695_v25  ;;  %8763 = vmatpush1.bf16.msra.mxu1 %v15463_v39  ;;  %v15469_v21 = vpack.c.bf16 %v15467_v27, %v15468_v49  ;;  %v15470_v25 = vld [vmem:[#allocation43_spill] sm:$0xff] }
 0xc33   : > { %8765 = vmatprep.subr.bf16.mxu1 %v15464_v23  ;;  %v15472_v59 = vpack.c.bf16 %v15470_v25, %v15471_v1 }
 0xc35   : > { %5149 = vmatmul.mubr.f32.gmra.mrb[120].mxu1 %v12693_v44  ;;  %v15474_v44 = vld [vmem:[#allocation42_spill] sm:$0xff] }
 0xc36   : > { %5154 = vmatprep.mubr.f32.mxu1 %v12701_v16  ;;  %8767 = vmatpush1.bf16.msra.mxu1 %v15466_v12  ;;  %v15475_v48 = vpack.c.bf16 %v15473_v18, %v15474_v44  ;;  %v15476_v16 = vld [vmem:[#allocation47_spill] sm:$0xff] }
 0xc37   : > { %8769 = vmatprep.subr.bf16.mxu1 %v15469_v21  ;;  %v15478_v47 = vpack.c.bf16 %v15476_v16, %v15477_v17 }
 0xc39   : > { %5155 = vmatmul.mubr.f32.gmra.mrb[122].mxu1 %v12697_v60  ;;  %v15479_v60 = vpack.c.bf16 %v12809_v3, %v12803_v6 }
 0xc3a   : > { %5160 = vmatprep.mubr.f32.mxu1 %v12707_v19  ;;  %8771 = vmatpush1.bf16.msra.mxu1 %v15472_v59  ;;  %v15480_v19 = vld [vmem:[#allocation46_spill] sm:$0xff] }
 0xc3b   : > { %8773 = vmatprep.subr.bf16.mxu1 %v15475_v48  ;;  %v15482_v61 = vpack.c.bf16 %v15480_v19, %v15481_v45 }
 0xc3d   : > { %5161 = vmatmul.mubr.f32.gmra.mrb[124].mxu1 %v12705_v55 }
 0xc3e   : > { %5166 = vmatprep.mubr.f32.mxu1 %v12713_v32  ;;  %8775 = vmatpush1.bf16.msra.mxu1 %v15478_v47  ;;  %v15487_v32 = vld [vmem:[#allocation119_spill] sm:$0xff] }
 0xc3f   : > { %8777 = vmatprep.subr.bf16.mxu1 %v15479_v60  ;;  %v15495_v60 = vld [vmem:[#allocation127_spill] sm:$0xff] }
 0xc41   : > { %5167 = vmatmul.mubr.f32.gmra.mrb[126].mxu1 %v12709_v28 }
 0xc42   : > { %5172 = vmatprep.mubr.f32.mxu1 %v12719_v63  ;;  %8779 = vmatpush1.bf16.msra.mxu1 %v15482_v61 }
 0xc45   : > { %5173 = vmatmul.mubr.f32.gmra.mrb[128].mxu1 %v12717_v30 }
 0xc46   : > { %5178 = vmatprep.mubr.f32.mxu1 %v12725_v14  ;;  %v15486_v14 = vld [vmem:[#allocation118_spill] sm:$0xff] }
 0xc49   : > { %5179 = vmatmul.mubr.f32.gmra.mrb[130].mxu1 %v12721_v52 }
 0xc4a   : > { %5184 = vmatprep.mubr.f32.mxu1 %v12731_v2 }
 0xc4d   : > { %5185 = vmatmul.mubr.f32.gmra.mrb[132].mxu1 %v12729_v34  ;;  %v15488_v34 = vld [vmem:[#allocation120_spill] sm:$0xff] }
 0xc4e   : > { %5190 = vmatprep.mubr.f32.mxu1 %v12737_v10  ;;  %v15485_v10 = vld [vmem:[#allocation117_spill] sm:$0xff] }
 0xc51   : > { %5191 = vmatmul.mubr.f32.gmra.mrb[134].mxu1 %v12733_v35 }
 0xc52   : > { %5196 = vmatprep.mubr.f32.mxu1 %v12743_v13 }
 0xc55   : > { %5197 = vmatmul.mubr.f32.gmra.mrb[136].mxu1 %v12741_v38 }
 0xc56   : > { %5202 = vmatprep.mubr.f32.mxu1 %v12749_v50 }
 0xc59   : > { %5203 = vmatmul.mubr.f32.gmra.mrb[138].mxu1 %v12745_v37 }
 0xc5a   : > { %5208 = vmatprep.mubr.f32.mxu1 %v12755_v8 }
 0xc5d   : > { %5209 = vmatmul.mubr.f32.gmra.mrb[140].mxu1 %v12753_v7 }
 0xc5e   : > { %5214 = vmatprep.mubr.f32.mxu1 %v12761_v9 }
 0xc61   : > { %5215 = vmatmul.mubr.f32.gmra.mrb[142].mxu1 %v12757_v31  ;;  %v15484_v31 = vld [vmem:[#allocation116_spill] sm:$0xff] }
 0xc62   : > { %5220 = vmatprep.mubr.f32.mxu1 %v12767_v15 }
 0xc65   : > { %5221 = vmatmul.mubr.f32.gmra.mrb[144].mxu1 %v15465_v33  ;;  %v15492_v33 = vld [vmem:[#allocation124_spill] sm:$0xff] }
 0xc66   : > { %5226 = vmatprep.mubr.f32.mxu1 %v12773_v62 }
 0xc69   : > { %5227 = vmatmul.mubr.f32.gmra.mrb[146].mxu1 %v12769_v26  ;;  %v15483_v26 = vld [vmem:[#allocation115_spill] sm:$0xff] }
 0xc6a   : > { %5232 = vmatprep.mubr.f32.mxu1 %v15468_v49 }
 0xc6d   : > { %5233 = vmatmul.mubr.f32.gmra.mrb[148].mxu1 %v15471_v1 }
 0xc6e   : > { %5238 = vmatprep.mubr.f32.mxu1 %v15467_v27 }
 0xc71   : > { %5239 = vmatmul.mubr.f32.gmra.mrb[150].mxu1 %v15470_v25  ;;  %v15493_v25 = vld [vmem:[#allocation125_spill] sm:$0xff] }
 0xc72   : > { %5244 = vmatprep.mubr.f32.mxu1 %v15474_v44 }
 0xc75   : > { %5245 = vmatmul.mubr.f32.gmra.mrb[152].mxu1 %v15477_v17 }
 0xc76   : > { %5250 = vmatprep.mubr.f32.mxu1 %v15473_v18  ;;  %v15494_v18 = vld [vmem:[#allocation126_spill] sm:$0xff] }
 0xc79   : > { %5251 = vmatmul.mubr.f32.gmra.mrb[154].mxu1 %v15476_v16 }
 0xc7a   : > { %5256 = vmatprep.mubr.f32.mxu1 %v12803_v6 }
 0xc7d   : > { %5257 = vmatmul.mubr.f32.gmra.mrb[156].mxu1 %v15481_v45 }
 0xc7e   : > { %5262 = vmatprep.mubr.f32.mxu1 %v12809_v3 }
 0xc81   : > { %5263 = vmatmul.mubr.f32.gmra.mrb[158].mxu1 %v15480_v19 }
 0xcd8   : > { %v5078_v62 = vpop.f32.mrb[96].mxu1 }
 0xcd9   : > { %v5269_v15 = vsub.f32 %v15483_v26, %v5078_v62  ;;  %v5080_v9 = vpop.f32.mrb[97].mxu1  ;;  %v15496_v62 = vld [vmem:[#allocation128_spill] sm:$0xff] }
 0xcda   : > { %v5270_v8 = vsub.f32 %v15484_v31, %v5080_v9 }
 0xcdb   : > { %v5333_v13 = vmul.f32 0.5, %v5269_v15 }
 0xcdc   : > { %v5334_v50 = vmul.f32 0.5, %v5270_v8  ;;  %v5084_v37 = vpop.f32.mrb[98].mxu1 }
 0xcdd   : > { %v5271_v35 = vsub.f32 %v15485_v10, %v5084_v37  ;;  %v5086_v2 = vpop.f32.mrb[99].mxu1  ;;  %v15497_v37 = vld [vmem:[#allocation129_spill] sm:$0xff] }
 0xcde   : > { %v5272_v6 = vsub.f32 %v15486_v14, %v5086_v2  ;;  %5718 = vmatprep.mubr.f32.mxu1 %v5334_v50  ;;  %v15498_v2 = vld [vmem:[#allocation130_spill] sm:$0xff] }
 0xcdf   : > { %v5335_v52 = vmul.f32 0.5, %v5271_v35  ;;  %5719 = vmatmul.mubr.f32.vlgmr.msra.gmra.mrb[160].mxu1 %v5333_v13 }
 0xce0   : > { %v5336_v3 = vmul.f32 0.5, %v5272_v6  ;;  %v5090_v63 = vpop.f32.mrb[100].mxu1 }
 0xce1   : > { %v8654_v7 = vpack.c.bf16 %v5335_v52, %v5333_v13  ;;  %v5273_v28 = vsub.f32 %v15487_v32, %v5090_v63  ;;  %v5092_v38 = vpop.f32.mrb[101].mxu1 }
 0xce2   : > { %v8652_v55 = vpack.c.bf16 %v5336_v3, %v5334_v50  ;;  %v5274_v30 = vsub.f32 %v15488_v34, %v5092_v38  ;;  %5724 = vmatprep.mubr.f32.mxu1 %v5336_v3 }
 0xce3   : > { %5725 = vmatmul.mubr.f32.gmra.mrb[162].mxu1 %v5335_v52  ;;  %v5337_v22 = vmul.f32 0.5, %v5273_v28  ;;  %v15499_v28 = vld [vmem:[#allocation131_spill] sm:$0xff] }
 0xce4   : > { %v5338_v36 = vmul.f32 0.5, %v5274_v30  ;;  %v5096_v43 = vpop.f32.mrb[102].mxu1  ;;  %8653 = vmatprep.subr.bf16.mxu0 %v8652_v55 }
 0xce5   : > { %v5275_v42 = vsub.f32 %v15489_v41, %v5096_v43  ;;  %v5098_v29 = vpop.f32.mrb[103].mxu1  ;;  %8655 = vmatpush1.bf16.msra.mxu0 %v8654_v7 }
 0xce6   : > { %v5276_v51 = vsub.f32 %v15490_v40, %v5098_v29  ;;  %5730 = vmatprep.mubr.f32.mxu1 %v5338_v36 }
 0xce7   : > { %v5339_v4 = vmul.f32 0.5, %v5275_v42  ;;  %5731 = vmatmul.mubr.f32.gmra.mrb[164].mxu1 %v5337_v22 }
 0xce8   : > { %v5340_v5 = vmul.f32 0.5, %v5276_v51  ;;  %v5102_v20 = vpop.f32.mrb[104].mxu1  ;;  %v15501_v51 = vld [vmem:[#allocation133_spill] sm:$0xff] }
 0xce9   : > { %v8658_v53 = vpack.c.bf16 %v5339_v4, %v5337_v22  ;;  %v5277_v58 = vsub.f32 %v15491_v57, %v5102_v20  ;;  %v5104_v39 = vpop.f32.mrb[105].mxu1  ;;  %v15502_v20 = vld [vmem:[#allocation134_spill] sm:$0xff] }
 0xcea   : > { %v8656_v23 = vpack.c.bf16 %v5340_v5, %v5338_v36  ;;  %v5278_v12 = vsub.f32 %v15492_v33, %v5104_v39  ;;  %5736 = vmatprep.mubr.f32.mxu1 %v5340_v5  ;;  %v15500_v36 = vld [vmem:[#allocation132_spill] sm:$0xff] }
 0xceb   : > { %5737 = vmatmul.mubr.f32.gmra.mrb[166].mxu1 %v5339_v4  ;;  %v5341_v21 = vmul.f32 0.5, %v5277_v58 }
 0xcec   : > { %v5342_v27 = vmul.f32 0.5, %v5278_v12  ;;  %v5108_v49 = vpop.f32.mrb[106].mxu1  ;;  %8657 = vmatprep.subr.bf16.mxu0 %v8656_v23 }
 0xced   : > { %v5279_v1 = vsub.f32 %v15493_v25, %v5108_v49  ;;  %v5110_v59 = vpop.f32.mrb[107].mxu1  ;;  %8659 = vmatpush1.bf16.msra.mxu0 %v8658_v53 }
 0xcee   : > { %v5280_v44 = vsub.f32 %v15494_v18, %v5110_v59  ;;  %5742 = vmatprep.mubr.f32.mxu1 %v5342_v27  ;;  %v15504_v59 = vld [vmem:[#allocation136_spill] sm:$0xff] }
 0xcef   : > { %v5343_v48 = vmul.f32 0.5, %v5279_v1  ;;  %5743 = vmatmul.mubr.f32.gmra.mrb[168].mxu1 %v5341_v21 }
 0xcf0   : > { %v5344_v16 = vmul.f32 0.5, %v5280_v44  ;;  %v5114_v17 = vpop.f32.mrb[108].mxu1 }
 0xcf1   : > { %v8662_v47 = vpack.c.bf16 %v5343_v48, %v5341_v21  ;;  %v5281_v19 = vsub.f32 %v15495_v60, %v5114_v17  ;;  %v5116_v45 = vpop.f32.mrb[109].mxu1 }
 0xcf2   : > { %v8660_v61 = vpack.c.bf16 %v5344_v16, %v5342_v27  ;;  %v5282_v15 = vsub.f32 %v15496_v62, %v5116_v45  ;;  %5748 = vmatprep.mubr.f32.mxu1 %v5344_v16  ;;  %v15503_v27 = vld [vmem:[#allocation135_spill] sm:$0xff] }
 0xcf3   : > { %5749 = vmatmul.mubr.f32.gmra.mrb[170].mxu1 %v5343_v48  ;;  %v5345_v50 = vmul.f32 0.5, %v5281_v19 }
 0xcf4   : > { %v5346_v9 = vmul.f32 0.5, %v5282_v15  ;;  %v5120_v8 = vpop.f32.mrb[110].mxu1  ;;  %8661 = vmatprep.subr.bf16.mxu0 %v8660_v61  ;;  %v15506_v61 = vld [vmem:[#allocation138_spill] sm:$0xff] }
 0xcf5   : > { %v5283_v13 = vsub.f32 %v15497_v37, %v5120_v8  ;;  %v5122_v35 = vpop.f32.mrb[111].mxu1  ;;  %8663 = vmatpush1.bf16.msra.mxu0 %v8662_v47  ;;  %v15505_v47 = vld [vmem:[#allocation137_spill] sm:$0xff] }
 0xcf6   : > { %v5284_v6 = vsub.f32 %v15498_v2, %v5122_v35  ;;  %5754 = vmatprep.mubr.f32.mxu1 %v5346_v9  ;;  %v15507_v35 = vld [vmem:[#allocation139_spill] sm:$0xff] }
 0xcf7   : > { %v5347_v52 = vmul.f32 0.5, %v5283_v13  ;;  %5755 = vmatmul.mubr.f32.gmra.mrb[172].mxu1 %v5345_v50 }
 0xcf8   : > { %v5348_v3 = vmul.f32 0.5, %v5284_v6  ;;  %v5126_v63 = vpop.f32.mrb[112].mxu1 }
 0xcf9   : > { %v8666_v7 = vpack.c.bf16 %v5347_v52, %v5345_v50  ;;  %v5285_v38 = vsub.f32 %v15499_v28, %v5126_v63  ;;  %v5128_v55 = vpop.f32.mrb[113].mxu1  ;;  %v15508_v63 = vld [vmem:[#allocation140_spill] sm:$0xff] }
 0xcfa   : > { %v8664_v30 = vpack.c.bf16 %v5348_v3, %v5346_v9  ;;  %v5286_v43 = vsub.f32 %v15500_v36, %v5128_v55  ;;  %5760 = vmatprep.mubr.f32.mxu1 %v5348_v3 }
 0xcfb   : > { %5761 = vmatmul.mubr.f32.gmra.mrb[174].mxu1 %v5347_v52  ;;  %v5349_v29 = vmul.f32 0.5, %v5285_v38 }
 0xcfc   : > { %v5350_v22 = vmul.f32 0.5, %v5286_v43  ;;  %v5132_v42 = vpop.f32.mrb[114].mxu1  ;;  %8665 = vmatprep.subr.bf16.mxu0 %v8664_v30  ;;  %v15509_v43 = vld [vmem:[#allocation141_spill] sm:$0xff] }
 0xcfd   : > { %v5287_v4 = vsub.f32 %v15501_v51, %v5132_v42  ;;  %v5134_v5 = vpop.f32.mrb[115].mxu1  ;;  %8667 = vmatpush1.bf16.msra.mxu0 %v8666_v7 }
 0xcfe   : > { %v5288_v53 = vsub.f32 %v15502_v20, %v5134_v5  ;;  %5766 = vmatprep.mubr.f32.mxu1 %v5350_v22 }
 0xcff   : > { %v5351_v58 = vmul.f32 0.5, %v5287_v4  ;;  %5767 = vmatmul.mubr.f32.gmra.mrb[176].mxu1 %v5349_v29 }
 0xd00   : > { %v5352_v39 = vmul.f32 0.5, %v5288_v53  ;;  %v5138_v23 = vpop.f32.mrb[116].mxu1 }
 0xd01   : > { %v8670_v12 = vpack.c.bf16 %v5351_v58, %v5349_v29  ;;  %v5289_v49 = vsub.f32 %v15503_v27, %v5138_v23  ;;  %v5140_v21 = vpop.f32.mrb[117].mxu1  ;;  %v15510_v29 = vld [vmem:[#allocation142_spill] sm:$0xff]  ;;  %v15511_v23 = vld [vmem:[#allocation143_spill] sm:$0xff] }
 0xd02   : > { %v8668_v1 = vpack.c.bf16 %v5352_v39, %v5350_v22  ;;  %v5290_v44 = vsub.f32 %v15504_v59, %v5140_v21  ;;  %5772 = vmatprep.mubr.f32.mxu1 %v5352_v39 }
 0xd03   : > { %5773 = vmatmul.mubr.f32.gmra.mrb[178].mxu1 %v5351_v58  ;;  %v5353_v17 = vmul.f32 0.5, %v5289_v49 }
 0xd04   : > { %v5354_v48 = vmul.f32 0.5, %v5290_v44  ;;  %v5144_v16 = vpop.f32.mrb[118].mxu1  ;;  %8669 = vmatprep.subr.bf16.mxu0 %v8668_v1  ;;  %v15512_v1 = vld [vmem:[#allocation144_spill] sm:$0xff] }
 0xd05   : > { %v5291_v19 = vsub.f32 %v15505_v47, %v5144_v16  ;;  %v5146_v45 = vpop.f32.mrb[119].mxu1  ;;  %8671 = vmatpush1.bf16.msra.mxu0 %v8670_v12 }
 0xd06   : > { %v5292_v15 = vsub.f32 %v15506_v61, %v5146_v45  ;;  %5778 = vmatprep.mubr.f32.mxu1 %v5354_v48 }
 0xd07   : > { %v5355_v9 = vmul.f32 0.5, %v5291_v19  ;;  %5779 = vmatmul.mubr.f32.gmra.mrb[180].mxu1 %v5353_v17  ;;  %v15513_v19 = vld [vmem:[#allocation145_spill] sm:$0xff] }
 0xd08   : > { %v5356_v8 = vmul.f32 0.5, %v5292_v15  ;;  %v5150_v50 = vpop.f32.mrb[120].mxu1 }
 0xd09   : > { %v8674_v13 = vpack.c.bf16 %v5355_v9, %v5353_v17  ;;  %v5293_v6 = vsub.f32 %v15507_v35, %v5150_v50  ;;  %v5152_v52 = vpop.f32.mrb[121].mxu1 }
 0xd0a   : > { %v8672_v3 = vpack.c.bf16 %v5356_v8, %v5354_v48  ;;  %v5294_v7 = vsub.f32 %v15508_v63, %v5152_v52  ;;  %5784 = vmatprep.mubr.f32.mxu1 %v5356_v8 }
 0xd0b   : > { %5785 = vmatmul.mubr.f32.gmra.mrb[182].mxu1 %v5355_v9  ;;  %v5357_v30 = vmul.f32 0.5, %v5293_v6  ;;  %v15514_v9 = vld [vmem:[#allocation146_spill] sm:$0xff] }
 0xd0c   : > { %v5358_v38 = vmul.f32 0.5, %v5294_v7  ;;  %v5156_v55 = vpop.f32.mrb[122].mxu1  ;;  %8673 = vmatprep.subr.bf16.mxu0 %v8672_v3  ;;  %v15515_v3 = vld [vmem:[#allocation147_spill] sm:$0xff] }
 0xd0d   : > { %v5295_v22 = vsub.f32 %v15509_v43, %v5156_v55  ;;  %v5158_v42 = vpop.f32.mrb[123].mxu1  ;;  %8675 = vmatpush1.bf16.msra.mxu0 %v8674_v13 }
 0xd0e   : > { %v5296_v4 = vsub.f32 %v15510_v29, %v5158_v42  ;;  %5790 = vmatprep.mubr.f32.mxu1 %v5358_v38 }
 0xd0f   : > { %v5359_v5 = vmul.f32 0.5, %v5295_v22  ;;  %5791 = vmatmul.mubr.f32.gmra.mrb[184].mxu1 %v5357_v30 }
 0xd10   : > { %v5360_v53 = vmul.f32 0.5, %v5296_v4  ;;  %v5162_v58 = vpop.f32.mrb[124].mxu1 }
 0xd11   : > { %v8678_v39 = vpack.c.bf16 %v5359_v5, %v5357_v30  ;;  %v5297_v12 = vsub.f32 %v15511_v23, %v5162_v58  ;;  %v5164_v49 = vpop.f32.mrb[125].mxu1  ;;  %v15516_v30 = vld [vmem:[#allocation148_spill] sm:$0xff] }
 0xd12   : > { %v8676_v21 = vpack.c.bf16 %v5360_v53, %v5358_v38  ;;  %v5298_v44 = vsub.f32 %v15512_v1, %v5164_v49  ;;  %5796 = vmatprep.mubr.f32.mxu1 %v5360_v53  ;;  %v15517_v53 = vld [vmem:[#allocation149_spill] sm:$0xff] }
 0xd13   : > { %5797 = vmatmul.mubr.f32.gmra.mrb[186].mxu1 %v5359_v5  ;;  %v5361_v17 = vmul.f32 0.5, %v5297_v12  ;;  %v15518_v12 = vld [vmem:[#allocation150_spill] sm:$0xff] }
 0xd14   : > { %v5362_v48 = vmul.f32 0.5, %v5298_v44  ;;  %v5168_v16 = vpop.f32.mrb[126].mxu1  ;;  %8677 = vmatprep.subr.bf16.mxu0 %v8676_v21 }
 0xd15   : > { %v5299_v45 = vsub.f32 %v15513_v19, %v5168_v16  ;;  %v5170_v15 = vpop.f32.mrb[127].mxu1  ;;  %8679 = vmatpush1.bf16.msra.mxu0 %v8678_v39 }
 0xd16   : > { %v5300_v8 = vsub.f32 %v15514_v9, %v5170_v15  ;;  %5802 = vmatprep.mubr.f32.mxu1 %v5362_v48 }
 0xd17   : > { %v5363_v50 = vmul.f32 0.5, %v5299_v45  ;;  %5803 = vmatmul.mubr.f32.gmra.mrb[188].mxu1 %v5361_v17 }
 0xd18   : > { %v5364_v13 = vmul.f32 0.5, %v5300_v8  ;;  %v5174_v6 = vpop.f32.mrb[128].mxu1 }
 0xd19   : > { %v8682_v52 = vpack.c.bf16 %v5363_v50, %v5361_v17  ;;  %v5301_v7 = vsub.f32 %v15515_v3, %v5174_v6  ;;  %v5176_v38 = vpop.f32.mrb[129].mxu1  ;;  %v15519_v17 = vld [vmem:[#allocation151_spill] sm:$0xff] }
 0xd1a   : > { %v8680_v55 = vpack.c.bf16 %v5364_v13, %v5362_v48  ;;  %v5302_v22 = vsub.f32 %v15516_v30, %v5176_v38  ;;  %5808 = vmatprep.mubr.f32.mxu1 %v5364_v13  ;;  %v15521_v38 = vld [vmem:[#allocation153_spill] sm:$0xff] }
 0xd1b   : > { %5809 = vmatmul.mubr.f32.gmra.mrb[190].mxu1 %v5363_v50  ;;  %v5365_v5 = vmul.f32 0.5, %v5301_v7  ;;  %v15520_v50 = vld [vmem:[#allocation152_spill] sm:$0xff] }
 0xd1c   : > { %v5366_v42 = vmul.f32 0.5, %v5302_v22  ;;  %v5180_v4 = vpop.f32.mrb[130].mxu1  ;;  %8681 = vmatprep.subr.bf16.mxu0 %v8680_v55 }
 0xd1d   : > { %v5303_v58 = vsub.f32 %v15517_v53, %v5180_v4  ;;  %v5182_v39 = vpop.f32.mrb[131].mxu1  ;;  %8683 = vmatpush1.bf16.msra.mxu0 %v8682_v52  ;;  %v15522_v4 = vld [vmem:[#allocation154_spill] sm:$0xff] }
 0xd1e   : > { %v5304_v49 = vsub.f32 %v15518_v12, %v5182_v39  ;;  %5814 = vmatprep.mubr.f32.mxu1 %v5366_v42 }
 0xd1f   : > { %v5367_v21 = vmul.f32 0.5, %v5303_v58  ;;  %5815 = vmatmul.mubr.f32.gmra.mrb[192].mxu1 %v5365_v5 }
 0xd20   : > { %v5368_v44 = vmul.f32 0.5, %v5304_v49  ;;  %v5186_v16 = vpop.f32.mrb[132].mxu1 }
 0xd21   : > { %v8686_v48 = vpack.c.bf16 %v5367_v21, %v5365_v5  ;;  %v5305_v45 = vsub.f32 %v15519_v17, %v5186_v16  ;;  %v5188_v15 = vpop.f32.mrb[133].mxu1  ;;  %v15523_v16 = vld [vmem:[#allocation155_spill] sm:$0xff] }
 0xd22   : > { %v8684_v8 = vpack.c.bf16 %v5368_v44, %v5366_v42  ;;  %v5306_v13 = vsub.f32 %v15520_v50, %v5188_v15  ;;  %5820 = vmatprep.mubr.f32.mxu1 %v5368_v44 }
 0xd23   : > { %5821 = vmatmul.mubr.f32.gmra.mrb[194].mxu1 %v5367_v21  ;;  %v5369_v52 = vmul.f32 0.5, %v5305_v45 }
 0xd24   : > { %v5370_v6 = vmul.f32 0.5, %v5306_v13  ;;  %v5192_v7 = vpop.f32.mrb[134].mxu1  ;;  %8685 = vmatprep.subr.bf16.mxu0 %v8684_v8  ;;  %v15524_v13 = vld [vmem:[#allocation102_spill] sm:$0xff] }
 0xd25   : > { %v5307_v55 = vsub.f32 %v15521_v38, %v5192_v7  ;;  %v5194_v22 = vpop.f32.mrb[135].mxu1  ;;  %8687 = vmatpush1.bf16.msra.mxu0 %v8686_v48  ;;  %v15525_v7 = vld [vmem:[#allocation156_spill] sm:$0xff]  ;;  %v15527_v38 = vld [vmem:[#allocation158_spill] sm:$0xff] }
 0xd26   : > { %v5308_v58 = vsub.f32 %v15522_v4, %v5194_v22  ;;  %5826 = vmatprep.mubr.f32.mxu1 %v5370_v6 }
 0xd27   : > { %v5371_v5 = vmul.f32 0.5, %v5307_v55  ;;  %5827 = vmatmul.mubr.f32.gmra.mrb[196].mxu1 %v5369_v52  ;;  %v15526_v55 = vld [vmem:[#allocation157_spill] sm:$0xff] }
 0xd28   : > { %v5372_v39 = vmul.f32 0.5, %v5308_v58  ;;  %v5198_v49 = vpop.f32.mrb[136].mxu1 }
 0xd29   : > { %v8690_v42 = vpack.c.bf16 %v5371_v5, %v5369_v52  ;;  %v5309_v15 = vsub.f32 %v15523_v16, %v5198_v49  ;;  %v5200_v44 = vpop.f32.mrb[137].mxu1 }
 0xd2a   : > { %v8688_v21 = vpack.c.bf16 %v5372_v39, %v5370_v6  ;;  %v5310_v50 = vsub.f32 %v15524_v13, %v5200_v44  ;;  %5832 = vmatprep.mubr.f32.mxu1 %v5372_v39 }
 0xd2b   : > { %5833 = vmatmul.mubr.f32.gmra.mrb[198].mxu1 %v5371_v5  ;;  %v5373_v48 = vmul.f32 0.5, %v5309_v15 }
 0xd2c   : > { %v5374_v45 = vmul.f32 0.5, %v5310_v50  ;;  %v5204_v8 = vpop.f32.mrb[138].mxu1  ;;  %8689 = vmatprep.subr.bf16.mxu0 %v8688_v21  ;;  %v15528_v50 = vld [vmem:[#allocation159_spill] sm:$0xff] }
 0xd2d   : > { %v5311_v22 = vsub.f32 %v15525_v7, %v5204_v8  ;;  %v5206_v4 = vpop.f32.mrb[139].mxu1  ;;  %8691 = vmatpush1.bf16.msra.mxu0 %v8690_v42  ;;  %v15529_v8 = vld [vmem:[#allocation160_spill] sm:$0xff]  ;;  %v15531_v7 = vld [vmem:[#allocation162_spill] sm:$0xff] }
 0xd2e   : > { %v5312_v58 = vsub.f32 %v15526_v55, %v5206_v4  ;;  %5838 = vmatprep.mubr.f32.mxu1 %v5374_v45 }
 0xd2f   : > { %v5375_v52 = vmul.f32 0.5, %v5311_v22  ;;  %5839 = vmatmul.mubr.f32.gmra.mrb[200].mxu1 %v5373_v48  ;;  %v15530_v22 = vld [vmem:[#allocation161_spill] sm:$0xff] }
 0xd30   : > { %v5376_v49 = vmul.f32 0.5, %v5312_v58  ;;  %v5210_v16 = vpop.f32.mrb[140].mxu1 }
 0xd31   : > { %v8694_v6 = vpack.c.bf16 %v5375_v52, %v5373_v48  ;;  %v5313_v44 = vsub.f32 %v15527_v38, %v5210_v16  ;;  %v5212_v39 = vpop.f32.mrb[141].mxu1 }
 0xd32   : > { %v8692_v5 = vpack.c.bf16 %v5376_v49, %v5374_v45  ;;  %v5314_v13 = vsub.f32 %v15528_v50, %v5212_v39  ;;  %5844 = vmatprep.mubr.f32.mxu1 %v5376_v49 }
 0xd33   : > { %5845 = vmatmul.mubr.f32.gmra.mrb[202].mxu1 %v5375_v52  ;;  %v5377_v42 = vmul.f32 0.5, %v5313_v44 }
 0xd34   : > { %v5378_v15 = vmul.f32 0.5, %v5314_v13  ;;  %v5216_v21 = vpop.f32.mrb[142].mxu1  ;;  %8693 = vmatprep.subr.bf16.mxu0 %v8692_v5  ;;  %v15532_v13 = vld [vmem:[#allocation163_spill] sm:$0xff] }
 0xd35   : > { %v5315_v4 = vsub.f32 %v15529_v8, %v5216_v21  ;;  %v5218_v55 = vpop.f32.mrb[143].mxu1  ;;  %8695 = vmatpush1.bf16.msra.mxu0 %v8694_v6  ;;  %v15533_v21 = vld [vmem:[#allocation164_spill] sm:$0xff]  ;;  %v15535_v8 = vld [vmem:[#allocation105_spill] sm:$0xff] }
 0xd36   : > { %v5316_v58 = vsub.f32 %v15530_v22, %v5218_v55  ;;  %5850 = vmatprep.mubr.f32.mxu1 %v5378_v15 }
 0xd37   : > { %v5379_v48 = vmul.f32 0.5, %v5315_v4  ;;  %5851 = vmatmul.mubr.f32.gmra.mrb[204].mxu1 %v5377_v42  ;;  %v15534_v4 = vld [vmem:[#allocation165_spill] sm:$0xff] }
 0xd38   : > { %v5380_v16 = vmul.f32 0.5, %v5316_v58  ;;  %v5222_v38 = vpop.f32.mrb[144].mxu1 }
 0xd39   : > { %v8698_v45 = vpack.c.bf16 %v5379_v48, %v5377_v42  ;;  %v5317_v39 = vsub.f32 %v15531_v7, %v5222_v38  ;;  %v5224_v49 = vpop.f32.mrb[145].mxu1 }
 0xd3a   : > { %v8696_v52 = vpack.c.bf16 %v5380_v16, %v5378_v15  ;;  %v5318_v50 = vsub.f32 %v15532_v13, %v5224_v49  ;;  %5856 = vmatprep.mubr.f32.mxu1 %v5380_v16 }
 0xd3b   : > { %5857 = vmatmul.mubr.f32.gmra.mrb[206].mxu1 %v5379_v48  ;;  %v5381_v6 = vmul.f32 0.5, %v5317_v39 }
 0xd3c   : > { %v5382_v44 = vmul.f32 0.5, %v5318_v50  ;;  %v5228_v5 = vpop.f32.mrb[146].mxu1  ;;  %8697 = vmatprep.subr.bf16.mxu0 %v8696_v52  ;;  %v15536_v50 = vld [vmem:[#allocation103_spill] sm:$0xff] }
 0xd3d   : > { %v5319_v55 = vsub.f32 %v15533_v21, %v5228_v5  ;;  %v5230_v22 = vpop.f32.mrb[147].mxu1  ;;  %8699 = vmatpush1.bf16.msra.mxu0 %v8698_v45  ;;  %v15537_v5 = vld [vmem:[#allocation106_spill] sm:$0xff]  ;;  %v15539_v21 = vld [vmem:[#allocation109_spill] sm:$0xff] }
 0xd3e   : > { %v5320_v58 = vsub.f32 %v15534_v4, %v5230_v22  ;;  %5862 = vmatprep.mubr.f32.mxu1 %v5382_v44 }
 0xd3f   : > { %v5383_v42 = vmul.f32 0.5, %v5319_v55  ;;  %5863 = vmatmul.mubr.f32.gmra.mrb[208].mxu1 %v5381_v6  ;;  %v15538_v55 = vld [vmem:[#allocation104_spill] sm:$0xff] }
 0xd40   : > { %v5384_v38 = vmul.f32 0.5, %v5320_v58  ;;  %v5234_v7 = vpop.f32.mrb[148].mxu1 }
 0xd41   : > { %v8702_v15 = vpack.c.bf16 %v5383_v42, %v5381_v6  ;;  %v5321_v49 = vsub.f32 %v15535_v8, %v5234_v7  ;;  %v5236_v16 = vpop.f32.mrb[149].mxu1 }
 0xd42   : > { %v8700_v48 = vpack.c.bf16 %v5384_v38, %v5382_v44  ;;  %v5322_v13 = vsub.f32 %v15536_v50, %v5236_v16  ;;  %5868 = vmatprep.mubr.f32.mxu1 %v5384_v38 }
 0xd43   : > { %5869 = vmatmul.mubr.f32.gmra.mrb[210].mxu1 %v5383_v42  ;;  %v5385_v45 = vmul.f32 0.5, %v5321_v49 }
 0xd44   : > { %v5386_v39 = vmul.f32 0.5, %v5322_v13  ;;  %v5240_v52 = vpop.f32.mrb[150].mxu1  ;;  %8701 = vmatprep.subr.bf16.mxu0 %v8700_v48  ;;  %v15540_v13 = vld [vmem:[#allocation107_spill] sm:$0xff] }
 0xd45   : > { %v5323_v22 = vsub.f32 %v15537_v5, %v5240_v52  ;;  %v5242_v4 = vpop.f32.mrb[151].mxu1  ;;  %8703 = vmatpush1.bf16.msra.mxu0 %v8702_v15  ;;  %v15541_v52 = vld [vmem:[#allocation110_spill] sm:$0xff]  ;;  %v15543_v5 = vld [vmem:[#allocation111_spill] sm:$0xff] }
 0xd46   : > { %v5324_v58 = vsub.f32 %v15538_v55, %v5242_v4  ;;  %5874 = vmatprep.mubr.f32.mxu1 %v5386_v39 }
 0xd47   : > { %v5387_v6 = vmul.f32 0.5, %v5323_v22  ;;  %5875 = vmatmul.mubr.f32.gmra.mrb[212].mxu1 %v5385_v45  ;;  %v15542_v22 = vld [vmem:[#allocation108_spill] sm:$0xff] }
 0xd48   : > { %v5388_v7 = vmul.f32 0.5, %v5324_v58  ;;  %v5246_v8 = vpop.f32.mrb[152].mxu1 }
 0xd49   : > { %v8706_v44 = vpack.c.bf16 %v5387_v6, %v5385_v45  ;;  %v5325_v16 = vsub.f32 %v15539_v21, %v5246_v8  ;;  %v5248_v38 = vpop.f32.mrb[153].mxu1 }
 0xd4a   : > { %v8704_v42 = vpack.c.bf16 %v5388_v7, %v5386_v39  ;;  %v5326_v50 = vsub.f32 %v15540_v13, %v5248_v38  ;;  %5880 = vmatprep.mubr.f32.mxu1 %v5388_v7 }
 0xd4b   : > { %5881 = vmatmul.mubr.f32.gmra.mrb[214].mxu1 %v5387_v6  ;;  %v5389_v15 = vmul.f32 0.5, %v5325_v16 }
 0xd4c   : > { %v5390_v49 = vmul.f32 0.5, %v5326_v50  ;;  %v5252_v48 = vpop.f32.mrb[154].mxu1  ;;  %8705 = vmatprep.subr.bf16.mxu0 %v8704_v42  ;;  %v15544_v50 = vld [vmem:[#allocation113_spill] sm:$0xff] }
 0xd4d   : > { %v5327_v4 = vsub.f32 %v15541_v52, %v5252_v48  ;;  %v5254_v55 = vpop.f32.mrb[155].mxu1  ;;  %8707 = vmatpush1.bf16.msra.mxu0 %v8706_v44  ;;  %v15545_v48 = vld [vmem:[#allocation112_spill] sm:$0xff] }
 0xd4e   : > { %v5328_v58 = vsub.f32 %v15542_v22, %v5254_v55  ;;  %5886 = vmatprep.mubr.f32.mxu1 %v5390_v49 }
 0xd4f   : > { %v5391_v45 = vmul.f32 0.5, %v5327_v4  ;;  %5887 = vmatmul.mubr.f32.gmra.mrb[216].mxu1 %v5389_v15  ;;  %v15546_v4 = vld [vmem:[#allocation114_spill] sm:$0xff] }
 0xd50   : > { %v5392_v8 = vmul.f32 0.5, %v5328_v58  ;;  %v5258_v21 = vpop.f32.mrb[156].mxu1 }
 0xd51   : > { %v8710_v39 = vpack.c.bf16 %v5391_v45, %v5389_v15  ;;  %v5329_v38 = vsub.f32 %v15543_v5, %v5258_v21  ;;  %v5260_v7 = vpop.f32.mrb[157].mxu1 }
 0xd52   : > { %v8708_v6 = vpack.c.bf16 %v5392_v8, %v5390_v49  ;;  %v5330_v13 = vsub.f32 %v15544_v50, %v5260_v7  ;;  %5892 = vmatprep.mubr.f32.mxu1 %v5392_v8  ;;  %v15549_v8 = vld [vmem:[#allocation53_spill] sm:$0xff] }
 0xd53   : > { %5893 = vmatmul.mubr.f32.gmra.mrb[218].mxu1 %v5391_v45  ;;  %v5393_v44 = vmul.f32 0.5, %v5329_v38  ;;  %v15548_v45 = vld [vmem:[#allocation52_spill] sm:$0xff]  ;;  %v15550_v38 = vld [vmem:[#allocation55_spill] sm:$0xff]  ;;  %v15553_v7 = vld [vmem:[#allocation57_spill] sm:$0xff] }
 0xd54   : > { %v5394_v16 = vmul.f32 0.5, %v5330_v13  ;;  %v5264_v42 = vpop.f32.mrb[158].mxu1  ;;  %8709 = vmatprep.subr.bf16.mxu0 %v8708_v6  ;;  %v15547_v13 = vld [vmem:[#allocation51_spill] sm:$0xff] }
 0xd55   : > { %v5331_v55 = vsub.f32 %v15545_v48, %v5264_v42  ;;  %v5266_v22 = vpop.f32.mrb[159].mxu1  ;;  %8711 = vmatpush1.bf16.msra.mxu0 %v8710_v39  ;;  %v15551_v39 = vld [vmem:[#allocation50_spill] sm:$0xff]  ;;  %v15554_v6 = vld [vmem:[#allocation59_spill] sm:$0xff]  ;;  %v15556_v42 = vld [vmem:[#allocation60_spill] sm:$0xff] }
 0xd56   : > { %v5332_v58 = vsub.f32 %v15546_v4, %v5266_v22  ;;  %5898 = vmatprep.mubr.f32.mxu1 %v5394_v16  ;;  %v15552_v22 = vld [vmem:[#allocation56_spill] sm:$0xff] }
 0xd57   : > { %v5395_v15 = vmul.f32 0.5, %v5331_v55  ;;  %5899 = vmatmul.mubr.f32.gmra.mrb[220].mxu1 %v5393_v44  ;;  %v15559_v55 = vld [vmem:[#allocation58_spill] sm:$0xff]  ;;  %v15600_v4 = vld [vmem:[#allocation168_spill] sm:$0xff] }
 0xd58   : > { %v5396_v21 = vmul.f32 0.5, %v5332_v58  ;;  %v15560_v58 = vld [vmem:[#allocation64_spill] sm:$0xff] }
 0xd59   : > { %v8714_v5 = vpack.c.bf16 %v5395_v15, %v5393_v44  ;;  %v15558_v44 = vld [vmem:[#allocation63_spill] sm:$0xff] }
 0xd5a   : > { %v8712_v49 = vpack.c.bf16 %v5396_v21, %v5394_v16  ;;  %5904 = vmatprep.mubr.f32.mxu1 %v5396_v21  ;;  %v15555_v16 = vld [vmem:[#allocation54_spill] sm:$0xff]  ;;  %v15562_v21 = vld [vmem:[#allocation67_spill] sm:$0xff] }
 0xd5b   : > { %5905 = vmatmul.mubr.f32.gmra.mrb[222].mxu1 %v5395_v15  ;;  %v15561_v15 = vld [vmem:[#allocation65_spill] sm:$0xff] }
 0xd5c   : > { %8713 = vmatprep.subr.bf16.mxu0 %v8712_v49  ;;  %v15563_v49 = vld [vmem:[#allocation62_spill] sm:$0xff] }
 0xd5d   : > { %8715 = vmatpush1.bf16.msra.mxu0 %v8714_v5  ;;  %v15557_v5 = vld [vmem:[#allocation61_spill] sm:$0xff] }
 0xd60   : > { %5462 = vmatmul.mubr.f32.vlgmr.msra.gmra.mrb[130].mxu0 %v15547_v13  ;;  %v15564_v13 = vld [vmem:[#allocation68_spill] sm:$0xff] }
 0xd61   : > { %5467 = vmatprep.mubr.f32.mxu0 %v15548_v45  ;;  %v15565_v45 = vld [vmem:[#allocation69_spill] sm:$0xff] }
 0xd64   : > { %5468 = vmatmul.mubr.f32.gmra.mrb[132].mxu0 %v15549_v8  ;;  %v15566_v8 = vld [vmem:[#allocation71_spill] sm:$0xff] }
 0xd65   : > { %5473 = vmatprep.mubr.f32.mxu0 %v15550_v38  ;;  %v15567_v38 = vld [vmem:[#allocation66_spill] sm:$0xff] }
 0xd68   : > { %5474 = vmatmul.mubr.f32.gmra.mrb[134].mxu0 %v15551_v39  ;;  %v15568_v39 = vld [vmem:[#allocation72_spill] sm:$0xff] }
 0xd69   : > { %5479 = vmatprep.mubr.f32.mxu0 %v15552_v22  ;;  %v15569_v22 = vld [vmem:[#allocation73_spill] sm:$0xff] }
 0xd6c   : > { %5480 = vmatmul.mubr.f32.gmra.mrb[136].mxu0 %v15553_v7  ;;  %v15570_v7 = vld [vmem:[#allocation75_spill] sm:$0xff] }
 0xd6d   : > { %5485 = vmatprep.mubr.f32.mxu0 %v15554_v6  ;;  %v15571_v6 = vld [vmem:[#allocation70_spill] sm:$0xff] }
 0xd70   : > { %5486 = vmatmul.mubr.f32.gmra.mrb[138].mxu0 %v15555_v16  ;;  %v15572_v16 = vld [vmem:[#allocation76_spill] sm:$0xff] }
 0xd71   : > { %5491 = vmatprep.mubr.f32.mxu0 %v15556_v42  ;;  %v15573_v42 = vld [vmem:[#allocation77_spill] sm:$0xff] }
 0xd74   : > { %5492 = vmatmul.mubr.f32.gmra.mrb[140].mxu0 %v15557_v5  ;;  %v15574_v5 = vld [vmem:[#allocation79_spill] sm:$0xff] }
 0xd75   : > { %5497 = vmatprep.mubr.f32.mxu0 %v15558_v44  ;;  %v15575_v44 = vld [vmem:[#allocation74_spill] sm:$0xff] }
 0xd78   : > { %5498 = vmatmul.mubr.f32.gmra.mrb[142].mxu0 %v15559_v55  ;;  %v15576_v55 = vld [vmem:[#allocation80_spill] sm:$0xff] }
 0xd79   : > { %5503 = vmatprep.mubr.f32.mxu0 %v15560_v58  ;;  %v15577_v58 = vld [vmem:[#allocation81_spill] sm:$0xff] }
 0xd7c   : > { %5504 = vmatmul.mubr.f32.gmra.mrb[144].mxu0 %v15561_v15  ;;  %v15578_v15 = vld [vmem:[#allocation83_spill] sm:$0xff] }
 0xd7d   : > { %5509 = vmatprep.mubr.f32.mxu0 %v15562_v21  ;;  %v15579_v21 = vld [vmem:[#allocation78_spill] sm:$0xff] }
 0xd80   : > { %5510 = vmatmul.mubr.f32.gmra.mrb[146].mxu0 %v15563_v49  ;;  %v15580_v49 = vld [vmem:[#allocation84_spill] sm:$0xff] }
 0xd81   : > { %5515 = vmatprep.mubr.f32.mxu0 %v15564_v13  ;;  %v15581_v13 = vld [vmem:[#allocation85_spill] sm:$0xff] }
 0xd84   : > { %5516 = vmatmul.mubr.f32.gmra.mrb[148].mxu0 %v15565_v45  ;;  %v15582_v45 = vld [vmem:[#allocation87_spill] sm:$0xff] }
 0xd85   : > { %5521 = vmatprep.mubr.f32.mxu0 %v15566_v8  ;;  %v15583_v8 = vld [vmem:[#allocation82_spill] sm:$0xff] }
 0xd88   : > { %5522 = vmatmul.mubr.f32.gmra.mrb[150].mxu0 %v15567_v38  ;;  %v15584_v38 = vld [vmem:[#allocation88_spill] sm:$0xff] }
 0xd89   : > { %5527 = vmatprep.mubr.f32.mxu0 %v15568_v39  ;;  %v15585_v39 = vld [vmem:[#allocation89_spill] sm:$0xff] }
 0xd8c   : > { %5528 = vmatmul.mubr.f32.gmra.mrb[152].mxu0 %v15569_v22  ;;  %v15586_v22 = vld [vmem:[#allocation91_spill] sm:$0xff] }
 0xd8d   : > { %5533 = vmatprep.mubr.f32.mxu0 %v15570_v7  ;;  %v15587_v7 = vld [vmem:[#allocation86_spill] sm:$0xff] }
 0xd90   : > { %5534 = vmatmul.mubr.f32.gmra.mrb[154].mxu0 %v15571_v6  ;;  %v15588_v6 = vld [vmem:[#allocation92_spill] sm:$0xff] }
 0xd91   : > { %5539 = vmatprep.mubr.f32.mxu0 %v15572_v16 }
 0xd94   : > { %5540 = vmatmul.mubr.f32.gmra.mrb[156].mxu0 %v15573_v42 }
 0xd95   : > { %5545 = vmatprep.mubr.f32.mxu0 %v15574_v5  ;;  %v15589_v5 = vld [vmem:[#allocation93_spill] sm:$0xff] }
 0xd98   : > { %5546 = vmatmul.mubr.f32.gmra.mrb[158].mxu0 %v15575_v44  ;;  %v15590_v44 = vld [vmem:[#allocation95_spill] sm:$0xff] }
 0xd99   : > { %5551 = vmatprep.mubr.f32.mxu0 %v15576_v55 }
 0xd9c   : > { %5552 = vmatmul.mubr.f32.gmra.mrb[160].mxu0 %v15577_v58 }
 0xd9d   : > { %5557 = vmatprep.mubr.f32.mxu0 %v15578_v15  ;;  %v15591_v15 = vld [vmem:[#allocation90_spill] sm:$0xff] }
 0xda0   : > { %5558 = vmatmul.mubr.f32.gmra.mrb[162].mxu0 %v15579_v21  ;;  %v15592_v21 = vld [vmem:[#allocation96_spill] sm:$0xff] }
 0xda1   : > { %5563 = vmatprep.mubr.f32.mxu0 %v15580_v49 }
 0xda4   : > { %5564 = vmatmul.mubr.f32.gmra.mrb[164].mxu0 %v15581_v13 }
 0xda5   : > { %5569 = vmatprep.mubr.f32.mxu0 %v15582_v45  ;;  %v15593_v45 = vld [vmem:[#allocation97_spill] sm:$0xff] }
 0xda8   : > { %5570 = vmatmul.mubr.f32.gmra.mrb[166].mxu0 %v15583_v8  ;;  %v15594_v8 = vld [vmem:[#allocation99_spill] sm:$0xff] }
 0xda9   : > { %5575 = vmatprep.mubr.f32.mxu0 %v15584_v38 }
 0xdac   : > { %5576 = vmatmul.mubr.f32.gmra.mrb[168].mxu0 %v15585_v39 }
 0xdad   : > { %5581 = vmatprep.mubr.f32.mxu0 %v15586_v22  ;;  %v15595_v22 = vld [vmem:[#allocation94_spill] sm:$0xff] }
 0xdb0   : > { %5582 = vmatmul.mubr.f32.gmra.mrb[170].mxu0 %v15587_v7  ;;  %v15596_v7 = vld [vmem:[#allocation100_spill] sm:$0xff] }
 0xdb1   : > { %5587 = vmatprep.mubr.f32.mxu0 %v15588_v6 }
 0xdb2   : > { %v13267_v16 = vpop.f32.mrb[160].mxu1 }
 0xdb3   : > { %v5722_v42 = vpop.f32.mrb[161].mxu1 }
 0xdb4   : > { %5588 = vmatmul.mubr.f32.gmra.mrb[172].mxu0 %v15589_v5 }
 0xdb5   : > { %5593 = vmatprep.mubr.f32.mxu0 %v15590_v44  ;;  %v15597_v44 = vld [vmem:[#allocation101_spill] sm:$0xff] }
 0xdb6   : > { %v13271_v55 = vpop.f32.mrb[162].mxu1 }
 0xdb7   : > { %v13273_v58 = vpop.f32.mrb[163].mxu1 }
 0xdb8   : > { %5594 = vmatmul.mubr.f32.gmra.mrb[174].mxu0 %v15591_v15  ;;  %v15598_v15 = vld [vmem:[#allocation166_spill] sm:$0xff] }
 0xdb9   : > { %5599 = vmatprep.mubr.f32.mxu0 %v15592_v21 }
 0xdba   : > { %v13277_v49 = vpop.f32.mrb[164].mxu1 }
 0xdbb   : > { %v13279_v13 = vpop.f32.mrb[165].mxu1 }
 0xdbc   : > { %5600 = vmatmul.mubr.f32.gmra.mrb[176].mxu0 %v15593_v45 }
 0xdbd   : > { %5605 = vmatprep.mubr.f32.mxu0 %v15594_v8  ;;  %v15599_v8 = vld [vmem:[#allocation98_spill] sm:$0xff] }
 0xdbe   : > { %v13283_v38 = vpop.f32.mrb[166].mxu1 }
 0xdbf   : > { %v13285_v39 = vpop.f32.mrb[167].mxu1 }
 0xdc0   : > { %5606 = vmatmul.mubr.f32.gmra.mrb[178].mxu0 %v15595_v22 }
 0xdc1   : > { %5611 = vmatprep.mubr.f32.mxu0 %v15596_v7  ;;  %v15601_v7 = vld [vmem:[#allocation167_spill] sm:$0xff] }
 0xdc2   : > { %v13289_v6 = vpop.f32.mrb[168].mxu1 }
 0xdc3   : > { %v13291_v5 = vpop.f32.mrb[169].mxu1 }
 0xdc4   : > { %5612 = vmatmul.mubr.f32.gmra.mrb[180].mxu0 %v15597_v44 }
 0xdc5   : > { %5617 = vmatprep.mubr.f32.mxu0 %v15598_v15  ;;  %v15602_v15 = vld [vmem:[#allocation170_spill] sm:$0xff] }
 0xdc6   : > { %v13295_v21 = vpop.f32.mrb[170].mxu1 }
 0xdc7   : > { %v13297_v45 = vpop.f32.mrb[171].mxu1 }
 0xdc8   : > { %5618 = vmatmul.mubr.f32.gmra.mrb[182].mxu0 %v15599_v8 }
 0xdc9   : > { %5623 = vmatprep.mubr.f32.mxu0 %v15600_v4  ;;  %v15603_v4 = vld [vmem:[#allocation169_spill] sm:$0xff] }
 0xdca   : > { %v13301_v48 = vpop.f32.mrb[172].mxu1 }
 0xdcb   : > { %v13303_v22 = vpop.f32.mrb[173].mxu1 }
 0xdcc   : > { %5624 = vmatmul.mubr.f32.gmra.mrb[184].mxu0 %v15601_v7 }
 0xdcd   : > { %5629 = vmatprep.mubr.f32.mxu0 %v12980_v11 }
 0xdce   : > { %v13307_v50 = vpop.f32.mrb[174].mxu1 }
 0xdcf   : > { %v13309_v44 = vpop.f32.mrb[175].mxu1 }
 0xdd0   : > { %5630 = vmatmul.mubr.f32.gmra.mrb[186].mxu0 %v12978_v0 }
 0xdd1   : > { %5635 = vmatprep.mubr.f32.mxu0 %v15602_v15 }
 0xdd2   : > { %v13313_v52 = vpop.f32.mrb[176].mxu1 }
 0xdd3   : > { %v13315_v8 = vpop.f32.mrb[177].mxu1 }
 0xdd4   : > { %5636 = vmatmul.mubr.f32.gmra.mrb[188].mxu0 %v15603_v4 }
 0xdd5   : > { %5641 = vmatprep.mubr.f32.mxu0 %v12992_v56 }
 0xdd6   : > { %v13319_v17 = vpop.f32.mrb[178].mxu1 }
 0xdd7   : > { %v13321_v7 = vpop.f32.mrb[179].mxu1 }
 0xdd8   : > { %5642 = vmatmul.mubr.f32.gmra.mrb[190].mxu0 %v12990_v24 }
 0xdd9   : > { %5647 = vmatprep.mubr.f32.mxu0 %v12998_v46 }
 0xdda   : > { %v13325_v11 = vpop.f32.mrb[180].mxu1 }
 0xddb   : > { %v13327_v0 = vpop.f32.mrb[181].mxu1 }
 0xddc   : > { %5648 = vmatmul.mubr.f32.gmra.mrb[192].mxu0 %v12994_v54 }
 0xddd   : > { %5975 = vmatprep.mubr.f32.mxu0 %v5722_v42 }
 0xdde   : > { %v13330_v15 = vpop.f32.mrb[182].mxu1 }
 0xddf   : > { %v13332_v4 = vpop.f32.mrb[183].mxu1 }
 0xde2   : > { %v13334_v56 = vpop.f32.mrb[184].mxu1 }
 0xde3   : > { %v13336_v12 = vpop.f32.mrb[185].mxu1 }
 0xde6   : > { %v13338_v53 = vpop.f32.mrb[186].mxu1 }
 0xde7   : > { %v13340_v24 = vpop.f32.mrb[187].mxu1 }
 0xdea   : > { %v13342_v46 = vpop.f32.mrb[188].mxu1 }
 0xdeb   : > { %v13344_v30 = vpop.f32.mrb[189].mxu1 }
 0xdee   : > { %v13346_v3 = vpop.f32.mrb[190].mxu1 }
 0xdef   : > { %v13348_v54 = vpop.f32.mrb[191].mxu1 }
 0xdf2   : > { %v13350_v42 = vpop.f32.mrb[192].mxu1 }
 0xdf3   : > { %v13352_v9 = vpop.f32.mrb[193].mxu1 }
 0xdf6   : > { %v13354_v19 = vpop.f32.mrb[194].mxu1 }
 0xdf7   : > { %v13356_v1 = vpop.f32.mrb[195].mxu1 }
 0xdfa   : > { %v13358_v23 = vpop.f32.mrb[196].mxu1 }
 0xdfb   : > { %v13360_v29 = vpop.f32.mrb[197].mxu1 }
 0xdfe   : > { %v13362_v43 = vpop.f32.mrb[198].mxu1 }
 0xdff   : > { %v13364_v63 = vpop.f32.mrb[199].mxu1 }
 0xe02   : > { %v13366_v35 = vpop.f32.mrb[200].mxu1 }
 0xe03   : > { %v13368_v61 = vpop.f32.mrb[201].mxu1 }
 0xe06   : > { %v13370_v47 = vpop.f32.mrb[202].mxu1 }
 0xe07   : > { %v13372_v59 = vpop.f32.mrb[203].mxu1 }
 0xe0a   : > { %v13374_v27 = vpop.f32.mrb[204].mxu1 }
 0xe0b   : > { %v13376_v20 = vpop.f32.mrb[205].mxu1 }
 0xe0e   : > { %v13378_v51 = vpop.f32.mrb[206].mxu1 }
 0xe0f   : > { %v13380_v36 = vpop.f32.mrb[207].mxu1 }
 0xe12   : > { %v13382_v28 = vpop.f32.mrb[208].mxu1 }
 0xe13   : > { %v13384_v2 = vpop.f32.mrb[209].mxu1 }
 0xe16   : > { %v13386_v37 = vpop.f32.mrb[210].mxu1 }
 0xe17   : > { %v13388_v62 = vpop.f32.mrb[211].mxu1 }
 0xe1a   : > { %v13390_v60 = vpop.f32.mrb[212].mxu1 }
 0xe1b   : > { %15604 = vst [vmem:[#allocation40_spill] sm:$0xff] %v13390_v60  ;;  %v13392_v18 = vpop.f32.mrb[213].mxu1  ;;  %v15671_v60 = vld [vmem:[#allocation41_spill] sm:$0xff] }
 0xe1c   : > { %15605 = vst [vmem:[#allocation45_spill] sm:$0xff] %v13392_v18  ;;  %9106 = vrsqrt.f32 %v15671_v60  ;;  %vm6555_vm5 = vcmp.eq.f32.partialorder %v15671_v60, inf  ;;  %vm6557_vm6 = vcmp.eq.f32.partialorder %v15671_v60, 0.0 }
 0xe1e   : > { %v13394_v25 = vpop.f32.mrb[214].mxu1 }
 0xe1f   : > { %15606 = vst [vmem:[#allocation38_spill] sm:$0xff] %v13394_v25  ;;  %v13396_v33 = vpop.f32.mrb[215].mxu1 }
 0xe20   : > { %15607 = vst [vmem:[#allocation43_spill] sm:$0xff] %v13396_v33 }
 0xe22   : > { %v13398_v57 = vpop.f32.mrb[216].mxu1 }
 0xe23   : > { %15608 = vst [vmem:[#allocation39_spill] sm:$0xff] %v13398_v57  ;;  %v13400_v40 = vpop.f32.mrb[217].mxu1 }
 0xe24   : > { %15609 = vst [vmem:[#allocation49_spill] sm:$0xff] %v13400_v40 }
 0xe26   : > { %v13402_v41 = vpop.f32.mrb[218].mxu1 }
 0xe27   : > { %15610 = vst [vmem:[#allocation42_spill] sm:$0xff] %v13402_v41  ;;  %v13404_v34 = vpop.f32.mrb[219].mxu1 }
 0xe28   : > { %15611 = vst [vmem:[#allocation47_spill] sm:$0xff] %v13404_v34 }
 0xe2a   : > { %v13406_v32 = vpop.f32.mrb[220].mxu1 }
 0xe2b   : > { %15612 = vst [vmem:[#allocation44_spill] sm:$0xff] %v13406_v32  ;;  %v13408_v14 = vpop.f32.mrb[221].mxu1 }
 0xe2c   : > { %15613 = vst [vmem:[#allocation46_spill] sm:$0xff] %v13408_v14 }
 0xe2e   : > { %v13410_v10 = vpop.f32.mrb[222].mxu1 }
 0xe2f   : > { %15614 = vst [vmem:[#allocation48_spill] sm:$0xff] %v13410_v10  ;;  %v13412_v31 = vpop.f32.mrb[223].mxu1 }
 0xe30   : > { %15615 = vst [vmem:[#allocation51_spill] sm:$0xff] %v13412_v31 }
 0xe33   : > { %v13414_v26 = vpop.f32.mrb[130].mxu0 }
 0xe34   : > { %15616 = vst [vmem:[#allocation52_spill] sm:$0xff] %v13414_v26  ;;  %v5465_v25 = vpop.f32.mrb[131].mxu0 }
 0xe35   : > { %6360 = vmatprep.mubr.f32.mxu1 %v5465_v25 }
 0xe37   : > { %v13416_v33 = vpop.f32.mrb[132].mxu0 }
 0xe38   : > { %15617 = vst [vmem:[#allocation53_spill] sm:$0xff] %v13416_v33  ;;  %v8782_v57 = vpack.c.bf16 %v13416_v33, %v13414_v26  ;;  %v13420_v41 = vpop.f32.mrb[133].mxu0 }
 0xe39   : > { %15618 = vst [vmem:[#allocation55_spill] sm:$0xff] %v13420_v41  ;;  %v8780_v34 = vpack.c.bf16 %v13420_v41, %v5465_v25 }
 0xe3b   : > { %v13423_v32 = vpop.f32.mrb[134].mxu0  ;;  %8781 = vmatprep.subr.bf16.mxu0 %v8780_v34 }
 0xe3c   : > { %15619 = vst [vmem:[#allocation50_spill] sm:$0xff] %v13423_v32  ;;  %v13425_v14 = vpop.f32.mrb[135].mxu0  ;;  %8783 = vmatpush1.bf16.msra.mxu0 %v8782_v57 }
 0xe3d   : > { %15620 = vst [vmem:[#allocation56_spill] sm:$0xff] %v13425_v14 }
 0xe3f   : > { %v13427_v10 = vpop.f32.mrb[136].mxu0 }
 0xe40   : > { %15621 = vst [vmem:[#allocation57_spill] sm:$0xff] %v13427_v10  ;;  %v8786_v31 = vpack.c.bf16 %v13427_v10, %v13423_v32  ;;  %v13431_v40 = vpop.f32.mrb[137].mxu0 }
 0xe41   : > { %15622 = vst [vmem:[#allocation59_spill] sm:$0xff] %v13431_v40  ;;  %v8784_v33 = vpack.c.bf16 %v13431_v40, %v13425_v14 }
 0xe43   : > { %v13435_v26 = vpop.f32.mrb[138].mxu0  ;;  %8785 = vmatprep.subr.bf16.mxu0 %v8784_v33 }
 0xe44   : > { %15623 = vst [vmem:[#allocation54_spill] sm:$0xff] %v13435_v26  ;;  %v13437_v25 = vpop.f32.mrb[139].mxu0  ;;  %8787 = vmatpush1.bf16.msra.mxu0 %v8786_v31 }
 0xe45   : > { %15624 = vst [vmem:[#allocation60_spill] sm:$0xff] %v13437_v25 }
 0xe47   : > { %v13439_v34 = vpop.f32.mrb[140].mxu0 }
 0xe48   : > { %15625 = vst [vmem:[#allocation61_spill] sm:$0xff] %v13439_v34  ;;  %v8790_v57 = vpack.c.bf16 %v13439_v34, %v13435_v26  ;;  %v13443_v41 = vpop.f32.mrb[141].mxu0 }
 0xe49   : > { %15626 = vst [vmem:[#allocation63_spill] sm:$0xff] %v13443_v41  ;;  %v8788_v10 = vpack.c.bf16 %v13443_v41, %v13437_v25 }
 0xe4b   : > { %v13447_v32 = vpop.f32.mrb[142].mxu0  ;;  %8789 = vmatprep.subr.bf16.mxu0 %v8788_v10 }
 0xe4c   : > { %15627 = vst [vmem:[#allocation58_spill] sm:$0xff] %v13447_v32  ;;  %v13449_v40 = vpop.f32.mrb[143].mxu0  ;;  %8791 = vmatpush1.bf16.msra.mxu0 %v8790_v57 }
 0xe4d   : > { %15628 = vst [vmem:[#allocation64_spill] sm:$0xff] %v13449_v40 }
 0xe4f   : > { %v13451_v33 = vpop.f32.mrb[144].mxu0 }
 0xe50   : > { %15629 = vst [vmem:[#allocation65_spill] sm:$0xff] %v13451_v33  ;;  %v8794_v31 = vpack.c.bf16 %v13451_v33, %v13447_v32  ;;  %v13455_v14 = vpop.f32.mrb[145].mxu0 }
 0xe51   : > { %15630 = vst [vmem:[#allocation67_spill] sm:$0xff] %v13455_v14  ;;  %v8792_v34 = vpack.c.bf16 %v13455_v14, %v13449_v40 }
 0xe53   : > { %v13459_v26 = vpop.f32.mrb[146].mxu0  ;;  %8793 = vmatprep.subr.bf16.mxu0 %v8792_v34 }
 0xe54   : > { %15631 = vst [vmem:[#allocation62_spill] sm:$0xff] %v13459_v26  ;;  %v13461_v41 = vpop.f32.mrb[147].mxu0  ;;  %8795 = vmatpush1.bf16.msra.mxu0 %v8794_v31 }
 0xe55   : > { %15632 = vst [vmem:[#allocation68_spill] sm:$0xff] %v13461_v41 }
 0xe57   : > { %v13463_v10 = vpop.f32.mrb[148].mxu0 }
 0xe58   : > { %15633 = vst [vmem:[#allocation69_spill] sm:$0xff] %v13463_v10  ;;  %v8798_v57 = vpack.c.bf16 %v13463_v10, %v13459_v26  ;;  %v13467_v25 = vpop.f32.mrb[149].mxu0 }
 0xe59   : > { %15634 = vst [vmem:[#allocation71_spill] sm:$0xff] %v13467_v25  ;;  %v8796_v33 = vpack.c.bf16 %v13467_v25, %v13461_v41 }
 0xe5b   : > { %v13471_v32 = vpop.f32.mrb[150].mxu0  ;;  %8797 = vmatprep.subr.bf16.mxu0 %v8796_v33 }
 0xe5c   : > { %15635 = vst [vmem:[#allocation66_spill] sm:$0xff] %v13471_v32  ;;  %v13473_v14 = vpop.f32.mrb[151].mxu0  ;;  %8799 = vmatpush1.bf16.msra.mxu0 %v8798_v57 }
 0xe5d   : > { %15636 = vst [vmem:[#allocation72_spill] sm:$0xff] %v13473_v14 }
 0xe5f   : > { %v13475_v34 = vpop.f32.mrb[152].mxu0 }
 0xe60   : > { %15637 = vst [vmem:[#allocation73_spill] sm:$0xff] %v13475_v34  ;;  %v8802_v31 = vpack.c.bf16 %v13475_v34, %v13471_v32  ;;  %v13479_v40 = vpop.f32.mrb[153].mxu0 }
 0xe61   : > { %15638 = vst [vmem:[#allocation75_spill] sm:$0xff] %v13479_v40  ;;  %v8800_v10 = vpack.c.bf16 %v13479_v40, %v13473_v14 }
 0xe63   : > { %v13483_v26 = vpop.f32.mrb[154].mxu0  ;;  %8801 = vmatprep.subr.bf16.mxu0 %v8800_v10 }
 0xe64   : > { %15639 = vst [vmem:[#allocation70_spill] sm:$0xff] %v13483_v26  ;;  %v13485_v25 = vpop.f32.mrb[155].mxu0  ;;  %8803 = vmatpush1.bf16.msra.mxu0 %v8802_v31 }
 0xe65   : > { %15640 = vst [vmem:[#allocation76_spill] sm:$0xff] %v13485_v25 }
 0xe67   : > { %v13487_v33 = vpop.f32.mrb[156].mxu0 }
 0xe68   : > { %15641 = vst [vmem:[#allocation77_spill] sm:$0xff] %v13487_v33  ;;  %v8806_v57 = vpack.c.bf16 %v13487_v33, %v13483_v26  ;;  %v13491_v41 = vpop.f32.mrb[157].mxu0 }
 0xe69   : > { %15642 = vst [vmem:[#allocation79_spill] sm:$0xff] %v13491_v41  ;;  %v8804_v34 = vpack.c.bf16 %v13491_v41, %v13485_v25 }
 0xe6b   : > { %v13495_v32 = vpop.f32.mrb[158].mxu0  ;;  %8805 = vmatprep.subr.bf16.mxu0 %v8804_v34 }
 0xe6c   : > { %15643 = vst [vmem:[#allocation74_spill] sm:$0xff] %v13495_v32  ;;  %v13497_v40 = vpop.f32.mrb[159].mxu0  ;;  %8807 = vmatpush1.bf16.msra.mxu0 %v8806_v57 }
 0xe6d   : > { %15644 = vst [vmem:[#allocation80_spill] sm:$0xff] %v13497_v40 }
 0xe6f   : > { %v13499_v10 = vpop.f32.mrb[160].mxu0 }
 0xe70   : > { %15645 = vst [vmem:[#allocation81_spill] sm:$0xff] %v13499_v10  ;;  %v8810_v31 = vpack.c.bf16 %v13499_v10, %v13495_v32  ;;  %v13503_v14 = vpop.f32.mrb[161].mxu0 }
 0xe71   : > { %15646 = vst [vmem:[#allocation83_spill] sm:$0xff] %v13503_v14  ;;  %v8808_v33 = vpack.c.bf16 %v13503_v14, %v13497_v40 }
 0xe73   : > { %v13507_v26 = vpop.f32.mrb[162].mxu0  ;;  %8809 = vmatprep.subr.bf16.mxu0 %v8808_v33 }
 0xe74   : > { %15647 = vst [vmem:[#allocation78_spill] sm:$0xff] %v13507_v26  ;;  %v13509_v41 = vpop.f32.mrb[163].mxu0  ;;  %8811 = vmatpush1.bf16.msra.mxu0 %v8810_v31 }
 0xe75   : > { %15648 = vst [vmem:[#allocation84_spill] sm:$0xff] %v13509_v41 }
 0xe77   : > { %v13511_v34 = vpop.f32.mrb[164].mxu0 }
 0xe78   : > { %15649 = vst [vmem:[#allocation85_spill] sm:$0xff] %v13511_v34  ;;  %v8814_v57 = vpack.c.bf16 %v13511_v34, %v13507_v26  ;;  %v13515_v25 = vpop.f32.mrb[165].mxu0 }
 0xe79   : > { %15650 = vst [vmem:[#allocation87_spill] sm:$0xff] %v13515_v25  ;;  %v8812_v10 = vpack.c.bf16 %v13515_v25, %v13509_v41 }
 0xe7b   : > { %v13519_v32 = vpop.f32.mrb[166].mxu0  ;;  %8813 = vmatprep.subr.bf16.mxu0 %v8812_v10 }
 0xe7c   : > { %15651 = vst [vmem:[#allocation82_spill] sm:$0xff] %v13519_v32  ;;  %v13521_v14 = vpop.f32.mrb[167].mxu0  ;;  %8815 = vmatpush1.bf16.msra.mxu0 %v8814_v57 }
 0xe7d   : > { %15652 = vst [vmem:[#allocation88_spill] sm:$0xff] %v13521_v14 }
 0xe7f   : > { %v13523_v33 = vpop.f32.mrb[168].mxu0 }
 0xe80   : > { %15653 = vst [vmem:[#allocation89_spill] sm:$0xff] %v13523_v33  ;;  %v8818_v31 = vpack.c.bf16 %v13523_v33, %v13519_v32  ;;  %v13527_v40 = vpop.f32.mrb[169].mxu0 }
 0xe81   : > { %15654 = vst [vmem:[#allocation91_spill] sm:$0xff] %v13527_v40  ;;  %v8816_v34 = vpack.c.bf16 %v13527_v40, %v13521_v14 }
 0xe83   : > { %v13531_v26 = vpop.f32.mrb[170].mxu0  ;;  %8817 = vmatprep.subr.bf16.mxu0 %v8816_v34 }
 0xe84   : > { %15655 = vst [vmem:[#allocation86_spill] sm:$0xff] %v13531_v26  ;;  %v13533_v25 = vpop.f32.mrb[171].mxu0  ;;  %8819 = vmatpush1.bf16.msra.mxu0 %v8818_v31 }
 0xe85   : > { %15656 = vst [vmem:[#allocation92_spill] sm:$0xff] %v13533_v25 }
 0xe87   : > { %v13535_v10 = vpop.f32.mrb[172].mxu0 }
 0xe88   : > { %15657 = vst [vmem:[#allocation93_spill] sm:$0xff] %v13535_v10  ;;  %v8822_v57 = vpack.c.bf16 %v13535_v10, %v13531_v26  ;;  %v13539_v41 = vpop.f32.mrb[173].mxu0 }
 0xe89   : > { %15658 = vst [vmem:[#allocation95_spill] sm:$0xff] %v13539_v41  ;;  %v8820_v33 = vpack.c.bf16 %v13539_v41, %v13533_v25 }
 0xe8b   : > { %v13543_v32 = vpop.f32.mrb[174].mxu0  ;;  %8821 = vmatprep.subr.bf16.mxu0 %v8820_v33 }
 0xe8c   : > { %15659 = vst [vmem:[#allocation90_spill] sm:$0xff] %v13543_v32  ;;  %v13545_v40 = vpop.f32.mrb[175].mxu0  ;;  %8823 = vmatpush1.bf16.msra.mxu0 %v8822_v57 }
 0xe8d   : > { %15660 = vst [vmem:[#allocation96_spill] sm:$0xff] %v13545_v40 }
 0xe8f   : > { %v13547_v34 = vpop.f32.mrb[176].mxu0 }
 0xe90   : > { %15661 = vst [vmem:[#allocation97_spill] sm:$0xff] %v13547_v34  ;;  %v8826_v31 = vpack.c.bf16 %v13547_v34, %v13543_v32  ;;  %v13551_v14 = vpop.f32.mrb[177].mxu0 }
 0xe91   : > { %15662 = vst [vmem:[#allocation99_spill] sm:$0xff] %v13551_v14  ;;  %v8824_v10 = vpack.c.bf16 %v13551_v14, %v13545_v40 }
 0xe93   : > { %v13555_v26 = vpop.f32.mrb[178].mxu0  ;;  %8825 = vmatprep.subr.bf16.mxu0 %v8824_v10 }
 0xe94   : > { %15663 = vst [vmem:[#allocation94_spill] sm:$0xff] %v13555_v26  ;;  %v13557_v41 = vpop.f32.mrb[179].mxu0  ;;  %8827 = vmatpush1.bf16.msra.mxu0 %v8826_v31 }
 0xe95   : > { %15664 = vst [vmem:[#allocation100_spill] sm:$0xff] %v13557_v41 }
 0xe97   : > { %v13559_v33 = vpop.f32.mrb[180].mxu0 }
 0xe98   : > { %15665 = vst [vmem:[#allocation101_spill] sm:$0xff] %v13559_v33  ;;  %v8830_v57 = vpack.c.bf16 %v13559_v33, %v13555_v26  ;;  %v13563_v25 = vpop.f32.mrb[181].mxu0 }
 0xe99   : > { %15666 = vst [vmem:[#allocation166_spill] sm:$0xff] %v13563_v25  ;;  %v8828_v34 = vpack.c.bf16 %v13563_v25, %v13557_v41 }
 0xe9b   : > { %v13567_v32 = vpop.f32.mrb[182].mxu0  ;;  %8829 = vmatprep.subr.bf16.mxu0 %v8828_v34 }
 0xe9c   : > { %15667 = vst [vmem:[#allocation98_spill] sm:$0xff] %v13567_v32  ;;  %v13569_v14 = vpop.f32.mrb[183].mxu0  ;;  %8831 = vmatpush1.bf16.msra.mxu0 %v8830_v57 }
 0xe9d   : > { %15668 = vst [vmem:[#allocation168_spill] sm:$0xff] %v13569_v14 }
 0xe9f   : > { %v13571_v10 = vpop.f32.mrb[184].mxu0 }
 0xea0   : > { %15669 = vst [vmem:[#allocation167_spill] sm:$0xff] %v13571_v10  ;;  %v8834_v31 = vpack.c.bf16 %v13571_v10, %v13567_v32  ;;  %v13575_v40 = vpop.f32.mrb[185].mxu0  ;;  %v9107_v32 = vpop.eup %9106 }
 0xea1   : > { %15670 = vst [vmem:[#allocation170_spill] sm:$0xff] %v13575_v40  ;;  %v8832_v33 = vpack.c.bf16 %v13575_v40, %v13569_v14 }
 0xea3   : > { %v13580_v26 = vpop.f32.mrb[186].mxu0  ;;  %8833 = vmatprep.subr.bf16.mxu0 %v8832_v33  ;;  %v6554_v33 = vmul.f32 %v9107_v32, %v15671_v60 }
 0xea4   : > { %15672 = vst [vmem:[#allocation169_spill] sm:$0xff] %v13580_v26  ;;  %v13582_v25 = vpop.f32.mrb[187].mxu0  ;;  %8835 = vmatpush1.bf16.msra.mxu0 %v8834_v31 }
 0xea7   : > { %v13584_v34 = vpop.f32.mrb[188].mxu0 }
 0xea8   : > { %15673 = vst [vmem:[#allocation41_spill] sm:$0xff] %v13584_v34  ;;  %v8838_v57 = vpack.c.bf16 %v13584_v34, %v13580_v26  ;;  %v13588_v41 = vpop.f32.mrb[189].mxu0  ;;  %v6556_v26 = vsel %vm6555_vm5, %v15671_v60, %v6554_v33 }
 0xea9   : > { %15674 = vst [vmem:[#allocation171_spill] sm:$0xff] %v13588_v41  ;;  %v8836_v10 = vpack.c.bf16 %v13588_v41, %v13582_v25 }
 0xeab   : > { %v13592_v18 = vpop.f32.mrb[190].mxu0  ;;  %8837 = vmatprep.subr.bf16.mxu0 %v8836_v10  ;;  %v6558_v10 = vand.u32 2147483648, %v15671_v60  ;;  %v15678_v60 = vld [vmem:[#allocation38_spill] sm:$0xff] }
 0xeac   : > { %v13594_v40 = vpop.f32.mrb[191].mxu0  ;;  %8839 = vmatpush1.bf16.msra.mxu0 %v8838_v57 }
 0xead   : > { %v6559_v32 = vsel %vm6557_vm6, %v6558_v10, %v6556_v26  ;;  %v15675_v26 = vld [vmem:[#allocation45_spill] sm:$0xff] }
 0xeaf   : > { %v13597_v31 = vpop.f32.mrb[192].mxu0 }
 0xeb0   : > { %v8842_v14 = vpack.c.bf16 %v13597_v31, %v13592_v18  ;;  %v13601_v34 = vpop.f32.mrb[193].mxu0 }
 0xeb1   : > { %v8840_v41 = vpack.c.bf16 %v13601_v34, %v13594_v40 }
 0xeb3   : > { %8841 = vmatprep.subr.bf16.mxu0 %v8840_v41  ;;  %v15677_v41 = vld [vmem:[#allocation43_spill] sm:$0xff] }
 0xeb4   : > { %8843 = vmatpush1.bf16.msra.mxu0 %v8842_v14  ;;  %v15676_v14 = vld [vmem:[#allocation40_spill] sm:$0xff] }
 0xeb5   : > { %7900 = vmatprep.subr.mxu0 %v6559_v32 }
 0xeb7   : > { %5976 = vmatmul.mubr.f32.vlgmr.msra.gmra.mrb[194].mxu0 %v13267_v16  ;;  %v9128_v16 = vld [vmem:[%s14106_s5 + $0x98] sm:$0xff] }
 0xeb8   : > { %5981 = vmatprep.mubr.f32.mxu0 %v13273_v58  ;;  %7901 = vmatpush3.msra.mxu0 %v6559_v32  ;;  %v9130_v58 = vld [vmem:[%s14106_s5 + $0xa8] sm:$0xff] }
 0xebb   : > { %5982 = vmatmul.mubr.f32.gmra.mrb[196].mxu0 %v13271_v55  ;;  %v9129_v55 = vld [vmem:[%s14106_s5 + $0xa0] sm:$0xff] }
 0xebc   : > { %5987 = vmatprep.mubr.f32.mxu0 %v13279_v13  ;;  %v9132_v13 = vld [vmem:[%s14106_s5 + $0xb8] sm:$0xff] }
 0xebf   : > { %5988 = vmatmul.mubr.f32.gmra.mrb[198].mxu0 %v13277_v49  ;;  %v9131_v49 = vld [vmem:[%s14106_s5 + $0xb0] sm:$0xff] }
 0xec0   : > { %5993 = vmatprep.mubr.f32.mxu0 %v13285_v39  ;;  %v9134_v39 = vld [vmem:[%s14106_s5 + $0xc8] sm:$0xff] }
 0xec3   : > { %5994 = vmatmul.mubr.f32.gmra.mrb[200].mxu0 %v13283_v38  ;;  %v9133_v38 = vld [vmem:[%s14106_s5 + $0xc0] sm:$0xff] }
 0xec4   : > { %5999 = vmatprep.mubr.f32.mxu0 %v13291_v5  ;;  %v9136_v5 = vld [vmem:[%s14106_s5 + $0xd8] sm:$0xff] }
 0xec7   : > { %6000 = vmatmul.mubr.f32.gmra.mrb[202].mxu0 %v13289_v6  ;;  %v9135_v6 = vld [vmem:[%s14106_s5 + $0xd0] sm:$0xff] }
 0xec8   : > { %6005 = vmatprep.mubr.f32.mxu0 %v13297_v45  ;;  %v9138_v45 = vld [vmem:[%s14106_s5 + $0xe8] sm:$0xff] }
 0xecb   : > { %6006 = vmatmul.mubr.f32.gmra.mrb[204].mxu0 %v13295_v21  ;;  %v9137_v21 = vld [vmem:[%s14106_s5 + $0xe0] sm:$0xff] }
 0xecc   : > { %6011 = vmatprep.mubr.f32.mxu0 %v13303_v22  ;;  %v9139_v22 = vld [vmem:[%s14106_s5 + $0xf0] sm:$0xff] }
 0xecf   : > { %6012 = vmatmul.mubr.f32.gmra.mrb[206].mxu0 %v13301_v48  ;;  %v9127_v48 = vld [vmem:[%s14106_s5 + $0x90] sm:$0xff] }
 0xed0   : > { %6017 = vmatprep.mubr.f32.mxu0 %v13309_v44  ;;  %v9140_v44 = vld [vmem:[%s14106_s5 + $0xf8] sm:$0xff] }
 0xed3   : > { %6018 = vmatmul.mubr.f32.gmra.mrb[208].mxu0 %v13307_v50  ;;  %v9126_v50 = vld [vmem:[%s14106_s5 + $0x88] sm:$0xff] }
 0xed4   : > { %6023 = vmatprep.mubr.f32.mxu0 %v13315_v8 }
 0xed7   : > { %6024 = vmatmul.mubr.f32.gmra.mrb[210].mxu0 %v13313_v52  ;;  %v9125_v52 = vld [vmem:[%s14106_s5 + $0x80] sm:$0xff] }
 0xed8   : > { %6029 = vmatprep.mubr.f32.mxu0 %v13321_v7 }
 0xedb   : > { %6030 = vmatmul.mubr.f32.gmra.mrb[212].mxu0 %v13319_v17  ;;  %v9124_v17 = vld [vmem:[%s14106_s5 + $0x78] sm:$0xff] }
 0xedc   : > { %6035 = vmatprep.mubr.f32.mxu0 %v13327_v0 }
 0xedf   : > { %6036 = vmatmul.mubr.f32.gmra.mrb[214].mxu0 %v13325_v11  ;;  %v15687_v11 = vld [vmem:[#allocation115_spill] sm:$0xff] }
 0xee0   : > { %6041 = vmatprep.mubr.f32.mxu0 %v13332_v4 }
 0xee3   : > { %6042 = vmatmul.mubr.f32.gmra.mrb[216].mxu0 %v13330_v15  ;;  %v15688_v15 = vld [vmem:[#allocation116_spill] sm:$0xff] }
 0xee4   : > { %6047 = vmatprep.mubr.f32.mxu0 %v13336_v12  ;;  %v9123_v12 = vld [vmem:[%s14106_s5 + $0x70] sm:$0xff] }
 0xee7   : > { %6048 = vmatmul.mubr.f32.gmra.mrb[218].mxu0 %v13334_v56 }
 0xee8   : > { %6053 = vmatprep.mubr.f32.mxu0 %v13340_v24  ;;  %v15689_v24 = vld [vmem:[#allocation117_spill] sm:$0xff] }
 0xeeb   : > { %6054 = vmatmul.mubr.f32.gmra.mrb[220].mxu0 %v13338_v53  ;;  %v9122_v53 = vld [vmem:[%s14106_s5 + $0x68] sm:$0xff] }
 0xeec   : > { %6059 = vmatprep.mubr.f32.mxu0 %v13344_v30  ;;  %v9121_v30 = vld [vmem:[%s14106_s5 + $0x60] sm:$0xff] }
 0xeef   : > { %6060 = vmatmul.mubr.f32.gmra.mrb[222].mxu0 %v13342_v46 }
 0xef0   : > { %6065 = vmatprep.mubr.f32.mxu0 %v13348_v54 }
 0xef3   : > { %6066 = vmatmul.mubr.f32.gmra.mrb[224].mxu0 %v13346_v3  ;;  %v9120_v3 = vld [vmem:[%s14106_s5 + $0x58] sm:$0xff] }
 0xef4   : > { %6071 = vmatprep.mubr.f32.mxu0 %v13352_v9  ;;  %v9119_v9 = vld [vmem:[%s14106_s5 + $0x50] sm:$0xff] }
 0xef7   : > { %6072 = vmatmul.mubr.f32.gmra.mrb[226].mxu0 %v13350_v42  ;;  %v15690_v42 = vld [vmem:[#allocation118_spill] sm:$0xff] }
 0xef8   : > { %6077 = vmatprep.mubr.f32.mxu0 %v13356_v1  ;;  %v9117_v1 = vld [vmem:[%s14106_s5 + $0x40] sm:$0xff] }
 0xefb   : > { %6078 = vmatmul.mubr.f32.gmra.mrb[228].mxu0 %v13354_v19  ;;  %v9118_v19 = vld [vmem:[%s14106_s5 + $0x48] sm:$0xff] }
 0xefc   : > { %6083 = vmatprep.mubr.f32.mxu0 %v13360_v29  ;;  %v9115_v29 = vld [vmem:[%s14106_s5 + $0x30] sm:$0xff] }
 0xeff   : > { %6084 = vmatmul.mubr.f32.gmra.mrb[230].mxu0 %v13358_v23  ;;  %v9116_v23 = vld [vmem:[%s14106_s5 + $0x38] sm:$0xff] }
 0xf00   : > { %6089 = vmatprep.mubr.f32.mxu0 %v13364_v63  ;;  %v9113_v63 = vld [vmem:[%s14106_s5 + $0x20] sm:$0xff] }
 0xf03   : > { %6090 = vmatmul.mubr.f32.gmra.mrb[232].mxu0 %v13362_v43  ;;  %v9114_v43 = vld [vmem:[%s14106_s5 + $0x28] sm:$0xff] }
 0xf04   : > { %6095 = vmatprep.mubr.f32.mxu0 %v13368_v61  ;;  %v9111_v61 = vld [vmem:[%s14106_s5 + $0x10] sm:$0xff] }
 0xf07   : > { %6096 = vmatmul.mubr.f32.gmra.mrb[234].mxu0 %v13366_v35  ;;  %v9112_v35 = vld [vmem:[%s14106_s5 + $0x18] sm:$0xff] }
 0xf08   : > { %6101 = vmatprep.mubr.f32.mxu0 %v13372_v59  ;;  %v9109_v59 = vld [vmem:[%s14106_s5] sm:$0xff] }
 0xf0b   : > { %6102 = vmatmul.mubr.f32.gmra.mrb[236].mxu0 %v13370_v47  ;;  %v9110_v47 = vld [vmem:[%s14106_s5 + $0x8] sm:$0xff] }
 0xf0c   : > { %6107 = vmatprep.mubr.f32.mxu0 %v13376_v20  ;;  %v15679_v20 = vld [vmem:[#allocation49_spill] sm:$0xff] }
 0xf0f   : > { %6108 = vmatmul.mubr.f32.gmra.mrb[238].mxu0 %v13374_v27  ;;  %v15686_v27 = vld [vmem:[#allocation48_spill] sm:$0xff] }
 0xf10   : > { %6113 = vmatprep.mubr.f32.mxu0 %v13380_v36  ;;  %v15680_v36 = vld [vmem:[#allocation39_spill] sm:$0xff] }
 0xf13   : > { %6114 = vmatmul.mubr.f32.gmra.mrb[240].mxu0 %v13378_v51  ;;  %v15681_v51 = vld [vmem:[#allocation47_spill] sm:$0xff] }
 0xf14   : > { %6119 = vmatprep.mubr.f32.mxu0 %v13384_v2  ;;  %v15682_v2 = vld [vmem:[#allocation42_spill] sm:$0xff] }
 0xf17   : > { %6120 = vmatmul.mubr.f32.gmra.mrb[242].mxu0 %v13382_v28  ;;  %v15683_v28 = vld [vmem:[#allocation46_spill] sm:$0xff] }
 0xf18   : > { %6125 = vmatprep.mubr.f32.mxu0 %v13388_v62  ;;  %v15684_v62 = vld [vmem:[#allocation44_spill] sm:$0xff] }
 0xf1b   : > { %6126 = vmatmul.mubr.f32.gmra.mrb[244].mxu0 %v13386_v37  ;;  %v15685_v37 = vld [vmem:[#allocation51_spill] sm:$0xff] }
 0xf1c   : > { %6131 = vmatprep.mubr.f32.mxu0 %v15675_v26 }
 0xf1f   : > { %6132 = vmatmul.mubr.f32.gmra.mrb[246].mxu0 %v15676_v14 }
 0xf20   : > { %6137 = vmatprep.mubr.f32.mxu0 %v15677_v41 }
 0xf23   : > { %6138 = vmatmul.mubr.f32.gmra.mrb[248].mxu0 %v15678_v60 }
 0xf24   : > { %6143 = vmatprep.mubr.f32.mxu0 %v15679_v20 }
 0xf27   : > { %6144 = vmatmul.mubr.f32.gmra.mrb[250].mxu0 %v15680_v36  ;;  %v15691_v36 = vld [vmem:[#allocation119_spill] sm:$0xff] }
 0xf28   : > { %6149 = vmatprep.mubr.f32.mxu0 %v15681_v51 }
 0xf2b   : > { %6150 = vmatmul.mubr.f32.gmra.mrb[252].mxu0 %v15682_v2  ;;  %v15692_v2 = vld [vmem:[#allocation120_spill] sm:$0xff] }
 0xf2c   : > { %6155 = vmatprep.mubr.f32.mxu0 %v15683_v28 }
 0xf2f   : > { %6156 = vmatmul.mubr.f32.gmra.mrb[254].mxu0 %v15684_v62 }
 0xf30   : > { %6161 = vmatprep.mubr.f32.mxu0 %v15685_v37  ;;  %v15693_v37 = vld [vmem:[#allocation121_spill] sm:$0xff] }
 0xf33   : > { %6162 = vmatmul.mubr.f32.gmra.mrb[0].mxu0 %v15686_v27 }
 0xf34   : > { %7902 = vmatprep.mubr.msk.f32.mxu0 %vm700_vm3, %v9109_v59 }
 0xf37   : > { %7903 = vmatmul.mubr.msk.f32.vlgmr.msra.gmra.mrb[2].mxu0 %vm700_vm3, %v9110_v47  ;;  %v15694_v47 = vld [vmem:[#allocation122_spill] sm:$0xff] }
 0xf38   : > { %7905 = vmatprep.mubr.msk.f32.mxu0 %vm700_vm3, %v9111_v61 }
 0xf3b   : > { %7906 = vmatmul.mubr.msk.f32.gmra.mrb[4].mxu0 %vm700_vm3, %v9112_v35 }
 0xf3c   : > { %7908 = vmatprep.mubr.msk.f32.mxu0 %vm700_vm3, %v9113_v63 }
 0xf3f   : > { %7909 = vmatmul.mubr.msk.f32.gmra.mrb[6].mxu0 %vm700_vm3, %v9114_v43 }
 0xf40   : > { %7911 = vmatprep.mubr.msk.f32.mxu0 %vm700_vm3, %v9115_v29 }
 0xf43   : > { %7912 = vmatmul.mubr.msk.f32.gmra.mrb[8].mxu0 %vm700_vm3, %v9116_v23 }
 0xf44   : > { %7914 = vmatprep.mubr.msk.f32.mxu0 %vm700_vm3, %v9117_v1 }
 0xf47   : > { %7915 = vmatmul.mubr.msk.f32.gmra.mrb[10].mxu0 %vm700_vm3, %v9118_v19 }
 0xf48   : > { %7917 = vmatprep.mubr.msk.f32.mxu0 %vm700_vm3, %v9119_v9 }
 0xf4b   : > { %7918 = vmatmul.mubr.msk.f32.gmra.mrb[12].mxu0 %vm700_vm3, %v9120_v3  ;;  %v15695_v3 = vld [vmem:[#allocation123_spill] sm:$0xff] }
 0xf4c   : > { %7920 = vmatprep.mubr.msk.f32.mxu0 %vm700_vm3, %v9121_v30 }
 0xf4f   : > { %7921 = vmatmul.mubr.msk.f32.gmra.mrb[14].mxu0 %vm700_vm3, %v9122_v53  ;;  %v15696_v53 = vld [vmem:[#allocation124_spill] sm:$0xff] }
 0xf50   : > { %7923 = vmatprep.mubr.msk.f32.mxu0 %vm700_vm3, %v9123_v12 }
 0xf53   : > { %7924 = vmatmul.mubr.msk.f32.gmra.mrb[16].mxu0 %vm700_vm3, %v9124_v17 }
 0xf54   : > { %7926 = vmatprep.mubr.msk.f32.mxu0 %vm700_vm3, %v9125_v52  ;;  %v15697_v52 = vld [vmem:[#allocation125_spill] sm:$0xff] }
 0xf57   : > { %7927 = vmatmul.mubr.msk.f32.gmra.mrb[18].mxu0 %vm700_vm3, %v9126_v50 }
 0xf58   : > { %7929 = vmatprep.mubr.msk.f32.mxu0 %vm700_vm3, %v9127_v48 }
 0xf5b   : > { %7930 = vmatmul.mubr.msk.f32.gmra.mrb[20].mxu0 %vm700_vm3, %v9128_v16  ;;  %v15698_v16 = vld [vmem:[#allocation126_spill] sm:$0xff] }
 0xf5c   : > { %7932 = vmatprep.mubr.msk.f32.mxu0 %vm700_vm3, %v9129_v55 }
 0xf5f   : > { %7933 = vmatmul.mubr.msk.f32.gmra.mrb[22].mxu0 %vm700_vm3, %v9130_v58 }
 0xf60   : > { %7935 = vmatprep.mubr.msk.f32.mxu0 %vm700_vm3, %v9131_v49 }
 0xf63   : > { %7936 = vmatmul.mubr.msk.f32.gmra.mrb[24].mxu0 %vm700_vm3, %v9132_v13 }
 0xf64   : > { %7938 = vmatprep.mubr.msk.f32.mxu0 %vm700_vm3, %v9133_v38 }
 0xf67   : > { %7939 = vmatmul.mubr.msk.f32.gmra.mrb[26].mxu0 %vm700_vm3, %v9134_v39 }
 0xf68   : > { %7941 = vmatprep.mubr.msk.f32.mxu0 %vm700_vm3, %v9135_v6 }
 0xf6b   : > { %7942 = vmatmul.mubr.msk.f32.gmra.mrb[28].mxu0 %vm700_vm3, %v9136_v5 }
 0xf6c   : > { %7944 = vmatprep.mubr.msk.f32.mxu0 %vm700_vm3, %v9137_v21 }
 0xf6f   : > { %7945 = vmatmul.mubr.msk.f32.gmra.mrb[30].mxu0 %vm700_vm3, %v9138_v45  ;;  %v15699_v45 = vld [vmem:[#allocation127_spill] sm:$0xff] }
 0xf70   : > { %7947 = vmatprep.mubr.msk.f32.mxu0 %vm700_vm3, %v9139_v22 }
 0xf73   : > { %7948 = vmatmul.mubr.msk.f32.gmra.mrb[32].mxu0 %vm700_vm3, %v9140_v44  ;;  %v15700_v44 = vld [vmem:[#allocation128_spill] sm:$0xff] }
 0xf8a   : > { %v5977_v8 = vpop.f32.mrb[194].mxu0 }
 0xf8b   : > { %v5979_v7 = vpop.f32.mrb[195].mxu0  ;;  %v6168_v0 = vsub.f32 %v15687_v11, %v5977_v8  ;;  %v15701_v11 = vld [vmem:[#allocation129_spill] sm:$0xff] }
 0xf8c   : > { %v6169_v4 = vsub.f32 %v15688_v15, %v5979_v7 }
 0xf8d   : > { %v6232_v33 = vmul.f32 0.5, %v6168_v0 }
 0xf8e   : > { %v5983_v56 = vpop.f32.mrb[196].mxu0  ;;  %v6233_v32 = vmul.f32 0.5, %v6169_v4  ;;  %v15702_v4 = vld [vmem:[#allocation130_spill] sm:$0xff] }
 0xf8f   : > { %v6170_v46 = vsub.f32 %v15689_v24, %v5983_v56  ;;  %v5985_v54 = vpop.f32.mrb[197].mxu0 }
 0xf90   : > { %v6171_v57 = vsub.f32 %v15690_v42, %v5985_v54 }
 0xf91   : > { %v6234_v10 = vmul.f32 0.5, %v6170_v46 }
 0xf92   : > { %v6235_v26 = vmul.f32 0.5, %v6171_v57  ;;  %v5989_v14 = vpop.f32.mrb[198].mxu0 }
 0xf93   : > { %v8846_v41 = vpack.c.bf16 %v6234_v10, %v6232_v33  ;;  %v5991_v60 = vpop.f32.mrb[199].mxu0  ;;  %v6172_v51 = vsub.f32 %v15691_v36, %v5989_v14  ;;  %v15705_v36 = vld [vmem:[#allocation133_spill] sm:$0xff] }
 0xf94   : > { %v8844_v20 = vpack.c.bf16 %v6235_v26, %v6233_v32  ;;  %v6173_v28 = vsub.f32 %v15692_v2, %v5991_v60  ;;  %v15703_v26 = vld [vmem:[#allocation131_spill] sm:$0xff] }
 0xf95   : > { %v6236_v35 = vmul.f32 0.5, %v6172_v51 }
 0xf96   : > { %v5995_v62 = vpop.f32.mrb[200].mxu0  ;;  %8845 = vmatprep.subr.bf16.mxu1 %v8844_v20  ;;  %v6237_v43 = vmul.f32 0.5, %v6173_v28  ;;  %v15706_v28 = vld [vmem:[#allocation134_spill] sm:$0xff] }
 0xf97   : > { %v6174_v27 = vsub.f32 %v15693_v37, %v5995_v62  ;;  %v5997_v59 = vpop.f32.mrb[201].mxu0  ;;  %8847 = vmatpush1.bf16.msra.mxu1 %v8846_v41  ;;  %v15704_v41 = vld [vmem:[#allocation132_spill] sm:$0xff] }
 0xf98   : > { %v6175_v61 = vsub.f32 %v15694_v47, %v5997_v59 }
 0xf99   : > { %v6238_v63 = vmul.f32 0.5, %v6174_v27 }
 0xf9a   : > { %v6239_v29 = vmul.f32 0.5, %v6175_v61  ;;  %v6001_v23 = vpop.f32.mrb[202].mxu0 }
 0xf9b   : > { %v8850_v1 = vpack.c.bf16 %v6238_v63, %v6236_v35  ;;  %v6003_v19 = vpop.f32.mrb[203].mxu0  ;;  %v6176_v30 = vsub.f32 %v15695_v3, %v6001_v23  ;;  %v15709_v3 = vld [vmem:[#allocation137_spill] sm:$0xff] }
 0xf9c   : > { %v8848_v9 = vpack.c.bf16 %v6239_v29, %v6237_v43  ;;  %v6177_v12 = vsub.f32 %v15696_v53, %v6003_v19  ;;  %v15707_v29 = vld [vmem:[#allocation135_spill] sm:$0xff] }
 0xf9d   : > { %v6240_v58 = vmul.f32 0.5, %v6176_v30 }
 0xf9e   : > { %v6007_v17 = vpop.f32.mrb[204].mxu0  ;;  %8849 = vmatprep.subr.bf16.mxu1 %v8848_v9  ;;  %v6241_v13 = vmul.f32 0.5, %v6177_v12  ;;  %v15710_v12 = vld [vmem:[#allocation138_spill] sm:$0xff] }
 0xf9f   : > { %v6178_v50 = vsub.f32 %v15697_v52, %v6007_v17  ;;  %v6009_v48 = vpop.f32.mrb[205].mxu0  ;;  %8851 = vmatpush1.bf16.msra.mxu1 %v8850_v1  ;;  %v15708_v1 = vld [vmem:[#allocation136_spill] sm:$0xff] }
 0xfa0   : > { %v6179_v55 = vsub.f32 %v15698_v16, %v6009_v48 }
 0xfa1   : > { %v6242_v49 = vmul.f32 0.5, %v6178_v50 }
 0xfa2   : > { %v6243_v38 = vmul.f32 0.5, %v6179_v55  ;;  %v6013_v39 = vpop.f32.mrb[206].mxu0 }
 0xfa3   : > { %v8854_v6 = vpack.c.bf16 %v6242_v49, %v6240_v58  ;;  %v6015_v5 = vpop.f32.mrb[207].mxu0  ;;  %v6180_v22 = vsub.f32 %v15699_v45, %v6013_v39  ;;  %v15713_v45 = vld [vmem:[#allocation141_spill] sm:$0xff] }
 0xfa4   : > { %v8852_v21 = vpack.c.bf16 %v6243_v38, %v6241_v13  ;;  %v6181_v8 = vsub.f32 %v15700_v44, %v6015_v5  ;;  %v15711_v38 = vld [vmem:[#allocation139_spill] sm:$0xff] }
 0xfa5   : > { %v6244_v24 = vmul.f32 0.5, %v6180_v22 }
 0xfa6   : > { %v6019_v7 = vpop.f32.mrb[208].mxu0  ;;  %8853 = vmatprep.subr.bf16.mxu1 %v8852_v21  ;;  %v6245_v54 = vmul.f32 0.5, %v6181_v8  ;;  %v15714_v8 = vld [vmem:[#allocation142_spill] sm:$0xff] }
 0xfa7   : > { %v6182_v0 = vsub.f32 %v15701_v11, %v6019_v7  ;;  %v6021_v15 = vpop.f32.mrb[209].mxu0  ;;  %8855 = vmatpush1.bf16.msra.mxu1 %v8854_v6  ;;  %v15712_v6 = vld [vmem:[#allocation140_spill] sm:$0xff] }
 0xfa8   : > { %v6183_v56 = vsub.f32 %v15702_v4, %v6021_v15 }
 0xfa9   : > { %v6246_v46 = vmul.f32 0.5, %v6182_v0 }
 0xfaa   : > { %v6247_v42 = vmul.f32 0.5, %v6183_v56  ;;  %v6025_v57 = vpop.f32.mrb[210].mxu0 }
 0xfab   : > { %v8858_v33 = vpack.c.bf16 %v6246_v46, %v6244_v24  ;;  %v6027_v10 = vpop.f32.mrb[211].mxu0  ;;  %v6184_v14 = vsub.f32 %v15703_v26, %v6025_v57  ;;  %v15717_v26 = vld [vmem:[#allocation145_spill] sm:$0xff] }
 0xfac   : > { %v8856_v32 = vpack.c.bf16 %v6247_v42, %v6245_v54  ;;  %v6185_v60 = vsub.f32 %v15704_v41, %v6027_v10  ;;  %v15715_v42 = vld [vmem:[#allocation143_spill] sm:$0xff] }
 0xfad   : > { %v6248_v37 = vmul.f32 0.5, %v6184_v14 }
 0xfae   : > { %v6031_v20 = vpop.f32.mrb[212].mxu0  ;;  %8857 = vmatprep.subr.bf16.mxu1 %v8856_v32  ;;  %v6249_v59 = vmul.f32 0.5, %v6185_v60  ;;  %v15718_v60 = vld [vmem:[#allocation146_spill] sm:$0xff] }
 0xfaf   : > { %v6186_v51 = vsub.f32 %v15705_v36, %v6031_v20  ;;  %v6033_v2 = vpop.f32.mrb[213].mxu0  ;;  %8859 = vmatpush1.bf16.msra.mxu1 %v8858_v33  ;;  %v15716_v33 = vld [vmem:[#allocation144_spill] sm:$0xff] }
 0xfb0   : > { %v6187_v62 = vsub.f32 %v15706_v28, %v6033_v2 }
 0xfb1   : > { %v6250_v27 = vmul.f32 0.5, %v6186_v51 }
 0xfb2   : > { %v6251_v47 = vmul.f32 0.5, %v6187_v62  ;;  %v6037_v61 = vpop.f32.mrb[214].mxu0 }
 0xfb3   : > { %v8862_v35 = vpack.c.bf16 %v6250_v27, %v6248_v37  ;;  %v6039_v63 = vpop.f32.mrb[215].mxu0  ;;  %v6188_v23 = vsub.f32 %v15707_v29, %v6037_v61  ;;  %v15721_v29 = vld [vmem:[#allocation149_spill] sm:$0xff] }
 0xfb4   : > { %v8860_v43 = vpack.c.bf16 %v6251_v47, %v6249_v59  ;;  %v6189_v19 = vsub.f32 %v15708_v1, %v6039_v63  ;;  %v15719_v47 = vld [vmem:[#allocation147_spill] sm:$0xff] }
 0xfb5   : > { %v6252_v52 = vmul.f32 0.5, %v6188_v23 }
 0xfb6   : > { %v6043_v9 = vpop.f32.mrb[216].mxu0  ;;  %8861 = vmatprep.subr.bf16.mxu1 %v8860_v43  ;;  %v6253_v48 = vmul.f32 0.5, %v6189_v19  ;;  %v15722_v19 = vld [vmem:[#allocation150_spill] sm:$0xff] }
 0xfb7   : > { %v6190_v30 = vsub.f32 %v15709_v3, %v6043_v9  ;;  %v6045_v53 = vpop.f32.mrb[217].mxu0  ;;  %8863 = vmatpush1.bf16.msra.mxu1 %v8862_v35  ;;  %v15720_v35 = vld [vmem:[#allocation148_spill] sm:$0xff] }
 0xfb8   : > { %v6191_v17 = vsub.f32 %v15710_v12, %v6045_v53 }
 0xfb9   : > { %v6254_v50 = vmul.f32 0.5, %v6190_v30 }
 0xfba   : > { %v6255_v16 = vmul.f32 0.5, %v6191_v17  ;;  %v6049_v55 = vpop.f32.mrb[218].mxu0 }
 0xfbb   : > { %v8866_v58 = vpack.c.bf16 %v6254_v50, %v6252_v52  ;;  %v6051_v49 = vpop.f32.mrb[219].mxu0  ;;  %v6192_v39 = vsub.f32 %v15711_v38, %v6049_v55  ;;  %v15725_v38 = vld [vmem:[#allocation153_spill] sm:$0xff] }
 0xfbc   : > { %v8864_v13 = vpack.c.bf16 %v6255_v16, %v6253_v48  ;;  %v6193_v5 = vsub.f32 %v15712_v6, %v6051_v49  ;;  %v15723_v16 = vld [vmem:[#allocation151_spill] sm:$0xff] }
 0xfbd   : > { %v6256_v11 = vmul.f32 0.5, %v6192_v39 }
 0xfbe   : > { %v6055_v21 = vpop.f32.mrb[220].mxu0  ;;  %8865 = vmatprep.subr.bf16.mxu1 %v8864_v13  ;;  %v6257_v15 = vmul.f32 0.5, %v6193_v5  ;;  %v15726_v5 = vld [vmem:[#allocation154_spill] sm:$0xff] }
 0xfbf   : > { %v6194_v22 = vsub.f32 %v15713_v45, %v6055_v21  ;;  %v6057_v44 = vpop.f32.mrb[221].mxu0  ;;  %8867 = vmatpush1.bf16.msra.mxu1 %v8866_v58  ;;  %v15724_v58 = vld [vmem:[#allocation152_spill] sm:$0xff] }
 0xfc0   : > { %v6195_v7 = vsub.f32 %v15714_v8, %v6057_v44 }
 0xfc1   : > { %v6258_v0 = vmul.f32 0.5, %v6194_v22 }
 0xfc2   : > { %v6259_v4 = vmul.f32 0.5, %v6195_v7  ;;  %v6061_v56 = vpop.f32.mrb[222].mxu0 }
 0xfc3   : > { %v8870_v24 = vpack.c.bf16 %v6258_v0, %v6256_v11  ;;  %v6063_v46 = vpop.f32.mrb[223].mxu0  ;;  %v6196_v57 = vsub.f32 %v15715_v42, %v6061_v56  ;;  %v15729_v42 = vld [vmem:[#allocation156_spill] sm:$0xff] }
 0xfc4   : > { %v8868_v54 = vpack.c.bf16 %v6259_v4, %v6257_v15  ;;  %v6197_v10 = vsub.f32 %v15716_v33, %v6063_v46  ;;  %v15727_v4 = vld [vmem:[#allocation155_spill] sm:$0xff] }
 0xfc5   : > { %v6260_v36 = vmul.f32 0.5, %v6196_v57 }
 0xfc6   : > { %v6067_v32 = vpop.f32.mrb[224].mxu0  ;;  %8869 = vmatprep.subr.bf16.mxu1 %v8868_v54  ;;  %v6261_v2 = vmul.f32 0.5, %v6197_v10  ;;  %v15730_v10 = vld [vmem:[#allocation157_spill] sm:$0xff] }
 0xfc7   : > { %v6198_v14 = vsub.f32 %v15717_v26, %v6067_v32  ;;  %v6069_v41 = vpop.f32.mrb[225].mxu0  ;;  %8871 = vmatpush1.bf16.msra.mxu1 %v8870_v24  ;;  %v15728_v24 = vld [vmem:[#allocation102_spill] sm:$0xff] }
 0xfc8   : > { %v6199_v20 = vsub.f32 %v15718_v60, %v6069_v41 }
 0xfc9   : > { %v6262_v51 = vmul.f32 0.5, %v6198_v14 }
 0xfca   : > { %v6263_v28 = vmul.f32 0.5, %v6199_v20  ;;  %v6073_v62 = vpop.f32.mrb[226].mxu0 }
 0xfcb   : > { %v8874_v37 = vpack.c.bf16 %v6262_v51, %v6260_v36  ;;  %v6075_v27 = vpop.f32.mrb[227].mxu0  ;;  %v6200_v61 = vsub.f32 %v15719_v47, %v6073_v62  ;;  %v15733_v47 = vld [vmem:[#allocation160_spill] sm:$0xff] }
 0xfcc   : > { %v8872_v59 = vpack.c.bf16 %v6263_v28, %v6261_v2  ;;  %v6201_v63 = vsub.f32 %v15720_v35, %v6075_v27  ;;  %v15731_v28 = vld [vmem:[#allocation158_spill] sm:$0xff] }
 0xfcd   : > { %v6264_v3 = vmul.f32 0.5, %v6200_v61 }
 0xfce   : > { %v6079_v43 = vpop.f32.mrb[228].mxu0  ;;  %8873 = vmatprep.subr.bf16.mxu1 %v8872_v59  ;;  %v6265_v53 = vmul.f32 0.5, %v6201_v63  ;;  %v15734_v63 = vld [vmem:[#allocation161_spill] sm:$0xff] }
 0xfcf   : > { %v6202_v23 = vsub.f32 %v15721_v29, %v6079_v43  ;;  %v6081_v1 = vpop.f32.mrb[229].mxu0  ;;  %8875 = vmatpush1.bf16.msra.mxu1 %v8874_v37  ;;  %v15732_v37 = vld [vmem:[#allocation159_spill] sm:$0xff] }
 0xfd0   : > { %v6203_v9 = vsub.f32 %v15722_v19, %v6081_v1 }
 0xfd1   : > { %v6266_v30 = vmul.f32 0.5, %v6202_v23 }
 0xfd2   : > { %v6267_v12 = vmul.f32 0.5, %v6203_v9  ;;  %v6085_v17 = vpop.f32.mrb[230].mxu0 }
 0xfd3   : > { %v8878_v52 = vpack.c.bf16 %v6266_v30, %v6264_v3  ;;  %v6087_v50 = vpop.f32.mrb[231].mxu0  ;;  %v6204_v55 = vsub.f32 %v15723_v16, %v6085_v17  ;;  %v15737_v16 = vld [vmem:[#allocation164_spill] sm:$0xff] }
 0xfd4   : > { %v8876_v48 = vpack.c.bf16 %v6267_v12, %v6265_v53  ;;  %v6205_v49 = vsub.f32 %v15724_v58, %v6087_v50  ;;  %v15735_v12 = vld [vmem:[#allocation162_spill] sm:$0xff] }
 0xfd5   : > { %v6268_v45 = vmul.f32 0.5, %v6204_v55 }
 0xfd6   : > { %v6091_v13 = vpop.f32.mrb[232].mxu0  ;;  %8877 = vmatprep.subr.bf16.mxu1 %v8876_v48  ;;  %v6269_v44 = vmul.f32 0.5, %v6205_v49  ;;  %v15738_v49 = vld [vmem:[#allocation165_spill] sm:$0xff] }
 0xfd7   : > { %v6206_v39 = vsub.f32 %v15725_v38, %v6091_v13  ;;  %v6093_v6 = vpop.f32.mrb[233].mxu0  ;;  %8879 = vmatpush1.bf16.msra.mxu1 %v8878_v52  ;;  %v15736_v52 = vld [vmem:[#allocation163_spill] sm:$0xff] }
 0xfd8   : > { %v6207_v21 = vsub.f32 %v15726_v5, %v6093_v6 }
 0xfd9   : > { %v6270_v22 = vmul.f32 0.5, %v6206_v39 }
 0xfda   : > { %v6271_v8 = vmul.f32 0.5, %v6207_v21  ;;  %v6097_v7 = vpop.f32.mrb[234].mxu0 }
 0xfdb   : > { %v8882_v11 = vpack.c.bf16 %v6270_v22, %v6268_v45  ;;  %v6099_v0 = vpop.f32.mrb[235].mxu0  ;;  %v6208_v56 = vsub.f32 %v15727_v4, %v6097_v7  ;;  %v15741_v4 = vld [vmem:[#allocation106_spill] sm:$0xff] }
 0xfdc   : > { %v8880_v15 = vpack.c.bf16 %v6271_v8, %v6269_v44  ;;  %v6209_v46 = vsub.f32 %v15728_v24, %v6099_v0  ;;  %v15739_v8 = vld [vmem:[#allocation105_spill] sm:$0xff] }
 0xfdd   : > { %v6272_v26 = vmul.f32 0.5, %v6208_v56 }
 0xfde   : > { %v6103_v54 = vpop.f32.mrb[236].mxu0  ;;  %8881 = vmatprep.subr.bf16.mxu1 %v8880_v15  ;;  %v6273_v41 = vmul.f32 0.5, %v6209_v46  ;;  %v15742_v46 = vld [vmem:[#allocation104_spill] sm:$0xff] }
 0xfdf   : > { %v6210_v57 = vsub.f32 %v15729_v42, %v6103_v54  ;;  %v6105_v33 = vpop.f32.mrb[237].mxu0  ;;  %8883 = vmatpush1.bf16.msra.mxu1 %v8882_v11  ;;  %v15740_v11 = vld [vmem:[#allocation103_spill] sm:$0xff] }
 0xfe0   : > { %v6211_v32 = vsub.f32 %v15730_v10, %v6105_v33 }
 0xfe1   : > { %v6274_v14 = vmul.f32 0.5, %v6210_v57 }
 0xfe2   : > { %v6275_v60 = vmul.f32 0.5, %v6211_v32  ;;  %v6109_v20 = vpop.f32.mrb[238].mxu0 }
 0xfe3   : > { %v8886_v36 = vpack.c.bf16 %v6274_v14, %v6272_v26  ;;  %v6111_v51 = vpop.f32.mrb[239].mxu0  ;;  %v6212_v62 = vsub.f32 %v15731_v28, %v6109_v20  ;;  %v15745_v28 = vld [vmem:[#allocation110_spill] sm:$0xff] }
 0xfe4   : > { %v8884_v2 = vpack.c.bf16 %v6275_v60, %v6273_v41  ;;  %v6213_v27 = vsub.f32 %v15732_v37, %v6111_v51  ;;  %v15743_v60 = vld [vmem:[#allocation109_spill] sm:$0xff] }
 0xfe5   : > { %v6276_v29 = vmul.f32 0.5, %v6212_v62 }
 0xfe6   : > { %v6115_v59 = vpop.f32.mrb[240].mxu0  ;;  %8885 = vmatprep.subr.bf16.mxu1 %v8884_v2  ;;  %v6277_v1 = vmul.f32 0.5, %v6213_v27  ;;  %v15746_v27 = vld [vmem:[#allocation108_spill] sm:$0xff] }
 0xfe7   : > { %v6214_v61 = vsub.f32 %v15733_v47, %v6115_v59  ;;  %v6117_v35 = vpop.f32.mrb[241].mxu0  ;;  %8887 = vmatpush1.bf16.msra.mxu1 %v8886_v36  ;;  %v15744_v36 = vld [vmem:[#allocation107_spill] sm:$0xff] }
 0xfe8   : > { %v6215_v43 = vsub.f32 %v15734_v63, %v6117_v35 }
 0xfe9   : > { %v6278_v23 = vmul.f32 0.5, %v6214_v61 }
 0xfea   : > { %v6279_v19 = vmul.f32 0.5, %v6215_v43  ;;  %v6121_v9 = vpop.f32.mrb[242].mxu0 }
 0xfeb   : > { %v8890_v3 = vpack.c.bf16 %v6278_v23, %v6276_v29  ;;  %v6123_v30 = vpop.f32.mrb[243].mxu0  ;;  %v6216_v17 = vsub.f32 %v15735_v12, %v6121_v9  ;;  %v15749_v12 = vld [vmem:[#allocation112_spill] sm:$0xff] }
 0xfec   : > { %v8888_v53 = vpack.c.bf16 %v6279_v19, %v6277_v1  ;;  %v6217_v50 = vsub.f32 %v15736_v52, %v6123_v30  ;;  %v15747_v19 = vld [vmem:[#allocation111_spill] sm:$0xff] }
 0xfed   : > { %v6280_v38 = vmul.f32 0.5, %v6216_v17 }
 0xfee   : > { %v6127_v48 = vpop.f32.mrb[244].mxu0  ;;  %8889 = vmatprep.subr.bf16.mxu1 %v8888_v53  ;;  %v6281_v6 = vmul.f32 0.5, %v6217_v50  ;;  %v15750_v50 = vld [vmem:[#allocation114_spill] sm:$0xff] }
 0xfef   : > { %v6218_v55 = vsub.f32 %v15737_v16, %v6127_v48  ;;  %v6129_v58 = vpop.f32.mrb[245].mxu0  ;;  %8891 = vmatpush1.bf16.msra.mxu1 %v8890_v3  ;;  %v15748_v3 = vld [vmem:[#allocation113_spill] sm:$0xff] }
 0xff0   : > { %v6219_v13 = vsub.f32 %v15738_v49, %v6129_v58 }
 0xff1   : > { %v6282_v39 = vmul.f32 0.5, %v6218_v55 }
 0xff2   : > { %v6283_v5 = vmul.f32 0.5, %v6219_v13  ;;  %v6133_v21 = vpop.f32.mrb[246].mxu0 }
 0xff3   : > { %v8894_v45 = vpack.c.bf16 %v6282_v39, %v6280_v38  ;;  %v6135_v22 = vpop.f32.mrb[247].mxu0  ;;  %v6220_v7 = vsub.f32 %v15739_v8, %v6133_v21 }
 0xff4   : > { %v8892_v44 = vpack.c.bf16 %v6283_v5, %v6281_v6  ;;  %v6221_v0 = vsub.f32 %v15740_v11, %v6135_v22 }
 0xff5   : > { %v6284_v42 = vmul.f32 0.5, %v6220_v7  ;;  %v15753_v7 = vld [vmem:[#allocation53_spill] sm:$0xff] }
 0xff6   : > { %v6139_v15 = vpop.f32.mrb[248].mxu0  ;;  %8893 = vmatprep.subr.bf16.mxu1 %v8892_v44  ;;  %v6285_v33 = vmul.f32 0.5, %v6221_v0  ;;  %v15752_v44 = vld [vmem:[#allocation55_spill] sm:$0xff]  ;;  %v15754_v0 = vld [vmem:[#allocation56_spill] sm:$0xff] }
 0xff7   : > { %v6222_v56 = vsub.f32 %v15741_v4, %v6139_v15  ;;  %v6141_v24 = vpop.f32.mrb[249].mxu0  ;;  %8895 = vmatpush1.bf16.msra.mxu1 %v8894_v45  ;;  %v15751_v45 = vld [vmem:[#allocation52_spill] sm:$0xff]  ;;  %v15755_v4 = vld [vmem:[#allocation50_spill] sm:$0xff] }
 0xff8   : > { %v6223_v54 = vsub.f32 %v15742_v46, %v6141_v24  ;;  %v15756_v24 = vld [vmem:[#allocation59_spill] sm:$0xff] }
 0xff9   : > { %v6286_v57 = vmul.f32 0.5, %v6222_v56 }
 0xffa   : > { %v6287_v10 = vmul.f32 0.5, %v6223_v54  ;;  %v6145_v32 = vpop.f32.mrb[250].mxu0  ;;  %v15757_v54 = vld [vmem:[#allocation57_spill] sm:$0xff] }
 0xffb   : > { %v8898_v26 = vpack.c.bf16 %v6286_v57, %v6284_v42  ;;  %v6147_v14 = vpop.f32.mrb[251].mxu0  ;;  %v6224_v20 = vsub.f32 %v15743_v60, %v6145_v32  ;;  %v15758_v57 = vld [vmem:[#allocation60_spill] sm:$0xff] }
 0xffc   : > { %v8896_v41 = vpack.c.bf16 %v6287_v10, %v6285_v33  ;;  %v6225_v51 = vsub.f32 %v15744_v36, %v6147_v14  ;;  %v15759_v10 = vld [vmem:[#allocation54_spill] sm:$0xff] }
 0xffd   : > { %v6288_v47 = vmul.f32 0.5, %v6224_v20  ;;  %v15762_v20 = vld [vmem:[#allocation64_spill] sm:$0xff] }
 0xffe   : > { %v6151_v2 = vpop.f32.mrb[252].mxu0  ;;  %8897 = vmatprep.subr.bf16.mxu1 %v8896_v41  ;;  %v6289_v35 = vmul.f32 0.5, %v6225_v51  ;;  %v15761_v41 = vld [vmem:[#allocation61_spill] sm:$0xff]  ;;  %v15763_v51 = vld [vmem:[#allocation58_spill] sm:$0xff] }
 0xfff   : > { %v6226_v62 = vsub.f32 %v15745_v28, %v6151_v2  ;;  %v6153_v37 = vpop.f32.mrb[253].mxu0  ;;  %8899 = vmatpush1.bf16.msra.mxu1 %v8898_v26  ;;  %v15760_v26 = vld [vmem:[#allocation63_spill] sm:$0xff] }
0x1000   : > { %v6227_v59 = vsub.f32 %v15746_v27, %v6153_v37  ;;  %v15764_v28 = vld [vmem:[#allocation67_spill] sm:$0xff]  ;;  %v15765_v37 = vld [vmem:[#allocation65_spill] sm:$0xff] }
0x1001   : > { %v6290_v61 = vmul.f32 0.5, %v6226_v62 }
0x1002   : > { %v6291_v63 = vmul.f32 0.5, %v6227_v59  ;;  %v6157_v43 = vpop.f32.mrb[254].mxu0  ;;  %v15766_v59 = vld [vmem:[#allocation68_spill] sm:$0xff] }
0x1003   : > { %v8902_v29 = vpack.c.bf16 %v6290_v61, %v6288_v47  ;;  %v6159_v23 = vpop.f32.mrb[255].mxu0  ;;  %v6228_v9 = vsub.f32 %v15747_v19, %v6157_v43  ;;  %v15767_v61 = vld [vmem:[#allocation62_spill] sm:$0xff] }
0x1004   : > { %v8900_v1 = vpack.c.bf16 %v6291_v63, %v6289_v35  ;;  %v6229_v30 = vsub.f32 %v15748_v3, %v6159_v23  ;;  %v15768_v63 = vld [vmem:[#allocation71_spill] sm:$0xff] }
0x1005   : > { %v6292_v16 = vmul.f32 0.5, %v6228_v9  ;;  %v15771_v9 = vld [vmem:[#allocation66_spill] sm:$0xff] }
0x1006   : > { %v6163_v53 = vpop.f32.mrb[0].mxu0  ;;  %8901 = vmatprep.subr.bf16.mxu1 %v8900_v1  ;;  %v6293_v58 = vmul.f32 0.5, %v6229_v30  ;;  %v15770_v1 = vld [vmem:[#allocation72_spill] sm:$0xff]  ;;  %v15772_v30 = vld [vmem:[#allocation75_spill] sm:$0xff] }
0x1007   : > { %v6230_v17 = vsub.f32 %v15749_v12, %v6163_v53  ;;  %v6165_v52 = vpop.f32.mrb[1].mxu0  ;;  %8903 = vmatpush1.bf16.msra.mxu1 %v8902_v29  ;;  %v15769_v29 = vld [vmem:[#allocation69_spill] sm:$0xff] }
0x1008   : > { %v6231_v48 = vsub.f32 %v15750_v50, %v6165_v52  ;;  %v15773_v12 = vld [vmem:[#allocation73_spill] sm:$0xff]  ;;  %v15774_v52 = vld [vmem:[#allocation76_spill] sm:$0xff] }
0x1009   : > { %v6294_v55 = vmul.f32 0.5, %v6230_v17 }
0x100a   : > { %v6295_v49 = vmul.f32 0.5, %v6231_v48  ;;  %v7904_v13 = vpop.f32.mrb[2].mxu0  ;;  %v15775_v48 = vld [vmem:[#allocation70_spill] sm:$0xff] }
0x100b   : > { %v8906_v38 = vpack.c.bf16 %v6294_v55, %v6292_v16  ;;  %6792 = vperm.xlu1 %9047, %v7904_v13   ;;  %v6626_v39 = vpop.f32.mrb[3].mxu0  ;;  %v15776_v55 = vld [vmem:[#allocation79_spill] sm:$0xff] }
0x100c   : > { %v8904_v6 = vpack.c.bf16 %v6295_v49, %v6293_v58  ;;  %6787 = vperm.xlu0 %9046, %v6626_v39   ;;  %v15777_v49 = vld [vmem:[#allocation77_spill] sm:$0xff] }
0x100e   : > { %8905 = vmatprep.subr.bf16.mxu1 %v8904_v6  ;;  %v7907_v5 = vpop.f32.mrb[4].mxu0  ;;  %v15779_v6 = vld [vmem:[#allocation74_spill] sm:$0xff] }
0x100f   : > { %6802 = vperm.xlu1 %9047, %v7907_v5   ;;  %8907 = vmatpush1.bf16.msra.mxu1 %v8906_v38  ;;  %v6636_v21 = vpop.f32.mrb[5].mxu0  ;;  %v15778_v38 = vld [vmem:[#allocation80_spill] sm:$0xff]  ;;  %v15780_v5 = vld [vmem:[#allocation83_spill] sm:$0xff] }
0x1010   : > { %6797 = vperm.xlu0 %9046, %v6636_v21   ;;  %v15781_v21 = vld [vmem:[#allocation81_spill] sm:$0xff] }
0x1012   : > { %6361 = vmatmul.mubr.f32.vlgmr.msra.gmra.mrb[224].mxu1 %v15751_v45  ;;  %v7910_v22 = vpop.f32.mrb[6].mxu0  ;;  %v15782_v45 = vld [vmem:[#allocation84_spill] sm:$0xff] }
0x1013   : > { %6812 = vperm.xlu1 %9047, %v7910_v22   ;;  %6366 = vmatprep.mubr.f32.mxu1 %v15752_v44  ;;  %v6646_v8 = vpop.f32.mrb[7].mxu0  ;;  %v15783_v22 = vld [vmem:[#allocation78_spill] sm:$0xff]  ;;  %v15784_v44 = vld [vmem:[#allocation87_spill] sm:$0xff] }
0x1014   : > { %6807 = vperm.xlu0 %9046, %v6646_v8   ;;  %v15785_v8 = vld [vmem:[#allocation85_spill] sm:$0xff] }
0x1016   : > { %6367 = vmatmul.mubr.f32.gmra.mrb[226].mxu1 %v15753_v7  ;;  %v7913_v11 = vpop.f32.mrb[8].mxu0  ;;  %v15786_v7 = vld [vmem:[#allocation88_spill] sm:$0xff] }
0x1017   : > { %6822 = vperm.xlu1 %9047, %v7913_v11   ;;  %6372 = vmatprep.mubr.f32.mxu1 %v15754_v0  ;;  %v6656_v15 = vpop.f32.mrb[9].mxu0  ;;  %v15787_v11 = vld [vmem:[#allocation82_spill] sm:$0xff]  ;;  %v15788_v0 = vld [vmem:[#allocation91_spill] sm:$0xff] }
0x1018   : > { %6817 = vperm.xlu0 %9046, %v6656_v15   ;;  %v15789_v15 = vld [vmem:[#allocation89_spill] sm:$0xff] }
0x101a   : > { %6373 = vmatmul.mubr.f32.gmra.mrb[228].mxu1 %v15755_v4  ;;  %v7916_v56 = vpop.f32.mrb[10].mxu0  ;;  %v15790_v4 = vld [vmem:[#allocation92_spill] sm:$0xff] }
0x101b   : > { %6832 = vperm.xlu1 %9047, %v7916_v56   ;;  %6378 = vmatprep.mubr.f32.mxu1 %v15756_v24  ;;  %v6666_v46 = vpop.f32.mrb[11].mxu0  ;;  %v15791_v56 = vld [vmem:[#allocation86_spill] sm:$0xff]  ;;  %v15792_v24 = vld [vmem:[#allocation95_spill] sm:$0xff] }
0x101c   : > { %6827 = vperm.xlu0 %9046, %v6666_v46   ;;  %v15793_v46 = vld [vmem:[#allocation93_spill] sm:$0xff] }
0x101e   : > { %6379 = vmatmul.mubr.f32.gmra.mrb[230].mxu1 %v15757_v54  ;;  %v7919_v42 = vpop.f32.mrb[12].mxu0  ;;  %v9141_v54 = vld [vmem:[%s14107_s6] sm:$0xff] }
0x101f   : > { %6842 = vperm.xlu1 %9047, %v7919_v42   ;;  %6384 = vmatprep.mubr.f32.mxu1 %v15758_v57  ;;  %v6676_v33 = vpop.f32.mrb[13].mxu0  ;;  %v9142_v42 = vld [vmem:[%s14107_s6 + $0x80] sm:$0xff] }
0x1020   : > { %6837 = vperm.xlu0 %9046, %v6676_v33   ;;  %v9048_v57 = vpack.i.bf16 %v9141_v54, %v9142_v42  ;;  %v15794_v33 = vld [vmem:[#allocation96_spill] sm:$0xff]  ;;  %v15851_v42 = vld [vmem:[#allocation22_spill] sm:$0xff] }
0x1022   : > { %6385 = vmatmul.mubr.f32.gmra.mrb[232].mxu1 %v15759_v10  ;;  %v7922_v32 = vpop.f32.mrb[14].mxu0  ;;  %v15795_v10 = vld [vmem:[#allocation90_spill] sm:$0xff] }
0x1023   : > { %6852 = vperm.xlu1 %9047, %v7922_v32   ;;  %6390 = vmatprep.mubr.f32.mxu1 %v15760_v26  ;;  %v6686_v14 = vpop.f32.mrb[15].mxu0  ;;  %v15796_v32 = vld [vmem:[#allocation99_spill] sm:$0xff]  ;;  %v15797_v26 = vld [vmem:[#allocation8_spill] sm:$0xff] }
0x1024   : > { %6847 = vperm.xlu0 %9046, %v6686_v14   ;;  %v15798_v14 = vld [vmem:[#allocation23_spill] sm:$0xff] }
0x1026   : > { %6391 = vmatmul.mubr.f32.gmra.mrb[234].mxu1 %v15761_v41  ;;  %v7925_v60 = vpop.f32.mrb[16].mxu0  ;;  %v15799_v41 = vpack.i.bf16 %v15797_v26, %v15798_v14 }
0x1027   : > { %6862 = vperm.xlu1 %9047, %v7925_v60   ;;  %6396 = vmatprep.mubr.f32.mxu1 %v15762_v20  ;;  %v6696_v36 = vpop.f32.mrb[17].mxu0  ;;  %v15800_v60 = vld [vmem:[#allocation97_spill] sm:$0xff]  ;;  %v15801_v20 = vld [vmem:[#allocation100_spill] sm:$0xff] }
0x1028   : > { %6857 = vperm.xlu0 %9046, %v6696_v36   ;;  %v15802_v36 = vld [vmem:[#allocation9_spill] sm:$0xff] }
0x102a   : > { %6397 = vmatmul.mubr.f32.gmra.mrb[236].mxu1 %v15763_v51  ;;  %v7928_v2 = vpop.f32.mrb[18].mxu0  ;;  %v15803_v51 = vld [vmem:[#allocation24_spill] sm:$0xff] }
0x102b   : > { %6872 = vperm.xlu1 %9047, %v7928_v2   ;;  %6402 = vmatprep.mubr.f32.mxu1 %v15764_v28  ;;  %v6706_v62 = vpop.f32.mrb[19].mxu0  ;;  %v15804_v2 = vpack.i.bf16 %v15802_v36, %v15803_v51  ;;  %v15805_v28 = vld [vmem:[#allocation94_spill] sm:$0xff] }
0x102c   : > { %6867 = vperm.xlu0 %9046, %v6706_v62   ;;  %v15806_v62 = vld [vmem:[#allocation166_spill] sm:$0xff] }
0x102e   : > { %6403 = vmatmul.mubr.f32.gmra.mrb[238].mxu1 %v15765_v37  ;;  %v7931_v27 = vpop.f32.mrb[20].mxu0  ;;  %v15807_v37 = vld [vmem:[#allocation10_spill] sm:$0xff] }
0x102f   : > { %6882 = vperm.xlu1 %9047, %v7931_v27   ;;  %6408 = vmatprep.mubr.f32.mxu1 %v15766_v59  ;;  %v6716_v47 = vpop.f32.mrb[21].mxu0  ;;  %v15808_v27 = vld [vmem:[#allocation25_spill] sm:$0xff] }
0x1030   : > { %6877 = vperm.xlu0 %9046, %v6716_v47   ;;  %v15809_v59 = vpack.i.bf16 %v15807_v37, %v15808_v27  ;;  %v15810_v47 = vld [vmem:[#allocation101_spill] sm:$0xff] }
0x1032   : > { %6409 = vmatmul.mubr.f32.gmra.mrb[240].mxu1 %v15767_v61  ;;  %v7934_v35 = vpop.f32.mrb[22].mxu0  ;;  %v15811_v61 = vld [vmem:[#allocation168_spill] sm:$0xff] }
0x1033   : > { %6892 = vperm.xlu1 %9047, %v7934_v35   ;;  %6414 = vmatprep.mubr.f32.mxu1 %v15768_v63  ;;  %v6726_v43 = vpop.f32.mrb[23].mxu0  ;;  %v15812_v35 = vld [vmem:[#allocation11_spill] sm:$0xff]  ;;  %v15813_v63 = vld [vmem:[#allocation26_spill] sm:$0xff] }
0x1034   : > { %6887 = vperm.xlu0 %9046, %v6726_v43   ;;  %v15814_v43 = vpack.i.bf16 %v15812_v35, %v15813_v63 }
0x1036   : > { %6415 = vmatmul.mubr.f32.gmra.mrb[242].mxu1 %v15769_v29  ;;  %v7937_v23 = vpop.f32.mrb[24].mxu0  ;;  %v15815_v29 = vld [vmem:[#allocation98_spill] sm:$0xff] }
0x1037   : > { %6902 = vperm.xlu1 %9047, %v7937_v23   ;;  %6420 = vmatprep.mubr.f32.mxu1 %v15770_v1  ;;  %v6736_v19 = vpop.f32.mrb[25].mxu0  ;;  %v15816_v23 = vld [vmem:[#allocation170_spill] sm:$0xff]  ;;  %v15817_v1 = vld [vmem:[#allocation12_spill] sm:$0xff] }
0x1038   : > { %6897 = vperm.xlu0 %9046, %v6736_v19   ;;  %v15818_v19 = vld [vmem:[#allocation27_spill] sm:$0xff] }
0x103a   : > { %6421 = vmatmul.mubr.f32.gmra.mrb[244].mxu1 %v15771_v9  ;;  %v7940_v3 = vpop.f32.mrb[26].mxu0  ;;  %v15819_v9 = vpack.i.bf16 %v15817_v1, %v15818_v19 }
0x103b   : > { %6912 = vperm.xlu1 %9047, %v7940_v3   ;;  %6426 = vmatprep.mubr.f32.mxu1 %v15772_v30  ;;  %v6746_v53 = vpop.f32.mrb[27].mxu0  ;;  %v15820_v3 = vld [vmem:[#allocation167_spill] sm:$0xff]  ;;  %v15821_v30 = vld [vmem:[#allocation13_spill] sm:$0xff] }
0x103c   : > { %6907 = vperm.xlu0 %9046, %v6746_v53   ;;  %v15822_v53 = vld [vmem:[#allocation28_spill] sm:$0xff] }
0x103e   : > { %6427 = vmatmul.mubr.f32.gmra.mrb[246].mxu1 %v15773_v12  ;;  %v7943_v17 = vpop.f32.mrb[28].mxu0  ;;  %v15823_v12 = vpack.i.bf16 %v15821_v30, %v15822_v53 }
0x103f   : > { %6922 = vperm.xlu1 %9047, %v7943_v17   ;;  %6432 = vmatprep.mubr.f32.mxu1 %v15774_v52  ;;  %v6756_v50 = vpop.f32.mrb[29].mxu0  ;;  %v15824_v17 = vld [vmem:[#allocation169_spill] sm:$0xff]  ;;  %v15825_v52 = vld [vmem:[#allocation171_spill] sm:$0xff] }
0x1040   : > { %6917 = vperm.xlu0 %9046, %v6756_v50   ;;  %v15826_v50 = vld [vmem:[#allocation14_spill] sm:$0xff] }
0x1042   : > { %6433 = vmatmul.mubr.f32.gmra.mrb[248].mxu1 %v15775_v48  ;;  %v7946_v16 = vpop.f32.mrb[30].mxu0  ;;  %v15827_v48 = vld [vmem:[#allocation29_spill] sm:$0xff] }
0x1043   : > { %6932 = vperm.xlu1 %9047, %v7946_v16   ;;  %6438 = vmatprep.mubr.f32.mxu1 %v15776_v55  ;;  %v6766_v58 = vpop.f32.mrb[31].mxu0  ;;  %v15828_v16 = vpack.i.bf16 %v15826_v50, %v15827_v48  ;;  %v15829_v55 = vld [vmem:[#allocation41_spill] sm:$0xff] }
0x1044   : > { %6927 = vperm.xlu0 %9046, %v6766_v58   ;;  %v15830_v58 = vld [vmem:[#allocation15_spill] sm:$0xff] }
0x1046   : > { %6439 = vmatmul.mubr.f32.gmra.mrb[250].mxu1 %v15777_v49  ;;  %v7949_v13 = vpop.f32.mrb[32].mxu0  ;;  %v15831_v49 = vld [vmem:[#allocation30_spill] sm:$0xff] }
0x1047   : > { %6942 = vperm.xlu1 %9047, %v7949_v13   ;;  %6444 = vmatprep.mubr.f32.mxu1 %v15778_v38  ;;  %v6776_v39 = vpop.f32.mrb[33].mxu0  ;;  %v15832_v13 = vpack.i.bf16 %v15830_v58, %v15831_v49  ;;  %v15833_v38 = vld [vmem:[#allocation16_spill] sm:$0xff] }
0x1048   : > { %6937 = vperm.xlu0 %9046, %v6776_v39   ;;  %v15834_v39 = vld [vmem:[#allocation31_spill] sm:$0xff] }
0x104a   : > { %6445 = vmatmul.mubr.f32.gmra.mrb[252].mxu1 %v15779_v6  ;;  %v15835_v6 = vpack.i.bf16 %v15833_v38, %v15834_v39 }
0x104b   : > { %6450 = vmatprep.mubr.f32.mxu1 %v15780_v5 }
0x104e   : > { %6451 = vmatmul.mubr.f32.gmra.mrb[254].mxu1 %v15781_v21  ;;  %v15836_v21 = vld [vmem:[#allocation17_spill] sm:$0xff] }
0x104f   : > { %6456 = vmatprep.mubr.f32.mxu1 %v15782_v45  ;;  %v15837_v45 = vld [vmem:[#allocation32_spill] sm:$0xff] }
0x1052   : > { %6457 = vmatmul.mubr.f32.gmra.mrb[0].mxu1 %v15783_v22  ;;  %v15838_v22 = vpack.i.bf16 %v15836_v21, %v15837_v45 }
0x1053   : > { %6462 = vmatprep.mubr.f32.mxu1 %v15784_v44  ;;  %v15840_v44 = vld [vmem:[#allocation33_spill] sm:$0xff] }
0x1056   : > { %6463 = vmatmul.mubr.f32.gmra.mrb[2].mxu1 %v15785_v8 }
0x1057   : > { %6468 = vmatprep.mubr.f32.mxu1 %v15786_v7 }
0x105a   : > { %6469 = vmatmul.mubr.f32.gmra.mrb[4].mxu1 %v15787_v11  ;;  %v15843_v11 = vld [vmem:[#allocation34_spill] sm:$0xff] }
0x105b   : > { %6474 = vmatprep.mubr.f32.mxu1 %v15788_v0 }
0x105e   : > { %6475 = vmatmul.mubr.f32.gmra.mrb[6].mxu1 %v15789_v15  ;;  %v15845_v15 = vld [vmem:[#allocation20_spill] sm:$0xff] }
0x105f   : > { %6480 = vmatprep.mubr.f32.mxu1 %v15790_v4  ;;  %v15846_v4 = vld [vmem:[#allocation35_spill] sm:$0xff] }
0x1062   : > { %6481 = vmatmul.mubr.f32.gmra.mrb[8].mxu1 %v15791_v56  ;;  %v15847_v56 = vpack.i.bf16 %v15845_v15, %v15846_v4 }
0x1063   : > { %6486 = vmatprep.mubr.f32.mxu1 %v15792_v24  ;;  %v15849_v24 = vld [vmem:[#allocation36_spill] sm:$0xff] }
0x1066   : > { %6487 = vmatmul.mubr.f32.gmra.mrb[10].mxu1 %v15793_v46  ;;  %9049 = vxpose.xlu0.b32.start [1/16] (narrow) %v9048_v57, 32  ;;  %v15852_v57 = vld [vmem:[#allocation37_spill] sm:$0xff] }
0x1067   : > { %6492 = vmatprep.mubr.f32.mxu1 %v15794_v33  ;;  %v15853_v33 = vpack.i.bf16 %v15851_v42, %v15852_v57 }
0x106a   : > { %6493 = vmatmul.mubr.f32.gmra.mrb[12].mxu1 %v15795_v10  ;;  %9051 = vxpose.xlu0.b32.cont [2/16] (narrow) %v15799_v41, 32 }
0x106b   : > { %6498 = vmatprep.mubr.f32.mxu1 %v15796_v32 }
0x106e   : > { %6499 = vmatmul.mubr.f32.gmra.mrb[14].mxu1 %v15800_v60  ;;  %9053 = vxpose.xlu0.b32.cont [3/16] (narrow) %v15804_v2, 32 }
0x106f   : > { %6504 = vmatprep.mubr.f32.mxu1 %v15801_v20 }
0x1072   : > { %6505 = vmatmul.mubr.f32.gmra.mrb[16].mxu1 %v15805_v28  ;;  %9055 = vxpose.xlu0.b32.cont [4/16] (narrow) %v15809_v59, 32 }
0x1073   : > { %6510 = vmatprep.mubr.f32.mxu1 %v15806_v62 }
0x1076   : > { %6511 = vmatmul.mubr.f32.gmra.mrb[18].mxu1 %v15810_v47  ;;  %9057 = vxpose.xlu0.b32.cont [5/16] (narrow) %v15814_v43, 32 }
0x1077   : > { %6516 = vmatprep.mubr.f32.mxu1 %v15811_v61 }
0x107a   : > { %6517 = vmatmul.mubr.f32.gmra.mrb[20].mxu1 %v15815_v29  ;;  %9059 = vxpose.xlu0.b32.cont [6/16] (narrow) %v15819_v9, 32 }
0x107b   : > { %6522 = vmatprep.mubr.f32.mxu1 %v15816_v23 }
0x107e   : > { %6523 = vmatmul.mubr.f32.gmra.mrb[22].mxu1 %v15820_v3  ;;  %9061 = vxpose.xlu0.b32.cont [7/16] (narrow) %v15823_v12, 32 }
0x107f   : > { %6528 = vmatprep.mubr.f32.mxu1 %v13582_v25 }
0x1082   : > { %6529 = vmatmul.mubr.f32.gmra.mrb[24].mxu1 %v15824_v17  ;;  %9063 = vxpose.xlu0.b32.cont [8/16] (narrow) %v15828_v16, 32 }
0x1083   : > { %6534 = vmatprep.mubr.f32.mxu1 %v15825_v52 }
0x1086   : > { %6535 = vmatmul.mubr.f32.gmra.mrb[26].mxu1 %v15829_v55  ;;  %9065 = vxpose.xlu0.b32.cont [9/16] (narrow) %v15832_v13, 32 }
0x1087   : > { %6540 = vmatprep.mubr.f32.mxu1 %v13594_v40  ;;  %v15839_v40 = vld [vmem:[#allocation18_spill] sm:$0xff] }
0x1088   : > { %v15841_v8 = vpack.i.bf16 %v15839_v40, %v15840_v44 }
0x108a   : > { %6541 = vmatmul.mubr.f32.gmra.mrb[28].mxu1 %v13592_v18  ;;  %9067 = vxpose.xlu0.b32.cont [10/16] (narrow) %v15835_v6, 32  ;;  %v15842_v18 = vld [vmem:[#allocation19_spill] sm:$0xff]  ;;  %v6793_v61 = vpop.permute.xlu1 %6792 }
0x108b   : > { %v6788_v25 = vpop.permute.xlu0 %6787  ;;  %6546 = vmatprep.mubr.f32.mxu1 %v13601_v34  ;;  %v15844_v0 = vpack.i.bf16 %v15842_v18, %v15843_v11 }
0x108e   : > { %6547 = vmatmul.mubr.f32.gmra.mrb[30].mxu1 %v13597_v31  ;;  %9069 = vxpose.xlu0.b32.cont [11/16] (narrow) %v15838_v22, 32  ;;  %v15848_v31 = vld [vmem:[#allocation21_spill] sm:$0xff]  ;;  %v6803_v12 = vpop.permute.xlu1 %6802 }
0x108f   : > { %v6798_v5 = vpop.permute.xlu0 %6797  ;;  %v15850_v46 = vpack.i.bf16 %v15848_v31, %v15849_v24 }
0x1092   : > { %9071 = vxpose.xlu0.b32.cont [12/16] (narrow) %v15841_v8, 32  ;;  %v6813_v39 = vpop.permute.xlu1 %6812 }
0x1093   : > { %v6808_v7 = vpop.permute.xlu0 %6807 }
0x1096   : > { %9073 = vxpose.xlu0.b32.cont [13/16] (narrow) %v15844_v0, 32  ;;  %v6823_v0 = vpop.permute.xlu1 %6822 }
0x1097   : > { %v13969_v34 = vpop.permute.xlu0 %6817 }
0x109a   : > { %9075 = vxpose.xlu0.b32.cont [14/16] (narrow) %v15847_v56, 32 }
0x109b   : > { %v13977_v54 = vpop.permute.xlu0 %6827 }
0x109e   : > { %9077 = vxpose.xlu0.b32.cont [15/16] (narrow) %v15850_v46, 32 }
0x109f   : > { %v13982_v10 = vpop.permute.xlu0 %6837 }
0x10a2   : > { %9079 = vxpose.xlu0.b32.end [16/16] (narrow) %v15853_v33, 32 }
0x10a3   : > { %v13984_v32 = vpop.permute.xlu0 %6847 }
0x10a7   : > { %v13986_v26 = vpop.permute.xlu0 %6857 }
0x10ab   : > { %v13988_v14 = vpop.permute.xlu0 %6867 }
0x10af   : > { %v13990_v41 = vpop.permute.xlu0 %6877 }
0x10b3   : > { %v13992_v60 = vpop.permute.xlu0 %6887 }
0x10b7   : > { %v13994_v20 = vpop.permute.xlu0 %6897 }
0x10bb   : > { %v13996_v36 = vpop.permute.xlu0 %6907 }
0x10bf   : > { %v13998_v51 = vpop.permute.xlu0 %6917 }
0x10c3   : > { %v14000_v2 = vpop.permute.xlu0 %6927 }
0x10c7   : > { %v14002_v28 = vpop.permute.xlu0 %6937 }
0x10e5   : > { %v6362_v62 = vpop.f32.mrb[224].mxu1 }
0x10e6   : > { %v6945_v37 = vmul.f32 %v6788_v25, %v6362_v62  ;;  %v6364_v27 = vpop.f32.mrb[225].mxu1  ;;  %v14004_v47 = vpop.trf.xlu0 }
0x10e7   : > { %v6946_v59 = vmul.f32 %v6788_v25, %v6364_v27  ;;  %v9081_v63 = vunpack.i.l.bf16 %v14004_v47  ;;  %v6833_v62 = vpop.permute.xlu1 %6832 }
0x10e9   : > { %v6368_v35 = vpop.f32.mrb[226].mxu1  ;;  %7137 = vmatprep.mubr.f32.mxu1 %v9081_v63 }
0x10ea   : > { %v6947_v43 = vmul.f32 %v6793_v61, %v6368_v35  ;;  %v6370_v29 = vpop.f32.mrb[227].mxu1  ;;  %v14007_v19 = vpop.trf.xlu0 }
0x10eb   : > { %v6948_v23 = vmul.f32 %v6793_v61, %v6370_v29 }
0x10ec   : > { %v8910_v1 = vpack.c.bf16 %v6947_v43, %v6945_v37 }
0x10ed   : > { %v8908_v9 = vpack.c.bf16 %v6948_v23, %v6946_v59  ;;  %v6374_v3 = vpop.f32.mrb[228].mxu1 }
0x10ee   : > { %v6376_v30 = vpop.f32.mrb[229].mxu1  ;;  %v14009_v53 = vpop.trf.xlu0  ;;  %v6949_v52 = vmul.f32 %v6798_v5, %v6374_v3 }
0x10ef   : > { %8909 = vmatprep.subr.bf16.mxu1 %v8908_v9  ;;  %v6950_v16 = vmul.f32 %v6798_v5, %v6376_v30 }
0x10f0   : > { %8911 = vmatpush1.bf16.msra.mxu1 %v8910_v1  ;;  %v6843_v1 = vpop.permute.xlu1 %6842 }
0x10f1   : > { %v6380_v17 = vpop.f32.mrb[230].mxu1 }
0x10f2   : > { %v6951_v50 = vmul.f32 %v6803_v12, %v6380_v17  ;;  %v6382_v48 = vpop.f32.mrb[231].mxu1  ;;  %v14011_v49 = vpop.trf.xlu0 }
0x10f3   : > { %v6952_v55 = vmul.f32 %v6803_v12, %v6382_v48 }
0x10f4   : > { %v8914_v58 = vpack.c.bf16 %v6951_v50, %v6949_v52 }
0x10f5   : > { %v8912_v13 = vpack.c.bf16 %v6952_v55, %v6950_v16  ;;  %v6386_v25 = vpop.f32.mrb[232].mxu1  ;;  %v6853_v55 = vpop.permute.xlu1 %6852 }
0x10f6   : > { %v6388_v38 = vpop.f32.mrb[233].mxu1  ;;  %v6953_v21 = vmul.f32 %v6808_v7, %v6386_v25 }
0x10f7   : > { %8913 = vmatprep.subr.bf16.mxu1 %v8912_v13  ;;  %v6954_v40 = vmul.f32 %v6808_v7, %v6388_v38 }
0x10f8   : > { %8915 = vmatpush1.bf16.msra.mxu1 %v8914_v58 }
0x10f9   : > { %v6392_v6 = vpop.f32.mrb[234].mxu1 }
0x10fa   : > { %v6955_v45 = vmul.f32 %v6813_v39, %v6392_v6  ;;  %v6394_v22 = vpop.f32.mrb[235].mxu1 }
0x10fb   : > { %v6956_v44 = vmul.f32 %v6813_v39, %v6394_v22 }
0x10fc   : > { %v8918_v8 = vpack.c.bf16 %v6955_v45, %v6953_v21 }
0x10fd   : > { %v8916_v18 = vpack.c.bf16 %v6956_v44, %v6954_v40  ;;  %v6398_v11 = vpop.f32.mrb[236].mxu1  ;;  %v6863_v40 = vpop.permute.xlu1 %6862 }
0x10fe   : > { %v6400_v5 = vpop.f32.mrb[237].mxu1  ;;  %v6957_v4 = vmul.f32 %v13969_v34, %v6398_v11 }
0x10ff   : > { %8917 = vmatprep.subr.bf16.mxu1 %v8916_v18  ;;  %v6958_v24 = vmul.f32 %v13969_v34, %v6400_v5 }
0x1100   : > { %8919 = vmatpush1.bf16.msra.mxu1 %v8918_v8 }
0x1101   : > { %v6404_v15 = vpop.f32.mrb[238].mxu1 }
0x1102   : > { %v6959_v56 = vmul.f32 %v6823_v0, %v6404_v15  ;;  %v6406_v31 = vpop.f32.mrb[239].mxu1 }
0x1103   : > { %v6960_v46 = vmul.f32 %v6823_v0, %v6406_v31  ;;  %v6873_v31 = vpop.permute.xlu1 %6872 }
0x1104   : > { %v8922_v42 = vpack.c.bf16 %v6959_v56, %v6957_v4 }
0x1105   : > { %v8920_v57 = vpack.c.bf16 %v6960_v46, %v6958_v24  ;;  %v6410_v33 = vpop.f32.mrb[240].mxu1 }
0x1106   : > { %v6412_v7 = vpop.f32.mrb[241].mxu1  ;;  %v6961_v27 = vmul.f32 %v13977_v54, %v6410_v33 }
0x1107   : > { %8921 = vmatprep.subr.bf16.mxu1 %v8920_v57  ;;  %v6962_v35 = vmul.f32 %v13977_v54, %v6412_v7 }
0x1108   : > { %8923 = vmatpush1.bf16.msra.mxu1 %v8922_v42 }
0x1109   : > { %v6416_v37 = vpop.f32.mrb[242].mxu1 }
0x110a   : > { %v6963_v59 = vmul.f32 %v6833_v62, %v6416_v37  ;;  %v6418_v61 = vpop.f32.mrb[243].mxu1 }
0x110b   : > { %v6964_v63 = vmul.f32 %v6833_v62, %v6418_v61 }
0x110c   : > { %v8926_v43 = vpack.c.bf16 %v6963_v59, %v6961_v27  ;;  %v6883_v59 = vpop.permute.xlu1 %6882 }
0x110d   : > { %v8924_v29 = vpack.c.bf16 %v6964_v63, %v6962_v35  ;;  %v6422_v23 = vpop.f32.mrb[244].mxu1 }
0x110e   : > { %v6424_v34 = vpop.f32.mrb[245].mxu1  ;;  %v6965_v3 = vmul.f32 %v13982_v10, %v6422_v23 }
0x110f   : > { %8925 = vmatprep.subr.bf16.mxu1 %v8924_v29  ;;  %v6966_v17 = vmul.f32 %v13982_v10, %v6424_v34 }
0x1110   : > { %8927 = vmatpush1.bf16.msra.mxu1 %v8926_v43 }
0x1111   : > { %v6428_v9 = vpop.f32.mrb[246].mxu1 }
0x1112   : > { %v6967_v30 = vmul.f32 %v6843_v1, %v6428_v9  ;;  %v6430_v12 = vpop.f32.mrb[247].mxu1 }
0x1113   : > { %v6968_v52 = vmul.f32 %v6843_v1, %v6430_v12 }
0x1114   : > { %v8930_v50 = vpack.c.bf16 %v6967_v30, %v6965_v3  ;;  %v6893_v3 = vpop.permute.xlu1 %6892 }
0x1115   : > { %v8928_v48 = vpack.c.bf16 %v6968_v52, %v6966_v17  ;;  %v6434_v16 = vpop.f32.mrb[248].mxu1 }
0x1116   : > { %v6436_v54 = vpop.f32.mrb[249].mxu1  ;;  %v6969_v13 = vmul.f32 %v13984_v32, %v6434_v16 }
0x1117   : > { %8929 = vmatprep.subr.bf16.mxu1 %v8928_v48  ;;  %v6970_v39 = vmul.f32 %v13984_v32, %v6436_v54 }
0x1118   : > { %8931 = vmatpush1.bf16.msra.mxu1 %v8930_v50 }
0x1119   : > { %v6440_v58 = vpop.f32.mrb[250].mxu1 }
0x111a   : > { %v6971_v25 = vmul.f32 %v6853_v55, %v6440_v58  ;;  %v6442_v38 = vpop.f32.mrb[251].mxu1  ;;  %v6903_v58 = vpop.permute.xlu1 %6902 }
0x111b   : > { %v6972_v6 = vmul.f32 %v6853_v55, %v6442_v38 }
0x111c   : > { %v8934_v21 = vpack.c.bf16 %v6971_v25, %v6969_v13 }
0x111d   : > { %v8932_v45 = vpack.c.bf16 %v6972_v6, %v6970_v39  ;;  %v6446_v22 = vpop.f32.mrb[252].mxu1 }
0x111e   : > { %v6448_v10 = vpop.f32.mrb[253].mxu1  ;;  %v6973_v8 = vmul.f32 %v13986_v26, %v6446_v22 }
0x111f   : > { %8933 = vmatprep.subr.bf16.mxu1 %v8932_v45  ;;  %v6974_v5 = vmul.f32 %v13986_v26, %v6448_v10 }
0x1120   : > { %8935 = vmatpush1.bf16.msra.mxu1 %v8934_v21 }
0x1121   : > { %v6452_v44 = vpop.f32.mrb[254].mxu1 }
0x1122   : > { %v6975_v18 = vmul.f32 %v6863_v40, %v6452_v44  ;;  %v6454_v11 = vpop.f32.mrb[255].mxu1 }
0x1123   : > { %v6976_v0 = vmul.f32 %v6863_v40, %v6454_v11  ;;  %v6913_v40 = vpop.permute.xlu1 %6912 }
0x1124   : > { %v8938_v15 = vpack.c.bf16 %v6975_v18, %v6973_v8 }
0x1125   : > { %v8936_v4 = vpack.c.bf16 %v6976_v0, %v6974_v5  ;;  %v6458_v56 = vpop.f32.mrb[0].mxu1 }
0x1126   : > { %v6460_v32 = vpop.f32.mrb[1].mxu1  ;;  %v6977_v46 = vmul.f32 %v13988_v14, %v6458_v56 }
0x1127   : > { %8937 = vmatprep.subr.bf16.mxu1 %v8936_v4  ;;  %v6978_v33 = vmul.f32 %v13988_v14, %v6460_v32  ;;  %v6923_v32 = vpop.permute.xlu1 %6922 }
0x1128   : > { %8939 = vmatpush1.bf16.msra.mxu1 %v8938_v15 }
0x1129   : > { %v6464_v24 = vpop.f32.mrb[2].mxu1 }
0x112a   : > { %v6979_v42 = vmul.f32 %v6873_v31, %v6464_v24  ;;  %v6466_v57 = vpop.f32.mrb[3].mxu1 }
0x112b   : > { %v6980_v7 = vmul.f32 %v6873_v31, %v6466_v57 }
0x112c   : > { %v8942_v62 = vpack.c.bf16 %v6979_v42, %v6977_v46 }
0x112d   : > { %v8940_v37 = vpack.c.bf16 %v6980_v7, %v6978_v33  ;;  %v6470_v27 = vpop.f32.mrb[4].mxu1 }
0x112e   : > { %v6472_v26 = vpop.f32.mrb[5].mxu1  ;;  %v6981_v35 = vmul.f32 %v13990_v41, %v6470_v27  ;;  %v6933_v27 = vpop.permute.xlu1 %6932 }
0x112f   : > { %8941 = vmatprep.subr.bf16.mxu1 %v8940_v37  ;;  %v6982_v29 = vmul.f32 %v13990_v41, %v6472_v26 }
0x1130   : > { %8943 = vmatpush1.bf16.msra.mxu1 %v8942_v62 }
0x1131   : > { %v6476_v61 = vpop.f32.mrb[6].mxu1 }
0x1132   : > { %v6983_v63 = vmul.f32 %v6883_v59, %v6476_v61  ;;  %v6478_v43 = vpop.f32.mrb[7].mxu1 }
0x1133   : > { %v6984_v23 = vmul.f32 %v6883_v59, %v6478_v43 }
0x1134   : > { %v8946_v34 = vpack.c.bf16 %v6983_v63, %v6981_v35 }
0x1135   : > { %v8944_v1 = vpack.c.bf16 %v6984_v23, %v6982_v29  ;;  %v6482_v9 = vpop.f32.mrb[8].mxu1 }
0x1136   : > { %v6484_v14 = vpop.f32.mrb[9].mxu1  ;;  %v6985_v12 = vmul.f32 %v13992_v60, %v6482_v9 }
0x1137   : > { %8945 = vmatprep.subr.bf16.mxu1 %v8944_v1  ;;  %v6986_v50 = vmul.f32 %v13992_v60, %v6484_v14  ;;  %v6943_v1 = vpop.permute.xlu1 %6942 }
0x1138   : > { %8947 = vmatpush1.bf16.msra.mxu1 %v8946_v34 }
0x1139   : > { %v6488_v30 = vpop.f32.mrb[10].mxu1 }
0x113a   : > { %v6987_v17 = vmul.f32 %v6893_v3, %v6488_v30  ;;  %v6490_v52 = vpop.f32.mrb[11].mxu1 }
0x113b   : > { %v6988_v48 = vmul.f32 %v6893_v3, %v6490_v52 }
0x113c   : > { %v8950_v16 = vpack.c.bf16 %v6987_v17, %v6985_v12 }
0x113d   : > { %v8948_v54 = vpack.c.bf16 %v6988_v48, %v6986_v50  ;;  %v6494_v55 = vpop.f32.mrb[12].mxu1  ;;  %v9086_v48 = vunpack.i.l.bf16 %v14007_v19 }
0x113e   : > { %v6496_v41 = vpop.f32.mrb[13].mxu1  ;;  %v6989_v25 = vmul.f32 %v13994_v20, %v6494_v55  ;;  %v9094_v55 = vunpack.i.h.bf16 %v14009_v53 }
0x113f   : > { %8949 = vmatprep.subr.bf16.mxu1 %v8948_v54  ;;  %v6990_v6 = vmul.f32 %v13994_v20, %v6496_v41  ;;  %v9091_v54 = vunpack.i.l.bf16 %v14009_v53  ;;  %v9099_v41 = vunpack.i.h.bf16 %v14011_v49 }
0x1140   : > { %8951 = vmatpush1.bf16.msra.mxu1 %v8950_v16  ;;  %v9089_v16 = vunpack.i.h.bf16 %v14007_v19 }
0x1141   : > { %v6500_v13 = vpop.f32.mrb[14].mxu1 }
0x1142   : > { %v6991_v38 = vmul.f32 %v6903_v58, %v6500_v13  ;;  %v6502_v39 = vpop.f32.mrb[15].mxu1 }
0x1143   : > { %v6992_v21 = vmul.f32 %v6903_v58, %v6502_v39 }
0x1144   : > { %v8954_v45 = vpack.c.bf16 %v6991_v38, %v6989_v25 }
0x1145   : > { %v8952_v22 = vpack.c.bf16 %v6992_v21, %v6990_v6  ;;  %v6506_v10 = vpop.f32.mrb[16].mxu1 }
0x1146   : > { %v6508_v60 = vpop.f32.mrb[17].mxu1  ;;  %v6993_v8 = vmul.f32 %v13996_v36, %v6506_v10 }
0x1147   : > { %8953 = vmatprep.subr.bf16.mxu1 %v8952_v22  ;;  %v6994_v5 = vmul.f32 %v13996_v36, %v6508_v60 }
0x1148   : > { %8955 = vmatpush1.bf16.msra.mxu1 %v8954_v45 }
0x1149   : > { %v6512_v44 = vpop.f32.mrb[18].mxu1 }
0x114a   : > { %v6995_v18 = vmul.f32 %v6913_v40, %v6512_v44  ;;  %v6514_v11 = vpop.f32.mrb[19].mxu1 }
0x114b   : > { %v6996_v0 = vmul.f32 %v6913_v40, %v6514_v11 }
0x114c   : > { %v8958_v15 = vpack.c.bf16 %v6995_v18, %v6993_v8 }
0x114d   : > { %v8956_v4 = vpack.c.bf16 %v6996_v0, %v6994_v5  ;;  %v6518_v56 = vpop.f32.mrb[20].mxu1 }
0x114e   : > { %v6520_v20 = vpop.f32.mrb[21].mxu1  ;;  %v6997_v24 = vmul.f32 %v13998_v51, %v6518_v56 }
0x114f   : > { %8957 = vmatprep.subr.bf16.mxu1 %v8956_v4  ;;  %v6998_v57 = vmul.f32 %v13998_v51, %v6520_v20 }
0x1150   : > { %8959 = vmatpush1.bf16.msra.mxu1 %v8958_v15 }
0x1151   : > { %v6524_v31 = vpop.f32.mrb[22].mxu1 }
0x1152   : > { %v6999_v46 = vmul.f32 %v6923_v32, %v6524_v31  ;;  %v6526_v42 = vpop.f32.mrb[23].mxu1 }
0x1153   : > { %v7000_v33 = vmul.f32 %v6923_v32, %v6526_v42 }
0x1154   : > { %v8962_v7 = vpack.c.bf16 %v6999_v46, %v6997_v24 }
0x1155   : > { %v8960_v62 = vpack.c.bf16 %v7000_v33, %v6998_v57  ;;  %v6530_v37 = vpop.f32.mrb[24].mxu1 }
0x1156   : > { %v6532_v36 = vpop.f32.mrb[25].mxu1  ;;  %v7001_v59 = vmul.f32 %v14000_v2, %v6530_v37 }
0x1157   : > { %8961 = vmatprep.subr.bf16.mxu1 %v8960_v62  ;;  %v7002_v63 = vmul.f32 %v14000_v2, %v6532_v36  ;;  %v9084_v2 = vunpack.i.h.bf16 %v14004_v47 }
0x1158   : > { %8963 = vmatpush1.bf16.msra.mxu1 %v8962_v7 }
0x1159   : > { %v6536_v26 = vpop.f32.mrb[26].mxu1 }
0x115a   : > { %v7003_v61 = vmul.f32 %v6933_v27, %v6536_v26  ;;  %v6538_v35 = vpop.f32.mrb[27].mxu1 }
0x115b   : > { %v7004_v43 = vmul.f32 %v6933_v27, %v6538_v35 }
0x115c   : > { %v8966_v29 = vpack.c.bf16 %v7003_v61, %v7001_v59 }
0x115d   : > { %v8964_v23 = vpack.c.bf16 %v7004_v43, %v7002_v63  ;;  %v6542_v34 = vpop.f32.mrb[28].mxu1 }
0x115e   : > { %v6544_v51 = vpop.f32.mrb[29].mxu1  ;;  %v7005_v14 = vmul.f32 %v14002_v28, %v6542_v34 }
0x115f   : > { %8965 = vmatprep.subr.bf16.mxu1 %v8964_v23  ;;  %v7006_v12 = vmul.f32 %v14002_v28, %v6544_v51  ;;  %v9096_v28 = vunpack.i.l.bf16 %v14011_v49 }
0x1160   : > { %8967 = vmatpush1.bf16.msra.mxu1 %v8966_v29 }
0x1161   : > { %v6548_v9 = vpop.f32.mrb[30].mxu1 }
0x1162   : > { %v7007_v3 = vmul.f32 %v6943_v1, %v6548_v9  ;;  %v6550_v30 = vpop.f32.mrb[31].mxu1 }
0x1163   : > { %v7008_v17 = vmul.f32 %v6943_v1, %v6550_v30 }
0x1164   : > { %v8970_v52 = vpack.c.bf16 %v7007_v3, %v7005_v14 }
0x1165   : > { %v8968_v50 = vpack.c.bf16 %v7008_v17, %v7006_v12 }
0x1167   : > { %8969 = vmatprep.subr.bf16.mxu1 %v8968_v50 }
0x1168   : > { %8971 = vmatpush1.bf16.msra.mxu1 %v8970_v52 }
0x116b   : > { %7138 = vmatmul.mubr.f32.vlgmr.msra.gmra.mrb[32].mxu1 %v9084_v2 }
0x116c   : > { %7143 = vmatprep.mubr.f32.mxu1 %v9086_v48 }
0x116f   : > { %7144 = vmatmul.mubr.f32.gmra.mrb[34].mxu1 %v9089_v16 }
0x1170   : > { %7149 = vmatprep.mubr.f32.mxu1 %v9091_v54 }
0x1173   : > { %7150 = vmatmul.mubr.f32.gmra.mrb[36].mxu1 %v9094_v55 }
0x1174   : > { %7155 = vmatprep.mubr.f32.mxu1 %v9096_v28 }
0x1177   : > { %7156 = vmatmul.mubr.f32.gmra.mrb[38].mxu1 %v9099_v41 }
0x123e   : > { %v7139_v47 = vpop.f32.mrb[32].mxu1 }
0x123f   : > { %7162 = vst [vmem:[%s367_s26] sm:$0xff] %v7139_v47  ;;  %v7141_v19 = vpop.f32.mrb[33].mxu1 }
0x1240   : > { %7163 = vst [vmem:[%s367_s26 + $0x8] sm:$0xff] %v7141_v19 }
0x1242   : > { %v7145_v58 = vpop.f32.mrb[34].mxu1 }
0x1243   : > { %7164 = vst [vmem:[%s367_s26 + $0x10] sm:$0xff] %v7145_v58  ;;  %v7147_v53 = vpop.f32.mrb[35].mxu1 }
0x1244   : > { %7165 = vst [vmem:[%s367_s26 + $0x18] sm:$0xff] %v7147_v53 }
0x1246   : > { %v7151_v13 = vpop.f32.mrb[36].mxu1 }
0x1247   : > { %7166 = vst [vmem:[%s367_s26 + $0x20] sm:$0xff] %v7151_v13  ;;  %v7153_v49 = vpop.f32.mrb[37].mxu1 }
0x1248   : > { %7167 = vst [vmem:[%s367_s26 + $0x28] sm:$0xff] %v7153_v49 }
0x124a   : > { %v7157_v25 = vpop.f32.mrb[38].mxu1 }
0x124b   : > { %7168 = vst [vmem:[%s367_s26 + $0x30] sm:$0xff] %v7157_v25  ;;  %v7159_v38 = vpop.f32.mrb[39].mxu1 }
0x124c   : > { %7169 = vst [vmem:[%s367_s26 + $0x38] sm:$0xff] %v7159_v38 }
0x124d   : > { %9184 = shalt.err (!%p9181_p6)
}
0x124e   : > { %s9185_s16 = scalar_lea.hbm %s14053_s24, 1024  ;;  %s9189_s26 = scalar_lea.hbm %s14110_s9, 2048 }
0x124f   : > { %p9186_p7 = scmp.ne.s32.totalorder %s14053_s24, %s9185_s16  ;;  %p9190_p0 = scmp.lt.u32.totalorder %s14053_s24, %s14110_s9 }
0x1250   : > { %p9191_p2 = scmp.lt.u32.totalorder %s9189_s26, %s9185_s16  ;;  %p9193_p8 = scmp.lt.u32.totalorder %s9185_s16, %s14053_s24 }
0x1251   : > { %p9187_p9 = pnand %p9186_p7, %p15854_p10 }
0x1252   : > { %p9192_p4 = por %p9191_p2, %p9190_p0 }
0x1253   : > { %p9188_p12 = pneg %p9187_p9 }
0x1254   : > { %p9194_p11 = por %p9193_p8, %p9192_p4 }
0x1256   : > { %p9195_p13 = pnand %p9194_p11, %p9188_p12 }
0x1258   : > { %9198 = shalt.err (!%p9195_p13)
}
0x1259   : > { %s9263_s21 = smov 256   ;;  %s9264_s13 = smov 16  }
0x125a   : > { %8976 = dma.vmem_to_hbm [thread:$0]  (%p15854_p10), %s14048_s27, 1024, %s14053_s24, %s14055_s25, %s9263_s21, %s9263_s21, %s9264_s13  }
0x125b PF: > { %p8988_p1 = scmp.ge.s32.totalorder %s9253_s12, 2  ;;  %s7201_s10 = sand.u32 1, %s9233_s29  }
0x125c   : > { %p15855_p3 = scmp.ne.s32.totalorder %s14647_s19, 0  ;;  %s7202_s22 = scalar_lea.sflag [#allocation4], %s7201_s10 }
0x125e   : > { %p8983_p5 = pnand %p8988_p1, %p15855_p3 }
0x1260   : > { %9228 = dma.done.wait (!%p8983_p5), %s7202_s22, 1024  }
0x1261   : > { %9230 = vsyncadd (!%p8983_p5), %s7202_s22, 4294966272  ;;  %s23_s12 = sadd.s32 1, %s9253_s12   ;;  %s15856_s29 = smov %s9237_s4 }
0x1262   : > { %p20_p6 = scmp.ge.s32.totalorder %s23_s12, 4   ;;  %s15857_s4 = smov %s9241_s30 }
0x1263   : > { %s15858_s30 = smov %s9368_s20  ;;  %s15859_s10 = smov %s9249_s11 }
0x1264   : > { %s15860_s11 = smov %s15862_s15  ;;  %22 = sbr.rel (!%p20_p6) target bundleno = 5 (0x5), region = 99 }
0x126b   :  { %7207 = vsyncpa [#allocation3], 1 }
0x126c   :  { %7209 = vsyncpa [#allocation3 + $0x1], 1 }
0x126d   :  { %7210 = vsyncpa [#allocation4], 1 }
0x126e   :  { %7212 = vsyncpa [#allocation4 + $0x1], 1 }

</bundles_post_ra>
